<compile_context>
chip_gen: v6e
topology: v6e:2x2x1
jax: 0.10.0
libtpu: 0.0.40
codegen_flags: <defaults>
</compile_context>

<pallas_src>
import functools

import jax
import jax.numpy as jnp
from jax.experimental import pallas as pl
from jax.experimental.pallas import tpu as pltpu

LANE = 128


def _round_up(v, m):
    return ((v + m - 1) // m) * m


def _full_spec(shape):
    n = len(shape)
    return pl.BlockSpec(shape, lambda i, _n=n: (0,) * _n)


# ------------------------------ fused kernel -------------------------------

def _make_kernel(*, N, H, W, CPAD, PPAD, SPAD, OPAD, num_blocks,
                 num_branches, inv_hw):
    M = N * H * W

    def kernel(x_ref, cw_ref, s1_ref, b1_ref, w1_ref, c2_ref, w2_ref,
               fs_ref, fb_ref, lw_ref, lb_ref, out_ref, pad_ref):

        def conv3x3(h_flat, cin, w_ref, base):
            """3x3 'same' conv: 9 accumulating MXU matmuls over shifted
            windows of a zero-padded VMEM scratch (no im2col in HBM)."""
            pad_ref[...] = jnp.zeros((N, H + 2, W + 2, SPAD), jnp.float32)
            h4 = h_flat.reshape(N, H, W, cin)
            if cin == SPAD:
                pad_ref[:, 1:H + 1, 1:W + 1, :] = h4
            else:
                pad_ref[:, 1:H + 1, 1:W + 1, :cin] = h4
            acc = jnp.zeros((M, CPAD), jnp.float32)
            for t in range(9):
                ky, kx = divmod(t, 3)
                if cin == SPAD:
                    win = pad_ref[:, ky:ky + H, kx:kx + W, :]
                else:
                    win = pad_ref[:, ky:ky + H, kx:kx + W, :cin]
                acc = acc + jnp.dot(
                    win.reshape(M, cin).astype(jnp.bfloat16),
                    w_ref[base + t],
                    preferred_element_type=jnp.float32)
            return acc

        # ---- stem: 3x3 conv on the channel-padded NHWC input ----
        x = conv3x3(x_ref[...].reshape(M, CPAD), CPAD, cw_ref, 0)

        # ---- Bottleneck blocks, fully fused ----
        # Per branch: relu(x*s1+b1) @ W1' (BN2 folded) -> relu(+b2) -> 3x3
        # conv.  Residual-add / concat are realised by the lane offsets baked
        # into W2, so the block update is a single vector add.
        for b in range(num_blocks):
            contrib = jnp.zeros((M, CPAD), jnp.float32)
            for br in range(num_branches):
                i = b * num_branches + br
                hb = jnp.maximum(x * s1_ref[i] + b1_ref[i], 0.0)
                h1 = jnp.dot(hb.astype(jnp.bfloat16), w1_ref[i],
                             preferred_element_type=jnp.float32)
                h2 = jnp.maximum(h1 + c2_ref[i], 0.0)
                contrib = contrib + conv3x3(h2, PPAD, w2_ref, i * 9)
            x = x + contrib

        # ---- tail: BN + ReLU -> global average pool -> linear head ----
        xb = jnp.maximum(x * fs_ref[...] + fb_ref[...], 0.0)
        pooled = jnp.sum(xb.reshape(N, H * W, CPAD), axis=1) * inv_hw
        out_ref[...] = (jnp.dot(pooled.astype(jnp.bfloat16), lw_ref[...],
                                preferred_element_type=jnp.float32)
                        + lb_ref[...])

    return kernel


# ------------------------------ model forward ------------------------------

def mlnet_a_forward(arrays, x_nchw, cfg):
    N, Cin, H, W = x_nchw.shape
    CPAD, PPAD, OPAD = cfg["CPAD"], cfg["PPAD"], cfg["OPAD"]
    SPAD = max(CPAD, PPAD)

    x = jnp.transpose(x_nchw, (0, 2, 3, 1)).astype(jnp.float32)   # NCHW -> NHWC
    x = jnp.pad(x, ((0, 0), (0, 0), (0, 0), (0, CPAD - Cin)))     # lane pad

    kernel = _make_kernel(
        N=N, H=H, W=W, CPAD=CPAD, PPAD=PPAD, SPAD=SPAD, OPAD=OPAD,
        num_blocks=cfg["num_blocks"], num_branches=cfg["num_branches"],
        inv_hw=1.0 / float(H * W))

    args = (x, arrays["cw"], arrays["s1"], arrays["b1"], arrays["w1"],
            arrays["c2"], arrays["w2"], arrays["fs"], arrays["fb"],
            arrays["lw"], arrays["lb"])

    out = pl.pallas_call(
        kernel,
        out_shape=jax.ShapeDtypeStruct((N, OPAD), jnp.float32),
        grid=(1,),
        in_specs=[_full_spec(a.shape) for a in args],
        out_specs=_full_spec((N, OPAD)),
        scratch_shapes=[pltpu.VMEM((N, H + 2, W + 2, SPAD), jnp.float32)],
        compiler_params=pltpu.CompilerParams(
            dimension_semantics=("arbitrary",)),
    )(*args)
    return out[:, :cfg["num_classes"]]


# ------------------------------ param init ---------------------------------

def _bn_fold(c, eps=1e-5):
    gamma = jnp.ones((c,), jnp.float32)
    beta = jnp.zeros((c,), jnp.float32)
    mean = jnp.zeros((c,), jnp.float32)
    var = jnp.ones((c,), jnp.float32)
    scale = gamma / jnp.sqrt(var + eps)
    bias = beta - mean * scale
    return scale.reshape(1, c), bias.reshape(1, c)


def _kaiming(key, shape):
    # nn.init.kaiming_normal_(mode='fan_out'): std = sqrt(2 / (Cout*kh*kw))
    fan_out = shape[0] * shape[2] * shape[3]
    return jax.random.normal(key, shape, jnp.float32) * jnp.sqrt(2.0 / fan_out)


def init_params(key, num_classes, channels, k1, k2, num_blocks, expansion=4):
    keys = iter(jax.random.split(key, 8 + 8 * num_blocks))
    params = {}
    inplanes = max(k1, k2 * 2)
    params["conv"] = _kaiming(next(keys), (inplanes, channels, 3, 3))

    blocks = []
    c = inplanes
    for _ in range(num_blocks):
        blk = {}
        for name, k in (("b1", k1), ("b2", k2)):
            if k == 0:
                continue
            planes = expansion * k
            s1, b1 = _bn_fold(c)
            s2, b2 = _bn_fold(planes)
            blk[name] = {
                "bn1_scale": s1, "bn1_bias": b1,
                "w1": _kaiming(next(keys), (planes, c, 1, 1)),
                "bn2_scale": s2, "bn2_bias": b2,
                "w2": _kaiming(next(keys), (k, planes, 3, 3)),
            }
        blocks.append(blk)
        c += k2
    params["blocks"] = blocks

    params["bn_scale"], params["bn_bias"] = _bn_fold(c)
    bound = 1.0 / float(c) ** 0.5
    params["lin_w"] = jax.random.uniform(next(keys), (c, num_classes),
                                         jnp.float32, -bound, bound)
    params["lin_b"] = jax.random.uniform(next(keys), (1, num_classes),
                                         jnp.float32, -bound, bound)
    return params


def pack_params(params, *, channels, num_classes, k1, k2, expansion=4):
    """Fold BN, pad every channel axis to 128 lanes, bake the residual/concat
    lane offsets into the 3x3 weights and cast MXU operands to bf16."""
    num_blocks = len(params["blocks"])
    inplanes = max(k1, k2 * 2)
    c_final = inplanes + num_blocks * k2
    CPAD = _round_up(max(c_final, channels), LANE)
    active = [(n, k) for (n, k) in (("b1", k1), ("b2", k2)) if k > 0]
    assert active, "k1 == k2 == 0 is a degenerate MLNet_A configuration"
    PPAD = _round_up(expansion * max(k for _, k in active), LANE)
    OPAD = _round_up(num_classes, LANE)

    # Stem conv [inplanes, channels, 3, 3] (OIHW) -> 9 lane-padded matrices.
    wt = jnp.transpose(params["conv"], (2, 3, 1, 0)).reshape(
        9, channels, inplanes)
    cw = jnp.zeros((9, CPAD, CPAD), jnp.float32)
    cw = cw.at[:, :channels, :inplanes].set(wt)

    s1s, b1s, w1s, c2s, w2s = [], [], [], [], []
    C = inplanes
    for blk in params["blocks"]:
        for name, k in active:
            p = blk[name]
            P = expansion * k
            s1s.append(jnp.zeros((1, CPAD), jnp.float32)
                       .at[:, :C].set(p["bn1_scale"]))
            b1s.append(jnp.zeros((1, CPAD), jnp.float32)
                       .at[:, :C].set(p["bn1_bias"]))
            # 1x1 conv with BN2's scale folded into its output columns.
            w1 = jnp.transpose(p["w1"][:, :, 0, 0]) * p["bn2_scale"]   # [C, P]
            w1s.append(jnp.zeros((CPAD, PPAD), jnp.float32)
                       .at[:C, :P].set(w1))
            c2s.append(jnp.zeros((1, PPAD), jnp.float32)
                       .at[:, :P].set(p["bn2_bias"]))
            # 3x3 conv -> 9 matrices [PPAD, CPAD]; output columns placed at
            # the lane offset realising the residual add (branch 1, C-k1) or
            # the channel concat (branch 2, C).
            off = C - k1 if name == "b1" else C
            w2 = jnp.transpose(p["w2"], (2, 3, 1, 0)).reshape(9, P, k)
            w2p = jnp.zeros((9, PPAD, CPAD), jnp.float32)
            if name == "b2" or 0 < k1 <= C:
                # (PyTorch silently drops the inner link when k1 > C.)
                w2p = w2p.at[:, :P, off:off + k].set(w2)
            w2s.append(w2p)
        C += k2

    arrays = {
        "cw": cw.astype(jnp.bfloat16),
        "s1": jnp.stack(s1s),                                     # [NB*nbr,1,CPAD]
        "b1": jnp.stack(b1s),
        "w1": jnp.stack(w1s).astype(jnp.bfloat16),                # [NB*nbr,CPAD,PPAD]
        "c2": jnp.stack(c2s),                                     # [NB*nbr,1,PPAD]
        "w2": jnp.concatenate(w2s, axis=0).astype(jnp.bfloat16),  # [NB*nbr*9,PPAD,CPAD]
        "fs": jnp.zeros((1, CPAD), jnp.float32)
              .at[:, :c_final].set(params["bn_scale"]),
        "fb": jnp.zeros((1, CPAD), jnp.float32)
              .at[:, :c_final].set(params["bn_bias"]),
        "lw": jnp.zeros((CPAD, OPAD), jnp.float32)
              .at[:c_final, :num_classes].set(params["lin_w"])
              .astype(jnp.bfloat16),
        "lb": jnp.zeros((1, OPAD), jnp.float32)
              .at[:, :num_classes].set(params["lin_b"]),
    }
    cfg = {"CPAD": CPAD, "PPAD": PPAD, "OPAD": OPAD,
           "num_blocks": num_blocks, "num_branches": len(active),
           "num_classes": num_classes}
    return arrays, cfg


# ---------------------------------- main ------------------------------------

if __name__ == "__main__":
    num_classes, channels = 10, 3
    k1 = k2 = 4
    num_blocks = 2
    N, H, W = 2, 8, 8        # W a multiple of 8 keeps in-kernel reshapes free

    key = jax.random.PRNGKey(0)
    pkey, xkey = jax.random.split(key)
    params = init_params(pkey, num_classes, channels, k1, k2, num_blocks)
    arrays, cfg = pack_params(params, channels=channels,
                              num_classes=num_classes, k1=k1, k2=k2)
    x = jax.random.normal(xkey, (N, channels, H, W), jnp.float32)  # NCHW

    fwd = jax.jit(functools.partial(mlnet_a_forward, cfg=cfg))
    out = fwd(arrays, x)
    jax.block_until_ready(out)

    assert out.shape == (N, num_classes), out.shape
    assert bool(jnp.all(jnp.isfinite(out)))
    print("KERNEL_OK")
</pallas_src>

<mosaic_0001>
module attributes {stable_mosaic.version = 11 : i64} {
  func.func @kernel(%arg0: i32, %arg1: memref<2x8x8x128xf32, #tpu.memory_space<vmem>>, %arg2: memref<9x128x128xbf16, #tpu.memory_space<vmem>>, %arg3: memref<4x1x128xf32, #tpu.memory_space<vmem>>, %arg4: memref<4x1x128xf32, #tpu.memory_space<vmem>>, %arg5: memref<4x128x128xbf16, #tpu.memory_space<vmem>>, %arg6: memref<4x1x128xf32, #tpu.memory_space<vmem>>, %arg7: memref<36x128x128xbf16, #tpu.memory_space<vmem>>, %arg8: memref<1x128xf32, #tpu.memory_space<vmem>>, %arg9: memref<1x128xf32, #tpu.memory_space<vmem>>, %arg10: memref<128x128xbf16, #tpu.memory_space<vmem>>, %arg11: memref<1x128xf32, #tpu.memory_space<vmem>>, %arg12: memref<2x128xf32, #tpu.memory_space<vmem>>, %arg13: memref<2x10x10x128xf32, #tpu.memory_space<vmem>>) attributes {dimension_semantics = [#tpu.dimension_semantics<arbitrary>], iteration_bounds = array<i64: 1>, scalar_prefetch = 0 : i64, scratch_operands = 1 : i64, tpu.core_type = #tpu.core_type<tc>, window_params = [{pipeline_mode = #tpu.pipeline_mode<synchronous>, transform_indices = @transform_0, window_bounds = array<i64: 2, 8, 8, 128>}, {pipeline_mode = #tpu.pipeline_mode<synchronous>, transform_indices = @transform_1, window_bounds = array<i64: 9, 128, 128>}, {pipeline_mode = #tpu.pipeline_mode<synchronous>, transform_indices = @transform_2, window_bounds = array<i64: 4, 1, 128>}, {pipeline_mode = #tpu.pipeline_mode<synchronous>, transform_indices = @transform_3, window_bounds = array<i64: 4, 1, 128>}, {pipeline_mode = #tpu.pipeline_mode<synchronous>, transform_indices = @transform_4, window_bounds = array<i64: 4, 128, 128>}, {pipeline_mode = #tpu.pipeline_mode<synchronous>, transform_indices = @transform_5, window_bounds = array<i64: 4, 1, 128>}, {pipeline_mode = #tpu.pipeline_mode<synchronous>, transform_indices = @transform_6, window_bounds = array<i64: 36, 128, 128>}, {pipeline_mode = #tpu.pipeline_mode<synchronous>, transform_indices = @transform_7, window_bounds = array<i64: 1, 128>}, {pipeline_mode = #tpu.pipeline_mode<synchronous>, transform_indices = @transform_8, window_bounds = array<i64: 1, 128>}, {pipeline_mode = #tpu.pipeline_mode<synchronous>, transform_indices = @transform_9, window_bounds = array<i64: 128, 128>}, {pipeline_mode = #tpu.pipeline_mode<synchronous>, transform_indices = @transform_10, window_bounds = array<i64: 1, 128>}, {pipeline_mode = #tpu.pipeline_mode<synchronous>, transform_indices = @transform_11, window_bounds = array<i64: 2, 128>}]} {
    %c0 = arith.constant 0 : index
    %c0_0 = arith.constant 0 : index
    %c0_1 = arith.constant 0 : index
    %c0_2 = arith.constant 0 : index
    %0 = vector.load %arg1[%c0, %c0_0, %c0_1, %c0_2] : memref<2x8x8x128xf32, #tpu.memory_space<vmem>>, vector<2x8x8x128xf32>
    %1 = vector.shape_cast %0 : vector<2x8x8x128xf32> to vector<128x128xf32>
    %cst = arith.constant 0.000000e+00 : f32
    %2 = vector.broadcast %cst : f32 to vector<2x10x10x128xf32>
    %c0_3 = arith.constant 0 : index
    %c0_4 = arith.constant 0 : index
    %c0_5 = arith.constant 0 : index
    %c0_6 = arith.constant 0 : index
    %3 = vector.load %arg13[%c0_3, %c0_4, %c0_5, %c0_6] : memref<2x10x10x128xf32, #tpu.memory_space<vmem>>, vector<2x10x10x128xf32>
    tpu.vector_store %arg13[%c0_3, %c0_4, %c0_5, %c0_6], %2 {strides = array<i32>} : memref<2x10x10x128xf32, #tpu.memory_space<vmem>>, vector<2x10x10x128xf32>,
    %4 = vector.shape_cast %1 : vector<128x128xf32> to vector<2x8x8x128xf32>
    %c0_7 = arith.constant 0 : index
    %c1 = arith.constant 1 : index
    %c1_8 = arith.constant 1 : index
    %c0_9 = arith.constant 0 : index
    %5 = vector.load %arg13[%c0_7, %c1, %c1_8, %c0_9] : memref<2x10x10x128xf32, #tpu.memory_space<vmem>>, vector<2x8x8x128xf32>
    tpu.vector_store %arg13[%c0_7, %c1, %c1_8, %c0_9], %4 {strides = array<i32>} : memref<2x10x10x128xf32, #tpu.memory_space<vmem>>, vector<2x8x8x128xf32>,
    %cst_10 = arith.constant 0.000000e+00 : f32
    %6 = vector.broadcast %cst_10 : f32 to vector<128x128xf32>
    %c0_11 = arith.constant 0 : index
    %c0_12 = arith.constant 0 : index
    %c0_13 = arith.constant 0 : index
    %c0_14 = arith.constant 0 : index
    %7 = vector.load %arg13[%c0_11, %c0_12, %c0_13, %c0_14] : memref<2x10x10x128xf32, #tpu.memory_space<vmem>>, vector<2x8x8x128xf32>
    %8 = vector.shape_cast %7 : vector<2x8x8x128xf32> to vector<128x128xf32>
    %9 = arith.truncf %8 : vector<128x128xf32> to vector<128x128xbf16>
    %c0_15 = arith.constant 0 : index
    %c0_16 = arith.constant 0 : index
    %c0_17 = arith.constant 0 : index
    %10 = vector.load %arg2[%c0_15, %c0_16, %c0_17] : memref<9x128x128xbf16, #tpu.memory_space<vmem>>, vector<1x128x128xbf16>
    %11 = vector.shape_cast %10 : vector<1x128x128xbf16> to vector<128x128xbf16>
    %cst_18 = arith.constant dense<0.000000e+00> : vector<128x128xf32>
    %12 = tpu.matmul %9, %11, %cst_18 {dimension_numbers = #tpu.dot_dimension_numbers<[1], [0], [0], [1], [0, 0, 1, 1], [], []>} : vector<128x128xbf16>, vector<128x128xbf16>, vector<128x128xf32> -> vector<128x128xf32>
    %13 = arith.addf %6, %12 : vector<128x128xf32>
    %c0_19 = arith.constant 0 : index
    %c0_20 = arith.constant 0 : index
    %c1_21 = arith.constant 1 : index
    %c0_22 = arith.constant 0 : index
    %14 = vector.load %arg13[%c0_19, %c0_20, %c1_21, %c0_22] : memref<2x10x10x128xf32, #tpu.memory_space<vmem>>, vector<2x8x8x128xf32>
    %15 = vector.shape_cast %14 : vector<2x8x8x128xf32> to vector<128x128xf32>
    %16 = arith.truncf %15 : vector<128x128xf32> to vector<128x128xbf16>
    %c1_23 = arith.constant 1 : index
    %c0_24 = arith.constant 0 : index
    %c0_25 = arith.constant 0 : index
    %17 = vector.load %arg2[%c1_23, %c0_24, %c0_25] : memref<9x128x128xbf16, #tpu.memory_space<vmem>>, vector<1x128x128xbf16>
    %18 = vector.shape_cast %17 : vector<1x128x128xbf16> to vector<128x128xbf16>
    %cst_26 = arith.constant dense<0.000000e+00> : vector<128x128xf32>
    %19 = tpu.matmul %16, %18, %cst_26 {dimension_numbers = #tpu.dot_dimension_numbers<[1], [0], [0], [1], [0, 0, 1, 1], [], []>} : vector<128x128xbf16>, vector<128x128xbf16>, vector<128x128xf32> -> vector<128x128xf32>
    %20 = arith.addf %13, %19 : vector<128x128xf32>
    %c0_27 = arith.constant 0 : index
    %c0_28 = arith.constant 0 : index
    %c2 = arith.constant 2 : index
    %c0_29 = arith.constant 0 : index
    %21 = vector.load %arg13[%c0_27, %c0_28, %c2, %c0_29] : memref<2x10x10x128xf32, #tpu.memory_space<vmem>>, vector<2x8x8x128xf32>
    %22 = vector.shape_cast %21 : vector<2x8x8x128xf32> to vector<128x128xf32>
    %23 = arith.truncf %22 : vector<128x128xf32> to vector<128x128xbf16>
    %c2_30 = arith.constant 2 : index
    %c0_31 = arith.constant 0 : index
    %c0_32 = arith.constant 0 : index
    %24 = vector.load %arg2[%c2_30, %c0_31, %c0_32] : memref<9x128x128xbf16, #tpu.memory_space<vmem>>, vector<1x128x128xbf16>
    %25 = vector.shape_cast %24 : vector<1x128x128xbf16> to vector<128x128xbf16>
    %cst_33 = arith.constant dense<0.000000e+00> : vector<128x128xf32>
    %26 = tpu.matmul %23, %25, %cst_33 {dimension_numbers = #tpu.dot_dimension_numbers<[1], [0], [0], [1], [0, 0, 1, 1], [], []>} : vector<128x128xbf16>, vector<128x128xbf16>, vector<128x128xf32> -> vector<128x128xf32>
    %27 = arith.addf %20, %26 : vector<128x128xf32>
    %c0_34 = arith.constant 0 : index
    %c1_35 = arith.constant 1 : index
    %c0_36 = arith.constant 0 : index
    %c0_37 = arith.constant 0 : index
    %28 = vector.load %arg13[%c0_34, %c1_35, %c0_36, %c0_37] : memref<2x10x10x128xf32, #tpu.memory_space<vmem>>, vector<2x8x8x128xf32>
    %29 = vector.shape_cast %28 : vector<2x8x8x128xf32> to vector<128x128xf32>
    %30 = arith.truncf %29 : vector<128x128xf32> to vector<128x128xbf16>
    %c3 = arith.constant 3 : index
    %c0_38 = arith.constant 0 : index
    %c0_39 = arith.constant 0 : index
    %31 = vector.load %arg2[%c3, %c0_38, %c0_39] : memref<9x128x128xbf16, #tpu.memory_space<vmem>>, vector<1x128x128xbf16>
    %32 = vector.shape_cast %31 : vector<1x128x128xbf16> to vector<128x128xbf16>
    %cst_40 = arith.constant dense<0.000000e+00> : vector<128x128xf32>
    %33 = tpu.matmul %30, %32, %cst_40 {dimension_numbers = #tpu.dot_dimension_numbers<[1], [0], [0], [1], [0, 0, 1, 1], [], []>} : vector<128x128xbf16>, vector<128x128xbf16>, vector<128x128xf32> -> vector<128x128xf32>
    %34 = arith.addf %27, %33 : vector<128x128xf32>
    %c0_41 = arith.constant 0 : index
    %c1_42 = arith.constant 1 : index
    %c1_43 = arith.constant 1 : index
    %c0_44 = arith.constant 0 : index
    %35 = vector.load %arg13[%c0_41, %c1_42, %c1_43, %c0_44] : memref<2x10x10x128xf32, #tpu.memory_space<vmem>>, vector<2x8x8x128xf32>
    %36 = vector.shape_cast %35 : vector<2x8x8x128xf32> to vector<128x128xf32>
    %37 = arith.truncf %36 : vector<128x128xf32> to vector<128x128xbf16>
    %c4 = arith.constant 4 : index
    %c0_45 = arith.constant 0 : index
    %c0_46 = arith.constant 0 : index
    %38 = vector.load %arg2[%c4, %c0_45, %c0_46] : memref<9x128x128xbf16, #tpu.memory_space<vmem>>, vector<1x128x128xbf16>
    %39 = vector.shape_cast %38 : vector<1x128x128xbf16> to vector<128x128xbf16>
    %cst_47 = arith.constant dense<0.000000e+00> : vector<128x128xf32>
    %40 = tpu.matmul %37, %39, %cst_47 {dimension_numbers = #tpu.dot_dimension_numbers<[1], [0], [0], [1], [0, 0, 1, 1], [], []>} : vector<128x128xbf16>, vector<128x128xbf16>, vector<128x128xf32> -> vector<128x128xf32>
    %41 = arith.addf %34, %40 : vector<128x128xf32>
    %c0_48 = arith.constant 0 : index
    %c1_49 = arith.constant 1 : index
    %c2_50 = arith.constant 2 : index
    %c0_51 = arith.constant 0 : index
    %42 = vector.load %arg13[%c0_48, %c1_49, %c2_50, %c0_51] : memref<2x10x10x128xf32, #tpu.memory_space<vmem>>, vector<2x8x8x128xf32>
    %43 = vector.shape_cast %42 : vector<2x8x8x128xf32> to vector<128x128xf32>
    %44 = arith.truncf %43 : vector<128x128xf32> to vector<128x128xbf16>
    %c5 = arith.constant 5 : index
    %c0_52 = arith.constant 0 : index
    %c0_53 = arith.constant 0 : index
    %45 = vector.load %arg2[%c5, %c0_52, %c0_53] : memref<9x128x128xbf16, #tpu.memory_space<vmem>>, vector<1x128x128xbf16>
    %46 = vector.shape_cast %45 : vector<1x128x128xbf16> to vector<128x128xbf16>
    %cst_54 = arith.constant dense<0.000000e+00> : vector<128x128xf32>
    %47 = tpu.matmul %44, %46, %cst_54 {dimension_numbers = #tpu.dot_dimension_numbers<[1], [0], [0], [1], [0, 0, 1, 1], [], []>} : vector<128x128xbf16>, vector<128x128xbf16>, vector<128x128xf32> -> vector<128x128xf32>
    %48 = arith.addf %41, %47 : vector<128x128xf32>
    %c0_55 = arith.constant 0 : index
    %c2_56 = arith.constant 2 : index
    %c0_57 = arith.constant 0 : index
    %c0_58 = arith.constant 0 : index
    %49 = vector.load %arg13[%c0_55, %c2_56, %c0_57, %c0_58] : memref<2x10x10x128xf32, #tpu.memory_space<vmem>>, vector<2x8x8x128xf32>
    %50 = vector.shape_cast %49 : vector<2x8x8x128xf32> to vector<128x128xf32>
    %51 = arith.truncf %50 : vector<128x128xf32> to vector<128x128xbf16>
    %c6 = arith.constant 6 : index
    %c0_59 = arith.constant 0 : index
    %c0_60 = arith.constant 0 : index
    %52 = vector.load %arg2[%c6, %c0_59, %c0_60] : memref<9x128x128xbf16, #tpu.memory_space<vmem>>, vector<1x128x128xbf16>
    %53 = vector.shape_cast %52 : vector<1x128x128xbf16> to vector<128x128xbf16>
    %cst_61 = arith.constant dense<0.000000e+00> : vector<128x128xf32>
    %54 = tpu.matmul %51, %53, %cst_61 {dimension_numbers = #tpu.dot_dimension_numbers<[1], [0], [0], [1], [0, 0, 1, 1], [], []>} : vector<128x128xbf16>, vector<128x128xbf16>, vector<128x128xf32> -> vector<128x128xf32>
    %55 = arith.addf %48, %54 : vector<128x128xf32>
    %c0_62 = arith.constant 0 : index
    %c2_63 = arith.constant 2 : index
    %c1_64 = arith.constant 1 : index
    %c0_65 = arith.constant 0 : index
    %56 = vector.load %arg13[%c0_62, %c2_63, %c1_64, %c0_65] : memref<2x10x10x128xf32, #tpu.memory_space<vmem>>, vector<2x8x8x128xf32>
    %57 = vector.shape_cast %56 : vector<2x8x8x128xf32> to vector<128x128xf32>
    %58 = arith.truncf %57 : vector<128x128xf32> to vector<128x128xbf16>
    %c7 = arith.constant 7 : index
    %c0_66 = arith.constant 0 : index
    %c0_67 = arith.constant 0 : index
    %59 = vector.load %arg2[%c7, %c0_66, %c0_67] : memref<9x128x128xbf16, #tpu.memory_space<vmem>>, vector<1x128x128xbf16>
    %60 = vector.shape_cast %59 : vector<1x128x128xbf16> to vector<128x128xbf16>
    %cst_68 = arith.constant dense<0.000000e+00> : vector<128x128xf32>
    %61 = tpu.matmul %58, %60, %cst_68 {dimension_numbers = #tpu.dot_dimension_numbers<[1], [0], [0], [1], [0, 0, 1, 1], [], []>} : vector<128x128xbf16>, vector<128x128xbf16>, vector<128x128xf32> -> vector<128x128xf32>
    %62 = arith.addf %55, %61 : vector<128x128xf32>
    %c0_69 = arith.constant 0 : index
    %c2_70 = arith.constant 2 : index
    %c2_71 = arith.constant 2 : index
    %c0_72 = arith.constant 0 : index
    %63 = vector.load %arg13[%c0_69, %c2_70, %c2_71, %c0_72] : memref<2x10x10x128xf32, #tpu.memory_space<vmem>>, vector<2x8x8x128xf32>
    %64 = vector.shape_cast %63 : vector<2x8x8x128xf32> to vector<128x128xf32>
    %65 = arith.truncf %64 : vector<128x128xf32> to vector<128x128xbf16>
    %c8 = arith.constant 8 : index
    %c0_73 = arith.constant 0 : index
    %c0_74 = arith.constant 0 : index
    %66 = vector.load %arg2[%c8, %c0_73, %c0_74] : memref<9x128x128xbf16, #tpu.memory_space<vmem>>, vector<1x128x128xbf16>
    %67 = vector.shape_cast %66 : vector<1x128x128xbf16> to vector<128x128xbf16>
    %cst_75 = arith.constant dense<0.000000e+00> : vector<128x128xf32>
    %68 = tpu.matmul %65, %67, %cst_75 {dimension_numbers = #tpu.dot_dimension_numbers<[1], [0], [0], [1], [0, 0, 1, 1], [], []>} : vector<128x128xbf16>, vector<128x128xbf16>, vector<128x128xf32> -> vector<128x128xf32>
    %69 = arith.addf %62, %68 : vector<128x128xf32>
    %cst_76 = arith.constant 0.000000e+00 : f32
    %70 = vector.broadcast %cst_76 : f32 to vector<128x128xf32>
    %c0_77 = arith.constant 0 : index
    %c0_78 = arith.constant 0 : index
    %c0_79 = arith.constant 0 : index
    %71 = vector.load %arg3[%c0_77, %c0_78, %c0_79] : memref<4x1x128xf32, #tpu.memory_space<vmem>>, vector<1x1x128xf32>
    %72 = vector.shape_cast %71 : vector<1x1x128xf32> to vector<1x128xf32>
    %73 = vector.broadcast %72 : vector<1x128xf32> to vector<128x128xf32>
    %74 = arith.mulf %69, %73 : vector<128x128xf32>
    %c0_80 = arith.constant 0 : index
    %c0_81 = arith.constant 0 : index
    %c0_82 = arith.constant 0 : index
    %75 = vector.load %arg4[%c0_80, %c0_81, %c0_82] : memref<4x1x128xf32, #tpu.memory_space<vmem>>, vector<1x1x128xf32>
    %76 = vector.shape_cast %75 : vector<1x1x128xf32> to vector<1x128xf32>
    %77 = vector.broadcast %76 : vector<1x128xf32> to vector<128x128xf32>
    %78 = arith.addf %74, %77 : vector<128x128xf32>
    %cst_83 = arith.constant 0.000000e+00 : f32
    %79 = vector.broadcast %cst_83 : f32 to vector<128x128xf32>
    %80 = arith.maximumf %78, %79 : vector<128x128xf32>
    %81 = arith.truncf %80 : vector<128x128xf32> to vector<128x128xbf16>
    %c0_84 = arith.constant 0 : index
    %c0_85 = arith.constant 0 : index
    %c0_86 = arith.constant 0 : index
    %82 = vector.load %arg5[%c0_84, %c0_85, %c0_86] : memref<4x128x128xbf16, #tpu.memory_space<vmem>>, vector<1x128x128xbf16>
    %83 = vector.shape_cast %82 : vector<1x128x128xbf16> to vector<128x128xbf16>
    %cst_87 = arith.constant dense<0.000000e+00> : vector<128x128xf32>
    %84 = tpu.matmul %81, %83, %cst_87 {dimension_numbers = #tpu.dot_dimension_numbers<[1], [0], [0], [1], [0, 0, 1, 1], [], []>} : vector<128x128xbf16>, vector<128x128xbf16>, vector<128x128xf32> -> vector<128x128xf32>
    %c0_88 = arith.constant 0 : index
    %c0_89 = arith.constant 0 : index
    %c0_90 = arith.constant 0 : index
    %85 = vector.load %arg6[%c0_88, %c0_89, %c0_90] : memref<4x1x128xf32, #tpu.memory_space<vmem>>, vector<1x1x128xf32>
    %86 = vector.shape_cast %85 : vector<1x1x128xf32> to vector<1x128xf32>
    %87 = vector.broadcast %86 : vector<1x128xf32> to vector<128x128xf32>
    %88 = arith.addf %84, %87 : vector<128x128xf32>
    %cst_91 = arith.constant 0.000000e+00 : f32
    %89 = vector.broadcast %cst_91 : f32 to vector<128x128xf32>
    %90 = arith.maximumf %88, %89 : vector<128x128xf32>
    %cst_92 = arith.constant 0.000000e+00 : f32
    %91 = vector.broadcast %cst_92 : f32 to vector<2x10x10x128xf32>
    %c0_93 = arith.constant 0 : index
    %c0_94 = arith.constant 0 : index
    %c0_95 = arith.constant 0 : index
    %c0_96 = arith.constant 0 : index
    %92 = vector.load %arg13[%c0_93, %c0_94, %c0_95, %c0_96] : memref<2x10x10x128xf32, #tpu.memory_space<vmem>>, vector<2x10x10x128xf32>
    tpu.vector_store %arg13[%c0_93, %c0_94, %c0_95, %c0_96], %91 {strides = array<i32>} : memref<2x10x10x128xf32, #tpu.memory_space<vmem>>, vector<2x10x10x128xf32>,
    %93 = vector.shape_cast %90 : vector<128x128xf32> to vector<2x8x8x128xf32>
    %c0_97 = arith.constant 0 : index
    %c1_98 = arith.constant 1 : index
    %c1_99 = arith.constant 1 : index
    %c0_100 = arith.constant 0 : index
    %94 = vector.load %arg13[%c0_97, %c1_98, %c1_99, %c0_100] : memref<2x10x10x128xf32, #tpu.memory_space<vmem>>, vector<2x8x8x128xf32>
    tpu.vector_store %arg13[%c0_97, %c1_98, %c1_99, %c0_100], %93 {strides = array<i32>} : memref<2x10x10x128xf32, #tpu.memory_space<vmem>>, vector<2x8x8x128xf32>,
    %cst_101 = arith.constant 0.000000e+00 : f32
    %95 = vector.broadcast %cst_101 : f32 to vector<128x128xf32>
    %c0_102 = arith.constant 0 : index
    %c0_103 = arith.constant 0 : index
    %c0_104 = arith.constant 0 : index
    %c0_105 = arith.constant 0 : index
    %96 = vector.load %arg13[%c0_102, %c0_103, %c0_104, %c0_105] : memref<2x10x10x128xf32, #tpu.memory_space<vmem>>, vector<2x8x8x128xf32>
    %97 = vector.shape_cast %96 : vector<2x8x8x128xf32> to vector<128x128xf32>
    %98 = arith.truncf %97 : vector<128x128xf32> to vector<128x128xbf16>
    %c0_106 = arith.constant 0 : index
    %c0_107 = arith.constant 0 : index
    %c0_108 = arith.constant 0 : index
    %99 = vector.load %arg7[%c0_106, %c0_107, %c0_108] : memref<36x128x128xbf16, #tpu.memory_space<vmem>>, vector<1x128x128xbf16>
    %100 = vector.shape_cast %99 : vector<1x128x128xbf16> to vector<128x128xbf16>
    %cst_109 = arith.constant dense<0.000000e+00> : vector<128x128xf32>
    %101 = tpu.matmul %98, %100, %cst_109 {dimension_numbers = #tpu.dot_dimension_numbers<[1], [0], [0], [1], [0, 0, 1, 1], [], []>} : vector<128x128xbf16>, vector<128x128xbf16>, vector<128x128xf32> -> vector<128x128xf32>
    %102 = arith.addf %95, %101 : vector<128x128xf32>
    %c0_110 = arith.constant 0 : index
    %c0_111 = arith.constant 0 : index
    %c1_112 = arith.constant 1 : index
    %c0_113 = arith.constant 0 : index
    %103 = vector.load %arg13[%c0_110, %c0_111, %c1_112, %c0_113] : memref<2x10x10x128xf32, #tpu.memory_space<vmem>>, vector<2x8x8x128xf32>
    %104 = vector.shape_cast %103 : vector<2x8x8x128xf32> to vector<128x128xf32>
    %105 = arith.truncf %104 : vector<128x128xf32> to vector<128x128xbf16>
    %c1_114 = arith.constant 1 : index
    %c0_115 = arith.constant 0 : index
    %c0_116 = arith.constant 0 : index
    %106 = vector.load %arg7[%c1_114, %c0_115, %c0_116] : memref<36x128x128xbf16, #tpu.memory_space<vmem>>, vector<1x128x128xbf16>
    %107 = vector.shape_cast %106 : vector<1x128x128xbf16> to vector<128x128xbf16>
    %cst_117 = arith.constant dense<0.000000e+00> : vector<128x128xf32>
    %108 = tpu.matmul %105, %107, %cst_117 {dimension_numbers = #tpu.dot_dimension_numbers<[1], [0], [0], [1], [0, 0, 1, 1], [], []>} : vector<128x128xbf16>, vector<128x128xbf16>, vector<128x128xf32> -> vector<128x128xf32>
    %109 = arith.addf %102, %108 : vector<128x128xf32>
    %c0_118 = arith.constant 0 : index
    %c0_119 = arith.constant 0 : index
    %c2_120 = arith.constant 2 : index
    %c0_121 = arith.constant 0 : index
    %110 = vector.load %arg13[%c0_118, %c0_119, %c2_120, %c0_121] : memref<2x10x10x128xf32, #tpu.memory_space<vmem>>, vector<2x8x8x128xf32>
    %111 = vector.shape_cast %110 : vector<2x8x8x128xf32> to vector<128x128xf32>
    %112 = arith.truncf %111 : vector<128x128xf32> to vector<128x128xbf16>
    %c2_122 = arith.constant 2 : index
    %c0_123 = arith.constant 0 : index
    %c0_124 = arith.constant 0 : index
    %113 = vector.load %arg7[%c2_122, %c0_123, %c0_124] : memref<36x128x128xbf16, #tpu.memory_space<vmem>>, vector<1x128x128xbf16>
    %114 = vector.shape_cast %113 : vector<1x128x128xbf16> to vector<128x128xbf16>
    %cst_125 = arith.constant dense<0.000000e+00> : vector<128x128xf32>
    %115 = tpu.matmul %112, %114, %cst_125 {dimension_numbers = #tpu.dot_dimension_numbers<[1], [0], [0], [1], [0, 0, 1, 1], [], []>} : vector<128x128xbf16>, vector<128x128xbf16>, vector<128x128xf32> -> vector<128x128xf32>
    %116 = arith.addf %109, %115 : vector<128x128xf32>
    %c0_126 = arith.constant 0 : index
    %c1_127 = arith.constant 1 : index
    %c0_128 = arith.constant 0 : index
    %c0_129 = arith.constant 0 : index
    %117 = vector.load %arg13[%c0_126, %c1_127, %c0_128, %c0_129] : memref<2x10x10x128xf32, #tpu.memory_space<vmem>>, vector<2x8x8x128xf32>
    %118 = vector.shape_cast %117 : vector<2x8x8x128xf32> to vector<128x128xf32>
    %119 = arith.truncf %118 : vector<128x128xf32> to vector<128x128xbf16>
    %c3_130 = arith.constant 3 : index
    %c0_131 = arith.constant 0 : index
    %c0_132 = arith.constant 0 : index
    %120 = vector.load %arg7[%c3_130, %c0_131, %c0_132] : memref<36x128x128xbf16, #tpu.memory_space<vmem>>, vector<1x128x128xbf16>
    %121 = vector.shape_cast %120 : vector<1x128x128xbf16> to vector<128x128xbf16>
    %cst_133 = arith.constant dense<0.000000e+00> : vector<128x128xf32>
    %122 = tpu.matmul %119, %121, %cst_133 {dimension_numbers = #tpu.dot_dimension_numbers<[1], [0], [0], [1], [0, 0, 1, 1], [], []>} : vector<128x128xbf16>, vector<128x128xbf16>, vector<128x128xf32> -> vector<128x128xf32>
    %123 = arith.addf %116, %122 : vector<128x128xf32>
    %c0_134 = arith.constant 0 : index
    %c1_135 = arith.constant 1 : index
    %c1_136 = arith.constant 1 : index
    %c0_137 = arith.constant 0 : index
    %124 = vector.load %arg13[%c0_134, %c1_135, %c1_136, %c0_137] : memref<2x10x10x128xf32, #tpu.memory_space<vmem>>, vector<2x8x8x128xf32>
    %125 = vector.shape_cast %124 : vector<2x8x8x128xf32> to vector<128x128xf32>
    %126 = arith.truncf %125 : vector<128x128xf32> to vector<128x128xbf16>
    %c4_138 = arith.constant 4 : index
    %c0_139 = arith.constant 0 : index
    %c0_140 = arith.constant 0 : index
    %127 = vector.load %arg7[%c4_138, %c0_139, %c0_140] : memref<36x128x128xbf16, #tpu.memory_space<vmem>>, vector<1x128x128xbf16>
    %128 = vector.shape_cast %127 : vector<1x128x128xbf16> to vector<128x128xbf16>
    %cst_141 = arith.constant dense<0.000000e+00> : vector<128x128xf32>
    %129 = tpu.matmul %126, %128, %cst_141 {dimension_numbers = #tpu.dot_dimension_numbers<[1], [0], [0], [1], [0, 0, 1, 1], [], []>} : vector<128x128xbf16>, vector<128x128xbf16>, vector<128x128xf32> -> vector<128x128xf32>
    %130 = arith.addf %123, %129 : vector<128x128xf32>
    %c0_142 = arith.constant 0 : index
    %c1_143 = arith.constant 1 : index
    %c2_144 = arith.constant 2 : index
    %c0_145 = arith.constant 0 : index
    %131 = vector.load %arg13[%c0_142, %c1_143, %c2_144, %c0_145] : memref<2x10x10x128xf32, #tpu.memory_space<vmem>>, vector<2x8x8x128xf32>
    %132 = vector.shape_cast %131 : vector<2x8x8x128xf32> to vector<128x128xf32>
    %133 = arith.truncf %132 : vector<128x128xf32> to vector<128x128xbf16>
    %c5_146 = arith.constant 5 : index
    %c0_147 = arith.constant 0 : index
    %c0_148 = arith.constant 0 : index
    %134 = vector.load %arg7[%c5_146, %c0_147, %c0_148] : memref<36x128x128xbf16, #tpu.memory_space<vmem>>, vector<1x128x128xbf16>
    %135 = vector.shape_cast %134 : vector<1x128x128xbf16> to vector<128x128xbf16>
    %cst_149 = arith.constant dense<0.000000e+00> : vector<128x128xf32>
    %136 = tpu.matmul %133, %135, %cst_149 {dimension_numbers = #tpu.dot_dimension_numbers<[1], [0], [0], [1], [0, 0, 1, 1], [], []>} : vector<128x128xbf16>, vector<128x128xbf16>, vector<128x128xf32> -> vector<128x128xf32>
    %137 = arith.addf %130, %136 : vector<128x128xf32>
    %c0_150 = arith.constant 0 : index
    %c2_151 = arith.constant 2 : index
    %c0_152 = arith.constant 0 : index
    %c0_153 = arith.constant 0 : index
    %138 = vector.load %arg13[%c0_150, %c2_151, %c0_152, %c0_153] : memref<2x10x10x128xf32, #tpu.memory_space<vmem>>, vector<2x8x8x128xf32>
    %139 = vector.shape_cast %138 : vector<2x8x8x128xf32> to vector<128x128xf32>
    %140 = arith.truncf %139 : vector<128x128xf32> to vector<128x128xbf16>
    %c6_154 = arith.constant 6 : index
    %c0_155 = arith.constant 0 : index
    %c0_156 = arith.constant 0 : index
    %141 = vector.load %arg7[%c6_154, %c0_155, %c0_156] : memref<36x128x128xbf16, #tpu.memory_space<vmem>>, vector<1x128x128xbf16>
    %142 = vector.shape_cast %141 : vector<1x128x128xbf16> to vector<128x128xbf16>
    %cst_157 = arith.constant dense<0.000000e+00> : vector<128x128xf32>
    %143 = tpu.matmul %140, %142, %cst_157 {dimension_numbers = #tpu.dot_dimension_numbers<[1], [0], [0], [1], [0, 0, 1, 1], [], []>} : vector<128x128xbf16>, vector<128x128xbf16>, vector<128x128xf32> -> vector<128x128xf32>
    %144 = arith.addf %137, %143 : vector<128x128xf32>
    %c0_158 = arith.constant 0 : index
    %c2_159 = arith.constant 2 : index
    %c1_160 = arith.constant 1 : index
    %c0_161 = arith.constant 0 : index
    %145 = vector.load %arg13[%c0_158, %c2_159, %c1_160, %c0_161] : memref<2x10x10x128xf32, #tpu.memory_space<vmem>>, vector<2x8x8x128xf32>
    %146 = vector.shape_cast %145 : vector<2x8x8x128xf32> to vector<128x128xf32>
    %147 = arith.truncf %146 : vector<128x128xf32> to vector<128x128xbf16>
    %c7_162 = arith.constant 7 : index
    %c0_163 = arith.constant 0 : index
    %c0_164 = arith.constant 0 : index
    %148 = vector.load %arg7[%c7_162, %c0_163, %c0_164] : memref<36x128x128xbf16, #tpu.memory_space<vmem>>, vector<1x128x128xbf16>
    %149 = vector.shape_cast %148 : vector<1x128x128xbf16> to vector<128x128xbf16>
    %cst_165 = arith.constant dense<0.000000e+00> : vector<128x128xf32>
    %150 = tpu.matmul %147, %149, %cst_165 {dimension_numbers = #tpu.dot_dimension_numbers<[1], [0], [0], [1], [0, 0, 1, 1], [], []>} : vector<128x128xbf16>, vector<128x128xbf16>, vector<128x128xf32> -> vector<128x128xf32>
    %151 = arith.addf %144, %150 : vector<128x128xf32>
    %c0_166 = arith.constant 0 : index
    %c2_167 = arith.constant 2 : index
    %c2_168 = arith.constant 2 : index
    %c0_169 = arith.constant 0 : index
    %152 = vector.load %arg13[%c0_166, %c2_167, %c2_168, %c0_169] : memref<2x10x10x128xf32, #tpu.memory_space<vmem>>, vector<2x8x8x128xf32>
    %153 = vector.shape_cast %152 : vector<2x8x8x128xf32> to vector<128x128xf32>
    %154 = arith.truncf %153 : vector<128x128xf32> to vector<128x128xbf16>
    %c8_170 = arith.constant 8 : index
    %c0_171 = arith.constant 0 : index
    %c0_172 = arith.constant 0 : index
    %155 = vector.load %arg7[%c8_170, %c0_171, %c0_172] : memref<36x128x128xbf16, #tpu.memory_space<vmem>>, vector<1x128x128xbf16>
    %156 = vector.shape_cast %155 : vector<1x128x128xbf16> to vector<128x128xbf16>
    %cst_173 = arith.constant dense<0.000000e+00> : vector<128x128xf32>
    %157 = tpu.matmul %154, %156, %cst_173 {dimension_numbers = #tpu.dot_dimension_numbers<[1], [0], [0], [1], [0, 0, 1, 1], [], []>} : vector<128x128xbf16>, vector<128x128xbf16>, vector<128x128xf32> -> vector<128x128xf32>
    %158 = arith.addf %151, %157 : vector<128x128xf32>
    %159 = arith.addf %70, %158 : vector<128x128xf32>
    %c1_174 = arith.constant 1 : index
    %c0_175 = arith.constant 0 : index
    %c0_176 = arith.constant 0 : index
    %160 = vector.load %arg3[%c1_174, %c0_175, %c0_176] : memref<4x1x128xf32, #tpu.memory_space<vmem>>, vector<1x1x128xf32>
    %161 = vector.shape_cast %160 : vector<1x1x128xf32> to vector<1x128xf32>
    %162 = vector.broadcast %161 : vector<1x128xf32> to vector<128x128xf32>
    %163 = arith.mulf %69, %162 : vector<128x128xf32>
    %c1_177 = arith.constant 1 : index
    %c0_178 = arith.constant 0 : index
    %c0_179 = arith.constant 0 : index
    %164 = vector.load %arg4[%c1_177, %c0_178, %c0_179] : memref<4x1x128xf32, #tpu.memory_space<vmem>>, vector<1x1x128xf32>
    %165 = vector.shape_cast %164 : vector<1x1x128xf32> to vector<1x128xf32>
    %166 = vector.broadcast %165 : vector<1x128xf32> to vector<128x128xf32>
    %167 = arith.addf %163, %166 : vector<128x128xf32>
    %cst_180 = arith.constant 0.000000e+00 : f32
    %168 = vector.broadcast %cst_180 : f32 to vector<128x128xf32>
    %169 = arith.maximumf %167, %168 : vector<128x128xf32>
    %170 = arith.truncf %169 : vector<128x128xf32> to vector<128x128xbf16>
    %c1_181 = arith.constant 1 : index
    %c0_182 = arith.constant 0 : index
    %c0_183 = arith.constant 0 : index
    %171 = vector.load %arg5[%c1_181, %c0_182, %c0_183] : memref<4x128x128xbf16, #tpu.memory_space<vmem>>, vector<1x128x128xbf16>
    %172 = vector.shape_cast %171 : vector<1x128x128xbf16> to vector<128x128xbf16>
    %cst_184 = arith.constant dense<0.000000e+00> : vector<128x128xf32>
    %173 = tpu.matmul %170, %172, %cst_184 {dimension_numbers = #tpu.dot_dimension_numbers<[1], [0], [0], [1], [0, 0, 1, 1], [], []>} : vector<128x128xbf16>, vector<128x128xbf16>, vector<128x128xf32> -> vector<128x128xf32>
    %c1_185 = arith.constant 1 : index
    %c0_186 = arith.constant 0 : index
    %c0_187 = arith.constant 0 : index
    %174 = vector.load %arg6[%c1_185, %c0_186, %c0_187] : memref<4x1x128xf32, #tpu.memory_space<vmem>>, vector<1x1x128xf32>
    %175 = vector.shape_cast %174 : vector<1x1x128xf32> to vector<1x128xf32>
    %176 = vector.broadcast %175 : vector<1x128xf32> to vector<128x128xf32>
    %177 = arith.addf %173, %176 : vector<128x128xf32>
    %cst_188 = arith.constant 0.000000e+00 : f32
    %178 = vector.broadcast %cst_188 : f32 to vector<128x128xf32>
    %179 = arith.maximumf %177, %178 : vector<128x128xf32>
    %cst_189 = arith.constant 0.000000e+00 : f32
    %180 = vector.broadcast %cst_189 : f32 to vector<2x10x10x128xf32>
    %c0_190 = arith.constant 0 : index
    %c0_191 = arith.constant 0 : index
    %c0_192 = arith.constant 0 : index
    %c0_193 = arith.constant 0 : index
    %181 = vector.load %arg13[%c0_190, %c0_191, %c0_192, %c0_193] : memref<2x10x10x128xf32, #tpu.memory_space<vmem>>, vector<2x10x10x128xf32>
    tpu.vector_store %arg13[%c0_190, %c0_191, %c0_192, %c0_193], %180 {strides = array<i32>} : memref<2x10x10x128xf32, #tpu.memory_space<vmem>>, vector<2x10x10x128xf32>,
    %182 = vector.shape_cast %179 : vector<128x128xf32> to vector<2x8x8x128xf32>
    %c0_194 = arith.constant 0 : index
    %c1_195 = arith.constant 1 : index
    %c1_196 = arith.constant 1 : index
    %c0_197 = arith.constant 0 : index
    %183 = vector.load %arg13[%c0_194, %c1_195, %c1_196, %c0_197] : memref<2x10x10x128xf32, #tpu.memory_space<vmem>>, vector<2x8x8x128xf32>
    tpu.vector_store %arg13[%c0_194, %c1_195, %c1_196, %c0_197], %182 {strides = array<i32>} : memref<2x10x10x128xf32, #tpu.memory_space<vmem>>, vector<2x8x8x128xf32>,
    %cst_198 = arith.constant 0.000000e+00 : f32
    %184 = vector.broadcast %cst_198 : f32 to vector<128x128xf32>
    %c0_199 = arith.constant 0 : index
    %c0_200 = arith.constant 0 : index
    %c0_201 = arith.constant 0 : index
    %c0_202 = arith.constant 0 : index
    %185 = vector.load %arg13[%c0_199, %c0_200, %c0_201, %c0_202] : memref<2x10x10x128xf32, #tpu.memory_space<vmem>>, vector<2x8x8x128xf32>
    %186 = vector.shape_cast %185 : vector<2x8x8x128xf32> to vector<128x128xf32>
    %187 = arith.truncf %186 : vector<128x128xf32> to vector<128x128xbf16>
    %c9 = arith.constant 9 : index
    %c0_203 = arith.constant 0 : index
    %c0_204 = arith.constant 0 : index
    %188 = vector.load %arg7[%c9, %c0_203, %c0_204] : memref<36x128x128xbf16, #tpu.memory_space<vmem>>, vector<1x128x128xbf16>
    %189 = vector.shape_cast %188 : vector<1x128x128xbf16> to vector<128x128xbf16>
    %cst_205 = arith.constant dense<0.000000e+00> : vector<128x128xf32>
    %190 = tpu.matmul %187, %189, %cst_205 {dimension_numbers = #tpu.dot_dimension_numbers<[1], [0], [0], [1], [0, 0, 1, 1], [], []>} : vector<128x128xbf16>, vector<128x128xbf16>, vector<128x128xf32> -> vector<128x128xf32>
    %191 = arith.addf %184, %190 : vector<128x128xf32>
    %c0_206 = arith.constant 0 : index
    %c0_207 = arith.constant 0 : index
    %c1_208 = arith.constant 1 : index
    %c0_209 = arith.constant 0 : index
    %192 = vector.load %arg13[%c0_206, %c0_207, %c1_208, %c0_209] : memref<2x10x10x128xf32, #tpu.memory_space<vmem>>, vector<2x8x8x128xf32>
    %193 = vector.shape_cast %192 : vector<2x8x8x128xf32> to vector<128x128xf32>
    %194 = arith.truncf %193 : vector<128x128xf32> to vector<128x128xbf16>
    %c10 = arith.constant 10 : index
    %c0_210 = arith.constant 0 : index
    %c0_211 = arith.constant 0 : index
    %195 = vector.load %arg7[%c10, %c0_210, %c0_211] : memref<36x128x128xbf16, #tpu.memory_space<vmem>>, vector<1x128x128xbf16>
    %196 = vector.shape_cast %195 : vector<1x128x128xbf16> to vector<128x128xbf16>
    %cst_212 = arith.constant dense<0.000000e+00> : vector<128x128xf32>
    %197 = tpu.matmul %194, %196, %cst_212 {dimension_numbers = #tpu.dot_dimension_numbers<[1], [0], [0], [1], [0, 0, 1, 1], [], []>} : vector<128x128xbf16>, vector<128x128xbf16>, vector<128x128xf32> -> vector<128x128xf32>
    %198 = arith.addf %191, %197 : vector<128x128xf32>
    %c0_213 = arith.constant 0 : index
    %c0_214 = arith.constant 0 : index
    %c2_215 = arith.constant 2 : index
    %c0_216 = arith.constant 0 : index
    %199 = vector.load %arg13[%c0_213, %c0_214, %c2_215, %c0_216] : memref<2x10x10x128xf32, #tpu.memory_space<vmem>>, vector<2x8x8x128xf32>
    %200 = vector.shape_cast %199 : vector<2x8x8x128xf32> to vector<128x128xf32>
    %201 = arith.truncf %200 : vector<128x128xf32> to vector<128x128xbf16>
    %c11 = arith.constant 11 : index
    %c0_217 = arith.constant 0 : index
    %c0_218 = arith.constant 0 : index
    %202 = vector.load %arg7[%c11, %c0_217, %c0_218] : memref<36x128x128xbf16, #tpu.memory_space<vmem>>, vector<1x128x128xbf16>
    %203 = vector.shape_cast %202 : vector<1x128x128xbf16> to vector<128x128xbf16>
    %cst_219 = arith.constant dense<0.000000e+00> : vector<128x128xf32>
    %204 = tpu.matmul %201, %203, %cst_219 {dimension_numbers = #tpu.dot_dimension_numbers<[1], [0], [0], [1], [0, 0, 1, 1], [], []>} : vector<128x128xbf16>, vector<128x128xbf16>, vector<128x128xf32> -> vector<128x128xf32>
    %205 = arith.addf %198, %204 : vector<128x128xf32>
    %c0_220 = arith.constant 0 : index
    %c1_221 = arith.constant 1 : index
    %c0_222 = arith.constant 0 : index
    %c0_223 = arith.constant 0 : index
    %206 = vector.load %arg13[%c0_220, %c1_221, %c0_222, %c0_223] : memref<2x10x10x128xf32, #tpu.memory_space<vmem>>, vector<2x8x8x128xf32>
    %207 = vector.shape_cast %206 : vector<2x8x8x128xf32> to vector<128x128xf32>
    %208 = arith.truncf %207 : vector<128x128xf32> to vector<128x128xbf16>
    %c12 = arith.constant 12 : index
    %c0_224 = arith.constant 0 : index
    %c0_225 = arith.constant 0 : index
    %209 = vector.load %arg7[%c12, %c0_224, %c0_225] : memref<36x128x128xbf16, #tpu.memory_space<vmem>>, vector<1x128x128xbf16>
    %210 = vector.shape_cast %209 : vector<1x128x128xbf16> to vector<128x128xbf16>
    %cst_226 = arith.constant dense<0.000000e+00> : vector<128x128xf32>
    %211 = tpu.matmul %208, %210, %cst_226 {dimension_numbers = #tpu.dot_dimension_numbers<[1], [0], [0], [1], [0, 0, 1, 1], [], []>} : vector<128x128xbf16>, vector<128x128xbf16>, vector<128x128xf32> -> vector<128x128xf32>
    %212 = arith.addf %205, %211 : vector<128x128xf32>
    %c0_227 = arith.constant 0 : index
    %c1_228 = arith.constant 1 : index
    %c1_229 = arith.constant 1 : index
    %c0_230 = arith.constant 0 : index
    %213 = vector.load %arg13[%c0_227, %c1_228, %c1_229, %c0_230] : memref<2x10x10x128xf32, #tpu.memory_space<vmem>>, vector<2x8x8x128xf32>
    %214 = vector.shape_cast %213 : vector<2x8x8x128xf32> to vector<128x128xf32>
    %215 = arith.truncf %214 : vector<128x128xf32> to vector<128x128xbf16>
    %c13 = arith.constant 13 : index
    %c0_231 = arith.constant 0 : index
    %c0_232 = arith.constant 0 : index
    %216 = vector.load %arg7[%c13, %c0_231, %c0_232] : memref<36x128x128xbf16, #tpu.memory_space<vmem>>, vector<1x128x128xbf16>
    %217 = vector.shape_cast %216 : vector<1x128x128xbf16> to vector<128x128xbf16>
    %cst_233 = arith.constant dense<0.000000e+00> : vector<128x128xf32>
    %218 = tpu.matmul %215, %217, %cst_233 {dimension_numbers = #tpu.dot_dimension_numbers<[1], [0], [0], [1], [0, 0, 1, 1], [], []>} : vector<128x128xbf16>, vector<128x128xbf16>, vector<128x128xf32> -> vector<128x128xf32>
    %219 = arith.addf %212, %218 : vector<128x128xf32>
    %c0_234 = arith.constant 0 : index
    %c1_235 = arith.constant 1 : index
    %c2_236 = arith.constant 2 : index
    %c0_237 = arith.constant 0 : index
    %220 = vector.load %arg13[%c0_234, %c1_235, %c2_236, %c0_237] : memref<2x10x10x128xf32, #tpu.memory_space<vmem>>, vector<2x8x8x128xf32>
    %221 = vector.shape_cast %220 : vector<2x8x8x128xf32> to vector<128x128xf32>
    %222 = arith.truncf %221 : vector<128x128xf32> to vector<128x128xbf16>
    %c14 = arith.constant 14 : index
    %c0_238 = arith.constant 0 : index
    %c0_239 = arith.constant 0 : index
    %223 = vector.load %arg7[%c14, %c0_238, %c0_239] : memref<36x128x128xbf16, #tpu.memory_space<vmem>>, vector<1x128x128xbf16>
    %224 = vector.shape_cast %223 : vector<1x128x128xbf16> to vector<128x128xbf16>
    %cst_240 = arith.constant dense<0.000000e+00> : vector<128x128xf32>
    %225 = tpu.matmul %222, %224, %cst_240 {dimension_numbers = #tpu.dot_dimension_numbers<[1], [0], [0], [1], [0, 0, 1, 1], [], []>} : vector<128x128xbf16>, vector<128x128xbf16>, vector<128x128xf32> -> vector<128x128xf32>
    %226 = arith.addf %219, %225 : vector<128x128xf32>
    %c0_241 = arith.constant 0 : index
    %c2_242 = arith.constant 2 : index
    %c0_243 = arith.constant 0 : index
    %c0_244 = arith.constant 0 : index
    %227 = vector.load %arg13[%c0_241, %c2_242, %c0_243, %c0_244] : memref<2x10x10x128xf32, #tpu.memory_space<vmem>>, vector<2x8x8x128xf32>
    %228 = vector.shape_cast %227 : vector<2x8x8x128xf32> to vector<128x128xf32>
    %229 = arith.truncf %228 : vector<128x128xf32> to vector<128x128xbf16>
    %c15 = arith.constant 15 : index
    %c0_245 = arith.constant 0 : index
    %c0_246 = arith.constant 0 : index
    %230 = vector.load %arg7[%c15, %c0_245, %c0_246] : memref<36x128x128xbf16, #tpu.memory_space<vmem>>, vector<1x128x128xbf16>
    %231 = vector.shape_cast %230 : vector<1x128x128xbf16> to vector<128x128xbf16>
    %cst_247 = arith.constant dense<0.000000e+00> : vector<128x128xf32>
    %232 = tpu.matmul %229, %231, %cst_247 {dimension_numbers = #tpu.dot_dimension_numbers<[1], [0], [0], [1], [0, 0, 1, 1], [], []>} : vector<128x128xbf16>, vector<128x128xbf16>, vector<128x128xf32> -> vector<128x128xf32>
    %233 = arith.addf %226, %232 : vector<128x128xf32>
    %c0_248 = arith.constant 0 : index
    %c2_249 = arith.constant 2 : index
    %c1_250 = arith.constant 1 : index
    %c0_251 = arith.constant 0 : index
    %234 = vector.load %arg13[%c0_248, %c2_249, %c1_250, %c0_251] : memref<2x10x10x128xf32, #tpu.memory_space<vmem>>, vector<2x8x8x128xf32>
    %235 = vector.shape_cast %234 : vector<2x8x8x128xf32> to vector<128x128xf32>
    %236 = arith.truncf %235 : vector<128x128xf32> to vector<128x128xbf16>
    %c16 = arith.constant 16 : index
    %c0_252 = arith.constant 0 : index
    %c0_253 = arith.constant 0 : index
    %237 = vector.load %arg7[%c16, %c0_252, %c0_253] : memref<36x128x128xbf16, #tpu.memory_space<vmem>>, vector<1x128x128xbf16>
    %238 = vector.shape_cast %237 : vector<1x128x128xbf16> to vector<128x128xbf16>
    %cst_254 = arith.constant dense<0.000000e+00> : vector<128x128xf32>
    %239 = tpu.matmul %236, %238, %cst_254 {dimension_numbers = #tpu.dot_dimension_numbers<[1], [0], [0], [1], [0, 0, 1, 1], [], []>} : vector<128x128xbf16>, vector<128x128xbf16>, vector<128x128xf32> -> vector<128x128xf32>
    %240 = arith.addf %233, %239 : vector<128x128xf32>
    %c0_255 = arith.constant 0 : index
    %c2_256 = arith.constant 2 : index
    %c2_257 = arith.constant 2 : index
    %c0_258 = arith.constant 0 : index
    %241 = vector.load %arg13[%c0_255, %c2_256, %c2_257, %c0_258] : memref<2x10x10x128xf32, #tpu.memory_space<vmem>>, vector<2x8x8x128xf32>
    %242 = vector.shape_cast %241 : vector<2x8x8x128xf32> to vector<128x128xf32>
    %243 = arith.truncf %242 : vector<128x128xf32> to vector<128x128xbf16>
    %c17 = arith.constant 17 : index
    %c0_259 = arith.constant 0 : index
    %c0_260 = arith.constant 0 : index
    %244 = vector.load %arg7[%c17, %c0_259, %c0_260] : memref<36x128x128xbf16, #tpu.memory_space<vmem>>, vector<1x128x128xbf16>
    %245 = vector.shape_cast %244 : vector<1x128x128xbf16> to vector<128x128xbf16>
    %cst_261 = arith.constant dense<0.000000e+00> : vector<128x128xf32>
    %246 = tpu.matmul %243, %245, %cst_261 {dimension_numbers = #tpu.dot_dimension_numbers<[1], [0], [0], [1], [0, 0, 1, 1], [], []>} : vector<128x128xbf16>, vector<128x128xbf16>, vector<128x128xf32> -> vector<128x128xf32>
    %247 = arith.addf %240, %246 : vector<128x128xf32>
    %248 = arith.addf %159, %247 : vector<128x128xf32>
    %249 = arith.addf %69, %248 : vector<128x128xf32>
    %cst_262 = arith.constant 0.000000e+00 : f32
    %250 = vector.broadcast %cst_262 : f32 to vector<128x128xf32>
    %c2_263 = arith.constant 2 : index
    %c0_264 = arith.constant 0 : index
    %c0_265 = arith.constant 0 : index
    %251 = vector.load %arg3[%c2_263, %c0_264, %c0_265] : memref<4x1x128xf32, #tpu.memory_space<vmem>>, vector<1x1x128xf32>
    %252 = vector.shape_cast %251 : vector<1x1x128xf32> to vector<1x128xf32>
    %253 = vector.broadcast %252 : vector<1x128xf32> to vector<128x128xf32>
    %254 = arith.mulf %249, %253 : vector<128x128xf32>
    %c2_266 = arith.constant 2 : index
    %c0_267 = arith.constant 0 : index
    %c0_268 = arith.constant 0 : index
    %255 = vector.load %arg4[%c2_266, %c0_267, %c0_268] : memref<4x1x128xf32, #tpu.memory_space<vmem>>, vector<1x1x128xf32>
    %256 = vector.shape_cast %255 : vector<1x1x128xf32> to vector<1x128xf32>
    %257 = vector.broadcast %256 : vector<1x128xf32> to vector<128x128xf32>
    %258 = arith.addf %254, %257 : vector<128x128xf32>
    %cst_269 = arith.constant 0.000000e+00 : f32
    %259 = vector.broadcast %cst_269 : f32 to vector<128x128xf32>
    %260 = arith.maximumf %258, %259 : vector<128x128xf32>
    %261 = arith.truncf %260 : vector<128x128xf32> to vector<128x128xbf16>
    %c2_270 = arith.constant 2 : index
    %c0_271 = arith.constant 0 : index
    %c0_272 = arith.constant 0 : index
    %262 = vector.load %arg5[%c2_270, %c0_271, %c0_272] : memref<4x128x128xbf16, #tpu.memory_space<vmem>>, vector<1x128x128xbf16>
    %263 = vector.shape_cast %262 : vector<1x128x128xbf16> to vector<128x128xbf16>
    %cst_273 = arith.constant dense<0.000000e+00> : vector<128x128xf32>
    %264 = tpu.matmul %261, %263, %cst_273 {dimension_numbers = #tpu.dot_dimension_numbers<[1], [0], [0], [1], [0, 0, 1, 1], [], []>} : vector<128x128xbf16>, vector<128x128xbf16>, vector<128x128xf32> -> vector<128x128xf32>
    %c2_274 = arith.constant 2 : index
    %c0_275 = arith.constant 0 : index
    %c0_276 = arith.constant 0 : index
    %265 = vector.load %arg6[%c2_274, %c0_275, %c0_276] : memref<4x1x128xf32, #tpu.memory_space<vmem>>, vector<1x1x128xf32>
    %266 = vector.shape_cast %265 : vector<1x1x128xf32> to vector<1x128xf32>
    %267 = vector.broadcast %266 : vector<1x128xf32> to vector<128x128xf32>
    %268 = arith.addf %264, %267 : vector<128x128xf32>
    %cst_277 = arith.constant 0.000000e+00 : f32
    %269 = vector.broadcast %cst_277 : f32 to vector<128x128xf32>
    %270 = arith.maximumf %268, %269 : vector<128x128xf32>
    %cst_278 = arith.constant 0.000000e+00 : f32
    %271 = vector.broadcast %cst_278 : f32 to vector<2x10x10x128xf32>
    %c0_279 = arith.constant 0 : index
    %c0_280 = arith.constant 0 : index
    %c0_281 = arith.constant 0 : index
    %c0_282 = arith.constant 0 : index
    %272 = vector.load %arg13[%c0_279, %c0_280, %c0_281, %c0_282] : memref<2x10x10x128xf32, #tpu.memory_space<vmem>>, vector<2x10x10x128xf32>
    tpu.vector_store %arg13[%c0_279, %c0_280, %c0_281, %c0_282], %271 {strides = array<i32>} : memref<2x10x10x128xf32, #tpu.memory_space<vmem>>, vector<2x10x10x128xf32>,
    %273 = vector.shape_cast %270 : vector<128x128xf32> to vector<2x8x8x128xf32>
    %c0_283 = arith.constant 0 : index
    %c1_284 = arith.constant 1 : index
    %c1_285 = arith.constant 1 : index
    %c0_286 = arith.constant 0 : index
    %274 = vector.load %arg13[%c0_283, %c1_284, %c1_285, %c0_286] : memref<2x10x10x128xf32, #tpu.memory_space<vmem>>, vector<2x8x8x128xf32>
    tpu.vector_store %arg13[%c0_283, %c1_284, %c1_285, %c0_286], %273 {strides = array<i32>} : memref<2x10x10x128xf32, #tpu.memory_space<vmem>>, vector<2x8x8x128xf32>,
    %cst_287 = arith.constant 0.000000e+00 : f32
    %275 = vector.broadcast %cst_287 : f32 to vector<128x128xf32>
    %c0_288 = arith.constant 0 : index
    %c0_289 = arith.constant 0 : index
    %c0_290 = arith.constant 0 : index
    %c0_291 = arith.constant 0 : index
    %276 = vector.load %arg13[%c0_288, %c0_289, %c0_290, %c0_291] : memref<2x10x10x128xf32, #tpu.memory_space<vmem>>, vector<2x8x8x128xf32>
    %277 = vector.shape_cast %276 : vector<2x8x8x128xf32> to vector<128x128xf32>
    %278 = arith.truncf %277 : vector<128x128xf32> to vector<128x128xbf16>
    %c18 = arith.constant 18 : index
    %c0_292 = arith.constant 0 : index
    %c0_293 = arith.constant 0 : index
    %279 = vector.load %arg7[%c18, %c0_292, %c0_293] : memref<36x128x128xbf16, #tpu.memory_space<vmem>>, vector<1x128x128xbf16>
    %280 = vector.shape_cast %279 : vector<1x128x128xbf16> to vector<128x128xbf16>
    %cst_294 = arith.constant dense<0.000000e+00> : vector<128x128xf32>
    %281 = tpu.matmul %278, %280, %cst_294 {dimension_numbers = #tpu.dot_dimension_numbers<[1], [0], [0], [1], [0, 0, 1, 1], [], []>} : vector<128x128xbf16>, vector<128x128xbf16>, vector<128x128xf32> -> vector<128x128xf32>
    %282 = arith.addf %275, %281 : vector<128x128xf32>
    %c0_295 = arith.constant 0 : index
    %c0_296 = arith.constant 0 : index
    %c1_297 = arith.constant 1 : index
    %c0_298 = arith.constant 0 : index
    %283 = vector.load %arg13[%c0_295, %c0_296, %c1_297, %c0_298] : memref<2x10x10x128xf32, #tpu.memory_space<vmem>>, vector<2x8x8x128xf32>
    %284 = vector.shape_cast %283 : vector<2x8x8x128xf32> to vector<128x128xf32>
    %285 = arith.truncf %284 : vector<128x128xf32> to vector<128x128xbf16>
    %c19 = arith.constant 19 : index
    %c0_299 = arith.constant 0 : index
    %c0_300 = arith.constant 0 : index
    %286 = vector.load %arg7[%c19, %c0_299, %c0_300] : memref<36x128x128xbf16, #tpu.memory_space<vmem>>, vector<1x128x128xbf16>
    %287 = vector.shape_cast %286 : vector<1x128x128xbf16> to vector<128x128xbf16>
    %cst_301 = arith.constant dense<0.000000e+00> : vector<128x128xf32>
    %288 = tpu.matmul %285, %287, %cst_301 {dimension_numbers = #tpu.dot_dimension_numbers<[1], [0], [0], [1], [0, 0, 1, 1], [], []>} : vector<128x128xbf16>, vector<128x128xbf16>, vector<128x128xf32> -> vector<128x128xf32>
    %289 = arith.addf %282, %288 : vector<128x128xf32>
    %c0_302 = arith.constant 0 : index
    %c0_303 = arith.constant 0 : index
    %c2_304 = arith.constant 2 : index
    %c0_305 = arith.constant 0 : index
    %290 = vector.load %arg13[%c0_302, %c0_303, %c2_304, %c0_305] : memref<2x10x10x128xf32, #tpu.memory_space<vmem>>, vector<2x8x8x128xf32>
    %291 = vector.shape_cast %290 : vector<2x8x8x128xf32> to vector<128x128xf32>
    %292 = arith.truncf %291 : vector<128x128xf32> to vector<128x128xbf16>
    %c20 = arith.constant 20 : index
    %c0_306 = arith.constant 0 : index
    %c0_307 = arith.constant 0 : index
    %293 = vector.load %arg7[%c20, %c0_306, %c0_307] : memref<36x128x128xbf16, #tpu.memory_space<vmem>>, vector<1x128x128xbf16>
    %294 = vector.shape_cast %293 : vector<1x128x128xbf16> to vector<128x128xbf16>
    %cst_308 = arith.constant dense<0.000000e+00> : vector<128x128xf32>
    %295 = tpu.matmul %292, %294, %cst_308 {dimension_numbers = #tpu.dot_dimension_numbers<[1], [0], [0], [1], [0, 0, 1, 1], [], []>} : vector<128x128xbf16>, vector<128x128xbf16>, vector<128x128xf32> -> vector<128x128xf32>
    %296 = arith.addf %289, %295 : vector<128x128xf32>
    %c0_309 = arith.constant 0 : index
    %c1_310 = arith.constant 1 : index
    %c0_311 = arith.constant 0 : index
    %c0_312 = arith.constant 0 : index
    %297 = vector.load %arg13[%c0_309, %c1_310, %c0_311, %c0_312] : memref<2x10x10x128xf32, #tpu.memory_space<vmem>>, vector<2x8x8x128xf32>
    %298 = vector.shape_cast %297 : vector<2x8x8x128xf32> to vector<128x128xf32>
    %299 = arith.truncf %298 : vector<128x128xf32> to vector<128x128xbf16>
    %c21 = arith.constant 21 : index
    %c0_313 = arith.constant 0 : index
    %c0_314 = arith.constant 0 : index
    %300 = vector.load %arg7[%c21, %c0_313, %c0_314] : memref<36x128x128xbf16, #tpu.memory_space<vmem>>, vector<1x128x128xbf16>
    %301 = vector.shape_cast %300 : vector<1x128x128xbf16> to vector<128x128xbf16>
    %cst_315 = arith.constant dense<0.000000e+00> : vector<128x128xf32>
    %302 = tpu.matmul %299, %301, %cst_315 {dimension_numbers = #tpu.dot_dimension_numbers<[1], [0], [0], [1], [0, 0, 1, 1], [], []>} : vector<128x128xbf16>, vector<128x128xbf16>, vector<128x128xf32> -> vector<128x128xf32>
    %303 = arith.addf %296, %302 : vector<128x128xf32>
    %c0_316 = arith.constant 0 : index
    %c1_317 = arith.constant 1 : index
    %c1_318 = arith.constant 1 : index
    %c0_319 = arith.constant 0 : index
    %304 = vector.load %arg13[%c0_316, %c1_317, %c1_318, %c0_319] : memref<2x10x10x128xf32, #tpu.memory_space<vmem>>, vector<2x8x8x128xf32>
    %305 = vector.shape_cast %304 : vector<2x8x8x128xf32> to vector<128x128xf32>
    %306 = arith.truncf %305 : vector<128x128xf32> to vector<128x128xbf16>
    %c22 = arith.constant 22 : index
    %c0_320 = arith.constant 0 : index
    %c0_321 = arith.constant 0 : index
    %307 = vector.load %arg7[%c22, %c0_320, %c0_321] : memref<36x128x128xbf16, #tpu.memory_space<vmem>>, vector<1x128x128xbf16>
    %308 = vector.shape_cast %307 : vector<1x128x128xbf16> to vector<128x128xbf16>
    %cst_322 = arith.constant dense<0.000000e+00> : vector<128x128xf32>
    %309 = tpu.matmul %306, %308, %cst_322 {dimension_numbers = #tpu.dot_dimension_numbers<[1], [0], [0], [1], [0, 0, 1, 1], [], []>} : vector<128x128xbf16>, vector<128x128xbf16>, vector<128x128xf32> -> vector<128x128xf32>
    %310 = arith.addf %303, %309 : vector<128x128xf32>
    %c0_323 = arith.constant 0 : index
    %c1_324 = arith.constant 1 : index
    %c2_325 = arith.constant 2 : index
    %c0_326 = arith.constant 0 : index
    %311 = vector.load %arg13[%c0_323, %c1_324, %c2_325, %c0_326] : memref<2x10x10x128xf32, #tpu.memory_space<vmem>>, vector<2x8x8x128xf32>
    %312 = vector.shape_cast %311 : vector<2x8x8x128xf32> to vector<128x128xf32>
    %313 = arith.truncf %312 : vector<128x128xf32> to vector<128x128xbf16>
    %c23 = arith.constant 23 : index
    %c0_327 = arith.constant 0 : index
    %c0_328 = arith.constant 0 : index
    %314 = vector.load %arg7[%c23, %c0_327, %c0_328] : memref<36x128x128xbf16, #tpu.memory_space<vmem>>, vector<1x128x128xbf16>
    %315 = vector.shape_cast %314 : vector<1x128x128xbf16> to vector<128x128xbf16>
    %cst_329 = arith.constant dense<0.000000e+00> : vector<128x128xf32>
    %316 = tpu.matmul %313, %315, %cst_329 {dimension_numbers = #tpu.dot_dimension_numbers<[1], [0], [0], [1], [0, 0, 1, 1], [], []>} : vector<128x128xbf16>, vector<128x128xbf16>, vector<128x128xf32> -> vector<128x128xf32>
    %317 = arith.addf %310, %316 : vector<128x128xf32>
    %c0_330 = arith.constant 0 : index
    %c2_331 = arith.constant 2 : index
    %c0_332 = arith.constant 0 : index
    %c0_333 = arith.constant 0 : index
    %318 = vector.load %arg13[%c0_330, %c2_331, %c0_332, %c0_333] : memref<2x10x10x128xf32, #tpu.memory_space<vmem>>, vector<2x8x8x128xf32>
    %319 = vector.shape_cast %318 : vector<2x8x8x128xf32> to vector<128x128xf32>
    %320 = arith.truncf %319 : vector<128x128xf32> to vector<128x128xbf16>
    %c24 = arith.constant 24 : index
    %c0_334 = arith.constant 0 : index
    %c0_335 = arith.constant 0 : index
    %321 = vector.load %arg7[%c24, %c0_334, %c0_335] : memref<36x128x128xbf16, #tpu.memory_space<vmem>>, vector<1x128x128xbf16>
    %322 = vector.shape_cast %321 : vector<1x128x128xbf16> to vector<128x128xbf16>
    %cst_336 = arith.constant dense<0.000000e+00> : vector<128x128xf32>
    %323 = tpu.matmul %320, %322, %cst_336 {dimension_numbers = #tpu.dot_dimension_numbers<[1], [0], [0], [1], [0, 0, 1, 1], [], []>} : vector<128x128xbf16>, vector<128x128xbf16>, vector<128x128xf32> -> vector<128x128xf32>
    %324 = arith.addf %317, %323 : vector<128x128xf32>
    %c0_337 = arith.constant 0 : index
    %c2_338 = arith.constant 2 : index
    %c1_339 = arith.constant 1 : index
    %c0_340 = arith.constant 0 : index
    %325 = vector.load %arg13[%c0_337, %c2_338, %c1_339, %c0_340] : memref<2x10x10x128xf32, #tpu.memory_space<vmem>>, vector<2x8x8x128xf32>
    %326 = vector.shape_cast %325 : vector<2x8x8x128xf32> to vector<128x128xf32>
    %327 = arith.truncf %326 : vector<128x128xf32> to vector<128x128xbf16>
    %c25 = arith.constant 25 : index
    %c0_341 = arith.constant 0 : index
    %c0_342 = arith.constant 0 : index
    %328 = vector.load %arg7[%c25, %c0_341, %c0_342] : memref<36x128x128xbf16, #tpu.memory_space<vmem>>, vector<1x128x128xbf16>
    %329 = vector.shape_cast %328 : vector<1x128x128xbf16> to vector<128x128xbf16>
    %cst_343 = arith.constant dense<0.000000e+00> : vector<128x128xf32>
    %330 = tpu.matmul %327, %329, %cst_343 {dimension_numbers = #tpu.dot_dimension_numbers<[1], [0], [0], [1], [0, 0, 1, 1], [], []>} : vector<128x128xbf16>, vector<128x128xbf16>, vector<128x128xf32> -> vector<128x128xf32>
    %331 = arith.addf %324, %330 : vector<128x128xf32>
    %c0_344 = arith.constant 0 : index
    %c2_345 = arith.constant 2 : index
    %c2_346 = arith.constant 2 : index
    %c0_347 = arith.constant 0 : index
    %332 = vector.load %arg13[%c0_344, %c2_345, %c2_346, %c0_347] : memref<2x10x10x128xf32, #tpu.memory_space<vmem>>, vector<2x8x8x128xf32>
    %333 = vector.shape_cast %332 : vector<2x8x8x128xf32> to vector<128x128xf32>
    %334 = arith.truncf %333 : vector<128x128xf32> to vector<128x128xbf16>
    %c26 = arith.constant 26 : index
    %c0_348 = arith.constant 0 : index
    %c0_349 = arith.constant 0 : index
    %335 = vector.load %arg7[%c26, %c0_348, %c0_349] : memref<36x128x128xbf16, #tpu.memory_space<vmem>>, vector<1x128x128xbf16>
    %336 = vector.shape_cast %335 : vector<1x128x128xbf16> to vector<128x128xbf16>
    %cst_350 = arith.constant dense<0.000000e+00> : vector<128x128xf32>
    %337 = tpu.matmul %334, %336, %cst_350 {dimension_numbers = #tpu.dot_dimension_numbers<[1], [0], [0], [1], [0, 0, 1, 1], [], []>} : vector<128x128xbf16>, vector<128x128xbf16>, vector<128x128xf32> -> vector<128x128xf32>
    %338 = arith.addf %331, %337 : vector<128x128xf32>
    %339 = arith.addf %250, %338 : vector<128x128xf32>
    %c3_351 = arith.constant 3 : index
    %c0_352 = arith.constant 0 : index
    %c0_353 = arith.constant 0 : index
    %340 = vector.load %arg3[%c3_351, %c0_352, %c0_353] : memref<4x1x128xf32, #tpu.memory_space<vmem>>, vector<1x1x128xf32>
    %341 = vector.shape_cast %340 : vector<1x1x128xf32> to vector<1x128xf32>
    %342 = vector.broadcast %341 : vector<1x128xf32> to vector<128x128xf32>
    %343 = arith.mulf %249, %342 : vector<128x128xf32>
    %c3_354 = arith.constant 3 : index
    %c0_355 = arith.constant 0 : index
    %c0_356 = arith.constant 0 : index
    %344 = vector.load %arg4[%c3_354, %c0_355, %c0_356] : memref<4x1x128xf32, #tpu.memory_space<vmem>>, vector<1x1x128xf32>
    %345 = vector.shape_cast %344 : vector<1x1x128xf32> to vector<1x128xf32>
    %346 = vector.broadcast %345 : vector<1x128xf32> to vector<128x128xf32>
    %347 = arith.addf %343, %346 : vector<128x128xf32>
    %cst_357 = arith.constant 0.000000e+00 : f32
    %348 = vector.broadcast %cst_357 : f32 to vector<128x128xf32>
    %349 = arith.maximumf %347, %348 : vector<128x128xf32>
    %350 = arith.truncf %349 : vector<128x128xf32> to vector<128x128xbf16>
    %c3_358 = arith.constant 3 : index
    %c0_359 = arith.constant 0 : index
    %c0_360 = arith.constant 0 : index
    %351 = vector.load %arg5[%c3_358, %c0_359, %c0_360] : memref<4x128x128xbf16, #tpu.memory_space<vmem>>, vector<1x128x128xbf16>
    %352 = vector.shape_cast %351 : vector<1x128x128xbf16> to vector<128x128xbf16>
    %cst_361 = arith.constant dense<0.000000e+00> : vector<128x128xf32>
    %353 = tpu.matmul %350, %352, %cst_361 {dimension_numbers = #tpu.dot_dimension_numbers<[1], [0], [0], [1], [0, 0, 1, 1], [], []>} : vector<128x128xbf16>, vector<128x128xbf16>, vector<128x128xf32> -> vector<128x128xf32>
    %c3_362 = arith.constant 3 : index
    %c0_363 = arith.constant 0 : index
    %c0_364 = arith.constant 0 : index
    %354 = vector.load %arg6[%c3_362, %c0_363, %c0_364] : memref<4x1x128xf32, #tpu.memory_space<vmem>>, vector<1x1x128xf32>
    %355 = vector.shape_cast %354 : vector<1x1x128xf32> to vector<1x128xf32>
    %356 = vector.broadcast %355 : vector<1x128xf32> to vector<128x128xf32>
    %357 = arith.addf %353, %356 : vector<128x128xf32>
    %cst_365 = arith.constant 0.000000e+00 : f32
    %358 = vector.broadcast %cst_365 : f32 to vector<128x128xf32>
    %359 = arith.maximumf %357, %358 : vector<128x128xf32>
    %cst_366 = arith.constant 0.000000e+00 : f32
    %360 = vector.broadcast %cst_366 : f32 to vector<2x10x10x128xf32>
    %c0_367 = arith.constant 0 : index
    %c0_368 = arith.constant 0 : index
    %c0_369 = arith.constant 0 : index
    %c0_370 = arith.constant 0 : index
    %361 = vector.load %arg13[%c0_367, %c0_368, %c0_369, %c0_370] : memref<2x10x10x128xf32, #tpu.memory_space<vmem>>, vector<2x10x10x128xf32>
    tpu.vector_store %arg13[%c0_367, %c0_368, %c0_369, %c0_370], %360 {strides = array<i32>} : memref<2x10x10x128xf32, #tpu.memory_space<vmem>>, vector<2x10x10x128xf32>,
    %362 = vector.shape_cast %359 : vector<128x128xf32> to vector<2x8x8x128xf32>
    %c0_371 = arith.constant 0 : index
    %c1_372 = arith.constant 1 : index
    %c1_373 = arith.constant 1 : index
    %c0_374 = arith.constant 0 : index
    %363 = vector.load %arg13[%c0_371, %c1_372, %c1_373, %c0_374] : memref<2x10x10x128xf32, #tpu.memory_space<vmem>>, vector<2x8x8x128xf32>
    tpu.vector_store %arg13[%c0_371, %c1_372, %c1_373, %c0_374], %362 {strides = array<i32>} : memref<2x10x10x128xf32, #tpu.memory_space<vmem>>, vector<2x8x8x128xf32>,
    %cst_375 = arith.constant 0.000000e+00 : f32
    %364 = vector.broadcast %cst_375 : f32 to vector<128x128xf32>
    %c0_376 = arith.constant 0 : index
    %c0_377 = arith.constant 0 : index
    %c0_378 = arith.constant 0 : index
    %c0_379 = arith.constant 0 : index
    %365 = vector.load %arg13[%c0_376, %c0_377, %c0_378, %c0_379] : memref<2x10x10x128xf32, #tpu.memory_space<vmem>>, vector<2x8x8x128xf32>
    %366 = vector.shape_cast %365 : vector<2x8x8x128xf32> to vector<128x128xf32>
    %367 = arith.truncf %366 : vector<128x128xf32> to vector<128x128xbf16>
    %c27 = arith.constant 27 : index
    %c0_380 = arith.constant 0 : index
    %c0_381 = arith.constant 0 : index
    %368 = vector.load %arg7[%c27, %c0_380, %c0_381] : memref<36x128x128xbf16, #tpu.memory_space<vmem>>, vector<1x128x128xbf16>
    %369 = vector.shape_cast %368 : vector<1x128x128xbf16> to vector<128x128xbf16>
    %cst_382 = arith.constant dense<0.000000e+00> : vector<128x128xf32>
    %370 = tpu.matmul %367, %369, %cst_382 {dimension_numbers = #tpu.dot_dimension_numbers<[1], [0], [0], [1], [0, 0, 1, 1], [], []>} : vector<128x128xbf16>, vector<128x128xbf16>, vector<128x128xf32> -> vector<128x128xf32>
    %371 = arith.addf %364, %370 : vector<128x128xf32>
    %c0_383 = arith.constant 0 : index
    %c0_384 = arith.constant 0 : index
    %c1_385 = arith.constant 1 : index
    %c0_386 = arith.constant 0 : index
    %372 = vector.load %arg13[%c0_383, %c0_384, %c1_385, %c0_386] : memref<2x10x10x128xf32, #tpu.memory_space<vmem>>, vector<2x8x8x128xf32>
    %373 = vector.shape_cast %372 : vector<2x8x8x128xf32> to vector<128x128xf32>
    %374 = arith.truncf %373 : vector<128x128xf32> to vector<128x128xbf16>
    %c28 = arith.constant 28 : index
    %c0_387 = arith.constant 0 : index
    %c0_388 = arith.constant 0 : index
    %375 = vector.load %arg7[%c28, %c0_387, %c0_388] : memref<36x128x128xbf16, #tpu.memory_space<vmem>>, vector<1x128x128xbf16>
    %376 = vector.shape_cast %375 : vector<1x128x128xbf16> to vector<128x128xbf16>
    %cst_389 = arith.constant dense<0.000000e+00> : vector<128x128xf32>
    %377 = tpu.matmul %374, %376, %cst_389 {dimension_numbers = #tpu.dot_dimension_numbers<[1], [0], [0], [1], [0, 0, 1, 1], [], []>} : vector<128x128xbf16>, vector<128x128xbf16>, vector<128x128xf32> -> vector<128x128xf32>
    %378 = arith.addf %371, %377 : vector<128x128xf32>
    %c0_390 = arith.constant 0 : index
    %c0_391 = arith.constant 0 : index
    %c2_392 = arith.constant 2 : index
    %c0_393 = arith.constant 0 : index
    %379 = vector.load %arg13[%c0_390, %c0_391, %c2_392, %c0_393] : memref<2x10x10x128xf32, #tpu.memory_space<vmem>>, vector<2x8x8x128xf32>
    %380 = vector.shape_cast %379 : vector<2x8x8x128xf32> to vector<128x128xf32>
    %381 = arith.truncf %380 : vector<128x128xf32> to vector<128x128xbf16>
    %c29 = arith.constant 29 : index
    %c0_394 = arith.constant 0 : index
    %c0_395 = arith.constant 0 : index
    %382 = vector.load %arg7[%c29, %c0_394, %c0_395] : memref<36x128x128xbf16, #tpu.memory_space<vmem>>, vector<1x128x128xbf16>
    %383 = vector.shape_cast %382 : vector<1x128x128xbf16> to vector<128x128xbf16>
    %cst_396 = arith.constant dense<0.000000e+00> : vector<128x128xf32>
    %384 = tpu.matmul %381, %383, %cst_396 {dimension_numbers = #tpu.dot_dimension_numbers<[1], [0], [0], [1], [0, 0, 1, 1], [], []>} : vector<128x128xbf16>, vector<128x128xbf16>, vector<128x128xf32> -> vector<128x128xf32>
    %385 = arith.addf %378, %384 : vector<128x128xf32>
    %c0_397 = arith.constant 0 : index
    %c1_398 = arith.constant 1 : index
    %c0_399 = arith.constant 0 : index
    %c0_400 = arith.constant 0 : index
    %386 = vector.load %arg13[%c0_397, %c1_398, %c0_399, %c0_400] : memref<2x10x10x128xf32, #tpu.memory_space<vmem>>, vector<2x8x8x128xf32>
    %387 = vector.shape_cast %386 : vector<2x8x8x128xf32> to vector<128x128xf32>
    %388 = arith.truncf %387 : vector<128x128xf32> to vector<128x128xbf16>
    %c30 = arith.constant 30 : index
    %c0_401 = arith.constant 0 : index
    %c0_402 = arith.constant 0 : index
    %389 = vector.load %arg7[%c30, %c0_401, %c0_402] : memref<36x128x128xbf16, #tpu.memory_space<vmem>>, vector<1x128x128xbf16>
    %390 = vector.shape_cast %389 : vector<1x128x128xbf16> to vector<128x128xbf16>
    %cst_403 = arith.constant dense<0.000000e+00> : vector<128x128xf32>
    %391 = tpu.matmul %388, %390, %cst_403 {dimension_numbers = #tpu.dot_dimension_numbers<[1], [0], [0], [1], [0, 0, 1, 1], [], []>} : vector<128x128xbf16>, vector<128x128xbf16>, vector<128x128xf32> -> vector<128x128xf32>
    %392 = arith.addf %385, %391 : vector<128x128xf32>
    %c0_404 = arith.constant 0 : index
    %c1_405 = arith.constant 1 : index
    %c1_406 = arith.constant 1 : index
    %c0_407 = arith.constant 0 : index
    %393 = vector.load %arg13[%c0_404, %c1_405, %c1_406, %c0_407] : memref<2x10x10x128xf32, #tpu.memory_space<vmem>>, vector<2x8x8x128xf32>
    %394 = vector.shape_cast %393 : vector<2x8x8x128xf32> to vector<128x128xf32>
    %395 = arith.truncf %394 : vector<128x128xf32> to vector<128x128xbf16>
    %c31 = arith.constant 31 : index
    %c0_408 = arith.constant 0 : index
    %c0_409 = arith.constant 0 : index
    %396 = vector.load %arg7[%c31, %c0_408, %c0_409] : memref<36x128x128xbf16, #tpu.memory_space<vmem>>, vector<1x128x128xbf16>
    %397 = vector.shape_cast %396 : vector<1x128x128xbf16> to vector<128x128xbf16>
    %cst_410 = arith.constant dense<0.000000e+00> : vector<128x128xf32>
    %398 = tpu.matmul %395, %397, %cst_410 {dimension_numbers = #tpu.dot_dimension_numbers<[1], [0], [0], [1], [0, 0, 1, 1], [], []>} : vector<128x128xbf16>, vector<128x128xbf16>, vector<128x128xf32> -> vector<128x128xf32>
    %399 = arith.addf %392, %398 : vector<128x128xf32>
    %c0_411 = arith.constant 0 : index
    %c1_412 = arith.constant 1 : index
    %c2_413 = arith.constant 2 : index
    %c0_414 = arith.constant 0 : index
    %400 = vector.load %arg13[%c0_411, %c1_412, %c2_413, %c0_414] : memref<2x10x10x128xf32, #tpu.memory_space<vmem>>, vector<2x8x8x128xf32>
    %401 = vector.shape_cast %400 : vector<2x8x8x128xf32> to vector<128x128xf32>
    %402 = arith.truncf %401 : vector<128x128xf32> to vector<128x128xbf16>
    %c32 = arith.constant 32 : index
    %c0_415 = arith.constant 0 : index
    %c0_416 = arith.constant 0 : index
    %403 = vector.load %arg7[%c32, %c0_415, %c0_416] : memref<36x128x128xbf16, #tpu.memory_space<vmem>>, vector<1x128x128xbf16>
    %404 = vector.shape_cast %403 : vector<1x128x128xbf16> to vector<128x128xbf16>
    %cst_417 = arith.constant dense<0.000000e+00> : vector<128x128xf32>
    %405 = tpu.matmul %402, %404, %cst_417 {dimension_numbers = #tpu.dot_dimension_numbers<[1], [0], [0], [1], [0, 0, 1, 1], [], []>} : vector<128x128xbf16>, vector<128x128xbf16>, vector<128x128xf32> -> vector<128x128xf32>
    %406 = arith.addf %399, %405 : vector<128x128xf32>
    %c0_418 = arith.constant 0 : index
    %c2_419 = arith.constant 2 : index
    %c0_420 = arith.constant 0 : index
    %c0_421 = arith.constant 0 : index
    %407 = vector.load %arg13[%c0_418, %c2_419, %c0_420, %c0_421] : memref<2x10x10x128xf32, #tpu.memory_space<vmem>>, vector<2x8x8x128xf32>
    %408 = vector.shape_cast %407 : vector<2x8x8x128xf32> to vector<128x128xf32>
    %409 = arith.truncf %408 : vector<128x128xf32> to vector<128x128xbf16>
    %c33 = arith.constant 33 : index
    %c0_422 = arith.constant 0 : index
    %c0_423 = arith.constant 0 : index
    %410 = vector.load %arg7[%c33, %c0_422, %c0_423] : memref<36x128x128xbf16, #tpu.memory_space<vmem>>, vector<1x128x128xbf16>
    %411 = vector.shape_cast %410 : vector<1x128x128xbf16> to vector<128x128xbf16>
    %cst_424 = arith.constant dense<0.000000e+00> : vector<128x128xf32>
    %412 = tpu.matmul %409, %411, %cst_424 {dimension_numbers = #tpu.dot_dimension_numbers<[1], [0], [0], [1], [0, 0, 1, 1], [], []>} : vector<128x128xbf16>, vector<128x128xbf16>, vector<128x128xf32> -> vector<128x128xf32>
    %413 = arith.addf %406, %412 : vector<128x128xf32>
    %c0_425 = arith.constant 0 : index
    %c2_426 = arith.constant 2 : index
    %c1_427 = arith.constant 1 : index
    %c0_428 = arith.constant 0 : index
    %414 = vector.load %arg13[%c0_425, %c2_426, %c1_427, %c0_428] : memref<2x10x10x128xf32, #tpu.memory_space<vmem>>, vector<2x8x8x128xf32>
    %415 = vector.shape_cast %414 : vector<2x8x8x128xf32> to vector<128x128xf32>
    %416 = arith.truncf %415 : vector<128x128xf32> to vector<128x128xbf16>
    %c34 = arith.constant 34 : index
    %c0_429 = arith.constant 0 : index
    %c0_430 = arith.constant 0 : index
    %417 = vector.load %arg7[%c34, %c0_429, %c0_430] : memref<36x128x128xbf16, #tpu.memory_space<vmem>>, vector<1x128x128xbf16>
    %418 = vector.shape_cast %417 : vector<1x128x128xbf16> to vector<128x128xbf16>
    %cst_431 = arith.constant dense<0.000000e+00> : vector<128x128xf32>
    %419 = tpu.matmul %416, %418, %cst_431 {dimension_numbers = #tpu.dot_dimension_numbers<[1], [0], [0], [1], [0, 0, 1, 1], [], []>} : vector<128x128xbf16>, vector<128x128xbf16>, vector<128x128xf32> -> vector<128x128xf32>
    %420 = arith.addf %413, %419 : vector<128x128xf32>
    %c0_432 = arith.constant 0 : index
    %c2_433 = arith.constant 2 : index
    %c2_434 = arith.constant 2 : index
    %c0_435 = arith.constant 0 : index
    %421 = vector.load %arg13[%c0_432, %c2_433, %c2_434, %c0_435] : memref<2x10x10x128xf32, #tpu.memory_space<vmem>>, vector<2x8x8x128xf32>
    %422 = vector.shape_cast %421 : vector<2x8x8x128xf32> to vector<128x128xf32>
    %423 = arith.truncf %422 : vector<128x128xf32> to vector<128x128xbf16>
    %c35 = arith.constant 35 : index
    %c0_436 = arith.constant 0 : index
    %c0_437 = arith.constant 0 : index
    %424 = vector.load %arg7[%c35, %c0_436, %c0_437] : memref<36x128x128xbf16, #tpu.memory_space<vmem>>, vector<1x128x128xbf16>
    %425 = vector.shape_cast %424 : vector<1x128x128xbf16> to vector<128x128xbf16>
    %cst_438 = arith.constant dense<0.000000e+00> : vector<128x128xf32>
    %426 = tpu.matmul %423, %425, %cst_438 {dimension_numbers = #tpu.dot_dimension_numbers<[1], [0], [0], [1], [0, 0, 1, 1], [], []>} : vector<128x128xbf16>, vector<128x128xbf16>, vector<128x128xf32> -> vector<128x128xf32>
    %427 = arith.addf %420, %426 : vector<128x128xf32>
    %428 = arith.addf %339, %427 : vector<128x128xf32>
    %429 = arith.addf %249, %428 : vector<128x128xf32>
    %c0_439 = arith.constant 0 : index
    %c0_440 = arith.constant 0 : index
    %430 = vector.load %arg8[%c0_439, %c0_440] : memref<1x128xf32, #tpu.memory_space<vmem>>, vector<1x128xf32>
    %431 = vector.broadcast %430 : vector<1x128xf32> to vector<128x128xf32>
    %432 = arith.mulf %429, %431 : vector<128x128xf32>
    %c0_441 = arith.constant 0 : index
    %c0_442 = arith.constant 0 : index
    %433 = vector.load %arg9[%c0_441, %c0_442] : memref<1x128xf32, #tpu.memory_space<vmem>>, vector<1x128xf32>
    %434 = vector.broadcast %433 : vector<1x128xf32> to vector<128x128xf32>
    %435 = arith.addf %432, %434 : vector<128x128xf32>
    %cst_443 = arith.constant 0.000000e+00 : f32
    %436 = vector.broadcast %cst_443 : f32 to vector<128x128xf32>
    %437 = arith.maximumf %435, %436 : vector<128x128xf32>
    %438 = vector.shape_cast %437 : vector<128x128xf32> to vector<2x64x128xf32>
    %cst_444 = arith.constant dense<0.000000e+00> : vector<2x128xf32>
    %439 = vector.multi_reduction <add>, %438, %cst_444 [1] : vector<2x64x128xf32> to vector<2x128xf32>
    %cst_445 = arith.constant 1.562500e-02 : f32
    %440 = vector.broadcast %cst_445 : f32 to vector<2x128xf32>
    %441 = arith.mulf %439, %440 : vector<2x128xf32>
    %442 = arith.truncf %441 : vector<2x128xf32> to vector<2x128xbf16>
    %c0_446 = arith.constant 0 : index
    %c0_447 = arith.constant 0 : index
    %443 = vector.load %arg10[%c0_446, %c0_447] : memref<128x128xbf16, #tpu.memory_space<vmem>>, vector<128x128xbf16>
    %cst_448 = arith.constant dense<0.000000e+00> : vector<2x128xf32>
    %444 = tpu.matmul %442, %443, %cst_448 {dimension_numbers = #tpu.dot_dimension_numbers<[1], [0], [0], [1], [0, 0, 1, 1], [], []>} : vector<2x128xbf16>, vector<128x128xbf16>, vector<2x128xf32> -> vector<2x128xf32>
    %c0_449 = arith.constant 0 : index
    %c0_450 = arith.constant 0 : index
    %445 = vector.load %arg11[%c0_449, %c0_450] : memref<1x128xf32, #tpu.memory_space<vmem>>, vector<1x128xf32>
    %446 = vector.broadcast %445 : vector<1x128xf32> to vector<2x128xf32>
    %447 = arith.addf %444, %446 : vector<2x128xf32>
    %c0_451 = arith.constant 0 : index
    %c0_452 = arith.constant 0 : index
    %448 = vector.load %arg12[%c0_451, %c0_452] : memref<2x128xf32, #tpu.memory_space<vmem>>, vector<2x128xf32>
    tpu.vector_store %arg12[%c0_451, %c0_452], %447 {strides = array<i32>} : memref<2x128xf32, #tpu.memory_space<vmem>>, vector<2x128xf32>,
    return
  }
  func.func @transform_0(%arg0: i32) -> (i32, i32, i32, i32) {
    %c0_i32 = arith.constant 0 : i32
    %c0_i32_0 = arith.constant 0 : i32
    %c0_i32_1 = arith.constant 0 : i32
    %c0_i32_2 = arith.constant 0 : i32
    %c0_i32_3 = arith.constant 0 : i32
    return %c0_i32, %c0_i32_0, %c0_i32_1, %c0_i32_2 : i32, i32, i32, i32
  }
  func.func @transform_1(%arg0: i32) -> (i32, i32, i32) {
    %c0_i32 = arith.constant 0 : i32
    %c0_i32_0 = arith.constant 0 : i32
    %c0_i32_1 = arith.constant 0 : i32
    %c0_i32_2 = arith.constant 0 : i32
    return %c0_i32, %c0_i32_0, %c0_i32_1 : i32, i32, i32
  }
  func.func @transform_2(%arg0: i32) -> (i32, i32, i32) {
    %c0_i32 = arith.constant 0 : i32
    %c0_i32_0 = arith.constant 0 : i32
    %c0_i32_1 = arith.constant 0 : i32
    %c0_i32_2 = arith.constant 0 : i32
    return %c0_i32, %c0_i32_0, %c0_i32_1 : i32, i32, i32
  }
  func.func @transform_3(%arg0: i32) -> (i32, i32, i32) {
    %c0_i32 = arith.constant 0 : i32
    %c0_i32_0 = arith.constant 0 : i32
    %c0_i32_1 = arith.constant 0 : i32
    %c0_i32_2 = arith.constant 0 : i32
    return %c0_i32, %c0_i32_0, %c0_i32_1 : i32, i32, i32
  }
  func.func @transform_4(%arg0: i32) -> (i32, i32, i32) {
    %c0_i32 = arith.constant 0 : i32
    %c0_i32_0 = arith.constant 0 : i32
    %c0_i32_1 = arith.constant 0 : i32
    %c0_i32_2 = arith.constant 0 : i32
    return %c0_i32, %c0_i32_0, %c0_i32_1 : i32, i32, i32
  }
  func.func @transform_5(%arg0: i32) -> (i32, i32, i32) {
    %c0_i32 = arith.constant 0 : i32
    %c0_i32_0 = arith.constant 0 : i32
    %c0_i32_1 = arith.constant 0 : i32
    %c0_i32_2 = arith.constant 0 : i32
    return %c0_i32, %c0_i32_0, %c0_i32_1 : i32, i32, i32
  }
  func.func @transform_6(%arg0: i32) -> (i32, i32, i32) {
    %c0_i32 = arith.constant 0 : i32
    %c0_i32_0 = arith.constant 0 : i32
    %c0_i32_1 = arith.constant 0 : i32
    %c0_i32_2 = arith.constant 0 : i32
    return %c0_i32, %c0_i32_0, %c0_i32_1 : i32, i32, i32
  }
  func.func @transform_7(%arg0: i32) -> (i32, i32) {
    %c0_i32 = arith.constant 0 : i32
    %c0_i32_0 = arith.constant 0 : i32
    %c0_i32_1 = arith.constant 0 : i32
    return %c0_i32, %c0_i32_0 : i32, i32
  }
  func.func @transform_8(%arg0: i32) -> (i32, i32) {
    %c0_i32 = arith.constant 0 : i32
    %c0_i32_0 = arith.constant 0 : i32
    %c0_i32_1 = arith.constant 0 : i32
    return %c0_i32, %c0_i32_0 : i32, i32
  }
  func.func @transform_9(%arg0: i32) -> (i32, i32) {
    %c0_i32 = arith.constant 0 : i32
    %c0_i32_0 = arith.constant 0 : i32
    %c0_i32_1 = arith.constant 0 : i32
    return %c0_i32, %c0_i32_0 : i32, i32
  }
  func.func @transform_10(%arg0: i32) -> (i32, i32) {
    %c0_i32 = arith.constant 0 : i32
    %c0_i32_0 = arith.constant 0 : i32
    %c0_i32_1 = arith.constant 0 : i32
    return %c0_i32, %c0_i32_0 : i32, i32
  }
  func.func @transform_11(%arg0: i32) -> (i32, i32) {
    %c0_i32 = arith.constant 0 : i32
    %c0_i32_0 = arith.constant 0 : i32
    %c0_i32_1 = arith.constant 0 : i32
    return %c0_i32, %c0_i32_0 : i32, i32
  }
}

</mosaic_0001>

<bundles_post_ra>
// kernel: mlnet_a_forward.1
= control target key start
LH: loop header
LB: loop body
LE: loop exit
PB: predicated region body
PF: predicated region fallthrough
CT: control target
= control target key end

     0   :  { %16 = vsyncpa [#allocation4], 0  ;;  %s17657_s0 = inlined_call_operand.vmem [shape: f32[2,8,8,128], index: 0, kind: input, shape index: {}]   ;;  %s17658_s1 = inlined_call_operand.hbm [shape: bf16[9,128,128], index: 1, kind: input, shape index: {}]   ;;  %s17659_s2 = inlined_call_operand.hbm [shape: f32[4,1,128], index: 2, kind: input, shape index: {}]   ;;  %s17660_s3 = inlined_call_operand.hbm [shape: f32[4,1,128], index: 3, kind: input, shape index: {}]   ;;  %s17661_s4 = inlined_call_operand.hbm [shape: bf16[4,128,128], index: 4, kind: input, shape index: {}]   ;;  %s17662_s5 = inlined_call_operand.hbm [shape: f32[4,1,128], index: 5, kind: input, shape index: {}]   ;;  %s17663_s6 = inlined_call_operand.hbm [shape: bf16[36,128,128], index: 6, kind: input, shape index: {}]   ;;  %s17664_s7 = inlined_call_operand.hbm [shape: f32[1,128], index: 7, kind: input, shape index: {}]   ;;  %s17665_s8 = inlined_call_operand.hbm [shape: f32[1,128], index: 8, kind: input, shape index: {}]   ;;  %s17666_s9 = inlined_call_operand.hbm [shape: bf16[128,128], index: 9, kind: input, shape index: {}]   ;;  %s17667_s10 = inlined_call_operand.hbm [shape: f32[1,128], index: 10, kind: input, shape index: {}]   ;;  %s17668_s11 = inlined_call_operand.hbm [shape: f32[2,128], index: 11, kind: output, shape index: {}]  }
   0x1   :  { %17 = vsyncpa [#allocation7], 0 }
   0x2   :  { %18 = vsyncpa [#allocation10], 0 }
   0x3   :  { %19 = vsyncpa [#allocation13], 0 }
   0x4   :  { %20 = vsyncpa [#allocation16], 0 }
   0x5   :  { %21 = vsyncpa [#allocation19], 0 }
   0x6   :  { %22 = vsyncpa [#allocation5], 0  ;;  %s14206_s17 = smov [#allocation6]  }
   0x7   :  { %s42_s18 = sshll.u32 %s14206_s17, 4  ;;  %s43_s18 = int_to_ptr.vmem [resolvable:$true] %s42_s18 }
   0x8   :  { %s13980_s19 = scalar_lea.vmem %s43_s18, 64  ;;  %p13985_p1 = scmp.lt.s32.totalorder %s43_s18, %s43_s18 }
   0x9   :  { %p13981_p0 = scmp.ne.s32.totalorder %s43_s18, %s13980_s19  ;;  %p13986_p2 = scmp.lt.s32.totalorder %s13980_s19, %s13980_s19 }
   0xb   :  { %p13987_p3 = por %p13986_p2, %p13985_p1 }
   0xd   :  { %p13988_p4 = pnand %p13987_p3, %p13981_p0 }
   0xf   :  { %13991 = shalt.err (!%p13988_p4)
}
  0x10   :  { %s14207_s20 = smov 16   ;;  %s14208_s21 = smov 1  }
  0x11   :  { %48 = dma.hbm_to_vmem [thread:$0]  %s17659_s2, 64, %s43_s18, [#allocation7], %s14207_s20, %s14207_s20, %s14208_s21  }
  0x12   :  { %s14209_s24 = smov [#allocation9]   ;;  %s14210_s26 = smov [#allocation12]  }
  0x13   :  { %s66_s25 = sshll.u32 %s14209_s24, 4  ;;  %s90_s27 = sshll.u32 %s14210_s26, 4  ;;  %s67_s25 = int_to_ptr.vmem [resolvable:$true] %s66_s25  ;;  %s91_s27 = int_to_ptr.vmem [resolvable:$true] %s90_s27 }
  0x14   :  { %s14000_s28 = scalar_lea.vmem %s67_s25, 4096  ;;  %p14005_p6 = scmp.lt.s32.totalorder %s67_s25, %s67_s25 }
  0x15   :  { %p14001_p5 = scmp.ne.s32.totalorder %s67_s25, %s14000_s28  ;;  %p14006_p7 = scmp.lt.s32.totalorder %s14000_s28, %s14000_s28 }
  0x17   :  { %p14007_p8 = por %p14006_p7, %p14005_p6 }
  0x19   :  { %p14008_p9 = pnand %p14007_p8, %p14001_p5 }
  0x1b   :  { %14011 = shalt.err (!%p14008_p9)
}
  0x1c   :  { %s14211_s29 = smov 64   ;;  %s14212_s30 = smov 4  }
  0x1d   :  { %72 = dma.hbm_to_vmem [thread:$0]  %s17661_s4, 4096, %s67_s25, [#allocation10], %s14211_s29, %s14211_s29, %s14212_s30  }
  0x1e   :  { %s14020_s2 = scalar_lea.vmem %s91_s27, 36864  ;;  %p14025_p11 = scmp.lt.s32.totalorder %s91_s27, %s91_s27 }
  0x1f   :  { %p14021_p10 = scmp.ne.s32.totalorder %s91_s27, %s14020_s2  ;;  %p14026_p12 = scmp.lt.s32.totalorder %s14020_s2, %s14020_s2 }
  0x21   :  { %p14027_p13 = por %p14026_p12, %p14025_p11 }
  0x23   :  { %p14028_p0 = pnand %p14027_p13, %p14021_p10 }
  0x25   :  { %14031 = shalt.err (!%p14028_p0)
}
  0x26   :  { %96 = dma.hbm_to_vmem [thread:$0]  %s17663_s6, 36864, %s91_s27, [#allocation13], %s14211_s29, %s14211_s29, %s14212_s30  }
  0x27   :  { %s14213_s16 = smov [#allocation15]   ;;  %s14214_s18 = smov [#allocation3]  }
  0x28   :  { %s113_s17 = sshll.u32 %s14213_s16, 4  ;;  %s30_s4 = sshll.u32 %s14214_s18, 4  ;;  %s114_s17 = int_to_ptr.vmem [resolvable:$true] %s113_s17  ;;  %s31_s4 = int_to_ptr.vmem [resolvable:$true] %s30_s4 }
  0x29   :  { %s14040_s19 = scalar_lea.vmem %s114_s17, 16  ;;  %s14044_s22 = scalar_lea.vmem %s114_s17, 32 }
  0x2a   :  { %p14041_p1 = scmp.ne.s32.totalorder %s114_s17, %s14040_s19  ;;  %p14045_p2 = scmp.lt.s32.totalorder %s114_s17, %s114_s17 }
  0x2b   :  { %p14046_p3 = scmp.lt.s32.totalorder %s14044_s22, %s14040_s19 }
  0x2d   :  { %p14047_p4 = por %p14046_p3, %p14045_p2 }
  0x2f   :  { %p14048_p5 = pnand %p14047_p4, %p14041_p1 }
  0x31   :  { %14051 = shalt.err (!%p14048_p5)
}
  0x32   :  { %116 = dma.hbm_to_vmem [thread:$0]  %s17665_s8, 16, %s114_s17, [#allocation16]  }
  0x33   :  { %s14060_s25 = scalar_lea.vmem %s31_s4, 9216  ;;  %p14065_p7 = scmp.lt.s32.totalorder %s31_s4, %s31_s4 }
  0x34   :  { %p14061_p6 = scmp.ne.s32.totalorder %s31_s4, %s14060_s25  ;;  %p14066_p8 = scmp.lt.s32.totalorder %s14060_s25, %s14060_s25 }
  0x36   :  { %p14067_p9 = por %p14066_p8, %p14065_p7 }
  0x38   :  { %p14068_p10 = pnand %p14067_p9, %p14061_p6 }
  0x3a   :  { %14071 = shalt.err (!%p14068_p10)
}
  0x3b   :  { %36 = dma.hbm_to_vmem [thread:$0]  %s17658_s1, 9216, %s31_s4, [#allocation4], %s14211_s29, %s14211_s29, %s14212_s30  }
  0x3c   :  { %s14215_s27 = smov [#allocation8]   ;;  %s14216_s12 = smov [#allocation11]  }
  0x3d   :  { %s54_s28 = sshll.u32 %s14215_s27, 4  ;;  %s78_s8 = sshll.u32 %s14216_s12, 4  ;;  %s55_s28 = int_to_ptr.vmem [resolvable:$true] %s54_s28  ;;  %s79_s8 = int_to_ptr.vmem [resolvable:$true] %s78_s8 }
  0x3e   :  { %s14080_s13 = scalar_lea.vmem %s55_s28, 64  ;;  %p14085_p12 = scmp.lt.s32.totalorder %s55_s28, %s55_s28 }
  0x3f   :  { %p14081_p11 = scmp.ne.s32.totalorder %s55_s28, %s14080_s13  ;;  %p14086_p13 = scmp.lt.s32.totalorder %s14080_s13, %s14080_s13 }
  0x41   :  { %p14087_p0 = por %p14086_p13, %p14085_p12 }
  0x43   :  { %p14088_p1 = pnand %p14087_p0, %p14081_p11 }
  0x45   :  { %14091 = shalt.err (!%p14088_p1)
}
  0x46   :  { %60 = dma.hbm_to_vmem [thread:$0]  %s17660_s3, 64, %s55_s28, [#allocation7], %s14207_s20, %s14207_s20, %s14208_s21  }
  0x47   :  { %s14100_s1 = scalar_lea.vmem %s79_s8, 64  ;;  %p14105_p3 = scmp.lt.s32.totalorder %s79_s8, %s79_s8 }
  0x48   :  { %p14101_p2 = scmp.ne.s32.totalorder %s79_s8, %s14100_s1  ;;  %p14106_p4 = scmp.lt.s32.totalorder %s14100_s1, %s14100_s1 }
  0x4a   :  { %p14107_p5 = por %p14106_p4, %p14105_p3 }
  0x4c   :  { %p14108_p6 = pnand %p14107_p5, %p14101_p2 }
  0x4e   :  { %14111 = shalt.err (!%p14108_p6)
}
  0x4f   :  { %84 = dma.hbm_to_vmem [thread:$0]  %s17662_s5, 64, %s79_s8, [#allocation10], %s14207_s20, %s14207_s20, %s14208_s21  }
  0x50   :  { %s14217_s17 = smov [#allocation14]   ;;  %s14218_s4 = smov [#allocation17]  }
  0x51   :  { %s103_s18 = sshll.u32 %s14217_s17, 4  ;;  %s122_s3 = sshll.u32 %s14218_s4, 4  ;;  %s104_s18 = int_to_ptr.vmem [resolvable:$true] %s103_s18  ;;  %s123_s3 = int_to_ptr.vmem [resolvable:$true] %s122_s3 }
  0x52   :  { %s14120_s19 = scalar_lea.vmem %s104_s18, 16  ;;  %s14124_s22 = scalar_lea.vmem %s104_s18, 32 }
  0x53   :  { %p14121_p7 = scmp.ne.s32.totalorder %s104_s18, %s14120_s19  ;;  %p14125_p8 = scmp.lt.s32.totalorder %s104_s18, %s104_s18 }
  0x54   :  { %p14126_p9 = scmp.lt.s32.totalorder %s14124_s22, %s14120_s19 }
  0x56   :  { %p14127_p10 = por %p14126_p9, %p14125_p8 }
  0x58   :  { %p14128_p11 = pnand %p14127_p10, %p14121_p7 }
  0x5a   :  { %14131 = shalt.err (!%p14128_p11)
}
  0x5b   :  { %106 = dma.hbm_to_vmem [thread:$0]  %s17664_s7, 16, %s104_s18, [#allocation13]  }
  0x5c   :  { %s14140_s25 = scalar_lea.vmem %s123_s3, 1024  ;;  %p14145_p13 = scmp.lt.s32.totalorder %s123_s3, %s123_s3 }
  0x5d   :  { %p14141_p12 = scmp.ne.s32.totalorder %s123_s3, %s14140_s25  ;;  %p14146_p0 = scmp.lt.s32.totalorder %s14140_s25, %s14140_s25 }
  0x5f   :  { %p14147_p1 = por %p14146_p0, %p14145_p13 }
  0x61   :  { %p14148_p2 = pnand %p14147_p1, %p14141_p12 }
  0x63   :  { %14151 = shalt.err (!%p14148_p2)
}
  0x64   :  { %128 = dma.hbm_to_vmem [thread:$0]  %s17666_s9, 1024, %s123_s3, [#allocation16], %s14211_s29, %s14211_s29, %s14212_s30  }
  0x65   :  { %s14219_s21 = smov [#allocation18]  }
  0x66   :  { %s135_s6 = sshll.u32 %s14219_s21, 4  ;;  %s136_s6 = int_to_ptr.vmem [resolvable:$true] %s135_s6 }
  0x67   :  { %s14160_s26 = scalar_lea.vmem %s136_s6, 16  ;;  %s14164_s7 = scalar_lea.vmem %s136_s6, 32 }
  0x68   :  { %p14161_p3 = scmp.ne.s32.totalorder %s136_s6, %s14160_s26  ;;  %p14165_p4 = scmp.lt.s32.totalorder %s136_s6, %s136_s6 }
  0x69   :  { %p14166_p5 = scmp.lt.s32.totalorder %s14164_s7, %s14160_s26 }
  0x6b   :  { %p14167_p6 = por %p14166_p5, %p14165_p4 }
  0x6d   :  { %p14168_p7 = pnand %p14167_p6, %p14161_p3 }
  0x6f   :  { %14171 = shalt.err (!%p14168_p7)
}
  0x70   :  { %138 = dma.hbm_to_vmem [thread:$0]  %s17667_s10, 16, %s136_s6, [#allocation19]  }
  0x71   :  { %14192 = dma.done.wait [#allocation4], 9216  }
  0x72   :  { %14193 = vsyncadd [#allocation4], 4294958080 }
  0x73   :  { %14194 = dma.done.wait [#allocation7], 128  }
  0x74   :  { %14195 = vsyncadd [#allocation7], 4294967168 }
  0x75   :  { %14196 = dma.done.wait [#allocation10], 4160  }
  0x76   :  { %14197 = vsyncadd [#allocation10], 4294963136 }
  0x77   :  { %14198 = dma.done.wait [#allocation13], 36880  }
  0x78   :  { %14199 = vsyncadd [#allocation13], 4294930416 }
  0x79   :  { %14200 = dma.done.wait [#allocation16], 1040  }
  0x7a   :  { %14201 = vsyncadd [#allocation16], 4294966256 }
  0x7b   :  { %14202 = dma.done.wait [#allocation19], 16  }
  0x7c   :  { %14203 = vsyncadd [#allocation19], 4294967280  ;;  %v17671_v0 = vmov 0.0   ;;  %v13565_v1 = vld [vmem:[#allocation3 + $0x78] sm:$0xff]   ;;  %v13567_v3 = vld [vmem:[#allocation3 + $0x70] sm:$0xff]   ;;  %vm14221_vm0 = vmmov 0  }
  0x7d   :  { %186 = vst [vmem:[#allocation2] sm:$0xff] %v17671_v0  ;;  %187 = vst [vmem:[#allocation2 + $0x8] sm:$0x3] %v17671_v0  ;;  %v13566_v2 = vld [vmem:[#allocation3 + $0x38] sm:$0xff]   ;;  %11960 = vmatprep.subr.bf16.mxu0 %v13565_v1  ;;  %v13568_v4 = vld [vmem:[#allocation3 + $0x30] sm:$0xff]   ;;  %vm10639_vm1 = vcmask 1041409  }
  0x7e   :  { %188 = vst [vmem:[#allocation2 + $0x10] sm:$0xff] %v17671_v0  ;;  %189 = vst [vmem:[#allocation2 + $0x18] sm:$0x3] %v17671_v0  ;;  %11992 = vmatprep.subr.bf16.mxu1 %v13566_v2  ;;  %11961 = vmatpush3.bf16.msra.mxu0 %v13565_v1  ;;  %v13569_v5 = vld [vmem:[#allocation3 + $0x68] sm:$0xff]   ;;  %v13571_v7 = vld [vmem:[#allocation3 + $0x60] sm:$0xff]  }
  0x7f   :  { %190 = vst [vmem:[#allocation2 + $0x20] sm:$0xff] %v17671_v0  ;;  %191 = vst [vmem:[#allocation2 + $0x28] sm:$0x3] %v17671_v0  ;;  %11993 = vmatpush3.bf16.msra.mxu1 %v13566_v2  ;;  %11962 = vmatprep.subr.bf16.mxu0 %v13567_v3  ;;  %v13570_v6 = vld [vmem:[#allocation3 + $0x28] sm:$0xff]   ;;  %v13572_v8 = vld [vmem:[#allocation3 + $0x20] sm:$0xff]  }
  0x80   :  { %192 = vst [vmem:[#allocation2 + $0x30] sm:$0xff] %v17671_v0  ;;  %193 = vst [vmem:[#allocation2 + $0x38] sm:$0x3] %v17671_v0  ;;  %11994 = vmatprep.subr.bf16.mxu1 %v13568_v4  ;;  %v13573_v9 = vld [vmem:[#allocation3 + $0x58] sm:$0xff]   ;;  %v13575_v11 = vld [vmem:[#allocation3 + $0x50] sm:$0xff]  }
  0x81   :  { %194 = vst [vmem:[#allocation2 + $0x40] sm:$0xff] %v17671_v0  ;;  %195 = vst [vmem:[#allocation2 + $0x48] sm:$0x3] %v17671_v0  ;;  %v13574_v10 = vld [vmem:[#allocation3 + $0x18] sm:$0xff]   ;;  %v13576_v12 = vld [vmem:[#allocation3 + $0x10] sm:$0xff]  }
  0x82   :  { %196 = vst [vmem:[#allocation2 + $0x50] sm:$0xff] %v17671_v0  ;;  %197 = vst [vmem:[#allocation2 + $0x58] sm:$0x3] %v17671_v0  ;;  %11963 = vmatpush3.bf16.msra.mxu0 %v13567_v3  ;;  %v14377_v13 = vld [vmem:[%s17657_s0] sm:$0xff]  ;;  %v14388_v17 = vld [vmem:[%s17657_s0 + $0x8] sm:$0xff] }
  0x83   :  { %198 = vst [vmem:[#allocation2 + $0x60] sm:$0xff] %v17671_v0  ;;  %199 = vst [vmem:[#allocation2 + $0x68] sm:$0x3] %v17671_v0  ;;  %11995 = vmatpush3.bf16.msra.mxu1 %v13568_v4  ;;  %11964 = vmatprep.subr.bf16.mxu0 %v13569_v5  ;;  %v14393_v18 = vld [vmem:[%s17657_s0 + $0x10] sm:$0xff]  ;;  %v13577_v20 = vld [vmem:[#allocation3 + $0x48] sm:$0xff]  }
  0x84   :  { %200 = vst [vmem:[#allocation2 + $0x70] sm:$0xff] %v17671_v0  ;;  %201 = vst [vmem:[#allocation2 + $0x78] sm:$0x3] %v17671_v0  ;;  %11996 = vmatprep.subr.bf16.mxu1 %v13570_v6  ;;  %v283_v14 = vld [vmem:[#allocation2 + $0x1] sm:$0xff]  ;;  %v14402_v22 = vld [vmem:[%s17657_s0 + $0x18] sm:$0xff]  ;;  %v14455_v41 = vpack.c.bf16 %v14393_v18, %v14388_v17 }
  0x85   :  { %202 = vst [vmem:[#allocation2 + $0x80] sm:$0xff] %v17671_v0  ;;  %203 = vst [vmem:[#allocation2 + $0x88] sm:$0x3] %v17671_v0  ;;  %v14379_v15 = vld [vmem:[#allocation2 + $0x2] sm:$0xff]  ;;  %v299_v16 = vpack.c.bf16 %v14377_v13, %v283_v14  ;;  %v14418_v26 = vld [vmem:[%s17657_s0 + $0x30] sm:$0xff] }
  0x86   :  { %204 = vst [vmem:[#allocation2 + $0x90] sm:$0xff] %v17671_v0  ;;  %205 = vst [vmem:[#allocation2 + $0x98] sm:$0x3] %v17671_v0  ;;  %11965 = vmatpush3.bf16.msra.mxu0 %v13569_v5  ;;  %v13578_v21 = vld [vmem:[#allocation3 + $0x8] sm:$0xff]   ;;  %v13579_v23 = vld [vmem:[#allocation3 + $0x40] sm:$0xff]  }
  0x87   :  { %206 = vst [vmem:[#allocation2 + $0xa0] sm:$0xff] %v17671_v0  ;;  %207 = vst [vmem:[#allocation2 + $0xa8] sm:$0x3] %v17671_v0  ;;  %11997 = vmatpush3.bf16.msra.mxu1 %v13570_v6  ;;  %11966 = vmatprep.subr.bf16.mxu0 %v13571_v7  ;;  %v14407_v24 = vld [vmem:[%s17657_s0 + $0x20] sm:$0xff]  ;;  %v14413_v25 = vld [vmem:[%s17657_s0 + $0x28] sm:$0xff] }
  0x88   :  { %208 = vst [vmem:[#allocation2 + $0xb0] sm:$0xff] %v17671_v0  ;;  %209 = vst [vmem:[#allocation2 + $0xb8] sm:$0x3] %v17671_v0  ;;  %11998 = vmatprep.subr.bf16.mxu1 %v13572_v8  ;;  %11976 = vmatprep.mubr.bf16.mxu0 %v299_v16  ;;  %v13580_v28 = vld [vmem:[#allocation3] sm:$0xff]   ;;  %v13581_v36 = vld [vmem:[#allocation3 + $0xb8] sm:$0xff]   ;;  %v14497_v55 = vpack.c.bf16 %v14407_v24, %v14402_v22  ;;  %v14525_v62 = vpack.c.bf16 %v14418_v26, %v14413_v25 }
  0x89   :  { %210 = vst [vmem:[#allocation2 + $0xc0] sm:$0xff] %v17671_v0  ;;  %211 = vst [vmem:[#allocation2 + $0xc8] sm:$0x3] %v17671_v0  ;;  %v14446_v37 = vld [vmem:[%s17657_s0 + $0x40] sm:$0xff]  ;;  %v13582_v38 = vld [vmem:[#allocation3 + $0xf8] sm:$0xff]  }
  0x8a   :  { %212 = vst [vmem:[#allocation2 + $0xd0] sm:$0xff] %v17671_v0  ;;  %213 = vst [vmem:[#allocation2 + $0xd8] sm:$0x3] %v17671_v0  ;;  %11967 = vmatpush3.bf16.msra.mxu0 %v13571_v7  ;;  %v13583_v42 = vld [vmem:[#allocation3 + $0xb0] sm:$0xff]   ;;  %v14485_v52 = vld [vmem:[%s17657_s0 + $0x48] sm:$0xff] }
  0x8b   :  { %214 = vst [vmem:[#allocation2 + $0xe0] sm:$0xff] %v17671_v0  ;;  %215 = vst [vmem:[#allocation2 + $0xe8] sm:$0x3] %v17671_v0  ;;  %11999 = vmatpush3.bf16.msra.mxu1 %v13572_v8  ;;  %11968 = vmatprep.subr.bf16.mxu0 %v13573_v9  ;;  %v14490_v53 = vld [vmem:[%s17657_s0 + $0x50] sm:$0xff]  ;;  %v13585_v58 = vld [vmem:[#allocation3 + $0xa8] sm:$0xff]  }
  0x8c   :  { %216 = vst [vmem:[#allocation2 + $0xf0] sm:$0xff] %v17671_v0  ;;  %217 = vst [vmem:[#allocation2 + $0xf8] sm:$0x3] %v17671_v0  ;;  %12000 = vmatprep.subr.bf16.mxu1 %v13574_v10  ;;  %v13584_v54 = vld [vmem:[#allocation3 + $0xf0] sm:$0xff]   ;;  %v13586_v59 = vld [vmem:[#allocation3 + $0xe8] sm:$0xff]  }
  0x8d   :  { %218 = vst [vmem:[#allocation2 + $0x100] sm:$0xff] %v17671_v0  ;;  %219 = vst [vmem:[#allocation2 + $0x108] sm:$0x3] %v17671_v0  ;;  %v14515_v60 = vld [vmem:[%s17657_s0 + $0x58] sm:$0xff]  ;;  %v14520_v61 = vld [vmem:[%s17657_s0 + $0x60] sm:$0xff] }
  0x8e   :  { %220 = vst [vmem:[#allocation2 + $0x110] sm:$0xff] %v17671_v0  ;;  %221 = vst [vmem:[#allocation2 + $0x118] sm:$0x3] %v17671_v0  ;;  %11969 = vmatpush3.bf16.msra.mxu0 %v13573_v9  ;;  %v14463_v46 = vld [vmem:[#allocation2 + $0xa1] sm:$0xff]  ;;  %v14537_v2 = vld [vmem:[%s17657_s0 + $0x70] sm:$0xff] }
  0x8f   :  { %222 = vst [vmem:[#allocation2 + $0x120] sm:$0xff] %v17671_v0  ;;  %223 = vst [vmem:[#allocation2 + $0x128] sm:$0x3] %v17671_v0  ;;  %12001 = vmatpush3.bf16.msra.mxu1 %v13574_v10  ;;  %11970 = vmatprep.subr.bf16.mxu0 %v13575_v11  ;;  %v14480_v51 = vld [vmem:[#allocation2 + $0xa2] sm:$0xff]  ;;  %v13589_v16 = vld [vmem:[#allocation3 + $0x98] sm:$0xff]  }
  0x90   :  { %224 = vst [vmem:[#allocation2 + $0x130] sm:$0xff] %v17671_v0  ;;  %225 = vst [vmem:[#allocation2 + $0x138] sm:$0x3] %v17671_v0  ;;  %12002 = vmatprep.subr.bf16.mxu1 %v13576_v12  ;;  %v13587_v63 = vld [vmem:[#allocation3 + $0xa0] sm:$0xff]   ;;  %v14532_v1 = vld [vmem:[%s17657_s0 + $0x68] sm:$0xff] }
  0x91   :  { %227 = vst [vmem:[#allocation2 + $0x11] sm:$0xff] %v14377_v13  ;;  %2283 = vst [vmem:[#allocation2] sm:$0xff] %v17671_v0  ;;  %v13588_v10 = vld [vmem:[#allocation3 + $0xe0] sm:$0xff]   ;;  %v14618_v3 = vld [vmem:[%s17657_s0 + $0x38] sm:$0xff]  ;;  %v14625_v29 = vpack.c.bf16 %v14537_v2, %v14532_v1 }
  0x92   :  { %2284 = vst [vmem:[#allocation2 + $0x8] sm:$0x3] %v17671_v0  ;;  %228 = vst [vmem:[#allocation2 + $0x21] sm:$0xff] %v14388_v17  ;;  %11971 = vmatpush3.bf16.msra.mxu0 %v13575_v11  ;;  %v303_v11 = vpack.c.bf16 %v14446_v37, %v14463_v46  ;;  %v13594_v56 = vld [vmem:[#allocation3 + $0xc8] sm:$0xff]   ;;  %v13595_v27 = vld [vmem:[#allocation3 + $0x80] sm:$0xff]  }
  0x93   :  { %229 = vst [vmem:[#allocation2 + $0x31] sm:$0xff] %v14393_v18  ;;  %230 = vst [vmem:[#allocation2 + $0x41] sm:$0xff] %v14402_v22  ;;  %12003 = vmatpush3.bf16.msra.mxu1 %v13576_v12  ;;  %11972 = vmatprep.subr.bf16.mxu0 %v13577_v20  ;;  %v13596_v19 = vld [vmem:[#allocation3 + $0xc0] sm:$0xff]  }
  0x94   :  { %231 = vst [vmem:[#allocation2 + $0x51] sm:$0xff] %v14407_v24  ;;  %232 = vst [vmem:[#allocation2 + $0x61] sm:$0xff] %v14413_v25  ;;  %12004 = vmatprep.subr.bf16.mxu1 %v13578_v21 }
  0x95   :  { %233 = vst [vmem:[#allocation2 + $0x71] sm:$0xff] %v14418_v26  ;;  %235 = vst [vmem:[#allocation2 + $0xb1] sm:$0xff] %v14446_v37 }
  0x96   :  { %11973 = vmatpush3.bf16.msra.mxu0 %v13577_v20  ;;  %2303 = vst [vmem:[#allocation2 + $0xa0] sm:$0xff] %v17671_v0  ;;  %2304 = vst [vmem:[#allocation2 + $0xa8] sm:$0x3] %v17671_v0  ;;  %v13590_v20 = vld [vmem:[#allocation3 + $0xd8] sm:$0xff]  }
  0x97   :  { %12005 = vmatpush3.bf16.msra.mxu1 %v13578_v21  ;;  %11974 = vmatprep.subr.bf16.mxu0 %v13579_v23  ;;  %236 = vst [vmem:[#allocation2 + $0xc1] sm:$0xff] %v14485_v52  ;;  %237 = vst [vmem:[#allocation2 + $0xd1] sm:$0xff] %v14490_v53 }
  0x98   :  { %v14427_v30 = vld [vmem:[#allocation2 + $0x10] sm:$0xff]  ;;  %12006 = vmatprep.subr.bf16.mxu1 %v13580_v28  ;;  %238 = vst [vmem:[#allocation2 + $0xe1] sm:$0xff] %v14515_v60  ;;  %239 = vst [vmem:[#allocation2 + $0xf1] sm:$0xff] %v14520_v61 }
  0x99   :  { %v259_v31 = vpack.c.bf16 %v14427_v30, %v17671_v0  ;;  %v14431_v32 = vld [vmem:[#allocation2 + $0x22] sm:$0xff]  ;;  %240 = vst [vmem:[#allocation2 + $0x101] sm:$0xff] %v14532_v1  ;;  %241 = vst [vmem:[#allocation2 + $0x111] sm:$0xff] %v14537_v2  ;;  %v14569_v21 = vld [vmem:[#allocation2 + $0x12] sm:$0xff] }
  0x9a   :  { %v14433_v33 = vld [vmem:[#allocation2 + $0x32] sm:$0xff]  ;;  %v14435_v34 = vld [vmem:[#allocation2 + $0x20] sm:$0xff]  ;;  %2288 = vst [vmem:[#allocation2 + $0x28] sm:$0x3] %v17671_v0  ;;  %11975 = vmatpush3.bf16.msra.mxu0 %v13579_v23  ;;  %2285 = vst [vmem:[#allocation2 + $0x10] sm:$0xff] %v17671_v0 }
  0x9b   :  { %v14437_v35 = vld [vmem:[#allocation2 + $0x30] sm:$0xff]  ;;  %2287 = vst [vmem:[#allocation2 + $0x20] sm:$0xff] %v17671_v0  ;;  %2290 = vst [vmem:[#allocation2 + $0x38] sm:$0x3] %v17671_v0  ;;  %12008 = vmatprep.mubr.bf16.mxu1 %v259_v31  ;;  %v14448_v39 = vld [vmem:[#allocation2 + $0x42] sm:$0xff]  ;;  %12007 = vmatpush3.bf16.msra.mxu1 %v13580_v28 }
  0x9c   :  { %2289 = vst [vmem:[#allocation2 + $0x30] sm:$0xff] %v17671_v0  ;;  %v14450_v40 = vld [vmem:[#allocation2 + $0x40] sm:$0xff]  ;;  %v14457_v43 = vld [vmem:[#allocation2 + $0x52] sm:$0xff]  ;;  %2292 = vst [vmem:[#allocation2 + $0x48] sm:$0x3] %v17671_v0  ;;  %v14469_v47 = vpack.c.bf16 %v14437_v35, %v14435_v34  ;;  %12024 = vmatprep.subr.bf16.mxu0 %v13581_v36  ;;  %12056 = vmatprep.subr.bf16.mxu1 %v13582_v38 }
  0x9d   :  { %v14459_v44 = vld [vmem:[#allocation2 + $0x50] sm:$0xff]  ;;  %v14461_v45 = vld [vmem:[#allocation2 + $0x62] sm:$0xff]  ;;  %2291 = vst [vmem:[#allocation2 + $0x40] sm:$0xff] %v17671_v0  ;;  %2294 = vst [vmem:[#allocation2 + $0x58] sm:$0x3] %v17671_v0  ;;  %11977 = vmatmul.mubr.bf16.vlgmr.msra.gmra.mxu0 %v14455_v41 }
  0x9e   :  { %v14471_v48 = vld [vmem:[#allocation2 + $0x72] sm:$0xff]  ;;  %v14473_v49 = vld [vmem:[#allocation2 + $0x60] sm:$0xff]  ;;  %2293 = vst [vmem:[#allocation2 + $0x50] sm:$0xff] %v17671_v0  ;;  %2296 = vst [vmem:[#allocation2 + $0x68] sm:$0x3] %v17671_v0  ;;  %v14508_v57 = vpack.c.bf16 %v14459_v44, %v14450_v40  ;;  %12009 = vmatmul.mubr.bf16.vlgmr.msra.gmra.mxu1 %v14469_v47  ;;  %12025 = vmatpush3.bf16.msra.mxu0 %v13581_v36  ;;  %v14581_v36 = vpack.c.bf16 %v14490_v53, %v14485_v52 }
  0x9f   :  { %v14475_v50 = vld [vmem:[#allocation2 + $0x70] sm:$0xff]  ;;  %2295 = vst [vmem:[#allocation2 + $0x60] sm:$0xff] %v17671_v0  ;;  %2298 = vst [vmem:[#allocation2 + $0x78] sm:$0x3] %v17671_v0  ;;  %12057 = vmatpush3.bf16.msra.mxu1 %v13582_v38  ;;  %12026 = vmatprep.subr.bf16.mxu0 %v13583_v42  ;;  %v14551_v7 = vld [vmem:[#allocation2 + $0xc2] sm:$0xff] }
  0xa0   :  { %2297 = vst [vmem:[#allocation2 + $0x70] sm:$0xff] %v17671_v0  ;;  %12058 = vmatprep.subr.bf16.mxu1 %v13584_v54  ;;  %11980 = vmatprep.mubr.bf16.mxu0 %v14497_v55  ;;  %v14543_v4 = vpack.c.bf16 %v14475_v50, %v14473_v49  ;;  %v14545_v5 = vld [vmem:[#allocation2 + $0xb0] sm:$0xff]  ;;  %v14555_v9 = vld [vmem:[#allocation2 + $0xc0] sm:$0xff]  ;;  %2308 = vst [vmem:[#allocation2 + $0xc8] sm:$0x3] %v17671_v0 }
  0xa1   :  { %12012 = vmatprep.mubr.bf16.mxu1 %v14508_v57  ;;  %v14553_v8 = vld [vmem:[#allocation2 + $0xd2] sm:$0xff]  ;;  %2307 = vst [vmem:[#allocation2 + $0xc0] sm:$0xff] %v17671_v0  ;;  %v263_v14 = vpack.c.bf16 %v14545_v5, %v17671_v0  ;;  %v14571_v23 = vld [vmem:[#allocation2 + $0xe2] sm:$0xff]  ;;  %2286 = vst [vmem:[#allocation2 + $0x18] sm:$0x3] %v17671_v0 }
  0xa2   :  { %12027 = vmatpush3.bf16.msra.mxu0 %v13583_v42  ;;  %v14559_v12 = vld [vmem:[#allocation2 + $0xd0] sm:$0xff]  ;;  %2310 = vst [vmem:[#allocation2 + $0xd8] sm:$0x3] %v17671_v0  ;;  %v14575_v31 = vld [vmem:[#allocation2 + $0xe0] sm:$0xff]  ;;  %2312 = vst [vmem:[#allocation2 + $0xe8] sm:$0x3] %v17671_v0 }
  0xa3   :  { %12059 = vmatpush3.bf16.msra.mxu1 %v13584_v54  ;;  %12028 = vmatprep.subr.bf16.mxu0 %v13585_v58  ;;  %2309 = vst [vmem:[#allocation2 + $0xd0] sm:$0xff] %v17671_v0  ;;  %v14573_v28 = vld [vmem:[#allocation2 + $0xf2] sm:$0xff]  ;;  %v14585_v42 = vld [vmem:[#allocation2 + $0x102] sm:$0xff]  ;;  %2311 = vst [vmem:[#allocation2 + $0xe0] sm:$0xff] %v17671_v0  ;;  %v14594_v54 = vpack.c.bf16 %v14559_v12, %v14555_v9 }
  0xa4   :  { %12060 = vmatprep.subr.bf16.mxu1 %v13586_v59  ;;  %v14583_v38 = vld [vmem:[#allocation2 + $0xf0] sm:$0xff]  ;;  %2314 = vst [vmem:[#allocation2 + $0xf8] sm:$0x3] %v17671_v0  ;;  %2316 = vst [vmem:[#allocation2 + $0x108] sm:$0x3] %v17671_v0 }
  0xa5   :  { %11981 = vmatmul.mubr.bf16.gmra.mxu0 %v14525_v62  ;;  %v14587_v46 = vld [vmem:[#allocation2 + $0x112] sm:$0xff]  ;;  %2313 = vst [vmem:[#allocation2 + $0xf0] sm:$0xff] %v17671_v0  ;;  %v14612_v6 = vpack.c.bf16 %v14583_v38, %v14575_v31  ;;  %234 = vst [vmem:[#allocation2 + $0x81] sm:$0xff] %v14618_v3 }
  0xa6   :  { %12013 = vmatmul.mubr.bf16.gmra.mxu1 %v14543_v4  ;;  %12029 = vmatpush3.bf16.msra.mxu0 %v13585_v58  ;;  %v14596_v58 = vld [vmem:[#allocation2 + $0x100] sm:$0xff]  ;;  %2318 = vst [vmem:[#allocation2 + $0x118] sm:$0x3] %v17671_v0 }
  0xa7   :  { %12061 = vmatpush3.bf16.msra.mxu1 %v13586_v59  ;;  %12030 = vmatprep.subr.bf16.mxu0 %v13587_v63  ;;  %v14598_v59 = vld [vmem:[#allocation2 + $0x110] sm:$0xff]  ;;  %2315 = vst [vmem:[#allocation2 + $0x100] sm:$0xff] %v17671_v0  ;;  %17757 = vst [vmem:[#allocation29_spill] sm:$0xff] %v14612_v6 }
  0xa8   :  { %12062 = vmatprep.subr.bf16.mxu1 %v13588_v10  ;;  %11984 = vmatprep.mubr.bf16.mxu0 %v303_v11  ;;  %v13591_v11 = vld [vmem:[#allocation3 + $0x90] sm:$0xff]   ;;  %2317 = vst [vmem:[#allocation2 + $0x110] sm:$0xff] %v17671_v0 }
  0xa9   :  { %12016 = vmatprep.mubr.bf16.mxu1 %v263_v14  ;;  %v14607_v14 = vpack.c.bf16 %v14520_v61, %v14515_v60 }
  0xaa   :  { %12031 = vmatpush3.bf16.msra.mxu0 %v13587_v63  ;;  %v13592_v63 = vld [vmem:[#allocation3 + $0xd0] sm:$0xff]  }
  0xab   :  { %12063 = vmatpush3.bf16.msra.mxu1 %v13588_v10  ;;  %12032 = vmatprep.subr.bf16.mxu0 %v13589_v16  ;;  %17756 = vst [vmem:[#allocation28_spill] sm:$0xff] %v14607_v14  ;;  %v13593_v10 = vld [vmem:[#allocation3 + $0x88] sm:$0xff]  }
  0xac   :  { %12064 = vmatprep.subr.bf16.mxu1 %v13590_v20 }
  0xad   :  { %11985 = vmatmul.mubr.bf16.gmra.mxu0 %v14581_v36 }
  0xae   :  { %12017 = vmatmul.mubr.bf16.gmra.mxu1 %v14594_v54  ;;  %12033 = vmatpush3.bf16.msra.mxu0 %v13589_v16  ;;  %v14629_v16 = vpack.c.bf16 %v14598_v59, %v14596_v58 }
  0xaf   :  { %12065 = vmatpush3.bf16.msra.mxu1 %v13590_v20  ;;  %12034 = vmatprep.subr.bf16.mxu0 %v13591_v11  ;;  %v14631_v20 = vld [vmem:[#allocation2 + $0xb2] sm:$0xff] }
  0xb0   :  { %12066 = vmatprep.subr.bf16.mxu1 %v13592_v63  ;;  %11988 = vmatprep.mubr.bf16.mxu0 %v14607_v14  ;;  %2305 = vst [vmem:[#allocation2 + $0xb0] sm:$0xff] %v17671_v0  ;;  %2306 = vst [vmem:[#allocation2 + $0xb8] sm:$0x3] %v17671_v0  ;;  %v630_v14 = vpack.c.bf16 %v14569_v21, %v14379_v15  ;;  %v14644_v0 = vld [vmem:[%s17657_s0 + $0x78] sm:$0xff]  ;;  %v14648_v15 = vpack.c.bf16 %v14433_v33, %v14431_v32  ;;  %s14222_s0 = smov [#allocation20]  }
  0xb1   :  { %12020 = vmatprep.mubr.bf16.mxu1 %v14612_v6  ;;  %v13598_v6 = vld [vmem:[#allocation3 + $0x178] sm:$0xff]   ;;  %242 = vst [vmem:[#allocation2 + $0x121] sm:$0xff] %v14644_v0  ;;  %s10738_s30 = sshll.u32 %s14222_s0, 4  ;;  %s10739_s30 = int_to_ptr.vmem [resolvable:$true] %s10738_s30 }
  0xb2   :  { %12035 = vmatpush3.bf16.msra.mxu0 %v13591_v11  ;;  %v832_v11 = vpack.c.bf16 %v14435_v34, %v14427_v30  ;;  %17758 = vst [vmem:[#allocation30_spill] sm:$0xff] %v14648_v15  ;;  %v833_v30 = vpack.c.bf16 %v14450_v40, %v14437_v35  ;;  %v13599_v34 = vld [vmem:[#allocation3 + $0x130] sm:$0xff]   ;;  %v14660_v35 = vld [vmem:[#allocation2 + $0x80] sm:$0xff]  ;;  %s14172_s12 = scalar_lea.vmem %s10739_s30, 32  ;;  %p14177_p9 = scmp.lt.s32.totalorder %s10739_s30, %s10739_s30 }
  0xb3   :  { %12067 = vmatpush3.bf16.msra.mxu1 %v13592_v63  ;;  %12036 = vmatprep.subr.bf16.mxu0 %v13593_v10  ;;  %v13597_v63 = vld [vmem:[#allocation3 + $0x138] sm:$0xff]   ;;  %v14663_v40 = vld [vmem:[#allocation2 + $0x82] sm:$0xff]  ;;  %p14173_p8 = scmp.ne.s32.totalorder %s10739_s30, %s14172_s12  ;;  %p14178_p10 = scmp.lt.s32.totalorder %s14172_s12, %s14172_s12 }
  0xb4   :  { %12068 = vmatprep.subr.bf16.mxu1 %v13594_v56 }
  0xb5   :  { %11989 = vmatmul.mubr.bf16.gmra.mxu0 %v14625_v29  ;;  %p14179_p11 = por %p14178_p10, %p14177_p9 }
  0xb6   :  { %12021 = vmatmul.mubr.bf16.gmra.mxu1 %v14629_v16  ;;  %12037 = vmatpush3.bf16.msra.mxu0 %v13593_v10  ;;  %v834_v10 = vpack.c.bf16 %v14473_v49, %v14459_v44  ;;  %v835_v44 = vpack.c.bf16 %v14660_v35, %v14475_v50  ;;  %v13603_v49 = vld [vmem:[#allocation3 + $0x120] sm:$0xff]  }
  0xb7   :  { %12069 = vmatpush3.bf16.msra.mxu1 %v13594_v56  ;;  %12038 = vmatprep.subr.bf16.mxu0 %v13595_v27  ;;  %v13600_v56 = vld [vmem:[#allocation3 + $0x170] sm:$0xff]   ;;  %p14180_p12 = pnand %p14179_p11, %p14173_p8 }
  0xb8   :  { %12070 = vmatprep.subr.bf16.mxu1 %v13596_v19  ;;  %12040 = vmatprep.mubr.bf16.mxu0 %v630_v14  ;;  %v14655_v14 = vpack.c.bf16 %v14457_v43, %v14448_v39  ;;  %v14678_v50 = vld [vmem:[#allocation2 + $0x120] sm:$0xff] }
  0xb9   :  { %12072 = vmatprep.mubr.bf16.mxu1 %v832_v11  ;;  %v14667_v11 = vpack.c.bf16 %v14471_v48, %v14461_v45 }
  0xba   :  { %12039 = vmatpush3.bf16.msra.mxu0 %v13595_v27  ;;  %v13601_v27 = vld [vmem:[#allocation3 + $0x128] sm:$0xff]  }
  0xbb   :  { %12071 = vmatpush3.bf16.msra.mxu1 %v13596_v19  ;;  %12088 = vmatprep.subr.bf16.mxu0 %v13597_v63  ;;  %v13602_v19 = vld [vmem:[#allocation3 + $0x168] sm:$0xff]  }
  0xbc   :  { %12120 = vmatprep.subr.bf16.mxu1 %v13598_v6 }
  0xbd   :  { %12041 = vmatmul.mubr.bf16.vlgmr.msra.gmra.mxu0 %v14648_v15  ;;  %v17759_v15 = vmov 0.0  }
  0xbe   :  { %12089 = vmatpush3.bf16.msra.mxu0 %v13597_v63  ;;  %12073 = vmatmul.mubr.bf16.vlgmr.msra.gmra.mxu1 %v833_v30  ;;  %2299 = vst [vmem:[#allocation2 + $0x80] sm:$0xff] %v17759_v15  ;;  %2300 = vst [vmem:[#allocation2 + $0x88] sm:$0x3] %v17759_v15  ;;  %v634_v63 = vpack.c.bf16 %v14631_v20, %v14480_v51  ;;  %v836_v30 = vpack.c.bf16 %v14555_v9, %v14545_v5  ;;  %v14684_v51 = vld [vmem:[#allocation2 + $0x122] sm:$0xff]  ;;  %v13607_v9 = vld [vmem:[#allocation3 + $0x110] sm:$0xff]  }
  0xbf   :  { %12121 = vmatpush3.bf16.msra.mxu1 %v13598_v6  ;;  %12090 = vmatprep.subr.bf16.mxu0 %v13599_v34  ;;  %v13604_v6 = vld [vmem:[#allocation3 + $0x160] sm:$0xff]   ;;  %v837_v5 = vpack.c.bf16 %v14575_v31, %v14559_v12  ;;  %2319 = vst [vmem:[#allocation2 + $0x120] sm:$0xff] %v17759_v15  ;;  %2320 = vst [vmem:[#allocation2 + $0x128] sm:$0x3] %v17759_v15  ;;  %v14697_v12 = vld [vmem:[#allocation2 + $0x91] sm:$0xff] }
  0xc0   :  { %12122 = vmatprep.subr.bf16.mxu1 %v13600_v56  ;;  %12044 = vmatprep.mubr.bf16.mxu0 %v14655_v14  ;;  %v14699_v31 = vld [vmem:[#allocation2 + $0x92] sm:$0xff] }
  0xc1   :  { %12076 = vmatprep.mubr.bf16.mxu1 %v834_v10  ;;  %v13605_v10 = vld [vmem:[#allocation3 + $0x118] sm:$0xff]   ;;  %2301 = vst [vmem:[#allocation2 + $0x90] sm:$0xff] %v17759_v15  ;;  %2302 = vst [vmem:[#allocation2 + $0x98] sm:$0x3] %v17759_v15 }
  0xc2   :  { %12091 = vmatpush3.bf16.msra.mxu0 %v13599_v34  ;;  %v13606_v34 = vld [vmem:[#allocation3 + $0x158] sm:$0xff]  }
  0xc3   :  { %12123 = vmatpush3.bf16.msra.mxu1 %v13600_v56  ;;  %12092 = vmatprep.subr.bf16.mxu0 %v13601_v27  ;;  %v14682_v56 = vpack.c.bf16 %v14553_v8, %v14551_v7 }
  0xc4   :  { %12124 = vmatprep.subr.bf16.mxu1 %v13602_v19 }
  0xc5   :  { %12045 = vmatmul.mubr.bf16.gmra.mxu0 %v14667_v11 }
  0xc6   :  { %12093 = vmatpush3.bf16.msra.mxu0 %v13601_v27  ;;  %12077 = vmatmul.mubr.bf16.gmra.mxu1 %v835_v44  ;;  %v13608_v27 = vld [vmem:[#allocation3 + $0x150] sm:$0xff]   ;;  %v838_v44 = vpack.c.bf16 %v14596_v58, %v14583_v38  ;;  %v14706_v38 = vpack.c.bf16 %v14587_v46, %v14585_v42  ;;  %v839_v58 = vpack.c.bf16 %v14678_v50, %v14598_v59  ;;  %v13614_v59 = vld [vmem:[#allocation3 + $0x1f8] sm:$0xff]  }
  0xc7   :  { %12125 = vmatpush3.bf16.msra.mxu1 %v13602_v19  ;;  %12094 = vmatprep.subr.bf16.mxu0 %v13603_v49  ;;  %v14692_v19 = vpack.c.bf16 %v14573_v28, %v14571_v23 }
  0xc8   :  { %12126 = vmatprep.subr.bf16.mxu1 %v13604_v6  ;;  %12048 = vmatprep.mubr.bf16.mxu0 %v634_v63  ;;  %v13611_v63 = vld [vmem:[#allocation3 + $0x100] sm:$0xff]  }
  0xc9   :  { %12080 = vmatprep.mubr.bf16.mxu1 %v836_v30  ;;  %v14710_v30 = vld [vmem:[#allocation2 + $0x131] sm:$0xff] }
  0xca   :  { %12095 = vmatpush3.bf16.msra.mxu0 %v13603_v49  ;;  %v13609_v49 = vld [vmem:[#allocation3 + $0x108] sm:$0xff]  }
  0xcb   :  { %12127 = vmatpush3.bf16.msra.mxu1 %v13604_v6  ;;  %12096 = vmatprep.subr.bf16.mxu0 %v13605_v10  ;;  %v13610_v6 = vld [vmem:[#allocation3 + $0x148] sm:$0xff]  }
  0xcc   :  { %12128 = vmatprep.subr.bf16.mxu1 %v13606_v34 }
  0xcd   :  { %12049 = vmatmul.mubr.bf16.gmra.mxu0 %v14682_v56 }
  0xce   :  { %12097 = vmatpush3.bf16.msra.mxu0 %v13605_v10  ;;  %12081 = vmatmul.mubr.bf16.gmra.mxu1 %v837_v5  ;;  %v14712_v10 = vld [vmem:[#allocation2 + $0x132] sm:$0xff] }
  0xcf   :  { %12129 = vmatpush3.bf16.msra.mxu1 %v13606_v34  ;;  %12098 = vmatprep.subr.bf16.mxu0 %v13607_v9  ;;  %17760 = vst [vmem:[#allocation31_spill] sm:$0xff] %v14712_v10  ;;  %v13612_v34 = vld [vmem:[#allocation3 + $0x140] sm:$0xff]   ;;  %2321 = vst [vmem:[#allocation2 + $0x130] sm:$0xff] %v17759_v15  ;;  %v13613_v5 = vld [vmem:[#allocation3 + $0x1b8] sm:$0xff]  }
  0xd0   :  { %12130 = vmatprep.subr.bf16.mxu1 %v13608_v27  ;;  %12052 = vmatprep.mubr.bf16.mxu0 %v14692_v19  ;;  %2322 = vst [vmem:[#allocation2 + $0x138] sm:$0x3] %v17759_v15  ;;  %v1237_v15 = vpack.c.bf16 %v14448_v39, %v14433_v33  ;;  %v13616_v10 = vld [vmem:[#allocation3 + $0x1f0] sm:$0xff]   ;;  %v1037_v33 = vpack.c.bf16 %v14618_v3, %v14418_v26  ;;  %v13620_v39 = vld [vmem:[#allocation3 + $0x1e0] sm:$0xff]  }
  0xd1   :  { %12084 = vmatprep.mubr.bf16.mxu1 %v838_v44  ;;  %v13615_v44 = vld [vmem:[#allocation3 + $0x1b0] sm:$0xff]  }
  0xd2   :  { %12099 = vmatpush3.bf16.msra.mxu0 %v13607_v9  ;;  %v1236_v9 = vpack.c.bf16 %v14431_v32, %v14569_v21  ;;  %v17762_v32 = vpack.c.bf16 %v14402_v22, %v14393_v18  ;;  %v13617_v21 = vld [vmem:[#allocation3 + $0x1a8] sm:$0xff]   ;;  %v13619_v18 = vld [vmem:[#allocation3 + $0x1a0] sm:$0xff]   ;;  %v1239_v22 = vpack.c.bf16 %v14663_v40, %v14471_v48  ;;  %v13623_v26 = vld [vmem:[#allocation3 + $0x190] sm:$0xff]   ;;  %v1241_v48 = vpack.c.bf16 %v14571_v23, %v14553_v8 }
  0xd3   :  { %12131 = vmatpush3.bf16.msra.mxu1 %v13608_v27  ;;  %12100 = vmatprep.subr.bf16.mxu0 %v13609_v49  ;;  %v17761_v27 = vpack.c.bf16 %v14388_v17, %v14377_v13  ;;  %v13618_v13 = vld [vmem:[#allocation3 + $0x1e8] sm:$0xff]   ;;  %v17763_v17 = vpack.c.bf16 %v14413_v25, %v14407_v24  ;;  %v13622_v24 = vld [vmem:[#allocation3 + $0x1d8] sm:$0xff]   ;;  %v17764_v25 = vpack.c.bf16 %v14485_v52, %v14446_v37  ;;  %v13628_v23 = vld [vmem:[#allocation3 + $0x1c0] sm:$0xff]  }
  0xd4   :  { %12132 = vmatprep.subr.bf16.mxu1 %v13610_v6  ;;  %v13626_v37 = vld [vmem:[#allocation3 + $0x1c8] sm:$0xff]   ;;  %v17766_v52 = vpack.c.bf16 %v14532_v1, %v14520_v61  ;;  %v1041_v8 = vpack.c.bf16 %v14644_v0, %v14537_v2  ;;  %v13630_v61 = vld [vmem:[#allocation3 + $0x230] sm:$0xff]   ;;  %v13965_v2 = vld [vmem:[#allocation2] sm:$0xff] }
  0xd5   :  { %12053 = vmatmul.mubr.bf16.gmra.mxu0 %v14706_v38  ;;  %v13631_v1 = vld [vmem:[#allocation3 + $0x228] sm:$0xff]  }
  0xd6   :  { %12101 = vmatpush3.bf16.msra.mxu0 %v13609_v49  ;;  %12085 = vmatmul.mubr.bf16.gmra.mxu1 %v839_v58  ;;  %v1238_v49 = vpack.c.bf16 %v14461_v45, %v14457_v43  ;;  %v13621_v43 = vld [vmem:[#allocation3 + $0x198] sm:$0xff]   ;;  %v1240_v45 = vpack.c.bf16 %v14551_v7, %v14631_v20  ;;  %v17765_v7 = vpack.c.bf16 %v14515_v60, %v14490_v53  ;;  %v13625_v20 = vld [vmem:[#allocation3 + $0x188] sm:$0xff]   ;;  %v13627_v53 = vld [vmem:[#allocation3 + $0x180] sm:$0xff]  }
  0xd7   :  { %12133 = vmatpush3.bf16.msra.mxu1 %v13610_v6  ;;  %12102 = vmatprep.subr.bf16.mxu0 %v13611_v63  ;;  %v13624_v6 = vld [vmem:[#allocation3 + $0x1d0] sm:$0xff]   ;;  %v1242_v58 = vpack.c.bf16 %v14585_v42, %v14573_v28  ;;  %v1243_v60 = vpack.c.bf16 %v14684_v51, %v14587_v46  ;;  %v13629_v28 = vld [vmem:[#allocation3 + $0x238] sm:$0xff]   ;;  %v13632_v42 = vld [vmem:[#allocation3 + $0x220] sm:$0xff]  }
  0xd8   :  { %12134 = vmatprep.subr.bf16.mxu1 %v13612_v34  ;;  %12104 = vmatprep.mubr.bf16.mxu0 %v17761_v27  ;;  %v17768_v46 = vld [vmem:[#allocation28_spill] sm:$0xff] }
  0xd9   :  { %12136 = vmatprep.mubr.bf16.mxu1 %v1236_v9 }
  0xda   :  { %12103 = vmatpush3.bf16.msra.mxu0 %v13611_v63 }
  0xdb   :  { %12135 = vmatpush3.bf16.msra.mxu1 %v13612_v34  ;;  %12152 = vmatprep.subr.bf16.mxu0 %v13613_v5  ;;  %v13642_v34 = vld [vmem:[#allocation9 + $0x10] sm:$0xff]  }
  0xdc   :  { %12184 = vmatprep.subr.bf16.mxu1 %v13614_v59 }
  0xdd   :  { %12105 = vmatmul.mubr.bf16.vlgmr.msra.gmra.mxu0 %v17762_v32 }
  0xde   :  { %12153 = vmatpush3.bf16.msra.mxu0 %v13613_v5  ;;  %12137 = vmatmul.mubr.bf16.vlgmr.msra.gmra.mxu1 %v1237_v15  ;;  %v13643_v15 = vld [vmem:[#allocation9 + $0x8] sm:$0xff]  }
  0xdf   :  { %12185 = vmatpush3.bf16.msra.mxu1 %v13614_v59  ;;  %12154 = vmatprep.subr.bf16.mxu0 %v13615_v44 }
  0xe0   :  { %12186 = vmatprep.subr.bf16.mxu1 %v13616_v10  ;;  %12108 = vmatprep.mubr.bf16.mxu0 %v17763_v17 }
  0xe1   :  { %12140 = vmatprep.mubr.bf16.mxu1 %v1238_v49 }
  0xe2   :  { %12155 = vmatpush3.bf16.msra.mxu0 %v13615_v44 }
  0xe3   :  { %12187 = vmatpush3.bf16.msra.mxu1 %v13616_v10  ;;  %12156 = vmatprep.subr.bf16.mxu0 %v13617_v21 }
  0xe4   :  { %12188 = vmatprep.subr.bf16.mxu1 %v13618_v13 }
  0xe5   :  { %12109 = vmatmul.mubr.bf16.gmra.mxu0 %v1037_v33 }
  0xe6   :  { %12157 = vmatpush3.bf16.msra.mxu0 %v13617_v21  ;;  %12141 = vmatmul.mubr.bf16.gmra.mxu1 %v1239_v22 }
  0xe7   :  { %12189 = vmatpush3.bf16.msra.mxu1 %v13618_v13  ;;  %12158 = vmatprep.subr.bf16.mxu0 %v13619_v18 }
  0xe8   :  { %12190 = vmatprep.subr.bf16.mxu1 %v13620_v39  ;;  %12112 = vmatprep.mubr.bf16.mxu0 %v17764_v25 }
  0xe9   :  { %12144 = vmatprep.mubr.bf16.mxu1 %v1240_v45 }
  0xea   :  { %12159 = vmatpush3.bf16.msra.mxu0 %v13619_v18  ;;  %v13644_v18 = vld [vmem:[#allocation9] sm:$0xff]  }
  0xeb   :  { %12191 = vmatpush3.bf16.msra.mxu1 %v13620_v39  ;;  %12160 = vmatprep.subr.bf16.mxu0 %v13621_v43 }
  0xec   :  { %12192 = vmatprep.subr.bf16.mxu1 %v13622_v24 }
  0xed   :  { %12113 = vmatmul.mubr.bf16.gmra.mxu0 %v17765_v7 }
  0xee   :  { %12161 = vmatpush3.bf16.msra.mxu0 %v13621_v43  ;;  %12145 = vmatmul.mubr.bf16.gmra.mxu1 %v1241_v48 }
  0xef   :  { %12193 = vmatpush3.bf16.msra.mxu1 %v13622_v24  ;;  %12162 = vmatprep.subr.bf16.mxu0 %v13623_v26 }
  0xf0   :  { %12194 = vmatprep.subr.bf16.mxu1 %v13624_v6  ;;  %12116 = vmatprep.mubr.bf16.mxu0 %v17766_v52 }
  0xf1   :  { %12148 = vmatprep.mubr.bf16.mxu1 %v1242_v58 }
  0xf2   :  { %12163 = vmatpush3.bf16.msra.mxu0 %v13623_v26 }
  0xf3   :  { %12195 = vmatpush3.bf16.msra.mxu1 %v13624_v6  ;;  %12164 = vmatprep.subr.bf16.mxu0 %v13625_v20 }
  0xf4   :  { %12196 = vmatprep.subr.bf16.mxu1 %v13626_v37 }
  0xf5   :  { %12117 = vmatmul.mubr.bf16.gmra.mxu0 %v1041_v8 }
  0xf6   :  { %12165 = vmatpush3.bf16.msra.mxu0 %v13625_v20  ;;  %12149 = vmatmul.mubr.bf16.gmra.mxu1 %v1243_v60 }
  0xf7   :  { %12197 = vmatpush3.bf16.msra.mxu1 %v13626_v37  ;;  %12166 = vmatprep.subr.bf16.mxu0 %v13627_v53 }
  0xf8   :  { %12198 = vmatprep.subr.bf16.mxu1 %v13628_v23  ;;  %12168 = vmatprep.mubr.bf16.mxu0 %v14469_v47  ;;  %v1442_v47 = vpack.c.bf16 %v13965_v2, %v14660_v35  ;;  %v13636_v35 = vld [vmem:[#allocation3 + $0x200] sm:$0xff]  }
  0xf9   :  { %12200 = vmatprep.mubr.bf16.mxu1 %v14455_v41  ;;  %v1644_v41 = vpack.c.bf16 %v14697_v12, %v14618_v3  ;;  %v1446_v3 = vpack.c.bf16 %v13965_v2, %v14678_v50  ;;  %v13637_v50 = vld [vmem:[#allocation9 + $0x38] sm:$0xff]  }
  0xfa   :  { %12167 = vmatpush3.bf16.msra.mxu0 %v13627_v53  ;;  %v13641_v12 = vld [vmem:[#allocation9 + $0x18] sm:$0xff]  }
  0xfb   :  { %12199 = vmatpush3.bf16.msra.mxu1 %v13628_v23  ;;  %12216 = vmatprep.subr.bf16.mxu0 %v13629_v28 }
  0xfc   :  { %12248 = vmatprep.subr.bf16.mxu1 %v13637_v50 }
  0xfd   :  { %12169 = vmatmul.mubr.bf16.vlgmr.msra.gmra.mxu0 %v14508_v57  ;;  %v13633_v57 = vld [vmem:[#allocation3 + $0x218] sm:$0xff]  }
  0xfe   :  { %12217 = vmatpush3.bf16.msra.mxu0 %v13629_v28  ;;  %12201 = vmatmul.mubr.bf16.vlgmr.msra.gmra.mxu1 %v14497_v55  ;;  %v13634_v55 = vld [vmem:[#allocation3 + $0x210] sm:$0xff]  }
  0xff   :  { %12218 = vmatprep.subr.bf16.mxu0 %v13630_v61  ;;  %12172 = vmatprep.mubr.bf16.mxu0 %v14543_v4  ;;  %v13635_v4 = vld [vmem:[#allocation3 + $0x208] sm:$0xff]  }
 0x100   :  { %12204 = vmatprep.mubr.bf16.mxu1 %v14525_v62  ;;  %v17767_v62 = vld [vmem:[#allocation29_spill] sm:$0xff]  ;;  %12249 = vmatpush3.bf16.msra.mxu1 %v13637_v50 }
 0x102   :  { %12219 = vmatpush3.bf16.msra.mxu0 %v13630_v61 }
 0x103   :  { %12220 = vmatprep.subr.bf16.mxu0 %v13631_v1 }
 0x105   :  { %12173 = vmatmul.mubr.bf16.gmra.mxu0 %v1442_v47 }
 0x106   :  { %12221 = vmatpush3.bf16.msra.mxu0 %v13631_v1  ;;  %12205 = vmatmul.mubr.bf16.gmra.mxu1 %v1644_v41 }
 0x107   :  { %12222 = vmatprep.subr.bf16.mxu0 %v13632_v42  ;;  %12176 = vmatprep.mubr.bf16.mxu0 %v14594_v54  ;;  %v17769_v54 = vld [vmem:[#allocation30_spill] sm:$0xff] }
 0x108   :  { %12208 = vmatprep.mubr.bf16.mxu1 %v14581_v36  ;;  %v1648_v36 = vpack.c.bf16 %v14710_v30, %v14644_v0  ;;  %v17770_v0 = vld [vmem:[#allocation31_spill] sm:$0xff] }
 0x10a   :  { %12223 = vmatpush3.bf16.msra.mxu0 %v13632_v42 }
 0x10b   :  { %12224 = vmatprep.subr.bf16.mxu0 %v13633_v57 }
 0x10d   :  { %12177 = vmatmul.mubr.bf16.gmra.mxu0 %v17767_v62 }
 0x10e   :  { %12225 = vmatpush3.bf16.msra.mxu0 %v13633_v57  ;;  %12209 = vmatmul.mubr.bf16.gmra.mxu1 %v17768_v46 }
 0x10f   :  { %12226 = vmatprep.subr.bf16.mxu0 %v13634_v55  ;;  %12180 = vmatprep.mubr.bf16.mxu0 %v14629_v16  ;;  %v1850_v16 = vpack.c.bf16 %v17770_v0, %v14684_v51 }
 0x110   :  { %12212 = vmatprep.mubr.bf16.mxu1 %v14625_v29  ;;  %v1846_v29 = vpack.c.bf16 %v14699_v31, %v14663_v40  ;;  %v13640_v40 = vld [vmem:[#allocation9 + $0x20] sm:$0xff]  }
 0x112   :  { %12227 = vmatpush3.bf16.msra.mxu0 %v13634_v55 }
 0x113   :  { %12228 = vmatprep.subr.bf16.mxu0 %v13635_v4 }
 0x115   :  { %12181 = vmatmul.mubr.bf16.gmra.mxu0 %v1446_v3 }
 0x116   :  { %12229 = vmatpush3.bf16.msra.mxu0 %v13635_v4  ;;  %12213 = vmatmul.mubr.bf16.gmra.mxu1 %v1648_v36 }
 0x117   :  { %12230 = vmatprep.subr.bf16.mxu0 %v13636_v35  ;;  %12232 = vmatprep.mubr.bf16.mxu0 %v17769_v54 }
 0x11a   :  { %12231 = vmatpush3.bf16.msra.mxu0 %v13636_v35 }
 0x11d   :  { %12233 = vmatmul.mubr.bf16.vlgmr.msra.gmra.mxu0 %v14655_v14  ;;  %v13638_v14 = vld [vmem:[#allocation9 + $0x30] sm:$0xff]  }
 0x11e   :  { %12236 = vmatprep.mubr.bf16.mxu0 %v14667_v11  ;;  %12250 = vmatprep.subr.bf16.mxu1 %v13638_v14  ;;  %v13639_v11 = vld [vmem:[#allocation9 + $0x28] sm:$0xff]  }
 0x11f   :  { %12251 = vmatpush3.bf16.msra.mxu1 %v13638_v14 }
 0x120   :  { %12252 = vmatprep.subr.bf16.mxu1 %v13639_v11 }
 0x123   :  { %12253 = vmatpush3.bf16.msra.mxu1 %v13639_v11 }
 0x124   :  { %12254 = vmatprep.subr.bf16.mxu1 %v13640_v40 }
 0x125   :  { %12237 = vmatmul.mubr.bf16.gmra.mxu0 %v1846_v29 }
 0x126   :  { %12240 = vmatprep.mubr.bf16.mxu0 %v14682_v56 }
 0x127   :  { %12255 = vmatpush3.bf16.msra.mxu1 %v13640_v40 }
 0x128   :  { %12256 = vmatprep.subr.bf16.mxu1 %v13641_v12 }
 0x12b   :  { %12257 = vmatpush3.bf16.msra.mxu1 %v13641_v12 }
 0x12c   :  { %12258 = vmatprep.subr.bf16.mxu1 %v13642_v34 }
 0x12d   :  { %12241 = vmatmul.mubr.bf16.gmra.mxu0 %v14692_v19 }
 0x12e   :  { %12244 = vmatprep.mubr.bf16.mxu0 %v14706_v38 }
 0x12f   :  { %12259 = vmatpush3.bf16.msra.mxu1 %v13642_v34  ;;  %v13649_v34 = vld [vmem:[#allocation12 + $0x68] sm:$0xff]  }
 0x130   :  { %12260 = vmatprep.subr.bf16.mxu1 %v13643_v15 }
 0x133   :  { %12261 = vmatpush3.bf16.msra.mxu1 %v13643_v15 }
 0x134   :  { %12262 = vmatprep.subr.bf16.mxu1 %v13644_v18 }
 0x135   :  { %12245 = vmatmul.mubr.bf16.gmra.mxu0 %v1850_v16 }
 0x137   :  { %12263 = vmatpush3.bf16.msra.mxu1 %v13644_v18 }
 0x15d   :  { %v11978_v56 = vpop.f32.mrf.mxu0 }
 0x15e   :  { %v12010_v19 = vpop.f32.mrf.mxu1 }
 0x15f   :  { %v560_v31 = vadd.f32 %v12010_v19, %v11978_v56  ;;  %v406_v38 = vpop.f32.mrf.mxu0 }
 0x160   :  { %v551_v63 = vpop.f32.mrf.mxu1 }
 0x161   :  { %v552_v51 = vadd.f32 %v551_v63, %v406_v38  ;;  %v11979_v30 = vpop.f32.mrf.mxu0  ;;  %v14815_v38 = vld [vmem:[#allocation12 + $0x38] sm:$0xff]   ;;  %v13647_v63 = vld [vmem:[#allocation12 + $0x70] sm:$0xff]  }
 0x162   :  { %v12011_v10 = vpop.f32.mrf.mxu1  ;;  %17771 = vst [vmem:[#allocation29_spill] sm:$0xff] %v14815_v38  ;;  %12312 = vmatprep.subr.bf16.mxu1 %v14815_v38 }
 0x163   :  { %v563_v5 = vadd.f32 %v12011_v10, %v11979_v30  ;;  %v14783_v9 = vpop.f32.mrf.mxu0 }
 0x164   :  { %v14785_v59 = vpop.f32.mrf.mxu1 }
 0x165   :  { %v11982_v27 = vpop.f32.mrf.mxu0 }
 0x166   :  { %v12014_v44 = vpop.f32.mrf.mxu1 }
 0x167   :  { %v576_v32 = vadd.f32 %v12014_v44, %v11982_v27  ;;  %v422_v21 = vpop.f32.mrf.mxu0 }
 0x168   :  { %v567_v49 = vpop.f32.mrf.mxu1 }
 0x169   :  { %v568_v13 = vadd.f32 %v567_v49, %v422_v21  ;;  %v11983_v17 = vpop.f32.mrf.mxu0 }
 0x16a   :  { %v12015_v33 = vpop.f32.mrf.mxu1 }
 0x16b   :  { %v579_v22 = vadd.f32 %v12015_v33, %v11983_v17  ;;  %v14787_v39 = vpop.f32.mrf.mxu0 }
 0x16c   :  { %v14789_v43 = vpop.f32.mrf.mxu1 }
 0x16d   :  { %v11986_v45 = vpop.f32.mrf.mxu0 }
 0x16e   :  { %v12018_v24 = vpop.f32.mrf.mxu1 }
 0x16f   :  { %v592_v25 = vadd.f32 %v12018_v24, %v11986_v45  ;;  %v438_v26 = vpop.f32.mrf.mxu0 }
 0x170   :  { %v583_v48 = vpop.f32.mrf.mxu1 }
 0x171   :  { %v584_v6 = vadd.f32 %v583_v48, %v438_v26  ;;  %v11987_v7 = vpop.f32.mrf.mxu0 }
 0x172   :  { %v12019_v20 = vpop.f32.mrf.mxu1 }
 0x173   :  { %v595_v58 = vadd.f32 %v12019_v20, %v11987_v7  ;;  %v14791_v37 = vpop.f32.mrf.mxu0 }
 0x174   :  { %v14793_v52 = vpop.f32.mrf.mxu1 }
 0x175   :  { %v11990_v8 = vpop.f32.mrf.mxu0 }
 0x176   :  { %v12022_v53 = vpop.f32.mrf.mxu1 }
 0x177   :  { %v608_v60 = vadd.f32 %v12022_v53, %v11990_v8  ;;  %v454_v23 = vpop.f32.mrf.mxu0 }
 0x178   :  { %v599_v28 = vpop.f32.mrf.mxu1 }
 0x179   :  { %v600_v61 = vadd.f32 %v599_v28, %v454_v23  ;;  %v11991_v1 = vpop.f32.mrf.mxu0 }
 0x17a   :  { %v12023_v2 = vpop.f32.mrf.mxu1 }
 0x17b   :  { %v611_v47 = vadd.f32 %v12023_v2, %v11991_v1  ;;  %v14795_v42 = vpop.f32.mrf.mxu0 }
 0x17c   :  { %v14797_v41 = vpop.f32.mrf.mxu1 }
 0x17d   :  { %v12042_v57 = vpop.f32.mrf.mxu0 }
 0x17e   :  { %v802_v55 = vadd.f32 %v12042_v57, %v560_v31  ;;  %v12074_v62 = vpop.f32.mrf.mxu1  ;;  %v13645_v31 = vld [vmem:[#allocation12 + $0x78] sm:$0xff]  }
 0x17f   :  { %v737_v4 = vpop.f32.mrf.mxu0  ;;  %12280 = vmatprep.subr.bf16.mxu0 %v13645_v31 }
 0x180   :  { %v14799_v46 = vadd.f32 %v737_v4, %v552_v51  ;;  %v1004_v3 = vadd.f32 %v12074_v62, %v802_v55  ;;  %v14801_v35 = vpop.f32.mrf.mxu1  ;;  %12281 = vmatpush3.bf16.msra.mxu0 %v13645_v31 }
 0x181   :  { %v12043_v36 = vpop.f32.mrf.mxu0  ;;  %12282 = vmatprep.subr.bf16.mxu0 %v13647_v63 }
 0x182   :  { %v14803_v54 = vadd.f32 %v12043_v36, %v563_v5  ;;  %v14805_v29 = vpop.f32.mrf.mxu1 }
 0x183   :  { %v14807_v0 = vpop.f32.mrf.mxu0 }
 0x184   :  { %v14809_v16 = vpop.f32.mrf.mxu1  ;;  %12283 = vmatpush3.bf16.msra.mxu0 %v13647_v63 }
 0x185   :  { %v12046_v50 = vpop.f32.mrf.mxu0  ;;  %12284 = vmatprep.subr.bf16.mxu0 %v13649_v34 }
 0x186   :  { %v806_v14 = vadd.f32 %v12046_v50, %v576_v32  ;;  %v12078_v11 = vpop.f32.mrf.mxu1 }
 0x187   :  { %v753_v40 = vpop.f32.mrf.mxu0 }
 0x188   :  { %v14811_v56 = vadd.f32 %v753_v40, %v568_v13  ;;  %v1008_v19 = vadd.f32 %v12078_v11, %v806_v14  ;;  %v14813_v12 = vpop.f32.mrf.mxu1  ;;  %12285 = vmatpush3.bf16.msra.mxu0 %v13649_v34 }
 0x189   :  { %v12047_v51 = vpop.f32.mrf.mxu0 }
 0x18a   :  { %v14817_v30 = vadd.f32 %v12047_v51, %v579_v22  ;;  %v14819_v10 = vpop.f32.mrf.mxu1 }
 0x18b   :  { %v14822_v5 = vpop.f32.mrf.mxu0 }
 0x18c   :  { %v14824_v27 = vpop.f32.mrf.mxu1 }
 0x18d   :  { %v12050_v44 = vpop.f32.mrf.mxu0 }
 0x18e   :  { %v810_v15 = vadd.f32 %v12050_v44, %v592_v25  ;;  %v12082_v32 = vpop.f32.mrf.mxu1 }
 0x18f   :  { %v769_v21 = vpop.f32.mrf.mxu0 }
 0x190   :  { %v14826_v49 = vadd.f32 %v769_v21, %v584_v6  ;;  %v1012_v13 = vadd.f32 %v12082_v32, %v810_v15  ;;  %v14828_v17 = vpop.f32.mrf.mxu1 }
 0x191   :  { %v12051_v33 = vpop.f32.mrf.mxu0 }
 0x192   :  { %v14830_v18 = vadd.f32 %v12051_v33, %v595_v58  ;;  %v14832_v22 = vpop.f32.mrf.mxu1 }
 0x193   :  { %v14834_v45 = vpop.f32.mrf.mxu0 }
 0x194   :  { %v14836_v24 = vpop.f32.mrf.mxu1 }
 0x195   :  { %v12054_v25 = vpop.f32.mrf.mxu0 }
 0x196   :  { %v814_v26 = vadd.f32 %v12054_v25, %v608_v60  ;;  %v12086_v48 = vpop.f32.mrf.mxu1 }
 0x197   :  { %v785_v7 = vpop.f32.mrf.mxu0 }
 0x198   :  { %v14838_v6 = vadd.f32 %v785_v7, %v600_v61  ;;  %v1016_v20 = vadd.f32 %v12086_v48, %v814_v26  ;;  %v14840_v8 = vpop.f32.mrf.mxu1 }
 0x199   :  { %v12055_v53 = vpop.f32.mrf.mxu0 }
 0x19a   :  { %v14842_v23 = vadd.f32 %v12055_v53, %v611_v47  ;;  %v14844_v58 = vpop.f32.mrf.mxu1 }
 0x19b   :  { %v14846_v28 = vpop.f32.mrf.mxu0 }
 0x19c   :  { %v14848_v1 = vpop.f32.mrf.mxu1 }
 0x19d   :  { %17772 = vst [vmem:[#allocation28_spill] sm:$0xff] %v14848_v1  ;;  %v12106_v2 = vpop.f32.mrf.mxu0  ;;  %v555_v1 = vadd.f32 %v14785_v59, %v14783_v9 }
 0x19e   :  { %v14850_v57 = vadd.f32 %v12106_v2, %v1004_v3  ;;  %v14852_v60 = vpop.f32.mrf.mxu1 }
 0x19f   :  { %v1141_v55 = vpop.f32.mrf.mxu0 }
 0x1a0   :  { %v14854_v61 = vpop.f32.mrf.mxu1 }
 0x1a1   :  { %v12107_v62 = vpop.f32.mrf.mxu0 }
 0x1a2   :  { %v14856_v4 = vpop.f32.mrf.mxu1 }
 0x1a3   :  { %v1144_v36 = vpop.f32.mrf.mxu0 }
 0x1a4   :  { %v14858_v47 = vpop.f32.mrf.mxu1 }
 0x1a5   :  { %v12110_v50 = vpop.f32.mrf.mxu0 }
 0x1a6   :  { %v14860_v14 = vadd.f32 %v12110_v50, %v1008_v19  ;;  %v14862_v11 = vpop.f32.mrf.mxu1 }
 0x1a7   :  { %v14864_v40 = vpop.f32.mrf.mxu0 }
 0x1a8   :  { %v14866_v3 = vpop.f32.mrf.mxu1 }
 0x1a9   :  { %v14868_v31 = vpop.f32.mrf.mxu0 }
 0x1aa   :  { %v14870_v63 = vpop.f32.mrf.mxu1 }
 0x1ab   :  { %v14872_v51 = vpop.f32.mrf.mxu0 }
 0x1ac   :  { %v14874_v34 = vpop.f32.mrf.mxu1 }
 0x1ad   :  { %17773 = vst [vmem:[#allocation30_spill] sm:$0xff] %v14874_v34  ;;  %v12114_v44 = vpop.f32.mrf.mxu0 }
 0x1ae   :  { %v14876_v15 = vadd.f32 %v12114_v44, %v1012_v13  ;;  %v14878_v32 = vpop.f32.mrf.mxu1 }
 0x1af   :  { %17775 = vst [vmem:[#allocation32_spill] sm:$0xff] %v14878_v32  ;;  %v14880_v19 = vpop.f32.mrf.mxu0 }
 0x1b0   :  { %17774 = vst [vmem:[#allocation31_spill] sm:$0xff] %v14876_v15  ;;  %17776 = vst [vmem:[#allocation33_spill] sm:$0xff] %v14880_v19  ;;  %v14882_v21 = vpop.f32.mrf.mxu1 }
 0x1b1   :  { %17777 = vst [vmem:[#allocation34_spill] sm:$0xff] %v14882_v21  ;;  %v14884_v33 = vpop.f32.mrf.mxu0 }
 0x1b2   :  { %17778 = vst [vmem:[#allocation35_spill] sm:$0xff] %v14884_v33  ;;  %v14886_v25 = vpop.f32.mrf.mxu1 }
 0x1b3   :  { %17779 = vst [vmem:[#allocation36_spill] sm:$0xff] %v14886_v25  ;;  %v14888_v26 = vpop.f32.mrf.mxu0 }
 0x1b4   :  { %17780 = vst [vmem:[#allocation37_spill] sm:$0xff] %v14888_v26  ;;  %v14890_v48 = vpop.f32.mrf.mxu1 }
 0x1b5   :  { %17781 = vst [vmem:[#allocation38_spill] sm:$0xff] %v14890_v48  ;;  %v12118_v7 = vpop.f32.mrf.mxu0 }
 0x1b6   :  { %v14892_v53 = vadd.f32 %v12118_v7, %v1016_v20  ;;  %v14894_v2 = vpop.f32.mrf.mxu1 }
 0x1b7   :  { %17783 = vst [vmem:[#allocation40_spill] sm:$0xff] %v14894_v2  ;;  %v14896_v13 = vpop.f32.mrf.mxu0 }
 0x1b8   :  { %17782 = vst [vmem:[#allocation39_spill] sm:$0xff] %v14892_v53  ;;  %17784 = vst [vmem:[#allocation41_spill] sm:$0xff] %v14896_v13  ;;  %v14898_v50 = vpop.f32.mrf.mxu1 }
 0x1b9   :  { %17785 = vst [vmem:[#allocation42_spill] sm:$0xff] %v14898_v50  ;;  %v14900_v44 = vpop.f32.mrf.mxu0 }
 0x1ba   :  { %17786 = vst [vmem:[#allocation43_spill] sm:$0xff] %v14900_v44  ;;  %v14902_v38 = vpop.f32.mrf.mxu1 }
 0x1bb   :  { %17787 = vst [vmem:[#allocation44_spill] sm:$0xff] %v14902_v38  ;;  %v14904_v21 = vpop.f32.mrf.mxu0 }
 0x1bc   :  { %17788 = vst [vmem:[#allocation45_spill] sm:$0xff] %v14904_v21  ;;  %v14906_v25 = vpop.f32.mrf.mxu1 }
 0x1bd   :  { %17789 = vst [vmem:[#allocation46_spill] sm:$0xff] %v14906_v25  ;;  %v12170_v26 = vpop.f32.mrf.mxu0 }
 0x1be   :  { %v12202_v33 = vpop.f32.mrf.mxu1 }
 0x1bf   :  { %v1546_v48 = vpop.f32.mrf.mxu0 }
 0x1c0   :  { %v1748_v32 = vpop.f32.mrf.mxu1 }
 0x1c1   :  { %v12171_v20 = vpop.f32.mrf.mxu0 }
 0x1c2   :  { %v12203_v53 = vpop.f32.mrf.mxu1 }
 0x1c3   :  { %v1549_v7 = vpop.f32.mrf.mxu0 }
 0x1c4   :  { %v14910_v13 = vpop.f32.mrf.mxu1 }
 0x1c5   :  { %v14908_v2 = vpop.f32.mrf.mxu0  ;;  %17790 = vst [vmem:[#allocation47_spill] sm:$0xff] %v14910_v13 }
 0x1c6   :  { %v14916_v38 = vpop.f32.mrf.mxu1 }
 0x1c7   :  { %v14912_v50 = vpop.f32.mrf.mxu0  ;;  %17793 = vst [vmem:[#allocation50_spill] sm:$0xff] %v14916_v38 }
 0x1c8   :  { %17791 = vst [vmem:[#allocation48_spill] sm:$0xff] %v14912_v50  ;;  %v14922_v15 = vpop.f32.mrf.mxu1  ;;  %v1002_v50 = vadd.f32 %v14801_v35, %v14799_v46  ;;  %v571_v46 = vadd.f32 %v14789_v43, %v14787_v39  ;;  %v1408_v35 = vadd.f32 %v14852_v60, %v14850_v57  ;;  %v1009_v39 = vadd.f32 %v14819_v10, %v14817_v30 }
 0x1c9   :  { %v14914_v44 = vpop.f32.mrf.mxu0  ;;  %17796 = vst [vmem:[#allocation53_spill] sm:$0xff] %v14922_v15 }
 0x1ca   :  { %17792 = vst [vmem:[#allocation49_spill] sm:$0xff] %v14914_v44  ;;  %v801_v44 = vadd.f32 %v14807_v0, %v555_v1  ;;  %v14933_v13 = vpop.f32.mrf.mxu1 }
 0x1cb   :  { %v14918_v21 = vpop.f32.mrf.mxu0 }
 0x1cc   :  { %17794 = vst [vmem:[#allocation51_spill] sm:$0xff] %v14918_v21  ;;  %v1204_v21 = vadd.f32 %v1141_v55, %v1002_v50  ;;  %v14942_v59 = vpop.f32.mrf.mxu1 }
 0x1cd   :  { %v14920_v25 = vpop.f32.mrf.mxu0 }
 0x1ce   :  { %17795 = vst [vmem:[#allocation52_spill] sm:$0xff] %v14920_v25  ;;  %v1005_v25 = vadd.f32 %v14805_v29, %v14803_v54  ;;  %v1406_v0 = vadd.f32 %v14854_v61, %v1204_v21  ;;  %v1006_v54 = vadd.f32 %v14813_v12, %v14811_v56  ;;  %v805_v29 = vadd.f32 %v14822_v5, %v571_v46  ;;  %v14961_v57 = vpop.f32.mrf.mxu1 }
 0x1cf   :  { %v14924_v34 = vpop.f32.mrf.mxu0  ;;  %v603_v12 = vadd.f32 %v14797_v41, %v14795_v42  ;;  %v1010_v21 = vadd.f32 %v14828_v17, %v14826_v49  ;;  %v1412_v42 = vadd.f32 %v14862_v11, %v14860_v14  ;;  %v1014_v17 = vadd.f32 %v14840_v8, %v14838_v6 }
 0x1d0   :  { %17797 = vst [vmem:[#allocation54_spill] sm:$0xff] %v14924_v34  ;;  %v1003_v34 = vadd.f32 %v14809_v16, %v801_v44  ;;  %v1207_v9 = vadd.f32 %v12107_v62, %v1005_v25  ;;  %v1611_v16 = vadd.f32 %v12170_v26, %v1408_v35  ;;  %v1609_v62 = vadd.f32 %v1546_v48, %v1406_v0  ;;  %v14979_v41 = vpop.f32.mrf.mxu1  ;;  %v17802_v48 = vld [vmem:[#allocation48_spill] sm:$0xff]  ;;  %v17803_v44 = vld [vmem:[#allocation33_spill] sm:$0xff]  ;;  %v17809_v0 = vld [vmem:[#allocation31_spill] sm:$0xff] }
 0x1d1   :  { %v14928_v19 = vpop.f32.mrf.mxu0  ;;  %v587_v25 = vadd.f32 %v14793_v52, %v14791_v37  ;;  %v1208_v56 = vadd.f32 %v14864_v40, %v1006_v54  ;;  %v1211_v37 = vadd.f32 %v14868_v31, %v1009_v39  ;;  %v1007_v30 = vadd.f32 %v14824_v27, %v805_v29  ;;  %v17811_v29 = vld [vmem:[#allocation35_spill] sm:$0xff]  ;;  %v15016_v39 = vld [vmem:[#allocation8] ss:$0 sm:$0xff] }
 0x1d2   :  { %17798 = vst [vmem:[#allocation55_spill] sm:$0xff] %v14928_v19  ;;  %v1205_v1 = vadd.f32 %v1144_v36, %v1003_v34  ;;  %v1409_v43 = vadd.f32 %v14856_v4, %v1207_v9  ;;  %v1813_v10 = vadd.f32 %v12202_v33, %v1611_v16  ;;  %v1811_v4 = vadd.f32 %v1748_v32, %v1609_v62  ;;  %v15000_v6 = vpop.f32.mrf.mxu1  ;;  %v17806_v9 = vld [vmem:[#allocation28_spill] sm:$0xff]  ;;  %v17812_v62 = vld [vmem:[#allocation37_spill] sm:$0xff] }
 0x1d3   :  { %v14935_v38 = vpop.f32.mrf.mxu0  ;;  %v809_v5 = vadd.f32 %v14834_v45, %v587_v25  ;;  %v813_v40 = vadd.f32 %v14846_v28, %v603_v12  ;;  %v1410_v31 = vadd.f32 %v14866_v3, %v1208_v56  ;;  %v1209_v27 = vadd.f32 %v14872_v51, %v1007_v30  ;;  %v14991_v28 = vld [vmem:[#allocation6] ss:$0 sm:$0xff]  ;;  %v17801_v51 = vld [vmem:[#allocation47_spill] sm:$0xff]  ;;  %v17813_v56 = vld [vmem:[#allocation50_spill] sm:$0xff] }
 0x1d4   :  { %v1407_v61 = vadd.f32 %v14858_v47, %v1205_v1  ;;  %v1612_v52 = vadd.f32 %v12171_v20, %v1409_v43  ;;  %v1013_v47 = vadd.f32 %v14832_v22, %v14830_v18  ;;  %v1413_v18 = vadd.f32 %v14870_v63, %v1211_v37  ;;  %v17804_v20 = vld [vmem:[#allocation49_spill] sm:$0xff]  ;;  %v17810_v1 = vld [vmem:[#allocation32_spill] sm:$0xff] }
 0x1d5   :  { %v14939_v15 = vpop.f32.mrf.mxu0  ;;  %v1011_v49 = vadd.f32 %v14836_v24, %v809_v5  ;;  %v1017_v11 = vadd.f32 %v14844_v58, %v14842_v23  ;;  %v1615_v3 = vadd.f32 %v14908_v2, %v1412_v42  ;;  %v1613_v50 = vadd.f32 %v17802_v48, %v1410_v31  ;;  %v17807_v58 = vld [vmem:[#allocation30_spill] sm:$0xff]  ;;  %v17814_v5 = vld [vmem:[#allocation53_spill] sm:$0xff] }
 0x1d6   :  { %v1610_v34 = vadd.f32 %v1549_v7, %v1407_v61  ;;  %v1814_v22 = vadd.f32 %v12203_v53, %v1612_v52  ;;  %v1212_v24 = vadd.f32 %v17803_v44, %v1010_v21  ;;  %v1616_v7 = vadd.f32 %v17804_v20, %v1413_v18  ;;  %v17815_v52 = vld [vmem:[#allocation51_spill] sm:$0xff]  ;;  %v1783_v21 = vpop.f32.mrf.mxu1  ;;  %v17819_v18 = vld [vmem:[#allocation36_spill] sm:$0xff] }
 0x1d7   :  { %v14944_v19 = vpop.f32.mrf.mxu0  ;;  %v1015_v23 = vadd.f32 %v17806_v9, %v813_v40  ;;  %v1411_v2 = vadd.f32 %v17807_v58, %v1209_v27  ;;  %v1416_v54 = vadd.f32 %v17810_v1, %v17809_v0  ;;  %v1215_v16 = vadd.f32 %v17811_v29, %v1013_v47 }
 0x1d8   :  { %v1812_v26 = vadd.f32 %v17801_v51, %v1610_v34  ;;  %v1213_v25 = vadd.f32 %v17812_v62, %v1011_v49  ;;  %v1817_v12 = vadd.f32 %v17813_v56, %v1615_v3  ;;  %v1815_v37 = vadd.f32 %v17814_v5, %v1613_v50  ;;  %v17821_v51 = vld [vmem:[#allocation41_spill] sm:$0xff]  ;;  %v12214_v58 = vpop.f32.mrf.mxu1 }
 0x1d9   :  { %v14951_v55 = vpop.f32.mrf.mxu0  ;;  %v1818_v34 = vadd.f32 %v14933_v13, %v1616_v7  ;;  %v1216_v13 = vadd.f32 %v17821_v51, %v1014_v17 }
 0x1db   :  { %v14963_v60 = vpop.f32.mrf.mxu0 }
 0x1dd   :  { %v12234_v36 = vpop.f32.mrf.mxu0 }
 0x1de   :  { %v14983_v32 = vadd.f32 %v12234_v36, %v1813_v10  ;;  %v1614_v36 = vadd.f32 %v17815_v52, %v1411_v2  ;;  %v17816_v10 = vld [vmem:[#allocation34_spill] sm:$0xff] }
 0x1df   :  { %v1950_v45 = vpop.f32.mrf.mxu0 }
 0x1e0   :  { %17799 = vst [vmem:[#allocation56_spill] sm:$0xff] %v14983_v32  ;;  %v14985_v33 = vadd.f32 %v1950_v45, %v1811_v4  ;;  %v2038_v46 = vmul.f32 %v14991_v28, %v14983_v32  ;;  %v1414_v4 = vadd.f32 %v17816_v10, %v1212_v24  ;;  %v1816_v44 = vadd.f32 %v14942_v59, %v1614_v36  ;;  %v17823_v24 = vld [vmem:[#allocation54_spill] sm:$0xff]  ;;  %v17829_v10 = vld [vmem:[#allocation39_spill] sm:$0xff] }
 0x1e1   :  { %v12235_v14 = vpop.f32.mrf.mxu0 }
 0x1e2   :  { %17800 = vst [vmem:[#allocation57_spill] sm:$0xff] %v14985_v33  ;;  %v2036_v8 = vmul.f32 %v14991_v28, %v14985_v33  ;;  %v15004_v63 = vadd.f32 %v12235_v14, %v1814_v22  ;;  %v2061_v45 = vadd.f32 %v15016_v39, %v2038_v46  ;;  %v1417_v22 = vadd.f32 %v17819_v18, %v1215_v16  ;;  %v17820_v14 = vld [vmem:[#allocation38_spill] sm:$0xff]  ;;  %v17827_v16 = vld [vmem:[#allocation43_spill] sm:$0xff]  ;;  %v17834_v18 = vld [vmem:[#allocation44_spill] sm:$0xff] }
 0x1e3   :  { %v1953_v53 = vpop.f32.mrf.mxu0  ;;  %v1415_v3 = vadd.f32 %v17820_v14, %v1213_v25  ;;  %v1617_v20 = vadd.f32 %v17823_v24, %v1414_v4  ;;  %v1219_v62 = vadd.f32 %v17827_v16, %v1017_v11  ;;  %v17828_v25 = vld [vmem:[#allocation45_spill] sm:$0xff]  ;;  %v17830_v4 = vld [vmem:[#allocation40_spill] sm:$0xff]  ;;  %v17835_v14 = vld [vmem:[#allocation46_spill] sm:$0xff] }
 0x1e4   :  { %17805 = vst [vmem:[#allocation47_spill] sm:$0xff] %v15004_v63  ;;  %v15010_v35 = vadd.f32 %v1953_v53, %v1812_v26  ;;  %v2039_v43 = vmul.f32 %v14991_v28, %v15004_v63  ;;  %v2059_v42 = vadd.f32 %v15016_v39, %v2036_v8  ;;  %v17822_v26 = vld [vmem:[#allocation52_spill] sm:$0xff]  ;;  %v17825_v53 = vld [vmem:[#allocation55_spill] sm:$0xff]  ;;  %v2077_v17 = vmax.f32 %v2061_v45, 0.0 }
 0x1e5   :  { %v12238_v61 = vpop.f32.mrf.mxu0  ;;  %v1619_v48 = vadd.f32 %v17822_v26, %v1416_v54  ;;  %v1620_v9 = vadd.f32 %v17825_v53, %v1417_v22  ;;  %v1819_v5 = vadd.f32 %v14979_v41, %v1617_v20  ;;  %v1421_v22 = vadd.f32 %v17834_v18, %v1219_v62  ;;  %v13650_v20 = vld [vmem:[#allocation12 + $0x28] sm:$0xff]  }
 0x1e6   :  { %17808 = vst [vmem:[#allocation48_spill] sm:$0xff] %v15010_v35  ;;  %v2037_v30 = vmul.f32 %v14991_v28, %v15010_v35  ;;  %v2062_v47 = vadd.f32 %v15016_v39, %v2039_v43  ;;  %v15030_v31 = vadd.f32 %v12238_v61, %v1817_v12  ;;  %v2075_v0 = vmax.f32 %v2059_v42, 0.0 }
 0x1e7   :  { %v1966_v40 = vpop.f32.mrf.mxu0  ;;  %v1217_v43 = vadd.f32 %v17828_v25, %v1015_v23  ;;  %v1821_v61 = vadd.f32 %v14961_v57, %v1619_v48  ;;  %v1822_v41 = vadd.f32 %v15000_v6, %v1620_v9  ;;  %v17836_v48 = vld [vmem:[#allocation29_spill] sm:$0xff] }
 0x1e8   :  { %17817 = vst [vmem:[#allocation33_spill] sm:$0xff] %v15030_v31  ;;  %v15032_v27 = vadd.f32 %v1966_v40, %v1815_v37  ;;  %v2060_v49 = vadd.f32 %v15016_v39, %v2037_v30  ;;  %v2078_v7 = vmax.f32 %v2062_v47, 0.0  ;;  %v2042_v54 = vmul.f32 %v14991_v28, %v15030_v31  ;;  %v13648_v30 = vld [vmem:[#allocation12 + $0x30] sm:$0xff]   ;;  %v17831_v47 = vld [vmem:[#allocation42_spill] sm:$0xff]  ;;  %v1796_v40 = vpop.f32.mrf.mxu1 }
 0x1e9   :  { %v12239_v50 = vpop.f32.mrf.mxu0  ;;  %v1618_v37 = vadd.f32 %v14935_v38, %v1415_v3  ;;  %v1418_v11 = vadd.f32 %v17831_v47, %v1216_v13  ;;  %v1419_v3 = vadd.f32 %v17835_v14, %v1217_v43 }
 0x1ea   :  { %17818 = vst [vmem:[#allocation49_spill] sm:$0xff] %v15032_v27  ;;  %v15041_v8 = vadd.f32 %v12239_v50, %v1818_v34  ;;  %v2040_v2 = vmul.f32 %v14991_v28, %v15032_v27  ;;  %v2076_v1 = vmax.f32 %v2060_v49, 0.0  ;;  %v2092_v52 = vpack.c.bf16 %v2078_v7, %v2077_v17  ;;  %v12215_v53 = vpop.f32.mrf.mxu1 }
 0x1eb   :  { %v1969_v46 = vpop.f32.mrf.mxu0  ;;  %v1420_v34 = vadd.f32 %v17830_v4, %v17829_v10  ;;  %v2065_v49 = vadd.f32 %v15016_v39, %v2042_v54  ;;  %v1820_v50 = vadd.f32 %v1783_v21, %v1618_v37  ;;  %v1621_v6 = vadd.f32 %v14944_v19, %v1418_v11 }
 0x1ec   :  { %17824 = vst [vmem:[#allocation28_spill] sm:$0xff] %v15041_v8  ;;  %v2043_v59 = vmul.f32 %v14991_v28, %v15041_v8  ;;  %v15050_v29 = vadd.f32 %v1969_v46, %v1816_v44  ;;  %v2091_v12 = vpack.c.bf16 %v2076_v1, %v2075_v0  ;;  %v2063_v57 = vadd.f32 %v15016_v39, %v2040_v2  ;;  %v1799_v43 = vpop.f32.mrf.mxu1 }
 0x1ed   :  { %v12242_v56 = vpop.f32.mrf.mxu0  ;;  %v1623_v51 = vadd.f32 %v14939_v15, %v1420_v34  ;;  %v1624_v7 = vadd.f32 %v14951_v55, %v1421_v22  ;;  %v2081_v1 = vmax.f32 %v2065_v49, 0.0  ;;  %v1823_v55 = vadd.f32 %v1796_v40, %v1621_v6 }
 0x1ee   :  { %17826 = vst [vmem:[#allocation30_spill] sm:$0xff] %v15050_v29  ;;  %v2041_v36 = vmul.f32 %v14991_v28, %v15050_v29  ;;  %12264 = vmatprep.mubr.bf16.mxu1 %v2091_v12  ;;  %v2066_v42 = vadd.f32 %v15016_v39, %v2043_v59  ;;  %v15065_v38 = vadd.f32 %v12242_v56, %v1821_v61  ;;  %v2079_v2 = vmax.f32 %v2063_v57, 0.0 }
 0x1ef   :  { %v1982_v23 = vpop.f32.mrf.mxu0  ;;  %12265 = vmatmul.mubr.bf16.vlgmr.msra.gmra.mxu1 %v2092_v52  ;;  %v1825_v17 = vadd.f32 %v12214_v58, %v1623_v51  ;;  %v1622_v16 = vadd.f32 %v14963_v60, %v1419_v3 }
 0x1f0   :  { %17832 = vst [vmem:[#allocation31_spill] sm:$0xff] %v15065_v38  ;;  %v15067_v45 = vadd.f32 %v1982_v23, %v1819_v5  ;;  %v2064_v26 = vadd.f32 %v15016_v39, %v2041_v36  ;;  %12313 = vmatpush3.bf16.msra.mxu1 %v17836_v48  ;;  %v2082_v24 = vmax.f32 %v2066_v42, 0.0  ;;  %v2046_v0 = vmul.f32 %v14991_v28, %v15065_v38 }
 0x1f1   :  { %v12243_v13 = vpop.f32.mrf.mxu0  ;;  %12314 = vmatprep.subr.bf16.mxu1 %v13648_v30  ;;  %v1826_v5 = vadd.f32 %v12215_v53, %v1624_v7  ;;  %v13653_v7 = vld [vmem:[#allocation12 + $0x58] sm:$0xff]   ;;  %v13652_v53 = vld [vmem:[#allocation12 + $0x20] sm:$0xff]  }
 0x1f2   :  { %17833 = vst [vmem:[#allocation32_spill] sm:$0xff] %v15067_v45  ;;  %v15076_v44 = vadd.f32 %v12243_v13, %v1822_v41  ;;  %v2044_v9 = vmul.f32 %v14991_v28, %v15067_v45  ;;  %v2080_v46 = vmax.f32 %v2064_v26, 0.0  ;;  %v2094_v25 = vpack.c.bf16 %v2082_v24, %v2081_v1  ;;  %v2379_v1 = vld [vmem:[#allocation2 + $0x1] sm:$0xff] }
 0x1f3   :  { %v1985_v15 = vpop.f32.mrf.mxu0  ;;  %v2069_v60 = vadd.f32 %v15016_v39, %v2046_v0  ;;  %v13658_v0 = vld [vmem:[#allocation12 + $0x8] sm:$0xff]  }
 0x1f4   :  { %17837 = vst [vmem:[#allocation35_spill] sm:$0xff] %v15076_v44  ;;  %v2047_v19 = vmul.f32 %v14991_v28, %v15076_v44  ;;  %v15085_v21 = vadd.f32 %v1985_v15, %v1820_v50  ;;  %v2093_v59 = vpack.c.bf16 %v2080_v46, %v2079_v2  ;;  %12315 = vmatpush3.bf16.msra.mxu1 %v13648_v30  ;;  %v13657_v15 = vld [vmem:[#allocation12 + $0x48] sm:$0xff]   ;;  %v13656_v2 = vld [vmem:[#allocation12 + $0x10] sm:$0xff]   ;;  %v13659_v46 = vld [vmem:[#allocation12 + $0x40] sm:$0xff]  }
 0x1f5   :  { %v12246_v54 = vpop.f32.mrf.mxu0  ;;  %12316 = vmatprep.subr.bf16.mxu1 %v13650_v20  ;;  %v2067_v56 = vadd.f32 %v15016_v39, %v2044_v9  ;;  %v1824_v30 = vadd.f32 %v1799_v43, %v1622_v16  ;;  %v2085_v41 = vmax.f32 %v2069_v60, 0.0  ;;  %v13655_v9 = vld [vmem:[#allocation12 + $0x50] sm:$0xff]   ;;  %v15126_v16 = vld [vmem:[#allocation2 + $0x91] sm:$0xff] }
 0x1f6   :  { %17838 = vst [vmem:[#allocation37_spill] sm:$0xff] %v15085_v21  ;;  %v2045_v62 = vmul.f32 %v14991_v28, %v15085_v21  ;;  %12268 = vmatprep.mubr.bf16.mxu1 %v2093_v59  ;;  %v2070_v12 = vadd.f32 %v15016_v39, %v2047_v19  ;;  %v15092_v58 = vadd.f32 %v12246_v54, %v1825_v17  ;;  %v15114_v19 = vld [vmem:[#allocation12 + $0xb8] sm:$0xff]   ;;  %v13660_v54 = vld [vmem:[#allocation12] sm:$0xff]   ;;  %17844 = vst [vmem:[#allocation38_spill] sm:$0xff] %v15126_v16 }
 0x1f7   :  { %v1998_v61 = vpop.f32.mrf.mxu0  ;;  %12269 = vmatmul.mubr.bf16.gmra.mxu1 %v2094_v25  ;;  %v2083_v11 = vmax.f32 %v2067_v56, 0.0  ;;  %v15117_v17 = vld [vmem:[#allocation2 + $0x2] sm:$0xff]  ;;  %v15140_v56 = vld [vmem:[#allocation2 + $0x132] sm:$0xff] }
 0x1f8   :  { %17839 = vst [vmem:[#allocation50_spill] sm:$0xff] %v15092_v58  ;;  %v15094_v37 = vadd.f32 %v1998_v61, %v1823_v55  ;;  %v2068_v36 = vadd.f32 %v15016_v39, %v2045_v62  ;;  %12317 = vmatpush3.bf16.msra.mxu1 %v13650_v20  ;;  %v2086_v34 = vmax.f32 %v2070_v12, 0.0  ;;  %v2050_v23 = vmul.f32 %v14991_v28, %v15092_v58  ;;  %v15119_v59 = vld [vmem:[#allocation2 + $0x20] sm:$0xff]  ;;  %v15128_v62 = vld [vmem:[#allocation2 + $0x92] sm:$0xff]  ;;  %v15144_v12 = vld [vmem:[#allocation11] ss:$0 sm:$0xff] }
 0x1f9   :  { %v12247_v52 = vpop.f32.mrf.mxu0  ;;  %12318 = vmatprep.subr.bf16.mxu1 %v13652_v53  ;;  %17843 = vst [vmem:[#allocation36_spill] sm:$0xff] %v15119_v59  ;;  %4398 = vst [vmem:[#allocation2] sm:$0xff] %v15119_v59  ;;  %v15123_v55 = vld [vmem:[#allocation12 + $0xf8] sm:$0xff]   ;;  %v15138_v61 = vld [vmem:[#allocation2 + $0x131] sm:$0xff] }
 0x1fa   :  { %17840 = vst [vmem:[#allocation53_spill] sm:$0xff] %v15094_v37  ;;  %v2048_v10 = vmul.f32 %v14991_v28, %v15094_v37  ;;  %v15100_v4 = vadd.f32 %v12247_v52, %v1826_v5  ;;  %v2084_v40 = vmax.f32 %v2068_v36, 0.0  ;;  %v2096_v22 = vpack.c.bf16 %v2086_v34, %v2085_v41  ;;  %4399 = vst [vmem:[#allocation2 + $0x8] sm:$0x3] %v15119_v59  ;;  %v15132_v25 = vld [vmem:[#allocation2 + $0xa1] sm:$0xff] }
 0x1fb   :  { %v2001_v47 = vpop.f32.mrf.mxu0  ;;  %v2073_v13 = vadd.f32 %v15016_v39, %v2050_v23  ;;  %17845 = vst [vmem:[#allocation41_spill] sm:$0xff] %v15128_v62  ;;  %4416 = vst [vmem:[#allocation2 + $0x90] sm:$0xff] %v15119_v59  ;;  %v15134_v43 = vld [vmem:[#allocation2 + $0xa2] sm:$0xff] }
 0x1fc   :  { %17841 = vst [vmem:[#allocation51_spill] sm:$0xff] %v15100_v4  ;;  %v2051_v57 = vmul.f32 %v14991_v28, %v15100_v4  ;;  %v15106_v42 = vadd.f32 %v2001_v47, %v1824_v30  ;;  %v2095_v49 = vpack.c.bf16 %v2084_v40, %v2083_v11  ;;  %v2071_v14 = vadd.f32 %v15016_v39, %v2048_v10  ;;  %v13671_v44 = vld [vmem:[#allocation12 + $0x90] sm:$0xff]  }
 0x1fd   :  { %v2089_v24 = vmax.f32 %v2073_v13, 0.0  ;;  %12319 = vmatpush3.bf16.msra.mxu1 %v13652_v53  ;;  %4417 = vst [vmem:[#allocation2 + $0x98] sm:$0x3] %v15119_v59  ;;  %4418 = vst [vmem:[#allocation2 + $0xa0] sm:$0xff] %v15119_v59 }
 0x1fe   :  { %17842 = vst [vmem:[#allocation34_spill] sm:$0xff] %v15106_v42  ;;  %v2049_v18 = vmul.f32 %v14991_v28, %v15106_v42  ;;  %v2074_v3 = vadd.f32 %v15016_v39, %v2051_v57  ;;  %12272 = vmatprep.mubr.bf16.mxu1 %v2095_v49  ;;  %v2087_v26 = vmax.f32 %v2071_v14, 0.0  ;;  %v13651_v28 = vld [vmem:[#allocation12 + $0x60] sm:$0xff]   ;;  %4419 = vst [vmem:[#allocation2 + $0xa8] sm:$0x3] %v15119_v59 }
 0x1ff   :  { %12273 = vmatmul.mubr.bf16.gmra.mxu1 %v2096_v22  ;;  %12286 = vmatprep.subr.bf16.mxu0 %v13651_v28  ;;  %17846 = vst [vmem:[#allocation52_spill] sm:$0xff] %v15138_v61  ;;  %17847 = vst [vmem:[#allocation54_spill] sm:$0xff] %v15140_v56 }
 0x200   :  { %v2072_v51 = vadd.f32 %v15016_v39, %v2049_v18  ;;  %v2090_v50 = vmax.f32 %v2074_v3, 0.0  ;;  %12287 = vmatpush3.bf16.msra.mxu0 %v13651_v28  ;;  %v13654_v39 = vld [vmem:[#allocation12 + $0x18] sm:$0xff]   ;;  %4436 = vst [vmem:[#allocation2 + $0x130] sm:$0xff] %v15119_v59  ;;  %4437 = vst [vmem:[#allocation2 + $0x138] sm:$0x3] %v15119_v59 }
 0x201   :  { %12288 = vmatprep.subr.bf16.mxu0 %v13653_v7  ;;  %12320 = vmatprep.subr.bf16.mxu1 %v13654_v39 }
 0x202   :  { %v2088_v48 = vmax.f32 %v2072_v51, 0.0  ;;  %v2098_v20 = vpack.c.bf16 %v2090_v50, %v2089_v24  ;;  %12321 = vmatpush3.bf16.msra.mxu1 %v13654_v39 }
 0x203   :  { %12322 = vmatprep.subr.bf16.mxu1 %v13656_v2 }
 0x204   :  { %v2097_v6 = vpack.c.bf16 %v2088_v48, %v2087_v26  ;;  %12289 = vmatpush3.bf16.msra.mxu0 %v13653_v7  ;;  %v13663_v26 = vld [vmem:[#allocation12 + $0xb0] sm:$0xff]  }
 0x205   :  { %12290 = vmatprep.subr.bf16.mxu0 %v13655_v9 }
 0x206   :  { %12276 = vmatprep.mubr.bf16.mxu1 %v2097_v6  ;;  %12323 = vmatpush3.bf16.msra.mxu1 %v13656_v2 }
 0x207   :  { %12277 = vmatmul.mubr.bf16.gmra.mxu1 %v2098_v20  ;;  %12324 = vmatprep.subr.bf16.mxu1 %v13658_v0 }
 0x208   :  { %12291 = vmatpush3.bf16.msra.mxu0 %v13655_v9 }
 0x209   :  { %12292 = vmatprep.subr.bf16.mxu0 %v13657_v15 }
 0x20a   :  { %12325 = vmatpush3.bf16.msra.mxu1 %v13658_v0  ;;  %v13665_v0 = vld [vmem:[#allocation12 + $0xa8] sm:$0xff]  }
 0x20b   :  { %12326 = vmatprep.subr.bf16.mxu1 %v13660_v54 }
 0x20c   :  { %12293 = vmatpush3.bf16.msra.mxu0 %v13657_v15 }
 0x20d   :  { %12294 = vmatprep.subr.bf16.mxu0 %v13659_v46 }
 0x20e   :  { %12327 = vmatpush3.bf16.msra.mxu1 %v13660_v54 }
 0x20f   :  { %12376 = vmatprep.subr.bf16.mxu1 %v15123_v55 }
 0x210   :  { %12295 = vmatpush3.bf16.msra.mxu0 %v13659_v46 }
 0x211   :  { %12344 = vmatprep.subr.bf16.mxu0 %v15114_v19 }
 0x2af   :  { %v12266_v5 = vpop.f32.mrf.mxu1 }
 0x2b0   :  { %v2213_v60 = vadd.f32 %v12266_v5, %v15144_v12 }
 0x2b1   :  { %v2204_v52 = vpop.f32.mrf.mxu1 }
 0x2b2   :  { %v15147_v36 = vmax.f32 %v2213_v60, 0.0  ;;  %v2205_v30 = vadd.f32 %v15144_v12, %v2204_v52 }
 0x2b3   :  { %v12267_v10 = vpop.f32.mrf.mxu1 }
 0x2b4   :  { %2325 = vst [vmem:[#allocation2 + $0x31] sm:$0xff] %v15147_v36  ;;  %v15151_v34 = vmax.f32 %v2205_v30, 0.0  ;;  %v2216_v47 = vadd.f32 %v12267_v10, %v15144_v12 }
 0x2b5   :  { %v2207_v11 = vpop.f32.mrf.mxu1 }
 0x2b6   :  { %2323 = vst [vmem:[#allocation2 + $0x11] sm:$0xff] %v15151_v34  ;;  %v15155_v40 = vmax.f32 %v2216_v47, 0.0  ;;  %v2208_v23 = vadd.f32 %v15144_v12, %v2207_v11  ;;  %v2395_v57 = vpack.c.bf16 %v15151_v34, %v2379_v1 }
 0x2b7   :  { %v12270_v41 = vpop.f32.mrf.mxu1 }
 0x2b8   :  { %2326 = vst [vmem:[#allocation2 + $0x41] sm:$0xff] %v15155_v40  ;;  %v15160_v49 = vmax.f32 %v2208_v23, 0.0  ;;  %v2229_v18 = vadd.f32 %v12270_v41, %v15144_v12  ;;  %12296 = vmatprep.mubr.bf16.mxu0 %v2395_v57 }
 0x2b9   :  { %v2220_v14 = vpop.f32.mrf.mxu1 }
 0x2ba   :  { %2324 = vst [vmem:[#allocation2 + $0x21] sm:$0xff] %v15160_v49  ;;  %v2273_v3 = vmax.f32 %v2229_v18, 0.0  ;;  %v2221_v51 = vadd.f32 %v15144_v12, %v2220_v14  ;;  %v2396_v13 = vpack.c.bf16 %v15147_v36, %v15160_v49  ;;  %v13664_v14 = vld [vmem:[#allocation12 + $0xf0] sm:$0xff]  }
 0x2bb   :  { %v12271_v48 = vpop.f32.mrf.mxu1  ;;  %v15169_v50 = vld [vmem:[#allocation2 + $0x30] sm:$0xff] }
 0x2bc   :  { %v15171_v6 = vld [vmem:[#allocation2 + $0x32] sm:$0xff]  ;;  %2329 = vst [vmem:[#allocation2 + $0x71] sm:$0xff] %v2273_v3  ;;  %v15175_v20 = vmax.f32 %v2221_v51, 0.0  ;;  %v2232_v28 = vadd.f32 %v12271_v48, %v15144_v12  ;;  %12297 = vmatmul.mubr.bf16.vlgmr.msra.gmra.mxu0 %v2396_v13 }
 0x2bd   :  { %v15173_v24 = vld [vmem:[#allocation2 + $0x31] sm:$0xff]  ;;  %v2223_v7 = vpop.f32.mrf.mxu1  ;;  %12345 = vmatpush3.bf16.msra.mxu0 %v15114_v19 }
 0x2be   :  { %4404 = vst [vmem:[#allocation2 + $0x30] sm:$0xff] %v15119_v59  ;;  %4405 = vst [vmem:[#allocation2 + $0x38] sm:$0x3] %v15119_v59  ;;  %v15180_v53 = vld [vmem:[#allocation2 + $0x10] sm:$0xff]  ;;  %v2274_v39 = vmax.f32 %v2232_v28, 0.0  ;;  %v2224_v15 = vadd.f32 %v15144_v12, %v2223_v7  ;;  %v2397_v46 = vpack.c.bf16 %v15175_v20, %v15155_v40  ;;  %12346 = vmatprep.subr.bf16.mxu0 %v13663_v26 }
 0x2bf   :  { %v15183_v9 = vld [vmem:[#allocation2 + $0x12] sm:$0xff]  ;;  %2327 = vst [vmem:[#allocation2 + $0x51] sm:$0xff] %v15175_v20  ;;  %v2355_v2 = vpack.c.bf16 %v15180_v53, %v15119_v59  ;;  %v12274_v19 = vpop.f32.mrf.mxu1  ;;  %v15193_v1 = vld [vmem:[#allocation2 + $0x40] sm:$0xff] }
 0x2c0   :  { %4401 = vst [vmem:[#allocation2 + $0x18] sm:$0x3] %v15119_v59  ;;  %4400 = vst [vmem:[#allocation2 + $0x10] sm:$0xff] %v15119_v59  ;;  %v15195_v54 = vld [vmem:[#allocation2 + $0x42] sm:$0xff]  ;;  %v15199_v60 = vmax.f32 %v2224_v15, 0.0  ;;  %v2245_v52 = vadd.f32 %v12274_v19, %v15144_v12  ;;  %12300 = vmatprep.mubr.bf16.mxu0 %v2397_v46  ;;  %v15208_v11 = vpack.c.bf16 %v2274_v39, %v2273_v3  ;;  %v13667_v13 = vld [vmem:[#allocation12 + $0xa0] sm:$0xff]  }
 0x2c1   :  { %v15197_v5 = vld [vmem:[#allocation2 + $0x41] sm:$0xff]  ;;  %2330 = vst [vmem:[#allocation2 + $0x81] sm:$0xff] %v2274_v39  ;;  %12328 = vmatprep.mubr.bf16.mxu1 %v2355_v2  ;;  %v2236_v30 = vpop.f32.mrf.mxu1  ;;  %12347 = vmatpush3.bf16.msra.mxu0 %v13663_v26  ;;  %v2726_v35 = vpack.c.bf16 %v15183_v9, %v15117_v17 }
 0x2c2   :  { %4406 = vst [vmem:[#allocation2 + $0x40] sm:$0xff] %v15119_v59  ;;  %4407 = vst [vmem:[#allocation2 + $0x48] sm:$0x3] %v15119_v59  ;;  %v15204_v10 = vld [vmem:[#allocation2 + $0x20] sm:$0xff]  ;;  %v15213_v57 = vmax.f32 %v2245_v52, 0.0  ;;  %v2237_v41 = vadd.f32 %v15144_v12, %v2236_v30  ;;  %v2398_v51 = vpack.c.bf16 %v2273_v3, %v15199_v60  ;;  %12348 = vmatprep.subr.bf16.mxu0 %v13665_v0 }
 0x2c3   :  { %v15206_v47 = vld [vmem:[#allocation2 + $0x22] sm:$0xff]  ;;  %2328 = vst [vmem:[#allocation2 + $0x61] sm:$0xff] %v15199_v60  ;;  %v15218_v18 = vpack.c.bf16 %v15169_v50, %v15204_v10  ;;  %v12275_v26 = vpop.f32.mrf.mxu1  ;;  %v15223_v48 = vld [vmem:[#allocation2 + $0x70] sm:$0xff] }
 0x2c4   :  { %v15210_v23 = vld [vmem:[#allocation2 + $0x21] sm:$0xff]  ;;  %v15225_v28 = vld [vmem:[#allocation2 + $0x72] sm:$0xff]  ;;  %2333 = vst [vmem:[#allocation2 + $0xd1] sm:$0xff] %v15213_v57  ;;  %v15230_v39 = vmax.f32 %v2237_v41, 0.0  ;;  %v2248_v15 = vadd.f32 %v12275_v26, %v15144_v12  ;;  %12301 = vmatmul.mubr.bf16.gmra.mxu0 %v2398_v51 }
 0x2c5   :  { %4402 = vst [vmem:[#allocation2 + $0x20] sm:$0xff] %v15119_v59  ;;  %4403 = vst [vmem:[#allocation2 + $0x28] sm:$0x3] %v15119_v59  ;;  %v15227_v7 = vld [vmem:[#allocation2 + $0x71] sm:$0xff]  ;;  %12329 = vmatmul.mubr.bf16.vlgmr.msra.gmra.mxu1 %v15218_v18  ;;  %v2239_v3 = vpop.f32.mrf.mxu1  ;;  %12349 = vmatpush3.bf16.msra.mxu0 %v13665_v0  ;;  %v13669_v0 = vld [vmem:[#allocation12 + $0x98] sm:$0xff]  }
 0x2c6   :  { %17848 = vst [vmem:[#allocation55_spill] sm:$0xff] %v15227_v7  ;;  %4413 = vst [vmem:[#allocation2 + $0x78] sm:$0x3] %v15119_v59  ;;  %12377 = vmatpush3.bf16.msra.mxu1 %v15123_v55  ;;  %v15237_v2 = vld [vmem:[#allocation2 + $0x50] sm:$0xff]  ;;  %v15244_v52 = vmax.f32 %v2248_v15, 0.0  ;;  %v2240_v30 = vadd.f32 %v15144_v12, %v2239_v3  ;;  %v2399_v55 = vpack.c.bf16 %v15230_v39, %v15132_v25  ;;  %12350 = vmatprep.subr.bf16.mxu0 %v13667_v13 }
 0x2c7   :  { %4412 = vst [vmem:[#allocation2 + $0x70] sm:$0xff] %v15119_v59  ;;  %v15239_v46 = vld [vmem:[#allocation2 + $0x52] sm:$0xff]  ;;  %2331 = vst [vmem:[#allocation2 + $0xb1] sm:$0xff] %v15230_v39  ;;  %v15249_v41 = vpack.c.bf16 %v15237_v2, %v15193_v1  ;;  %12378 = vmatprep.subr.bf16.mxu1 %v13664_v14  ;;  %v12278_v26 = vpop.f32.mrf.mxu1 }
 0x2c8   :  { %v15241_v19 = vld [vmem:[#allocation2 + $0x51] sm:$0xff]  ;;  %v15255_v15 = vld [vmem:[#allocation2 + $0x80] sm:$0xff]  ;;  %2334 = vst [vmem:[#allocation2 + $0xe1] sm:$0xff] %v15244_v52  ;;  %v15262_v56 = vmax.f32 %v2240_v30, 0.0  ;;  %v2261_v58 = vadd.f32 %v12278_v26, %v15144_v12  ;;  %12304 = vmatprep.mubr.bf16.mxu0 %v2399_v55 }
 0x2c9   :  { %v13666_v51 = vld [vmem:[#allocation12 + $0xe8] sm:$0xff]   ;;  %4408 = vst [vmem:[#allocation2 + $0x50] sm:$0xff] %v15119_v59  ;;  %4409 = vst [vmem:[#allocation2 + $0x58] sm:$0x3] %v15119_v59  ;;  %v15257_v22 = vld [vmem:[#allocation2 + $0x82] sm:$0xff]  ;;  %12332 = vmatprep.mubr.bf16.mxu1 %v15249_v41  ;;  %v2252_v25 = vpop.f32.mrf.mxu1  ;;  %12351 = vmatpush3.bf16.msra.mxu0 %v13667_v13 }
 0x2ca   :  { %v15259_v3 = vld [vmem:[#allocation2 + $0x81] sm:$0xff]  ;;  %12379 = vmatpush3.bf16.msra.mxu1 %v13664_v14  ;;  %2332 = vst [vmem:[#allocation2 + $0xc1] sm:$0xff] %v15262_v56  ;;  %v15277_v26 = vmax.f32 %v2261_v58, 0.0  ;;  %v2253_v55 = vadd.f32 %v15144_v12, %v2252_v25  ;;  %v13668_v14 = vld [vmem:[#allocation12 + $0xe0] sm:$0xff]   ;;  %v2400_v13 = vpack.c.bf16 %v15213_v57, %v15262_v56  ;;  %12352 = vmatprep.subr.bf16.mxu0 %v13669_v0 }
 0x2cb   :  { %17849 = vst [vmem:[#allocation43_spill] sm:$0xff] %v15259_v3  ;;  %4415 = vst [vmem:[#allocation2 + $0x88] sm:$0x3] %v15119_v59  ;;  %v15268_v4 = vld [vmem:[#allocation2 + $0x60] sm:$0xff]  ;;  %12380 = vmatprep.subr.bf16.mxu1 %v13666_v51  ;;  %v12279_v30 = vpop.f32.mrf.mxu1  ;;  %v15288_v58 = vld [vmem:[#allocation2 + $0xd0] sm:$0xff] }
 0x2cc   :  { %4414 = vst [vmem:[#allocation2 + $0x80] sm:$0xff] %v15119_v59  ;;  %v15270_v37 = vld [vmem:[#allocation2 + $0x62] sm:$0xff]  ;;  %v15282_v42 = vpack.c.bf16 %v15223_v48, %v15268_v4  ;;  %v15290_v62 = vld [vmem:[#allocation2 + $0xd2] sm:$0xff]  ;;  %2337 = vst [vmem:[#allocation2 + $0x111] sm:$0xff] %v15277_v26  ;;  %v15295_v45 = vmax.f32 %v2253_v55, 0.0  ;;  %v2264_v31 = vadd.f32 %v12279_v30, %v15144_v12  ;;  %12305 = vmatmul.mubr.bf16.gmra.mxu0 %v2400_v13 }
 0x2cd   :  { %v15274_v38 = vld [vmem:[#allocation2 + $0x61] sm:$0xff]  ;;  %v15292_v25 = vld [vmem:[#allocation2 + $0xd1] sm:$0xff]  ;;  %v2255_v21 = vpop.f32.mrf.mxu1  ;;  %12353 = vmatpush3.bf16.msra.mxu0 %v13669_v0 }
 0x2ce   :  { %17850 = vst [vmem:[#allocation45_spill] sm:$0xff] %v15274_v38  ;;  %4411 = vst [vmem:[#allocation2 + $0x68] sm:$0x3] %v15119_v59  ;;  %12333 = vmatmul.mubr.bf16.gmra.mxu1 %v15282_v42  ;;  %v15301_v8 = vld [vmem:[#allocation2 + $0xb0] sm:$0xff]  ;;  %v2282_v55 = vmax.f32 %v2264_v31, 0.0  ;;  %v2256_v27 = vadd.f32 %v15144_v12, %v2255_v21  ;;  %v13670_v13 = vld [vmem:[#allocation12 + $0xd8] sm:$0xff]   ;;  %v2401_v32 = vpack.c.bf16 %v15295_v45, %v15244_v52  ;;  %12354 = vmatprep.subr.bf16.mxu0 %v13671_v44 }
 0x2cf   :  { %4410 = vst [vmem:[#allocation2 + $0x60] sm:$0xff] %v15119_v59  ;;  %17851 = vst [vmem:[#allocation39_spill] sm:$0xff] %v15292_v25  ;;  %12381 = vmatpush3.bf16.msra.mxu1 %v13666_v51  ;;  %v15303_v61 = vld [vmem:[#allocation2 + $0xb2] sm:$0xff]  ;;  %v2359_v30 = vpack.c.bf16 %v15301_v8, %v15119_v59  ;;  %v15313_v0 = vld [vmem:[#allocation2 + $0xe0] sm:$0xff] }
 0x2d0   :  { %4425 = vst [vmem:[#allocation2 + $0xd8] sm:$0x3] %v15119_v59  ;;  %4424 = vst [vmem:[#allocation2 + $0xd0] sm:$0xff] %v15119_v59  ;;  %12382 = vmatprep.subr.bf16.mxu1 %v13668_v14  ;;  %v13673_v51 = vld [vmem:[#allocation12 + $0x88] sm:$0xff]   ;;  %v15315_v29 = vld [vmem:[#allocation2 + $0xe2] sm:$0xff]  ;;  %v15319_v21 = vmax.f32 %v2256_v27, 0.0  ;;  %12308 = vmatprep.mubr.bf16.mxu0 %v2401_v32  ;;  %v15322_v12 = vpack.c.bf16 %v2282_v55, %v15277_v26 }
 0x2d1   :  { %2335 = vst [vmem:[#allocation2 + $0xf1] sm:$0xff] %v15295_v45  ;;  %4421 = vst [vmem:[#allocation2 + $0xb8] sm:$0x3] %v15119_v59  ;;  %v15317_v31 = vld [vmem:[#allocation2 + $0xe1] sm:$0xff]  ;;  %12336 = vmatprep.mubr.bf16.mxu1 %v2359_v30  ;;  %12355 = vmatpush3.bf16.msra.mxu0 %v13671_v44  ;;  %v13675_v30 = vld [vmem:[#allocation12 + $0x80] sm:$0xff]  }
 0x2d2   :  { %4420 = vst [vmem:[#allocation2 + $0xb0] sm:$0xff] %v15119_v59  ;;  %17852 = vst [vmem:[#allocation40_spill] sm:$0xff] %v15317_v31  ;;  %v15326_v63 = vld [vmem:[#allocation2 + $0xc0] sm:$0xff]  ;;  %12356 = vmatprep.subr.bf16.mxu0 %v13673_v51  ;;  %v13676_v7 = vld [vmem:[#allocation12 + $0xc0] sm:$0xff]  }
 0x2d3   :  { %2338 = vst [vmem:[#allocation2 + $0x121] sm:$0xff] %v2282_v55  ;;  %4427 = vst [vmem:[#allocation2 + $0xe8] sm:$0x3] %v15119_v59  ;;  %12383 = vmatpush3.bf16.msra.mxu1 %v13668_v14  ;;  %v15328_v33 = vld [vmem:[#allocation2 + $0xc2] sm:$0xff]  ;;  %v15333_v27 = vpack.c.bf16 %v15288_v58, %v15326_v63  ;;  %v2402_v55 = vpack.c.bf16 %v15277_v26, %v15319_v21  ;;  %v15339_v44 = vld [vmem:[#allocation2 + $0x110] sm:$0xff] }
 0x2d4   :  { %4426 = vst [vmem:[#allocation2 + $0xe0] sm:$0xff] %v15119_v59  ;;  %2336 = vst [vmem:[#allocation2 + $0x101] sm:$0xff] %v15319_v21  ;;  %12384 = vmatprep.subr.bf16.mxu1 %v13670_v13  ;;  %v13672_v32 = vld [vmem:[#allocation12 + $0xd0] sm:$0xff]   ;;  %v15341_v14 = vld [vmem:[#allocation2 + $0x112] sm:$0xff] }
 0x2d5   :  { %17853 = vst [vmem:[#allocation42_spill] sm:$0xff] %v15333_v27  ;;  %4423 = vst [vmem:[#allocation2 + $0xc8] sm:$0x3] %v15119_v59  ;;  %v15343_v31 = vld [vmem:[#allocation2 + $0x111] sm:$0xff]  ;;  %12309 = vmatmul.mubr.bf16.gmra.mxu0 %v2402_v55  ;;  %v13677_v55 = vld [vmem:[#allocation12 + $0x138] sm:$0xff]  }
 0x2d6   :  { %4422 = vst [vmem:[#allocation2 + $0xc0] sm:$0xff] %v15119_v59  ;;  %17854 = vst [vmem:[#allocation44_spill] sm:$0xff] %v15343_v31  ;;  %12337 = vmatmul.mubr.bf16.gmra.mxu1 %v15333_v27  ;;  %12357 = vmatpush3.bf16.msra.mxu0 %v13673_v51  ;;  %v13674_v31 = vld [vmem:[#allocation12 + $0xc8] sm:$0xff]   ;;  %v13678_v38 = vld [vmem:[#allocation12 + $0x178] sm:$0xff]  }
 0x2d7   :  { %4433 = vst [vmem:[#allocation2 + $0x118] sm:$0x3] %v15119_v59  ;;  %4432 = vst [vmem:[#allocation2 + $0x110] sm:$0xff] %v15119_v59  ;;  %12385 = vmatpush3.bf16.msra.mxu1 %v13670_v13  ;;  %12360 = vmatprep.mubr.bf16.mxu0 %v2726_v35 }
 0x2d8   :  { %v15350_v26 = vld [vmem:[#allocation2 + $0xf0] sm:$0xff]  ;;  %12386 = vmatprep.subr.bf16.mxu1 %v13672_v32  ;;  %12358 = vmatprep.subr.bf16.mxu0 %v13675_v30 }
 0x2d9   :  { %v15352_v25 = vld [vmem:[#allocation2 + $0xf2] sm:$0xff]  ;;  %v15356_v16 = vpack.c.bf16 %v15350_v26, %v15313_v0 }
 0x2da   :  { %4429 = vst [vmem:[#allocation2 + $0xf8] sm:$0x3] %v15119_v59  ;;  %4428 = vst [vmem:[#allocation2 + $0xf0] sm:$0xff] %v15119_v59  ;;  %v15360_v17 = vld [vmem:[#allocation2 + $0x120] sm:$0xff]  ;;  %12359 = vmatpush3.bf16.msra.mxu0 %v13675_v30  ;;  %v15389_v30 = vpack.c.bf16 %v15239_v46, %v15195_v54 }
 0x2db   :  { %17855 = vst [vmem:[#allocation46_spill] sm:$0xff] %v15356_v16  ;;  %v15362_v13 = vld [vmem:[#allocation2 + $0x122] sm:$0xff]  ;;  %12340 = vmatprep.mubr.bf16.mxu1 %v15356_v16  ;;  %12387 = vmatpush3.bf16.msra.mxu1 %v13672_v32  ;;  %v2928_v32 = vpack.c.bf16 %v15204_v10, %v15180_v53  ;;  %v2929_v53 = vpack.c.bf16 %v15193_v1, %v15169_v50  ;;  %v13682_v1 = vld [vmem:[#allocation12 + $0x168] sm:$0xff]  }
 0x2dc   :  { %v15364_v51 = vld [vmem:[#allocation2 + $0x121] sm:$0xff]  ;;  %12388 = vmatprep.subr.bf16.mxu1 %v13674_v31  ;;  %12408 = vmatprep.subr.bf16.mxu0 %v13677_v55  ;;  %v2730_v50 = vpack.c.bf16 %v15303_v61, %v15134_v43  ;;  %v2932_v43 = vpack.c.bf16 %v15326_v63, %v15301_v8  ;;  %v2933_v63 = vpack.c.bf16 %v15313_v0, %v15288_v58  ;;  %v13690_v0 = vld [vmem:[#allocation12 + $0x148] sm:$0xff]  }
 0x2dd   :  { %17856 = vst [vmem:[#allocation29_spill] sm:$0xff] %v15364_v51  ;;  %4435 = vst [vmem:[#allocation2 + $0x128] sm:$0x3] %v15119_v59  ;;  %v15369_v35 = vld [vmem:[#allocation2 + $0x100] sm:$0xff]  ;;  %v15379_v51 = vpack.c.bf16 %v15171_v6, %v15206_v47  ;;  %v3130_v58 = vpack.c.bf16 %v15160_v49, %v15151_v34  ;;  %v3132_v49 = vpack.c.bf16 %v15199_v60, %v15175_v20  ;;  %v13699_v20 = vld [vmem:[#allocation12 + $0x1a0] sm:$0xff]  }
 0x2de   :  { %4434 = vst [vmem:[#allocation2 + $0x120] sm:$0xff] %v15119_v59  ;;  %v15371_v3 = vld [vmem:[#allocation2 + $0x102] sm:$0xff]  ;;  %v15375_v27 = vpack.c.bf16 %v15339_v44, %v15369_v35  ;;  %v3336_v60 = vpack.c.bf16 %v15328_v33, %v15303_v61 }
 0x2df   :  { %17858 = vst [vmem:[#allocation59_spill] sm:$0xff] %v15379_v51  ;;  %4431 = vst [vmem:[#allocation2 + $0x108] sm:$0x3] %v15119_v59  ;;  %12361 = vmatmul.mubr.bf16.vlgmr.msra.gmra.mxu0 %v15379_v51  ;;  %v13679_v16 = vld [vmem:[#allocation12 + $0x130] sm:$0xff]   ;;  %12389 = vmatpush3.bf16.msra.mxu1 %v13674_v31  ;;  %v15396_v51 = vpack.c.bf16 %v15225_v28, %v15270_v37  ;;  %v2930_v31 = vpack.c.bf16 %v15268_v4, %v15237_v2 }
 0x2e0   :  { %17857 = vst [vmem:[#allocation58_spill] sm:$0xff] %v15375_v27  ;;  %4430 = vst [vmem:[#allocation2 + $0x100] sm:$0xff] %v15119_v59  ;;  %12341 = vmatmul.mubr.bf16.gmra.mxu1 %v15375_v27  ;;  %12390 = vmatprep.subr.bf16.mxu1 %v13676_v7  ;;  %v13680_v10 = vld [vmem:[#allocation12 + $0x170] sm:$0xff]   ;;  %v13681_v27 = vld [vmem:[#allocation12 + $0x128] sm:$0xff]   ;;  %v2931_v4 = vpack.c.bf16 %v15255_v15, %v15223_v48  ;;  %v15414_v48 = vpack.c.bf16 %v15352_v25, %v15315_v29 }
 0x2e1   :  { %12392 = vmatprep.mubr.bf16.mxu1 %v2928_v32  ;;  %12364 = vmatprep.mubr.bf16.mxu0 %v15389_v30  ;;  %v13687_v2 = vld [vmem:[#allocation12 + $0x110] sm:$0xff]   ;;  %v15421_v32 = vpack.c.bf16 %v15341_v14, %v15371_v3 }
 0x2e2   :  { %12409 = vmatpush3.bf16.msra.mxu0 %v13677_v55  ;;  %v13683_v55 = vld [vmem:[#allocation12 + $0x120] sm:$0xff]   ;;  %v13688_v8 = vld [vmem:[#allocation12 + $0x150] sm:$0xff]  }
 0x2e3   :  { %12410 = vmatprep.subr.bf16.mxu0 %v13679_v16  ;;  %12391 = vmatpush3.bf16.msra.mxu1 %v13676_v7  ;;  %v15407_v7 = vpack.c.bf16 %v15290_v62, %v15328_v33  ;;  %v13695_v34 = vld [vmem:[#allocation12 + $0x1b0] sm:$0xff]   ;;  %v3337_v33 = vpack.c.bf16 %v15315_v29, %v15290_v62  ;;  %v13709_v29 = vld [vmem:[#allocation12 + $0x238] sm:$0xff]   ;;  %v3339_v62 = vpack.c.bf16 %v15362_v13, %v15341_v14 }
 0x2e4   :  { %12440 = vmatprep.subr.bf16.mxu1 %v13678_v38  ;;  %v13704_v61 = vld [vmem:[#allocation12 + $0x1d0] sm:$0xff]   ;;  %v3737_v14 = vpack.c.bf16 %v15241_v19, %v15197_v5  ;;  %v13717_v5 = vld [vmem:[#allocation12 + $0x218] sm:$0xff]   ;;  %v17864_v19 = vld [vmem:[#allocation43_spill] sm:$0xff] }
 0x2e6   :  { %12411 = vmatpush3.bf16.msra.mxu0 %v13679_v16  ;;  %v13684_v16 = vld [vmem:[#allocation12 + $0x160] sm:$0xff]  }
 0x2e7   :  { %12365 = vmatmul.mubr.bf16.gmra.mxu0 %v15396_v51  ;;  %12412 = vmatprep.subr.bf16.mxu0 %v13681_v27 }
 0x2e8   :  { %12393 = vmatmul.mubr.bf16.vlgmr.msra.gmra.mxu1 %v2929_v53  ;;  %12368 = vmatprep.mubr.bf16.mxu0 %v2730_v50  ;;  %v13689_v53 = vld [vmem:[#allocation12 + $0x108] sm:$0xff]   ;;  %v3332_v50 = vpack.c.bf16 %v15206_v47, %v15183_v9  ;;  %v3333_v9 = vpack.c.bf16 %v15195_v54, %v15171_v6  ;;  %v13696_v47 = vld [vmem:[#allocation12 + $0x1f0] sm:$0xff]   ;;  %v13701_v6 = vld [vmem:[#allocation12 + $0x198] sm:$0xff]  }
 0x2e9   :  { %12396 = vmatprep.mubr.bf16.mxu1 %v2930_v31  ;;  %12441 = vmatpush3.bf16.msra.mxu1 %v13678_v38  ;;  %v13685_v38 = vld [vmem:[#allocation12 + $0x118] sm:$0xff]   ;;  %v13691_v31 = vld [vmem:[#allocation12 + $0x100] sm:$0xff]  }
 0x2ea   :  { %12442 = vmatprep.subr.bf16.mxu1 %v13680_v10  ;;  %12413 = vmatpush3.bf16.msra.mxu0 %v13681_v27  ;;  %v13686_v27 = vld [vmem:[#allocation12 + $0x158] sm:$0xff]   ;;  %v13700_v54 = vld [vmem:[#allocation12 + $0x1e0] sm:$0xff]  }
 0x2eb   :  { %12414 = vmatprep.subr.bf16.mxu0 %v13683_v55 }
 0x2ed   :  { %12443 = vmatpush3.bf16.msra.mxu1 %v13680_v10  ;;  %v2934_v10 = vpack.c.bf16 %v15369_v35, %v15350_v26  ;;  %v2935_v26 = vpack.c.bf16 %v15360_v17, %v15339_v44  ;;  %v13692_v35 = vld [vmem:[#allocation12 + $0x140] sm:$0xff]   ;;  %v13694_v44 = vld [vmem:[#allocation12 + $0x1f8] sm:$0xff]  }
 0x2ee   :  { %12444 = vmatprep.subr.bf16.mxu1 %v13682_v1  ;;  %12415 = vmatpush3.bf16.msra.mxu0 %v13683_v55  ;;  %v13693_v55 = vld [vmem:[#allocation12 + $0x1b8] sm:$0xff]  }
 0x2ef   :  { %12369 = vmatmul.mubr.bf16.gmra.mxu0 %v15407_v7  ;;  %12416 = vmatprep.subr.bf16.mxu0 %v13685_v38 }
 0x2f0   :  { %12397 = vmatmul.mubr.bf16.gmra.mxu1 %v2931_v4  ;;  %12372 = vmatprep.mubr.bf16.mxu0 %v15414_v48  ;;  %v13697_v4 = vld [vmem:[#allocation12 + $0x1a8] sm:$0xff]  }
 0x2f1   :  { %12400 = vmatprep.mubr.bf16.mxu1 %v2932_v43  ;;  %12445 = vmatpush3.bf16.msra.mxu1 %v13682_v1  ;;  %v17859_v1 = vpack.c.bf16 %v15155_v40, %v15147_v36  ;;  %v3134_v36 = vpack.c.bf16 %v15262_v56, %v15230_v39  ;;  %v13698_v40 = vld [vmem:[#allocation12 + $0x1e8] sm:$0xff]   ;;  %v13703_v39 = vld [vmem:[#allocation12 + $0x190] sm:$0xff]   ;;  %v3338_v43 = vpack.c.bf16 %v15371_v3, %v15352_v25 }
 0x2f2   :  { %12446 = vmatprep.subr.bf16.mxu1 %v13684_v16  ;;  %12417 = vmatpush3.bf16.msra.mxu0 %v13685_v38  ;;  %v13705_v38 = vld [vmem:[#allocation12 + $0x188] sm:$0xff]   ;;  %v3736_v3 = vpack.c.bf16 %v15173_v24, %v15210_v23  ;;  %v13711_v25 = vld [vmem:[#allocation12 + $0x230] sm:$0xff]  }
 0x2f3   :  { %12418 = vmatprep.subr.bf16.mxu0 %v13687_v2  ;;  %v13712_v24 = vld [vmem:[#allocation9 + $0x70] sm:$0xff]  }
 0x2f4   :  { %v17861_v23 = vld [vmem:[#allocation45_spill] sm:$0xff] }
 0x2f5   :  { %12447 = vmatpush3.bf16.msra.mxu1 %v13684_v16  ;;  %v3334_v16 = vpack.c.bf16 %v15270_v37, %v15239_v46  ;;  %v3335_v37 = vpack.c.bf16 %v15257_v22, %v15225_v28  ;;  %v17860_v46 = vpack.c.bf16 %v15244_v52, %v15213_v57  ;;  %v13702_v28 = vld [vmem:[#allocation12 + $0x1d8] sm:$0xff]   ;;  %v13706_v57 = vld [vmem:[#allocation12 + $0x1c8] sm:$0xff]   ;;  %v13708_v52 = vld [vmem:[#allocation12 + $0x1c0] sm:$0xff]  }
 0x2f6   :  { %12448 = vmatprep.subr.bf16.mxu1 %v13686_v27  ;;  %12419 = vmatpush3.bf16.msra.mxu0 %v13687_v2  ;;  %v13707_v2 = vld [vmem:[#allocation12 + $0x180] sm:$0xff]  }
 0x2f7   :  { %12373 = vmatmul.mubr.bf16.gmra.mxu0 %v15421_v32  ;;  %12420 = vmatprep.subr.bf16.mxu0 %v13689_v53 }
 0x2f8   :  { %12401 = vmatmul.mubr.bf16.gmra.mxu1 %v2933_v63  ;;  %12424 = vmatprep.mubr.bf16.mxu0 %v3130_v58  ;;  %v13716_v58 = vld [vmem:[#allocation9 + $0x60] sm:$0xff]  }
 0x2f9   :  { %12404 = vmatprep.mubr.bf16.mxu1 %v2934_v10  ;;  %12449 = vmatpush3.bf16.msra.mxu1 %v13686_v27  ;;  %v17862_v27 = vld [vmem:[#allocation55_spill] sm:$0xff]  ;;  %v17865_v10 = vld [vmem:[#allocation38_spill] sm:$0xff] }
 0x2fa   :  { %12450 = vmatprep.subr.bf16.mxu1 %v13688_v8  ;;  %12421 = vmatpush3.bf16.msra.mxu0 %v13689_v53  ;;  %v3738_v63 = vpack.c.bf16 %v17862_v27, %v17861_v23  ;;  %v17863_v53 = vld [vmem:[#allocation42_spill] sm:$0xff]  ;;  %v17880_v23 = vld [vmem:[#allocation28_spill] sm:$0xff] }
 0x2fb   :  { %12422 = vmatprep.subr.bf16.mxu0 %v13691_v31 }
 0x2fd   :  { %12451 = vmatpush3.bf16.msra.mxu1 %v13688_v8  ;;  %v13715_v8 = vld [vmem:[#allocation12 + $0x220] sm:$0xff]  }
 0x2fe   :  { %12452 = vmatprep.subr.bf16.mxu1 %v13690_v0  ;;  %12423 = vmatpush3.bf16.msra.mxu0 %v13691_v31  ;;  %v3739_v31 = vpack.c.bf16 %v17865_v10, %v17864_v19  ;;  %v17883_v19 = vld [vmem:[#allocation32_spill] sm:$0xff] }
 0x2ff   :  { %12472 = vmatprep.subr.bf16.mxu0 %v13693_v55 }
 0x300   :  { %12405 = vmatmul.mubr.bf16.gmra.mxu1 %v2935_v26  ;;  %v15476_v26 = vld [vmem:[#allocation6 + $0x1] ss:$0 sm:$0xff] }
 0x301   :  { %12453 = vmatpush3.bf16.msra.mxu1 %v13690_v0  ;;  %12456 = vmatprep.mubr.bf16.mxu1 %v3332_v50  ;;  %v13718_v50 = vld [vmem:[#allocation9 + $0x58] sm:$0xff]   ;;  %v4155_v27 = vmul.f32 %v15476_v26, %v17880_v23  ;;  %v4156_v10 = vmul.f32 %v15476_v26, %v17883_v19 }
 0x302   :  { %12454 = vmatprep.subr.bf16.mxu1 %v13692_v35  ;;  %12425 = vmatmul.mubr.bf16.vlgmr.msra.gmra.mxu0 %v17859_v1  ;;  %v17869_v1 = vld [vmem:[#allocation58_spill] sm:$0xff] }
 0x303   :  { %12428 = vmatprep.mubr.bf16.mxu0 %v3132_v49  ;;  %12473 = vmatpush3.bf16.msra.mxu0 %v13693_v55  ;;  %v13719_v55 = vld [vmem:[#allocation12 + $0x210] sm:$0xff]  }
 0x304   :  { %12474 = vmatprep.subr.bf16.mxu0 %v13695_v34 }
 0x305   :  { %12455 = vmatpush3.bf16.msra.mxu1 %v13692_v35  ;;  %v17867_v35 = vld [vmem:[#allocation46_spill] sm:$0xff] }
 0x306   :  { %12504 = vmatprep.subr.bf16.mxu1 %v13694_v44 }
 0x307   :  { %12475 = vmatpush3.bf16.msra.mxu0 %v13695_v34  ;;  %v17868_v34 = vld [vmem:[#allocation48_spill] sm:$0xff] }
 0x308   :  { %12457 = vmatmul.mubr.bf16.vlgmr.msra.gmra.mxu1 %v3333_v9  ;;  %12476 = vmatprep.subr.bf16.mxu0 %v13697_v4  ;;  %v4149_v49 = vmul.f32 %v15476_v26, %v17868_v34  ;;  %v15484_v9 = vld [vmem:[#allocation8 + $0x1] ss:$0 sm:$0xff] }
 0x309   :  { %12460 = vmatprep.mubr.bf16.mxu1 %v3334_v16  ;;  %12505 = vmatpush3.bf16.msra.mxu1 %v13694_v44  ;;  %v17870_v44 = vld [vmem:[#allocation57_spill] sm:$0xff] }
 0x30a   :  { %12506 = vmatprep.subr.bf16.mxu1 %v13696_v47  ;;  %12429 = vmatmul.mubr.bf16.gmra.mxu0 %v15208_v11  ;;  %v3136_v11 = vpack.c.bf16 %v15319_v21, %v15295_v45 }
 0x30b   :  { %12432 = vmatprep.mubr.bf16.mxu0 %v3134_v36  ;;  %12477 = vmatpush3.bf16.msra.mxu0 %v13697_v4  ;;  %v4148_v4 = vmul.f32 %v15476_v26, %v17870_v44  ;;  %v17872_v36 = vld [vmem:[#allocation44_spill] sm:$0xff] }
 0x30c   :  { %12478 = vmatprep.subr.bf16.mxu0 %v13699_v20 }
 0x30d   :  { %12507 = vmatpush3.bf16.msra.mxu1 %v13696_v47  ;;  %v17871_v47 = vld [vmem:[#allocation40_spill] sm:$0xff] }
 0x30e   :  { %12508 = vmatprep.subr.bf16.mxu1 %v13698_v40  ;;  %v3741_v16 = vpack.c.bf16 %v15295_v45, %v17871_v47 }
 0x30f   :  { %12479 = vmatpush3.bf16.msra.mxu0 %v13699_v20  ;;  %v13720_v20 = vld [vmem:[#allocation9 + $0x50] sm:$0xff]  }
 0x310   :  { %12461 = vmatmul.mubr.bf16.gmra.mxu1 %v3335_v37  ;;  %12480 = vmatprep.subr.bf16.mxu0 %v13701_v6  ;;  %v3541_v37 = vpack.c.bf16 %v15119_v59, %v15360_v17  ;;  %v17876_v17 = vld [vmem:[#allocation56_spill] sm:$0xff] }
 0x311   :  { %12464 = vmatprep.mubr.bf16.mxu1 %v3336_v60  ;;  %12509 = vmatpush3.bf16.msra.mxu1 %v13698_v40  ;;  %v3742_v40 = vpack.c.bf16 %v17872_v36, %v15319_v21  ;;  %v4172_v60 = vadd.f32 %v15484_v9, %v4148_v4  ;;  %v17874_v21 = vld [vmem:[#allocation30_spill] sm:$0xff]  ;;  %v17887_v36 = vld [vmem:[#allocation31_spill] sm:$0xff] }
 0x312   :  { %12510 = vmatprep.subr.bf16.mxu1 %v13700_v54  ;;  %12433 = vmatmul.mubr.bf16.gmra.mxu0 %v17860_v46  ;;  %v4153_v46 = vmul.f32 %v15476_v26, %v17874_v21  ;;  %v17886_v4 = vld [vmem:[#allocation34_spill] sm:$0xff] }
 0x313   :  { %12436 = vmatprep.mubr.bf16.mxu0 %v3136_v11  ;;  %12481 = vmatpush3.bf16.msra.mxu0 %v13701_v6  ;;  %v4173_v6 = vadd.f32 %v15484_v9, %v4149_v49  ;;  %v13722_v11 = vld [vmem:[#allocation9 + $0x48] sm:$0xff]   ;;  %v4161_v47 = vmul.f32 %v15476_v26, %v17886_v4 }
 0x314   :  { %12482 = vmatprep.subr.bf16.mxu0 %v13703_v39  ;;  %v15612_v4 = vld [vmem:[#allocation2 + $0x131] sm:$0xff] }
 0x315   :  { %12511 = vmatpush3.bf16.msra.mxu1 %v13700_v54  ;;  %v13723_v54 = vld [vmem:[#allocation12 + $0x200] sm:$0xff]  }
 0x316   :  { %12512 = vmatprep.subr.bf16.mxu1 %v13702_v28 }
 0x317   :  { %12483 = vmatpush3.bf16.msra.mxu0 %v13703_v39  ;;  %v17873_v39 = vld [vmem:[#allocation47_spill] sm:$0xff] }
 0x318   :  { %12465 = vmatmul.mubr.bf16.gmra.mxu1 %v3337_v33  ;;  %12484 = vmatprep.subr.bf16.mxu0 %v13705_v38  ;;  %v4151_v45 = vmul.f32 %v15476_v26, %v17873_v39  ;;  %v4150_v33 = vmul.f32 %v15476_v26, %v17876_v17 }
 0x319   :  { %12468 = vmatprep.mubr.bf16.mxu1 %v3338_v43  ;;  %12513 = vmatpush3.bf16.msra.mxu1 %v13702_v28  ;;  %v17875_v28 = vld [vmem:[#allocation59_spill] sm:$0xff] }
 0x31a   :  { %12514 = vmatprep.subr.bf16.mxu1 %v13704_v61  ;;  %12437 = vmatmul.mubr.bf16.gmra.mxu0 %v15322_v12  ;;  %v13713_v12 = vld [vmem:[#allocation12 + $0x228] sm:$0xff]  }
 0x31b   :  { %12485 = vmatpush3.bf16.msra.mxu0 %v13705_v38  ;;  %12488 = vmatprep.mubr.bf16.mxu0 %v15218_v18  ;;  %v13710_v18 = vld [vmem:[#allocation9 + $0x78] sm:$0xff]   ;;  %v4189_v38 = vmax.f32 %v4173_v6, 0.0 }
 0x31c   :  { %12486 = vmatprep.subr.bf16.mxu0 %v13707_v2  ;;  %v17888_v6 = vld [vmem:[#allocation53_spill] sm:$0xff] }
 0x31d   :  { %12515 = vmatpush3.bf16.msra.mxu1 %v13704_v61  ;;  %v17877_v61 = vld [vmem:[#allocation49_spill] sm:$0xff] }
 0x31e   :  { %12516 = vmatprep.subr.bf16.mxu1 %v13706_v57  ;;  %v4152_v43 = vmul.f32 %v15476_v26, %v17877_v61 }
 0x31f   :  { %12487 = vmatpush3.bf16.msra.mxu0 %v13707_v2  ;;  %v4188_v2 = vmax.f32 %v4172_v60, 0.0 }
 0x320   :  { %12469 = vmatmul.mubr.bf16.gmra.mxu1 %v3339_v62  ;;  %12536 = vmatprep.subr.bf16.mxu0 %v13709_v29  ;;  %v17879_v62 = vld [vmem:[#allocation52_spill] sm:$0xff] }
 0x321   :  { %12517 = vmatpush3.bf16.msra.mxu1 %v13706_v57  ;;  %12520 = vmatprep.mubr.bf16.mxu1 %v3736_v3  ;;  %v4175_v57 = vadd.f32 %v15484_v9, %v4151_v45  ;;  %v13724_v3 = vld [vmem:[#allocation9 + $0x40] sm:$0xff]  }
 0x322   :  { %12518 = vmatprep.subr.bf16.mxu1 %v13708_v52  ;;  %12489 = vmatmul.mubr.bf16.vlgmr.msra.gmra.mxu0 %v15249_v41  ;;  %v3537_v41 = vpack.c.bf16 %v15119_v59, %v15255_v15  ;;  %v17866_v15 = vld [vmem:[#allocation39_spill] sm:$0xff] }
 0x323   :  { %12492 = vmatprep.mubr.bf16.mxu0 %v15282_v42  ;;  %12537 = vmatpush3.bf16.msra.mxu0 %v13709_v29  ;;  %v13714_v42 = vld [vmem:[#allocation9 + $0x68] sm:$0xff]   ;;  %v3740_v0 = vpack.c.bf16 %v17866_v15, %v15262_v56  ;;  %v17878_v29 = vld [vmem:[#allocation29_spill] sm:$0xff]  ;;  %v4179_v15 = vadd.f32 %v15484_v9, %v4155_v27  ;;  %v13725_v27 = vld [vmem:[#allocation12 + $0x2b8] sm:$0xff]  }
 0x324   :  { %12538 = vmatprep.subr.bf16.mxu0 %v13711_v25  ;;  %v13721_v56 = vld [vmem:[#allocation12 + $0x208] sm:$0xff]  }
 0x325   :  { %12519 = vmatpush3.bf16.msra.mxu1 %v13708_v52  ;;  %v3743_v52 = vpack.c.bf16 %v17879_v62, %v17878_v29  ;;  %v4195_v49 = vmax.f32 %v4179_v15, 0.0 }
 0x326   :  { %12568 = vmatprep.subr.bf16.mxu1 %v13710_v18 }
 0x327   :  { %12539 = vmatpush3.bf16.msra.mxu0 %v13711_v25  ;;  %v4204_v25 = vpack.c.bf16 %v4189_v38, %v4188_v2  ;;  %v17889_v38 = vld [vmem:[#allocation51_spill] sm:$0xff] }
 0x328   :  { %12521 = vmatmul.mubr.bf16.vlgmr.msra.gmra.mxu1 %v3737_v14  ;;  %12540 = vmatprep.subr.bf16.mxu0 %v13713_v12  ;;  %v4176_v14 = vadd.f32 %v15484_v9, %v4152_v43 }
 0x329   :  { %12524 = vmatprep.mubr.bf16.mxu1 %v3738_v63  ;;  %12569 = vmatpush3.bf16.msra.mxu1 %v13710_v18  ;;  %v4177_v18 = vadd.f32 %v15484_v9, %v4153_v46  ;;  %v17881_v63 = vld [vmem:[#allocation37_spill] sm:$0xff] }
 0x32a   :  { %12570 = vmatprep.subr.bf16.mxu1 %v13712_v24  ;;  %12493 = vmatmul.mubr.bf16.gmra.mxu0 %v3537_v41  ;;  %v4157_v41 = vmul.f32 %v15476_v26, %v17881_v63 }
 0x32b   :  { %12496 = vmatprep.mubr.bf16.mxu0 %v17863_v53  ;;  %12541 = vmatpush3.bf16.msra.mxu0 %v13713_v12  ;;  %v4174_v12 = vadd.f32 %v15484_v9, %v4150_v33  ;;  %v17882_v53 = vld [vmem:[#allocation33_spill] sm:$0xff]  ;;  %v4163_v33 = vmul.f32 %v15476_v26, %v17889_v38 }
 0x32c   :  { %12542 = vmatprep.subr.bf16.mxu0 %v13715_v8 }
 0x32d   :  { %12571 = vmatpush3.bf16.msra.mxu1 %v13712_v24  ;;  %v4191_v24 = vmax.f32 %v4175_v57, 0.0  ;;  %v17890_v57 = vld [vmem:[#allocation50_spill] sm:$0xff] }
 0x32e   :  { %12572 = vmatprep.subr.bf16.mxu1 %v13714_v42  ;;  %v4162_v29 = vmul.f32 %v15476_v26, %v17890_v57 }
 0x32f   :  { %12543 = vmatpush3.bf16.msra.mxu0 %v13715_v8  ;;  %v4193_v8 = vmax.f32 %v4177_v18, 0.0 }
 0x330   :  { %12525 = vmatmul.mubr.bf16.gmra.mxu1 %v3739_v31  ;;  %12544 = vmatprep.subr.bf16.mxu0 %v13717_v5  ;;  %v4192_v31 = vmax.f32 %v4176_v14, 0.0  ;;  %v4186_v18 = vadd.f32 %v15484_v9, %v4162_v29  ;;  %v13739_v29 = vld [vmem:[#allocation12 + $0x280] sm:$0xff]  }
 0x331   :  { %12528 = vmatprep.mubr.bf16.mxu1 %v3740_v0  ;;  %12573 = vmatpush3.bf16.msra.mxu1 %v13714_v42  ;;  %v4190_v42 = vmax.f32 %v4174_v12, 0.0  ;;  %v17891_v12 = vld [vmem:[#allocation54_spill] sm:$0xff] }
 0x332   :  { %12574 = vmatprep.subr.bf16.mxu1 %v13716_v58  ;;  %12497 = vmatmul.mubr.bf16.gmra.mxu0 %v17867_v35  ;;  %v4206_v0 = vpack.c.bf16 %v4193_v8, %v4192_v31  ;;  %v3945_v14 = vpack.c.bf16 %v17891_v12, %v15362_v13  ;;  %v13730_v31 = vld [vmem:[#allocation12 + $0x268] sm:$0xff]  }
 0x333   :  { %12500 = vmatprep.mubr.bf16.mxu0 %v17869_v1  ;;  %12545 = vmatpush3.bf16.msra.mxu0 %v13717_v5  ;;  %v4154_v5 = vmul.f32 %v15476_v26, %v17882_v53  ;;  %v17885_v1 = vld [vmem:[#allocation35_spill] sm:$0xff]  ;;  %v13738_v12 = vld [vmem:[#allocation12 + $0x248] sm:$0xff]  }
 0x334   :  { %12546 = vmatprep.subr.bf16.mxu0 %v13719_v55 }
 0x335   :  { %12575 = vmatpush3.bf16.msra.mxu1 %v13716_v58  ;;  %v4205_v58 = vpack.c.bf16 %v4191_v24, %v4190_v42  ;;  %v13728_v42 = vld [vmem:[#allocation12 + $0x270] sm:$0xff]  }
 0x336   :  { %12576 = vmatprep.subr.bf16.mxu1 %v13718_v50 }
 0x337   :  { %12547 = vmatpush3.bf16.msra.mxu0 %v13719_v55  ;;  %v4178_v55 = vadd.f32 %v15484_v9, %v4154_v5 }
 0x338   :  { %12529 = vmatmul.mubr.bf16.gmra.mxu1 %v3741_v16  ;;  %12548 = vmatprep.subr.bf16.mxu0 %v13721_v56 }
 0x339   :  { %12532 = vmatprep.mubr.bf16.mxu1 %v3742_v40  ;;  %12577 = vmatpush3.bf16.msra.mxu1 %v13718_v50  ;;  %v4180_v50 = vadd.f32 %v15484_v9, %v4156_v10  ;;  %v4158_v40 = vmul.f32 %v15476_v26, %v17887_v36  ;;  %v13731_v10 = vld [vmem:[#allocation12 + $0x2a0] sm:$0xff]  }
 0x33a   :  { %12578 = vmatprep.subr.bf16.mxu1 %v13720_v20  ;;  %12501 = vmatmul.mubr.bf16.gmra.mxu0 %v3541_v37 }
 0x33b   :  { %12549 = vmatpush3.bf16.msra.mxu0 %v13721_v56  ;;  %12552 = vmatprep.mubr.bf16.mxu0 %v17875_v28  ;;  %v4159_v56 = vmul.f32 %v15476_v26, %v17885_v1  ;;  %v4196_v37 = vmax.f32 %v4180_v50, 0.0  ;;  %v4182_v46 = vadd.f32 %v15484_v9, %v4158_v40 }
 0x33c   :  { %12550 = vmatprep.subr.bf16.mxu0 %v13723_v54 }
 0x33d   :  { %12579 = vmatpush3.bf16.msra.mxu1 %v13720_v20  ;;  %v4194_v20 = vmax.f32 %v4178_v55, 0.0  ;;  %v4198_v2 = vmax.f32 %v4182_v46, 0.0 }
 0x33e   :  { %12580 = vmatprep.subr.bf16.mxu1 %v13722_v11 }
 0x33f   :  { %12551 = vmatpush3.bf16.msra.mxu0 %v13723_v54  ;;  %v4183_v54 = vadd.f32 %v15484_v9, %v4159_v56  ;;  %v4207_v60 = vpack.c.bf16 %v4195_v49, %v4194_v20 }
 0x340   :  { %12533 = vmatmul.mubr.bf16.gmra.mxu1 %v3743_v52  ;;  %v4187_v52 = vadd.f32 %v15484_v9, %v4163_v33  ;;  %12600 = vmatprep.subr.bf16.mxu0 %v13725_v27 }
 0x341   :  { %12581 = vmatpush3.bf16.msra.mxu1 %v13722_v11  ;;  %12584 = vmatprep.mubr.bf16.mxu1 %v4204_v25  ;;  %v4185_v11 = vadd.f32 %v15484_v9, %v4161_v47  ;;  %v4199_v28 = vmax.f32 %v4183_v54, 0.0  ;;  %v13732_v47 = vld [vmem:[#allocation12 + $0x260] sm:$0xff]  }
 0x342   :  { %12582 = vmatprep.subr.bf16.mxu1 %v13724_v3  ;;  %12553 = vmatmul.mubr.bf16.vlgmr.msra.gmra.mxu0 %v15389_v30  ;;  %v4181_v30 = vadd.f32 %v15484_v9, %v4157_v41  ;;  %v13726_v41 = vld [vmem:[#allocation12 + $0x278] sm:$0xff]  }
 0x343   :  { %12556 = vmatprep.mubr.bf16.mxu0 %v15396_v51  ;;  %v17884_v51 = vld [vmem:[#allocation41_spill] sm:$0xff]  ;;  %v4201_v43 = vmax.f32 %v4185_v11, 0.0  ;;  %12601 = vmatpush3.bf16.msra.mxu0 %v13725_v27 }
 0x344   :  { %v3941_v35 = vpack.c.bf16 %v17884_v51, %v15257_v22  ;;  %v4197_v16 = vmax.f32 %v4181_v30, 0.0  ;;  %v4160_v22 = vmul.f32 %v15476_v26, %v17888_v6  ;;  %v13727_v26 = vld [vmem:[#allocation12 + $0x2b0] sm:$0xff]   ;;  %v13733_v30 = vld [vmem:[#allocation12 + $0x298] sm:$0xff]   ;;  %17905 = vst [vmem:[#allocation41_spill] sm:$0xff] %v15612_v4 }
 0x345   :  { %12583 = vmatpush3.bf16.msra.mxu1 %v13724_v3  ;;  %v4209_v3 = vpack.c.bf16 %v4199_v28, %v4198_v2  ;;  %12602 = vmatprep.subr.bf16.mxu0 %v13727_v26  ;;  %v13736_v2 = vld [vmem:[#allocation12 + $0x250] sm:$0xff]  }
 0x346   :  { %v4208_v45 = vpack.c.bf16 %v4197_v16, %v4196_v37  ;;  %12632 = vmatprep.subr.bf16.mxu1 %v13726_v41  ;;  %v13735_v16 = vld [vmem:[#allocation12 + $0x290] sm:$0xff]  }
 0x347   :  { %12603 = vmatpush3.bf16.msra.mxu0 %v13727_v26  ;;  %v15573_v26 = vld [vmem:[#allocation2 + $0x1] sm:$0xff] }
 0x348   :  { %12585 = vmatmul.mubr.bf16.vlgmr.msra.gmra.mxu1 %v4205_v58 }
 0x349   :  { %12588 = vmatprep.mubr.bf16.mxu1 %v4206_v0  ;;  %12633 = vmatpush3.bf16.msra.mxu1 %v13726_v41  ;;  %v15575_v41 = vld [vmem:[#allocation2 + $0x2] sm:$0xff] }
 0x34a   :  { %12557 = vmatmul.mubr.bf16.gmra.mxu0 %v3941_v35  ;;  %12634 = vmatprep.subr.bf16.mxu1 %v13728_v42  ;;  %6530 = vst [vmem:[#allocation2] sm:$0xff] %v15119_v59  ;;  %6531 = vst [vmem:[#allocation2 + $0x8] sm:$0x3] %v15119_v59 }
 0x34b   :  { %12560 = vmatprep.mubr.bf16.mxu0 %v15407_v7  ;;  %v4184_v7 = vadd.f32 %v15484_v9, %v4160_v22  ;;  %v13729_v9 = vld [vmem:[#allocation12 + $0x2a8] sm:$0xff]  }
 0x34c   :  { %12604 = vmatprep.subr.bf16.mxu0 %v13729_v9 }
 0x34d   :  { %v4200_v62 = vmax.f32 %v4184_v7, 0.0  ;;  %12605 = vmatpush3.bf16.msra.mxu0 %v13729_v9  ;;  %12635 = vmatpush3.bf16.msra.mxu1 %v13728_v42  ;;  %v13740_v42 = vld [vmem:[#allocation12 + $0x240] sm:$0xff]  }
 0x34e   :  { %12606 = vmatprep.subr.bf16.mxu0 %v13731_v10  ;;  %12636 = vmatprep.subr.bf16.mxu1 %v13730_v31 }
 0x34f   :  { %v4210_v25 = vpack.c.bf16 %v4201_v43, %v4200_v62 }
 0x350   :  { %12589 = vmatmul.mubr.bf16.gmra.mxu1 %v4207_v60  ;;  %v13734_v60 = vld [vmem:[#allocation12 + $0x258] sm:$0xff]  }
 0x351   :  { %12592 = vmatprep.mubr.bf16.mxu1 %v4208_v45  ;;  %12607 = vmatpush3.bf16.msra.mxu0 %v13731_v10  ;;  %v13737_v45 = vld [vmem:[#allocation12 + $0x288] sm:$0xff]  }
 0x352   :  { %12561 = vmatmul.mubr.bf16.gmra.mxu0 %v15414_v48  ;;  %v4203_v48 = vmax.f32 %v4187_v52, 0.0  ;;  %12637 = vmatpush3.bf16.msra.mxu1 %v13730_v31 }
 0x353   :  { %12564 = vmatprep.mubr.bf16.mxu0 %v15421_v32  ;;  %v4202_v32 = vmax.f32 %v4186_v18, 0.0  ;;  %12608 = vmatprep.subr.bf16.mxu0 %v13733_v30 }
 0x354   :  { %12638 = vmatprep.subr.bf16.mxu1 %v13732_v47 }
 0x355   :  { %v4211_v24 = vpack.c.bf16 %v4203_v48, %v4202_v32  ;;  %12609 = vmatpush3.bf16.msra.mxu0 %v13733_v30 }
 0x356   :  { %12610 = vmatprep.subr.bf16.mxu0 %v13735_v16  ;;  %12639 = vmatpush3.bf16.msra.mxu1 %v13732_v47 }
 0x357   :  { %12640 = vmatprep.subr.bf16.mxu1 %v13734_v60 }
 0x358   :  { %12593 = vmatmul.mubr.bf16.gmra.mxu1 %v4209_v3 }
 0x359   :  { %12596 = vmatprep.mubr.bf16.mxu1 %v4210_v25  ;;  %12611 = vmatpush3.bf16.msra.mxu0 %v13735_v16 }
 0x35a   :  { %12565 = vmatmul.mubr.bf16.gmra.mxu0 %v3945_v14  ;;  %12612 = vmatprep.subr.bf16.mxu0 %v13737_v45  ;;  %v15570_v14 = vld [vmem:[#allocation12 + $0x2f8] sm:$0xff]  }
 0x35b   :  { %12641 = vmatpush3.bf16.msra.mxu1 %v13734_v60 }
 0x35c   :  { %12642 = vmatprep.subr.bf16.mxu1 %v13736_v2 }
 0x35d   :  { %12613 = vmatpush3.bf16.msra.mxu0 %v13737_v45  ;;  %v15589_v45 = vld [vmem:[#allocation2 + $0x91] sm:$0xff] }
 0x35e   :  { %12614 = vmatprep.subr.bf16.mxu0 %v13739_v29  ;;  %17899 = vst [vmem:[#allocation58_spill] sm:$0xff] %v15589_v45 }
 0x35f   :  { %12643 = vmatpush3.bf16.msra.mxu1 %v13736_v2 }
 0x360   :  { %12597 = vmatmul.mubr.bf16.gmra.mxu1 %v4211_v24  ;;  %12644 = vmatprep.subr.bf16.mxu1 %v13738_v12 }
 0x361   :  { %12615 = vmatpush3.bf16.msra.mxu0 %v13739_v29 }
 0x362   :  { %12664 = vmatprep.subr.bf16.mxu0 %v15570_v14 }
 0x363   :  { %12645 = vmatpush3.bf16.msra.mxu1 %v13738_v12  ;;  %v15601_v12 = vld [vmem:[#allocation2 + $0xa1] sm:$0xff] }
 0x364   :  { %12646 = vmatprep.subr.bf16.mxu1 %v13740_v42 }
 0x367   :  { %12647 = vmatpush3.bf16.msra.mxu1 %v13740_v42 }
 0x37c   :  { %v12298_v8 = vpop.f32.mrf.mxu0 }
 0x37e   :  { %v2502_v5 = vpop.f32.mrf.mxu0 }
 0x380   :  { %v12299_v13 = vpop.f32.mrf.mxu0 }
 0x382   :  { %v15548_v58 = vpop.f32.mrf.mxu0 }
 0x383   :  { %17892 = vst [vmem:[#allocation45_spill] sm:$0xff] %v15548_v58  ;;  %v13753_v58 = vld [vmem:[#allocation12 + $0x2c8] sm:$0xff]  }
 0x384   :  { %v12302_v0 = vpop.f32.mrf.mxu0 }
 0x385   :  { %v12330_v15 = vpop.f32.mrf.mxu1 }
 0x386   :  { %v15550_v55 = vadd.f32 %v12330_v15, %v12298_v8  ;;  %v2518_v35 = vpop.f32.mrf.mxu0 }
 0x387   :  { %v2647_v51 = vpop.f32.mrf.mxu1 }
 0x388   :  { %v15552_v50 = vadd.f32 %v2647_v51, %v2502_v5  ;;  %v12303_v56 = vpop.f32.mrf.mxu0 }
 0x389   :  { %v12331_v49 = vpop.f32.mrf.mxu1 }
 0x38a   :  { %v15554_v20 = vadd.f32 %v12331_v49, %v12299_v13  ;;  %v15558_v22 = vpop.f32.mrf.mxu0 }
 0x38b   :  { %v15556_v40 = vpop.f32.mrf.mxu1  ;;  %17894 = vst [vmem:[#allocation42_spill] sm:$0xff] %v15558_v22 }
 0x38c   :  { %17893 = vst [vmem:[#allocation55_spill] sm:$0xff] %v15556_v40  ;;  %v12306_v54 = vpop.f32.mrf.mxu0  ;;  %v13750_v40 = vld [vmem:[#allocation12 + $0x318] sm:$0xff]  }
 0x38e   :  { %v12334_v37 = vpop.f32.mrf.mxu1  ;;  %v2534_v7 = vpop.f32.mrf.mxu0 }
 0x38f   :  { %v15560_v11 = vadd.f32 %v12334_v37, %v12302_v0  ;;  %v15583_v0 = vld [vmem:[#allocation12 + $0x338] sm:$0xff]  }
 0x390   :  { %v2663_v46 = vpop.f32.mrf.mxu1  ;;  %v12307_v43 = vpop.f32.mrf.mxu0  ;;  %12696 = vmatprep.subr.bf16.mxu1 %v15583_v0 }
 0x391   :  { %v15562_v28 = vadd.f32 %v2663_v46, %v2518_v35  ;;  %v15591_v46 = vld [vmem:[#allocation2 + $0x92] sm:$0xff] }
 0x392   :  { %v12335_v33 = vpop.f32.mrf.mxu1  ;;  %v15568_v3 = vpop.f32.mrf.mxu0  ;;  %17900 = vst [vmem:[#allocation40_spill] sm:$0xff] %v15591_v46  ;;  %6548 = vst [vmem:[#allocation2 + $0x90] sm:$0xff] %v15119_v59 }
 0x393   :  { %v15564_v62 = vadd.f32 %v12335_v33, %v12303_v56  ;;  %17896 = vst [vmem:[#allocation38_spill] sm:$0xff] %v15568_v3  ;;  %6549 = vst [vmem:[#allocation2 + $0x98] sm:$0x3] %v15119_v59 }
 0x394   :  { %v15566_v52 = vpop.f32.mrf.mxu1 }
 0x395   :  { %17895 = vst [vmem:[#allocation43_spill] sm:$0xff] %v15566_v52  ;;  %v12310_v18 = vpop.f32.mrf.mxu0 }
 0x396   :  { %v12338_v25 = vpop.f32.mrf.mxu1 }
 0x397   :  { %v2688_v48 = vadd.f32 %v12338_v25, %v12306_v54  ;;  %v2550_v24 = vpop.f32.mrf.mxu0 }
 0x398   :  { %v2679_v32 = vpop.f32.mrf.mxu1 }
 0x399   :  { %v2680_v27 = vadd.f32 %v2679_v32, %v2534_v7  ;;  %v12311_v9 = vpop.f32.mrf.mxu0  ;;  %v15603_v32 = vld [vmem:[#allocation2 + $0xa2] sm:$0xff] }
 0x39a   :  { %v12339_v8 = vpop.f32.mrf.mxu1  ;;  %6550 = vst [vmem:[#allocation2 + $0xa0] sm:$0xff] %v15119_v59  ;;  %6551 = vst [vmem:[#allocation2 + $0xa8] sm:$0x3] %v15119_v59 }
 0x39b   :  { %v2691_v5 = vadd.f32 %v12339_v8, %v12307_v43  ;;  %v15581_v10 = vpop.f32.mrf.mxu0 }
 0x39c   :  { %v15579_v13 = vpop.f32.mrf.mxu1  ;;  %17898 = vst [vmem:[#allocation46_spill] sm:$0xff] %v15581_v10 }
 0x39d   :  { %17897 = vst [vmem:[#allocation39_spill] sm:$0xff] %v15579_v13 }
 0x39f   :  { %v12362_v15 = vpop.f32.mrf.mxu0 }
 0x3a0   :  { %v12342_v31 = vpop.f32.mrf.mxu1  ;;  %v2898_v51 = vadd.f32 %v12362_v15, %v15550_v55 }
 0x3a1   :  { %v2704_v30 = vadd.f32 %v12342_v31, %v12310_v18  ;;  %v2833_v49 = vpop.f32.mrf.mxu0 }
 0x3a2   :  { %v2695_v35 = vpop.f32.mrf.mxu1  ;;  %v2896_v47 = vadd.f32 %v2833_v49, %v15552_v50 }
 0x3a3   :  { %v2696_v56 = vadd.f32 %v2695_v35, %v2550_v24  ;;  %v12363_v37 = vpop.f32.mrf.mxu0 }
 0x3a4   :  { %v12343_v16 = vpop.f32.mrf.mxu1  ;;  %v2899_v60 = vadd.f32 %v12363_v37, %v15554_v20 }
 0x3a5   :  { %v2707_v54 = vadd.f32 %v12343_v16, %v12311_v9  ;;  %v15595_v33 = vpop.f32.mrf.mxu0 }
 0x3a6   :  { %v15593_v7 = vpop.f32.mrf.mxu1  ;;  %17902 = vst [vmem:[#allocation59_spill] sm:$0xff] %v15595_v33 }
 0x3a7   :  { %17901 = vst [vmem:[#allocation44_spill] sm:$0xff] %v15593_v7  ;;  %v12366_v43 = vpop.f32.mrf.mxu0 }
 0x3a8   :  { %v12394_v55 = vpop.f32.mrf.mxu1  ;;  %v2902_v2 = vadd.f32 %v12366_v43, %v15560_v11 }
 0x3a9   :  { %v3100_v50 = vadd.f32 %v12394_v55, %v2898_v51  ;;  %v2849_v25 = vpop.f32.mrf.mxu0 }
 0x3aa   :  { %v3035_v29 = vpop.f32.mrf.mxu1  ;;  %v2900_v18 = vadd.f32 %v2849_v25, %v15562_v28 }
 0x3ab   :  { %v3098_v20 = vadd.f32 %v3035_v29, %v2896_v47  ;;  %v12367_v8 = vpop.f32.mrf.mxu0 }
 0x3ac   :  { %v12395_v24 = vpop.f32.mrf.mxu1  ;;  %v2903_v42 = vadd.f32 %v12367_v8, %v15564_v62 }
 0x3ad   :  { %v3101_v9 = vadd.f32 %v12395_v24, %v2899_v60  ;;  %v15610_v11 = vpop.f32.mrf.mxu0  ;;  %v15614_v60 = vld [vmem:[#allocation2 + $0x132] sm:$0xff] }
 0x3ae   :  { %v15608_v31 = vpop.f32.mrf.mxu1  ;;  %17904 = vst [vmem:[#allocation52_spill] sm:$0xff] %v15610_v11  ;;  %17906 = vst [vmem:[#allocation54_spill] sm:$0xff] %v15614_v60 }
 0x3af   :  { %17903 = vst [vmem:[#allocation29_spill] sm:$0xff] %v15608_v31  ;;  %v12370_v51 = vpop.f32.mrf.mxu0  ;;  %6568 = vst [vmem:[#allocation2 + $0x130] sm:$0xff] %v15119_v59 }
 0x3b0   :  { %v12398_v15 = vpop.f32.mrf.mxu1  ;;  %v2906_v35 = vadd.f32 %v12370_v51, %v2688_v48  ;;  %6569 = vst [vmem:[#allocation2 + $0x138] sm:$0x3] %v15119_v59 }
 0x3b1   :  { %v3104_v28 = vadd.f32 %v12398_v15, %v2902_v2  ;;  %v2865_v47 = vpop.f32.mrf.mxu0 }
 0x3b2   :  { %v3051_v49 = vpop.f32.mrf.mxu1  ;;  %v2904_v37 = vadd.f32 %v2865_v47, %v2680_v27 }
 0x3b3   :  { %v3102_v16 = vadd.f32 %v3051_v49, %v2900_v18  ;;  %v12371_v43 = vpop.f32.mrf.mxu0 }
 0x3b4   :  { %v12399_v55 = vpop.f32.mrf.mxu1  ;;  %v2907_v25 = vadd.f32 %v12371_v43, %v2691_v5 }
 0x3b5   :  { %v3105_v29 = vadd.f32 %v12399_v55, %v2903_v42  ;;  %v15618_v24 = vpop.f32.mrf.mxu0 }
 0x3b6   :  { %v15616_v62 = vpop.f32.mrf.mxu1  ;;  %17908 = vst [vmem:[#allocation61_spill] sm:$0xff] %v15618_v24  ;;  %v13751_v24 = vld [vmem:[#allocation12 + $0x2d0] sm:$0xff]  }
 0x3b7   :  { %17907 = vst [vmem:[#allocation60_spill] sm:$0xff] %v15616_v62  ;;  %v12374_v2 = vpop.f32.mrf.mxu0 }
 0x3b8   :  { %v12402_v48 = vpop.f32.mrf.mxu1  ;;  %v2910_v27 = vadd.f32 %v12374_v2, %v2704_v30 }
 0x3b9   :  { %v3108_v18 = vadd.f32 %v12402_v48, %v2906_v35  ;;  %v2881_v15 = vpop.f32.mrf.mxu0 }
 0x3ba   :  { %v3067_v8 = vpop.f32.mrf.mxu1  ;;  %v2908_v5 = vadd.f32 %v2881_v15, %v2696_v56 }
 0x3bb   :  { %v3106_v42 = vadd.f32 %v3067_v8, %v2904_v37  ;;  %v12375_v49 = vpop.f32.mrf.mxu0 }
 0x3bc   :  { %v12403_v51 = vpop.f32.mrf.mxu1  ;;  %v2911_v55 = vadd.f32 %v12375_v49, %v2707_v54 }
 0x3bd   :  { %v3109_v47 = vadd.f32 %v12403_v51, %v2907_v25  ;;  %v15624_v38 = vpop.f32.mrf.mxu0 }
 0x3be   :  { %v15622_v43 = vpop.f32.mrf.mxu1  ;;  %17910 = vst [vmem:[#allocation63_spill] sm:$0xff] %v15624_v38 }
 0x3bf   :  { %17909 = vst [vmem:[#allocation62_spill] sm:$0xff] %v15622_v43 }
 0x3c0   :  { %v12406_v6 = vpop.f32.mrf.mxu1 }
 0x3c1   :  { %v3112_v57 = vadd.f32 %v12406_v6, %v2910_v27 }
 0x3c2   :  { %v3083_v63 = vpop.f32.mrf.mxu1  ;;  %v12426_v1 = vpop.f32.mrf.mxu0 }
 0x3c3   :  { %v3110_v19 = vadd.f32 %v3083_v63, %v2908_v5  ;;  %v3302_v36 = vadd.f32 %v12426_v1, %v3100_v50 }
 0x3c4   :  { %v12407_v35 = vpop.f32.mrf.mxu1  ;;  %v3237_v30 = vpop.f32.mrf.mxu0 }
 0x3c5   :  { %v3113_v48 = vadd.f32 %v12407_v35, %v2911_v55  ;;  %v3300_v2 = vadd.f32 %v3237_v30, %v3098_v20 }
 0x3c6   :  { %v15626_v37 = vpop.f32.mrf.mxu1  ;;  %v12427_v56 = vpop.f32.mrf.mxu0 }
 0x3c7   :  { %17911 = vst [vmem:[#allocation64_spill] sm:$0xff] %v15626_v37  ;;  %v3303_v8 = vadd.f32 %v12427_v56, %v3101_v9 }
 0x3c8   :  { %v12458_v25 = vpop.f32.mrf.mxu1  ;;  %v15628_v54 = vpop.f32.mrf.mxu0 }
 0x3c9   :  { %17912 = vst [vmem:[#allocation65_spill] sm:$0xff] %v15628_v54  ;;  %v3504_v15 = vadd.f32 %v12458_v25, %v3302_v36 }
 0x3ca   :  { %v3439_v51 = vpop.f32.mrf.mxu1  ;;  %v12430_v49 = vpop.f32.mrf.mxu0 }
 0x3cb   :  { %v3502_v21 = vadd.f32 %v3439_v51, %v3300_v2  ;;  %v3306_v6 = vadd.f32 %v12430_v49, %v3104_v28 }
 0x3cc   :  { %v12459_v27 = vpop.f32.mrf.mxu1  ;;  %v3253_v23 = vpop.f32.mrf.mxu0 }
 0x3cd   :  { %v3505_v63 = vadd.f32 %v12459_v27, %v3303_v8  ;;  %v3304_v1 = vadd.f32 %v3253_v23, %v3102_v16 }
 0x3ce   :  { %v15630_v50 = vpop.f32.mrf.mxu1  ;;  %v12431_v5 = vpop.f32.mrf.mxu0 }
 0x3cf   :  { %17913 = vst [vmem:[#allocation66_spill] sm:$0xff] %v15630_v50  ;;  %v3307_v20 = vadd.f32 %v12431_v5, %v3105_v29 }
 0x3d0   :  { %v12462_v55 = vpop.f32.mrf.mxu1  ;;  %v15632_v35 = vpop.f32.mrf.mxu0 }
 0x3d1   :  { %17914 = vst [vmem:[#allocation67_spill] sm:$0xff] %v15632_v35  ;;  %v3508_v9 = vadd.f32 %v12462_v55, %v3306_v6 }
 0x3d2   :  { %v3455_v30 = vpop.f32.mrf.mxu1  ;;  %v12434_v56 = vpop.f32.mrf.mxu0 }
 0x3d3   :  { %v3506_v61 = vadd.f32 %v3455_v30, %v3304_v1  ;;  %v3310_v36 = vadd.f32 %v12434_v56, %v3108_v18 }
 0x3d4   :  { %v12463_v25 = vpop.f32.mrf.mxu1  ;;  %v3269_v53 = vpop.f32.mrf.mxu0 }
 0x3d5   :  { %v3509_v2 = vadd.f32 %v12463_v25, %v3307_v20  ;;  %v3308_v28 = vadd.f32 %v3269_v53, %v3106_v42 }
 0x3d6   :  { %v15634_v51 = vpop.f32.mrf.mxu1  ;;  %v12435_v8 = vpop.f32.mrf.mxu0 }
 0x3d7   :  { %17915 = vst [vmem:[#allocation68_spill] sm:$0xff] %v15634_v51  ;;  %v3311_v23 = vadd.f32 %v12435_v8, %v3109_v47 }
 0x3d8   :  { %v12466_v16 = vpop.f32.mrf.mxu1  ;;  %v15636_v49 = vpop.f32.mrf.mxu0 }
 0x3d9   :  { %17916 = vst [vmem:[#allocation69_spill] sm:$0xff] %v15636_v49  ;;  %v3512_v29 = vadd.f32 %v12466_v16, %v3310_v36 }
 0x3da   :  { %v3471_v27 = vpop.f32.mrf.mxu1  ;;  %v12438_v5 = vpop.f32.mrf.mxu0 }
 0x3db   :  { %v3510_v34 = vadd.f32 %v3471_v27, %v3308_v28  ;;  %v3314_v6 = vadd.f32 %v12438_v5, %v3112_v57 }
 0x3dc   :  { %v12467_v55 = vpop.f32.mrf.mxu1  ;;  %v3285_v39 = vpop.f32.mrf.mxu0 }
 0x3dd   :  { %v3513_v1 = vadd.f32 %v12467_v55, %v3311_v23  ;;  %v3312_v18 = vadd.f32 %v3285_v39, %v3110_v19 }
 0x3de   :  { %v15638_v30 = vpop.f32.mrf.mxu1  ;;  %v12439_v20 = vpop.f32.mrf.mxu0 }
 0x3df   :  { %17917 = vst [vmem:[#allocation70_spill] sm:$0xff] %v15638_v30  ;;  %v3315_v53 = vadd.f32 %v12439_v20, %v3113_v48 }
 0x3e0   :  { %v12470_v42 = vpop.f32.mrf.mxu1  ;;  %v15640_v56 = vpop.f32.mrf.mxu0 }
 0x3e1   :  { %17918 = vst [vmem:[#allocation71_spill] sm:$0xff] %v15640_v56  ;;  %v3516_v47 = vadd.f32 %v12470_v42, %v3314_v6 }
 0x3e2   :  { %v3487_v25 = vpop.f32.mrf.mxu1  ;;  %v12490_v8 = vpop.f32.mrf.mxu0 }
 0x3e3   :  { %v3514_v44 = vadd.f32 %v3487_v25, %v3312_v18  ;;  %v3706_v36 = vadd.f32 %v12490_v8, %v3504_v15 }
 0x3e4   :  { %v12471_v16 = vpop.f32.mrf.mxu1  ;;  %v3641_v17 = vpop.f32.mrf.mxu0 }
 0x3e5   :  { %v3517_v28 = vadd.f32 %v12471_v16, %v3315_v53  ;;  %v3704_v57 = vadd.f32 %v3641_v17, %v3502_v21 }
 0x3e6   :  { %v15642_v27 = vpop.f32.mrf.mxu1  ;;  %v12491_v23 = vpop.f32.mrf.mxu0 }
 0x3e7   :  { %17919 = vst [vmem:[#allocation72_spill] sm:$0xff] %v15642_v27  ;;  %v3707_v39 = vadd.f32 %v12491_v23, %v3505_v63 }
 0x3e8   :  { %v12522_v19 = vpop.f32.mrf.mxu1  ;;  %v15644_v5 = vpop.f32.mrf.mxu0 }
 0x3e9   :  { %17920 = vst [vmem:[#allocation73_spill] sm:$0xff] %v15644_v5  ;;  %v3908_v48 = vadd.f32 %v12522_v19, %v3706_v36 }
 0x3ea   :  { %v3843_v55 = vpop.f32.mrf.mxu1  ;;  %v12494_v20 = vpop.f32.mrf.mxu0 }
 0x3eb   :  { %v3906_v56 = vadd.f32 %v3843_v55, %v3704_v57  ;;  %v3710_v6 = vadd.f32 %v12494_v20, %v3508_v9 }
 0x3ec   :  { %v12523_v42 = vpop.f32.mrf.mxu1  ;;  %v3657_v30 = vpop.f32.mrf.mxu0 }
 0x3ed   :  { %v3909_v18 = vadd.f32 %v12523_v42, %v3707_v39  ;;  %v3708_v15 = vadd.f32 %v3657_v30, %v3506_v61 }
 0x3ee   :  { %v15646_v25 = vpop.f32.mrf.mxu1  ;;  %v12495_v53 = vpop.f32.mrf.mxu0 }
 0x3ef   :  { %17921 = vst [vmem:[#allocation74_spill] sm:$0xff] %v15646_v25  ;;  %v3711_v21 = vadd.f32 %v12495_v53, %v3509_v2 }
 0x3f0   :  { %v12526_v17 = vpop.f32.mrf.mxu1  ;;  %v15648_v8 = vpop.f32.mrf.mxu0 }
 0x3f1   :  { %17922 = vst [vmem:[#allocation75_spill] sm:$0xff] %v15648_v8  ;;  %v3912_v63 = vadd.f32 %v12526_v17, %v3710_v6  ;;  %v13747_v8 = vld [vmem:[#allocation12 + $0x2e0] sm:$0xff]  }
 0x3f2   :  { %v3859_v16 = vpop.f32.mrf.mxu1  ;;  %v12498_v23 = vpop.f32.mrf.mxu0 }
 0x3f3   :  { %v3910_v27 = vadd.f32 %v3859_v16, %v3708_v15  ;;  %v3714_v36 = vadd.f32 %v12498_v23, %v3512_v29 }
 0x3f4   :  { %v12527_v19 = vpop.f32.mrf.mxu1  ;;  %v3673_v5 = vpop.f32.mrf.mxu0 }
 0x3f5   :  { %v3913_v57 = vadd.f32 %v12527_v19, %v3711_v21  ;;  %v3712_v9 = vadd.f32 %v3673_v5, %v3510_v34 }
 0x3f6   :  { %v15650_v55 = vpop.f32.mrf.mxu1  ;;  %v12499_v39 = vpop.f32.mrf.mxu0 }
 0x3f7   :  { %17923 = vst [vmem:[#allocation76_spill] sm:$0xff] %v15650_v55  ;;  %v3715_v61 = vadd.f32 %v12499_v39, %v3513_v1 }
 0x3f8   :  { %v12530_v30 = vpop.f32.mrf.mxu1  ;;  %v15652_v20 = vpop.f32.mrf.mxu0 }
 0x3f9   :  { %17924 = vst [vmem:[#allocation77_spill] sm:$0xff] %v15652_v20  ;;  %v3916_v2 = vadd.f32 %v12530_v30, %v3714_v36 }
 0x3fa   :  { %v3875_v42 = vpop.f32.mrf.mxu1  ;;  %v12502_v53 = vpop.f32.mrf.mxu0 }
 0x3fb   :  { %v15654_v25 = vadd.f32 %v3875_v42, %v3712_v9  ;;  %v3718_v6 = vadd.f32 %v12502_v53, %v3516_v47 }
 0x3fc   :  { %v12531_v17 = vpop.f32.mrf.mxu1  ;;  %v3689_v15 = vpop.f32.mrf.mxu0 }
 0x3fd   :  { %v15656_v29 = vadd.f32 %v12531_v17, %v3715_v61  ;;  %v3716_v16 = vadd.f32 %v3689_v15, %v3514_v44 }
 0x3fe   :  { %v15658_v21 = vpop.f32.mrf.mxu1  ;;  %v12503_v34 = vpop.f32.mrf.mxu0 }
 0x3ff   :  { %17925 = vst [vmem:[#allocation78_spill] sm:$0xff] %v15658_v21  ;;  %v3719_v5 = vadd.f32 %v12503_v34, %v3517_v28  ;;  %v15674_v28 = vld [vmem:[#allocation11 + $0x1] ss:$0 sm:$0xff] }
 0x400   :  { %v12534_v23 = vpop.f32.mrf.mxu1  ;;  %v15660_v1 = vpop.f32.mrf.mxu0 }
 0x401   :  { %17926 = vst [vmem:[#allocation79_spill] sm:$0xff] %v15660_v1  ;;  %v15662_v19 = vadd.f32 %v12534_v23, %v3718_v6 }
 0x402   :  { %v3891_v36 = vpop.f32.mrf.mxu1  ;;  %v12554_v39 = vpop.f32.mrf.mxu0 }
 0x403   :  { %v15664_v30 = vadd.f32 %v3891_v36, %v3716_v16  ;;  %v15666_v9 = vadd.f32 %v12554_v39, %v3908_v48 }
 0x404   :  { %v12535_v47 = vpop.f32.mrf.mxu1  ;;  %v4045_v42 = vpop.f32.mrf.mxu0 }
 0x405   :  { %17927 = vst [vmem:[#allocation80_spill] sm:$0xff] %v15666_v9  ;;  %v15668_v61 = vadd.f32 %v12535_v47, %v3719_v5  ;;  %v15670_v44 = vadd.f32 %v4045_v42, %v3906_v56 }
 0x406   :  { %v15672_v53 = vpop.f32.mrf.mxu1  ;;  %v12555_v17 = vpop.f32.mrf.mxu0 }
 0x407   :  { %17928 = vst [vmem:[#allocation81_spill] sm:$0xff] %v15670_v44  ;;  %17929 = vst [vmem:[#allocation82_spill] sm:$0xff] %v15672_v53  ;;  %v15676_v15 = vadd.f32 %v12555_v17, %v3909_v18 }
 0x408   :  { %v12586_v6 = vpop.f32.mrf.mxu1  ;;  %v15678_v34 = vpop.f32.mrf.mxu0 }
 0x409   :  { %17930 = vst [vmem:[#allocation83_spill] sm:$0xff] %v15676_v15  ;;  %17931 = vst [vmem:[#allocation84_spill] sm:$0xff] %v15678_v34  ;;  %v4328_v16 = vadd.f32 %v12586_v6, %v15674_v28 }
 0x40a   :  { %v4319_v48 = vpop.f32.mrf.mxu1  ;;  %v12558_v23 = vpop.f32.mrf.mxu0 }
 0x40b   :  { %v15681_v36 = vmax.f32 %v4328_v16, 0.0  ;;  %v4320_v5 = vadd.f32 %v15674_v28, %v4319_v48  ;;  %v15684_v56 = vadd.f32 %v12558_v23, %v3912_v63 }
 0x40c   :  { %v12587_v39 = vpop.f32.mrf.mxu1  ;;  %v4061_v47 = vpop.f32.mrf.mxu0 }
 0x40d   :  { %17932 = vst [vmem:[#allocation85_spill] sm:$0xff] %v15684_v56  ;;  %4440 = vst [vmem:[#allocation2 + $0x31] sm:$0xff] %v15681_v36  ;;  %v15687_v42 = vmax.f32 %v4320_v5, 0.0  ;;  %v4331_v18 = vadd.f32 %v12587_v39, %v15674_v28  ;;  %v15690_v17 = vadd.f32 %v4061_v47, %v3910_v27 }
 0x40e   :  { %v4322_v53 = vpop.f32.mrf.mxu1  ;;  %v12559_v6 = vpop.f32.mrf.mxu0 }
 0x40f   :  { %17933 = vst [vmem:[#allocation86_spill] sm:$0xff] %v15690_v17  ;;  %4438 = vst [vmem:[#allocation2 + $0x11] sm:$0xff] %v15687_v42  ;;  %v15693_v16 = vmax.f32 %v4331_v18, 0.0  ;;  %v4323_v48 = vadd.f32 %v15674_v28, %v4322_v53  ;;  %v15696_v63 = vadd.f32 %v12559_v6, %v3913_v57  ;;  %v4511_v23 = vpack.c.bf16 %v15687_v42, %v15573_v26 }
 0x410   :  { %v12590_v56 = vpop.f32.mrf.mxu1  ;;  %v15700_v5 = vpop.f32.mrf.mxu0 }
 0x411   :  { %17934 = vst [vmem:[#allocation87_spill] sm:$0xff] %v15696_v63  ;;  %17935 = vst [vmem:[#allocation88_spill] sm:$0xff] %v15700_v5  ;;  %v15703_v27 = vmax.f32 %v4323_v48, 0.0  ;;  %v4344_v39 = vadd.f32 %v12590_v56, %v15674_v28  ;;  %12616 = vmatprep.mubr.bf16.mxu0 %v4511_v23  ;;  %v13743_v63 = vld [vmem:[#allocation12 + $0x2f0] sm:$0xff]  }
 0x412   :  { %4441 = vst [vmem:[#allocation2 + $0x41] sm:$0xff] %v15693_v16  ;;  %v4335_v18 = vpop.f32.mrf.mxu1  ;;  %v12562_v53 = vpop.f32.mrf.mxu0 }
 0x413   :  { %4439 = vst [vmem:[#allocation2 + $0x21] sm:$0xff] %v15703_v27  ;;  %v15709_v57 = vmax.f32 %v4344_v39, 0.0  ;;  %v4336_v26 = vadd.f32 %v15674_v28, %v4335_v18  ;;  %v15712_v6 = vadd.f32 %v12562_v53, %v3916_v2  ;;  %v4512_v48 = vpack.c.bf16 %v15681_v36, %v15703_v27 }
 0x414   :  { %v12591_v17 = vpop.f32.mrf.mxu1  ;;  %v4077_v56 = vpop.f32.mrf.mxu0  ;;  %v15716_v23 = vld [vmem:[#allocation2 + $0x30] sm:$0xff] }
 0x415   :  { %17936 = vst [vmem:[#allocation89_spill] sm:$0xff] %v15712_v6  ;;  %v15718_v15 = vld [vmem:[#allocation2 + $0x32] sm:$0xff]  ;;  %4444 = vst [vmem:[#allocation2 + $0x71] sm:$0xff] %v15709_v57  ;;  %v15723_v39 = vmax.f32 %v4336_v26, 0.0  ;;  %v4347_v18 = vadd.f32 %v12591_v17, %v15674_v28  ;;  %v15727_v2 = vadd.f32 %v4077_v56, %v15654_v25  ;;  %12617 = vmatmul.mubr.bf16.vlgmr.msra.gmra.mxu0 %v4512_v48 }
 0x416   :  { %v15720_v47 = vld [vmem:[#allocation2 + $0x31] sm:$0xff]  ;;  %v4338_v53 = vpop.f32.mrf.mxu1  ;;  %v12563_v44 = vpop.f32.mrf.mxu0  ;;  %12665 = vmatpush3.bf16.msra.mxu0 %v15570_v14 }
 0x417   :  { %17937 = vst [vmem:[#allocation90_spill] sm:$0xff] %v15727_v2  ;;  %6536 = vst [vmem:[#allocation2 + $0x30] sm:$0xff] %v15119_v59  ;;  %v15731_v6 = vld [vmem:[#allocation2 + $0x10] sm:$0xff]  ;;  %v4389_v26 = vmax.f32 %v4347_v18, 0.0  ;;  %v4339_v17 = vadd.f32 %v15674_v28, %v4338_v53  ;;  %v15741_v48 = vadd.f32 %v12563_v44, %v15656_v29  ;;  %12666 = vmatprep.subr.bf16.mxu0 %v13743_v63 }
 0x418   :  { %6537 = vst [vmem:[#allocation2 + $0x38] sm:$0x3] %v15119_v59  ;;  %v15734_v9 = vld [vmem:[#allocation2 + $0x12] sm:$0xff]  ;;  %4442 = vst [vmem:[#allocation2 + $0x51] sm:$0xff] %v15723_v39  ;;  %v4470_v25 = vpack.c.bf16 %v15731_v6, %v15119_v59  ;;  %v12594_v14 = vpop.f32.mrf.mxu1  ;;  %v15745_v2 = vpop.f32.mrf.mxu0  ;;  %v4513_v18 = vpack.c.bf16 %v15723_v39, %v15693_v16 }
 0x419   :  { %17938 = vst [vmem:[#allocation91_spill] sm:$0xff] %v15741_v48  ;;  %v13745_v56 = vld [vmem:[#allocation12 + $0x2e8] sm:$0xff]   ;;  %6532 = vst [vmem:[#allocation2 + $0x10] sm:$0xff] %v15119_v59  ;;  %v15749_v5 = vld [vmem:[#allocation2 + $0x40] sm:$0xff]  ;;  %v15755_v29 = vmax.f32 %v4339_v17, 0.0  ;;  %v4360_v44 = vadd.f32 %v12594_v14, %v15674_v28  ;;  %v15765_v55 = vpack.c.bf16 %v4389_v26, %v15709_v57 }
 0x41a   :  { %6533 = vst [vmem:[#allocation2 + $0x18] sm:$0x3] %v15119_v59  ;;  %17939 = vst [vmem:[#allocation92_spill] sm:$0xff] %v15745_v2  ;;  %v15751_v53 = vld [vmem:[#allocation2 + $0x42] sm:$0xff]  ;;  %12648 = vmatprep.mubr.bf16.mxu1 %v4470_v25  ;;  %v4351_v48 = vpop.f32.mrf.mxu1  ;;  %v12566_v1 = vpop.f32.mrf.mxu0  ;;  %12620 = vmatprep.mubr.bf16.mxu0 %v4513_v18 }
 0x41b   :  { %v15753_v34 = vld [vmem:[#allocation2 + $0x41] sm:$0xff]  ;;  %4445 = vst [vmem:[#allocation2 + $0x81] sm:$0xff] %v4389_v26  ;;  %12667 = vmatpush3.bf16.msra.mxu0 %v13743_v63  ;;  %4443 = vst [vmem:[#allocation2 + $0x61] sm:$0xff] %v15755_v29  ;;  %v15770_v25 = vmax.f32 %v4360_v44, 0.0  ;;  %v4352_v14 = vadd.f32 %v15674_v28, %v4351_v48  ;;  %v15778_v18 = vadd.f32 %v12566_v1, %v15662_v19 }
 0x41c   :  { %6539 = vst [vmem:[#allocation2 + $0x48] sm:$0x3] %v15119_v59  ;;  %6538 = vst [vmem:[#allocation2 + $0x40] sm:$0xff] %v15119_v59  ;;  %v15760_v2 = vld [vmem:[#allocation2 + $0x20] sm:$0xff]  ;;  %12668 = vmatprep.subr.bf16.mxu0 %v13745_v56  ;;  %v12595_v26 = vpop.f32.mrf.mxu1  ;;  %v4093_v51 = vpop.f32.mrf.mxu0  ;;  %v4514_v44 = vpack.c.bf16 %v15709_v57, %v15755_v29  ;;  %v15784_v48 = vld [vmem:[#allocation2 + $0x70] sm:$0xff] }
 0x41d   :  { %v15762_v21 = vld [vmem:[#allocation2 + $0x22] sm:$0xff]  ;;  %v15775_v20 = vpack.c.bf16 %v15716_v23, %v15760_v2  ;;  %17940 = vst [vmem:[#allocation93_spill] sm:$0xff] %v15778_v18  ;;  %v15786_v50 = vld [vmem:[#allocation2 + $0x72] sm:$0xff]  ;;  %4448 = vst [vmem:[#allocation2 + $0xd1] sm:$0xff] %v15770_v25  ;;  %v15791_v1 = vmax.f32 %v4352_v14, 0.0  ;;  %v4363_v19 = vadd.f32 %v12595_v26, %v15674_v28  ;;  %v15796_v18 = vadd.f32 %v4093_v51, %v15664_v30 }
 0x41e   :  { %v15767_v17 = vld [vmem:[#allocation2 + $0x21] sm:$0xff]  ;;  %v15788_v37 = vld [vmem:[#allocation2 + $0x71] sm:$0xff]  ;;  %v4354_v57 = vpop.f32.mrf.mxu1  ;;  %v12567_v35 = vpop.f32.mrf.mxu0  ;;  %12621 = vmatmul.mubr.bf16.gmra.mxu0 %v4514_v44 }
 0x41f   :  { %v13744_v63 = vld [vmem:[#allocation12 + $0x330] sm:$0xff]   ;;  %6534 = vst [vmem:[#allocation2 + $0x20] sm:$0xff] %v15119_v59  ;;  %6535 = vst [vmem:[#allocation2 + $0x28] sm:$0x3] %v15119_v59  ;;  %12649 = vmatmul.mubr.bf16.vlgmr.msra.gmra.mxu1 %v15775_v20  ;;  %v15801_v49 = vld [vmem:[#allocation2 + $0x50] sm:$0xff]  ;;  %v15808_v26 = vmax.f32 %v4363_v19, 0.0  ;;  %v4355_v51 = vadd.f32 %v15674_v28, %v4354_v57  ;;  %12669 = vmatpush3.bf16.msra.mxu0 %v13745_v56  ;;  %v4515_v19 = vpack.c.bf16 %v15791_v1, %v15601_v12 }
 0x420   :  { %17941 = vst [vmem:[#allocation94_spill] sm:$0xff] %v15788_v37  ;;  %17942 = vst [vmem:[#allocation95_spill] sm:$0xff] %v15796_v18  ;;  %12697 = vmatpush3.bf16.msra.mxu1 %v15583_v0  ;;  %v15803_v14 = vld [vmem:[#allocation2 + $0x52] sm:$0xff]  ;;  %v15813_v30 = vpack.c.bf16 %v15801_v49, %v15749_v5  ;;  %v15816_v0 = vadd.f32 %v12567_v35, %v15668_v61  ;;  %v13749_v44 = vld [vmem:[#allocation12 + $0x2d8] sm:$0xff]   ;;  %v12598_v38 = vpop.f32.mrf.mxu1  ;;  %12670 = vmatprep.subr.bf16.mxu0 %v13747_v8 }
 0x421   :  { %6544 = vst [vmem:[#allocation2 + $0x70] sm:$0xff] %v15119_v59  ;;  %6545 = vst [vmem:[#allocation2 + $0x78] sm:$0x3] %v15119_v59  ;;  %v15805_v54 = vld [vmem:[#allocation2 + $0x51] sm:$0xff]  ;;  %12698 = vmatprep.subr.bf16.mxu1 %v13744_v63  ;;  %v15829_v35 = vmax.f32 %v4355_v51, 0.0  ;;  %v4376_v61 = vadd.f32 %v12598_v38, %v15674_v28  ;;  %12624 = vmatprep.mubr.bf16.mxu0 %v4515_v19 }
 0x422   :  { %4446 = vst [vmem:[#allocation2 + $0xb1] sm:$0xff] %v15791_v1  ;;  %17943 = vst [vmem:[#allocation96_spill] sm:$0xff] %v15816_v0  ;;  %v13746_v18 = vld [vmem:[#allocation12 + $0x328] sm:$0xff]   ;;  %v15822_v57 = vld [vmem:[#allocation2 + $0x80] sm:$0xff]  ;;  %12652 = vmatprep.mubr.bf16.mxu1 %v15813_v30  ;;  %v4367_v12 = vpop.f32.mrf.mxu1 }
 0x423   :  { %6541 = vst [vmem:[#allocation2 + $0x58] sm:$0x3] %v15119_v59  ;;  %6540 = vst [vmem:[#allocation2 + $0x50] sm:$0xff] %v15119_v59  ;;  %v15824_v43 = vld [vmem:[#allocation2 + $0x82] sm:$0xff]  ;;  %v15844_v38 = vmax.f32 %v4376_v61, 0.0  ;;  %v4368_v7 = vadd.f32 %v15674_v28, %v4367_v12  ;;  %12671 = vmatpush3.bf16.msra.mxu0 %v13747_v8  ;;  %v4516_v19 = vpack.c.bf16 %v15770_v25, %v15829_v35  ;;  %v13756_v37 = vld [vmem:[#allocation12 + $0x300] sm:$0xff]  }
 0x424   :  { %v15826_v62 = vld [vmem:[#allocation2 + $0x81] sm:$0xff]  ;;  %4449 = vst [vmem:[#allocation2 + $0xe1] sm:$0xff] %v15808_v26  ;;  %12699 = vmatpush3.bf16.msra.mxu1 %v13744_v63  ;;  %4447 = vst [vmem:[#allocation2 + $0xc1] sm:$0xff] %v15829_v35  ;;  %v13748_v63 = vld [vmem:[#allocation12 + $0x320] sm:$0xff]   ;;  %v12599_v31 = vpop.f32.mrf.mxu1  ;;  %12672 = vmatprep.subr.bf16.mxu0 %v13749_v44 }
 0x425   :  { %17944 = vst [vmem:[#allocation97_spill] sm:$0xff] %v15826_v62  ;;  %6547 = vst [vmem:[#allocation2 + $0x88] sm:$0x3] %v15119_v59  ;;  %v15835_v56 = vld [vmem:[#allocation2 + $0x60] sm:$0xff]  ;;  %12700 = vmatprep.subr.bf16.mxu1 %v13746_v18  ;;  %v15855_v61 = vld [vmem:[#allocation2 + $0xd0] sm:$0xff]  ;;  %v15862_v33 = vmax.f32 %v4368_v7, 0.0  ;;  %v4379_v8 = vadd.f32 %v12599_v31, %v15674_v28 }
 0x426   :  { %6546 = vst [vmem:[#allocation2 + $0x80] sm:$0xff] %v15119_v59  ;;  %v15837_v0 = vld [vmem:[#allocation2 + $0x62] sm:$0xff]  ;;  %v15849_v10 = vpack.c.bf16 %v15784_v48, %v15835_v56  ;;  %v15857_v12 = vld [vmem:[#allocation2 + $0xd2] sm:$0xff]  ;;  %4452 = vst [vmem:[#allocation2 + $0x111] sm:$0xff] %v15844_v38  ;;  %v4370_v13 = vpop.f32.mrf.mxu1  ;;  %12625 = vmatmul.mubr.bf16.gmra.mxu0 %v4516_v19 }
 0x427   :  { %v15841_v51 = vld [vmem:[#allocation2 + $0x61] sm:$0xff]  ;;  %v15859_v11 = vld [vmem:[#allocation2 + $0xd1] sm:$0xff]  ;;  %4450 = vst [vmem:[#allocation2 + $0xf1] sm:$0xff] %v15862_v33  ;;  %v15873_v22 = vmax.f32 %v4379_v8, 0.0  ;;  %v4371_v7 = vadd.f32 %v15674_v28, %v4370_v13  ;;  %12673 = vmatpush3.bf16.msra.mxu0 %v13749_v44 }
 0x428   :  { %17945 = vst [vmem:[#allocation98_spill] sm:$0xff] %v15841_v51  ;;  %6542 = vst [vmem:[#allocation2 + $0x60] sm:$0xff] %v15119_v59  ;;  %12653 = vmatmul.mubr.bf16.gmra.mxu1 %v15849_v10  ;;  %12674 = vmatprep.subr.bf16.mxu0 %v13751_v24  ;;  %v13755_v44 = vld [vmem:[#allocation12 + $0x2c0] sm:$0xff]   ;;  %v13754_v62 = vld [vmem:[#allocation12 + $0x308] sm:$0xff]  }
 0x429   :  { %6543 = vst [vmem:[#allocation2 + $0x68] sm:$0x3] %v15119_v59  ;;  %17946 = vst [vmem:[#allocation99_spill] sm:$0xff] %v15859_v11  ;;  %12701 = vmatpush3.bf16.msra.mxu1 %v13746_v18  ;;  %v15868_v3 = vld [vmem:[#allocation2 + $0xb0] sm:$0xff]  ;;  %v4517_v18 = vpack.c.bf16 %v15862_v33, %v15808_v26  ;;  %v15889_v28 = vmax.f32 %v4371_v7, 0.0  ;;  %v13759_v51 = vld [vmem:[#allocation12 + $0x370] sm:$0xff]  }
 0x42a   :  { %6556 = vst [vmem:[#allocation2 + $0xd0] sm:$0xff] %v15119_v59  ;;  %6557 = vst [vmem:[#allocation2 + $0xd8] sm:$0x3] %v15119_v59  ;;  %v15870_v52 = vld [vmem:[#allocation2 + $0xb2] sm:$0xff]  ;;  %v4474_v31 = vpack.c.bf16 %v15868_v3, %v15119_v59  ;;  %12702 = vmatprep.subr.bf16.mxu1 %v13748_v63 }
 0x42b   :  { %6552 = vst [vmem:[#allocation2 + $0xb0] sm:$0xff] %v15119_v59  ;;  %6553 = vst [vmem:[#allocation2 + $0xb8] sm:$0x3] %v15119_v59  ;;  %v15882_v19 = vld [vmem:[#allocation2 + $0xe0] sm:$0xff]  ;;  %12628 = vmatprep.mubr.bf16.mxu0 %v4517_v18  ;;  %12675 = vmatpush3.bf16.msra.mxu0 %v13751_v24  ;;  %v15906_v18 = vpack.c.bf16 %v15844_v38, %v15889_v28 }
 0x42c   :  { %v15884_v8 = vld [vmem:[#allocation2 + $0xe2] sm:$0xff]  ;;  %4453 = vst [vmem:[#allocation2 + $0x121] sm:$0xff] %v15873_v22  ;;  %12656 = vmatprep.mubr.bf16.mxu1 %v4474_v31  ;;  %4451 = vst [vmem:[#allocation2 + $0x101] sm:$0xff] %v15889_v28  ;;  %12676 = vmatprep.subr.bf16.mxu0 %v13753_v58 }
 0x42d   :  { %v15886_v13 = vld [vmem:[#allocation2 + $0xe1] sm:$0xff]  ;;  %12703 = vmatpush3.bf16.msra.mxu1 %v13748_v63  ;;  %17949 = vst [vmem:[#allocation102_spill] sm:$0xff] %v15906_v18  ;;  %v15910_v63 = vld [vmem:[#allocation2 + $0x110] sm:$0xff] }
 0x42e   :  { %17947 = vst [vmem:[#allocation100_spill] sm:$0xff] %v15886_v13  ;;  %6559 = vst [vmem:[#allocation2 + $0xe8] sm:$0x3] %v15119_v59  ;;  %v15895_v60 = vld [vmem:[#allocation2 + $0xc0] sm:$0xff]  ;;  %12704 = vmatprep.subr.bf16.mxu1 %v13750_v40  ;;  %v15912_v4 = vld [vmem:[#allocation2 + $0x112] sm:$0xff]  ;;  %12629 = vmatmul.mubr.bf16.gmra.mxu0 %v15906_v18  ;;  %v4842_v13 = vpack.c.bf16 %v15734_v9, %v15575_v41 }
 0x42f   :  { %6558 = vst [vmem:[#allocation2 + $0xe0] sm:$0xff] %v15119_v59  ;;  %v15897_v46 = vld [vmem:[#allocation2 + $0xc2] sm:$0xff]  ;;  %v15902_v7 = vpack.c.bf16 %v15855_v61, %v15895_v60  ;;  %6564 = vst [vmem:[#allocation2 + $0x110] sm:$0xff] %v15119_v59  ;;  %v15917_v24 = vld [vmem:[#allocation2 + $0xf0] sm:$0xff]  ;;  %12677 = vmatpush3.bf16.msra.mxu0 %v13753_v58 }
 0x430   :  { %v13752_v31 = vld [vmem:[#allocation12 + $0x310] sm:$0xff]   ;;  %6554 = vst [vmem:[#allocation2 + $0xc0] sm:$0xff] %v15119_v59  ;;  %6555 = vst [vmem:[#allocation2 + $0xc8] sm:$0x3] %v15119_v59  ;;  %v15922_v11 = vld [vmem:[#allocation2 + $0xf2] sm:$0xff]  ;;  %v15926_v45 = vpack.c.bf16 %v15917_v24, %v15882_v19  ;;  %12680 = vmatprep.mubr.bf16.mxu0 %v4842_v13  ;;  %12678 = vmatprep.subr.bf16.mxu0 %v13755_v44 }
 0x431   :  { %17948 = vst [vmem:[#allocation101_spill] sm:$0xff] %v15902_v7  ;;  %12657 = vmatmul.mubr.bf16.gmra.mxu1 %v15902_v7  ;;  %6565 = vst [vmem:[#allocation2 + $0x118] sm:$0x3] %v15119_v59 }
 0x432   :  { %12705 = vmatpush3.bf16.msra.mxu1 %v13750_v40  ;;  %17950 = vst [vmem:[#allocation103_spill] sm:$0xff] %v15926_v45  ;;  %6561 = vst [vmem:[#allocation2 + $0xf8] sm:$0x3] %v15119_v59  ;;  %v13757_v40 = vld [vmem:[#allocation12 + $0x378] sm:$0xff]   ;;  %12660 = vmatprep.mubr.bf16.mxu1 %v15926_v45  ;;  %v5044_v45 = vpack.c.bf16 %v15760_v2, %v15731_v6  ;;  %v13761_v6 = vld [vmem:[#allocation12 + $0x368] sm:$0xff]   ;;  %v5045_v2 = vpack.c.bf16 %v15749_v5, %v15716_v23 }
 0x433   :  { %12706 = vmatprep.subr.bf16.mxu1 %v13752_v31  ;;  %6560 = vst [vmem:[#allocation2 + $0xf0] sm:$0xff] %v15119_v59  ;;  %v15930_v18 = vld [vmem:[#allocation2 + $0x120] sm:$0xff]  ;;  %12679 = vmatpush3.bf16.msra.mxu0 %v13755_v44  ;;  %v15956_v44 = vpack.c.bf16 %v15803_v14, %v15751_v53  ;;  %v13762_v5 = vld [vmem:[#allocation12 + $0x3a8] sm:$0xff]   ;;  %v5047_v23 = vpack.c.bf16 %v15822_v57, %v15784_v48 }
 0x434   :  { %v15932_v7 = vld [vmem:[#allocation2 + $0x122] sm:$0xff]  ;;  %12728 = vmatprep.subr.bf16.mxu0 %v13757_v40 }
 0x435   :  { %6567 = vst [vmem:[#allocation2 + $0x128] sm:$0x3] %v15119_v59  ;;  %6566 = vst [vmem:[#allocation2 + $0x120] sm:$0xff] %v15119_v59  ;;  %v15937_v41 = vld [vmem:[#allocation2 + $0x100] sm:$0xff] }
 0x436   :  { %12707 = vmatpush3.bf16.msra.mxu1 %v13752_v31  ;;  %v15939_v58 = vld [vmem:[#allocation2 + $0x102] sm:$0xff]  ;;  %v15943_v13 = vpack.c.bf16 %v15910_v63, %v15937_v41  ;;  %v15952_v31 = vpack.c.bf16 %v15718_v15, %v15762_v21  ;;  %17952 = vst [vmem:[#allocation105_spill] sm:$0xff] %v15956_v44 }
 0x437   :  { %12708 = vmatprep.subr.bf16.mxu1 %v13754_v62  ;;  %6562 = vst [vmem:[#allocation2 + $0x100] sm:$0xff] %v15119_v59  ;;  %6563 = vst [vmem:[#allocation2 + $0x108] sm:$0x3] %v15119_v59  ;;  %v13758_v59 = vld [vmem:[#allocation12 + $0x3b8] sm:$0xff]  }
 0x438   :  { %17951 = vst [vmem:[#allocation104_spill] sm:$0xff] %v15952_v31  ;;  %12681 = vmatmul.mubr.bf16.vlgmr.msra.gmra.mxu0 %v15952_v31  ;;  %v15966_v31 = vpack.c.bf16 %v15786_v50, %v15837_v0  ;;  %v13766_v48 = vld [vmem:[#allocation12 + $0x398] sm:$0xff]  }
 0x439   :  { %12661 = vmatmul.mubr.bf16.gmra.mxu1 %v15943_v13  ;;  %12684 = vmatprep.mubr.bf16.mxu0 %v15956_v44  ;;  %v13763_v44 = vld [vmem:[#allocation12 + $0x360] sm:$0xff]  }
 0x43a   :  { %12709 = vmatpush3.bf16.msra.mxu1 %v13754_v62  ;;  %12712 = vmatprep.mubr.bf16.mxu1 %v5044_v45  ;;  %v13760_v62 = vld [vmem:[#allocation12 + $0x3b0] sm:$0xff]   ;;  %v5046_v45 = vpack.c.bf16 %v15835_v56, %v15801_v49  ;;  %v13765_v49 = vld [vmem:[#allocation12 + $0x358] sm:$0xff]   ;;  %v13764_v56 = vld [vmem:[#allocation12 + $0x3a0] sm:$0xff]  }
 0x43b   :  { %12710 = vmatprep.subr.bf16.mxu1 %v13756_v37  ;;  %12729 = vmatpush3.bf16.msra.mxu0 %v13757_v40  ;;  %v15981_v40 = vpack.c.bf16 %v15922_v11, %v15884_v8 }
 0x43c   :  { %12730 = vmatprep.subr.bf16.mxu0 %v13759_v51 }
 0x43e   :  { %12711 = vmatpush3.bf16.msra.mxu1 %v13756_v37  ;;  %v4846_v37 = vpack.c.bf16 %v15870_v52, %v15603_v32  ;;  %v15977_v32 = vpack.c.bf16 %v15857_v12, %v15897_v46 }
 0x43f   :  { %12760 = vmatprep.subr.bf16.mxu1 %v13758_v59  ;;  %12731 = vmatpush3.bf16.msra.mxu0 %v13759_v51  ;;  %v13767_v51 = vld [vmem:[#allocation12 + $0x350] sm:$0xff]  }
 0x440   :  { %12732 = vmatprep.subr.bf16.mxu0 %v13761_v6  ;;  %12685 = vmatmul.mubr.bf16.gmra.mxu0 %v15966_v31 }
 0x441   :  { %12713 = vmatmul.mubr.bf16.vlgmr.msra.gmra.mxu1 %v5045_v2  ;;  %12688 = vmatprep.mubr.bf16.mxu0 %v4846_v37  ;;  %v15991_v2 = vpack.c.bf16 %v15912_v4, %v15939_v58  ;;  %v5448_v37 = vpack.c.bf16 %v15762_v21, %v15734_v9  ;;  %v5449_v21 = vpack.c.bf16 %v15751_v53, %v15718_v15  ;;  %v13776_v9 = vld [vmem:[#allocation12 + $0x430] sm:$0xff]   ;;  %v13781_v15 = vld [vmem:[#allocation12 + $0x3d8] sm:$0xff]  }
 0x442   :  { %12716 = vmatprep.mubr.bf16.mxu1 %v5046_v45  ;;  %12761 = vmatpush3.bf16.msra.mxu1 %v13758_v59  ;;  %v5048_v59 = vpack.c.bf16 %v15895_v60, %v15868_v3  ;;  %v13769_v3 = vld [vmem:[#allocation12 + $0x348] sm:$0xff]   ;;  %v5049_v60 = vpack.c.bf16 %v15882_v19, %v15855_v61  ;;  %v5246_v45 = vpack.c.bf16 %v15703_v27, %v15687_v42  ;;  %v13773_v19 = vld [vmem:[#allocation12 + $0x3f8] sm:$0xff]   ;;  %v13775_v42 = vld [vmem:[#allocation12 + $0x3f0] sm:$0xff]  }
 0x443   :  { %12762 = vmatprep.subr.bf16.mxu1 %v13760_v62  ;;  %12733 = vmatpush3.bf16.msra.mxu0 %v13761_v6  ;;  %v5050_v6 = vpack.c.bf16 %v15937_v41, %v15917_v24  ;;  %v13770_v61 = vld [vmem:[#allocation12 + $0x388] sm:$0xff]   ;;  %v5051_v24 = vpack.c.bf16 %v15930_v18, %v15910_v63  ;;  %v13772_v41 = vld [vmem:[#allocation12 + $0x380] sm:$0xff]   ;;  %v5248_v27 = vpack.c.bf16 %v15755_v29, %v15723_v39  ;;  %v13774_v63 = vld [vmem:[#allocation12 + $0x438] sm:$0xff]  }
 0x444   :  { %12734 = vmatprep.subr.bf16.mxu0 %v13763_v44  ;;  %v13779_v39 = vld [vmem:[#allocation12 + $0x3e0] sm:$0xff]   ;;  %v5451_v53 = vpack.c.bf16 %v15824_v43, %v15786_v50  ;;  %v13782_v50 = vld [vmem:[#allocation12 + $0x418] sm:$0xff]  }
 0x445   :  { %v13780_v29 = vld [vmem:[#allocation12 + $0x420] sm:$0xff]  }
 0x446   :  { %12763 = vmatpush3.bf16.msra.mxu1 %v13760_v62  ;;  %v13771_v62 = vld [vmem:[#allocation12 + $0x340] sm:$0xff]  }
 0x447   :  { %12764 = vmatprep.subr.bf16.mxu1 %v13762_v5  ;;  %12735 = vmatpush3.bf16.msra.mxu0 %v13763_v44  ;;  %v13768_v44 = vld [vmem:[#allocation12 + $0x390] sm:$0xff]  }
 0x448   :  { %12736 = vmatprep.subr.bf16.mxu0 %v13765_v49  ;;  %12689 = vmatmul.mubr.bf16.gmra.mxu0 %v15977_v32 }
 0x449   :  { %12717 = vmatmul.mubr.bf16.gmra.mxu1 %v5047_v23  ;;  %12692 = vmatprep.mubr.bf16.mxu0 %v15981_v40  ;;  %v5450_v23 = vpack.c.bf16 %v15837_v0, %v15803_v14  ;;  %v5452_v14 = vpack.c.bf16 %v15897_v46, %v15870_v52  ;;  %v17954_v0 = vpack.c.bf16 %v15808_v26, %v15770_v25  ;;  %v13784_v46 = vld [vmem:[#allocation12 + $0x410] sm:$0xff]   ;;  %v13786_v26 = vld [vmem:[#allocation12 + $0x408] sm:$0xff]  }
 0x44a   :  { %12720 = vmatprep.mubr.bf16.mxu1 %v5048_v59  ;;  %12765 = vmatpush3.bf16.msra.mxu1 %v13762_v5  ;;  %v17953_v5 = vpack.c.bf16 %v15693_v16, %v15681_v36  ;;  %v5250_v36 = vpack.c.bf16 %v15829_v35, %v15791_v1  ;;  %v13778_v16 = vld [vmem:[#allocation12 + $0x428] sm:$0xff]   ;;  %v13783_v1 = vld [vmem:[#allocation12 + $0x3d0] sm:$0xff]   ;;  %v5453_v52 = vpack.c.bf16 %v15884_v8, %v15857_v12  ;;  %v13789_v12 = vld [vmem:[#allocation12 + $0x478] sm:$0xff]  }
 0x44b   :  { %12766 = vmatprep.subr.bf16.mxu1 %v13764_v56  ;;  %12737 = vmatpush3.bf16.msra.mxu0 %v13765_v49  ;;  %v13777_v49 = vld [vmem:[#allocation12 + $0x3e8] sm:$0xff]   ;;  %v5454_v59 = vpack.c.bf16 %v15939_v58, %v15922_v11  ;;  %v17955_v25 = vpack.c.bf16 %v15873_v22, %v15844_v38  ;;  %v5455_v11 = vpack.c.bf16 %v15932_v7, %v15912_v4  ;;  %v13788_v8 = vld [vmem:[#allocation12 + $0x400] sm:$0xff]   ;;  %v13790_v38 = vld [vmem:[#allocation12 + $0x470] sm:$0xff]  }
 0x44c   :  { %12738 = vmatprep.subr.bf16.mxu0 %v13767_v51  ;;  %v5852_v58 = vpack.c.bf16 %v15720_v47, %v15767_v17  ;;  %v5853_v4 = vpack.c.bf16 %v15805_v54, %v15753_v34  ;;  %v17957_v47 = vld [vmem:[#allocation94_spill] sm:$0xff]  ;;  %v17962_v34 = vld [vmem:[#allocation99_spill] sm:$0xff] }
 0x44e   :  { %12767 = vmatpush3.bf16.msra.mxu1 %v13764_v56  ;;  %v13785_v56 = vld [vmem:[#allocation12 + $0x3c8] sm:$0xff]  }
 0x44f   :  { %12768 = vmatprep.subr.bf16.mxu1 %v13766_v48  ;;  %12739 = vmatpush3.bf16.msra.mxu0 %v13767_v51  ;;  %v17956_v51 = vld [vmem:[#allocation98_spill] sm:$0xff] }
 0x450   :  { %12740 = vmatprep.subr.bf16.mxu0 %v13769_v3  ;;  %12693 = vmatmul.mubr.bf16.gmra.mxu0 %v15991_v2  ;;  %v5854_v17 = vpack.c.bf16 %v17957_v47, %v17956_v51 }
 0x451   :  { %12721 = vmatmul.mubr.bf16.gmra.mxu1 %v5049_v60  ;;  %12744 = vmatprep.mubr.bf16.mxu0 %v5246_v45  ;;  %v13792_v60 = vld [vmem:[#allocation12 + $0x460] sm:$0xff]   ;;  %v13794_v45 = vld [vmem:[#allocation12 + $0x450] sm:$0xff]  }
 0x452   :  { %12724 = vmatprep.mubr.bf16.mxu1 %v5050_v6  ;;  %12769 = vmatpush3.bf16.msra.mxu1 %v13766_v48  ;;  %v17958_v48 = vld [vmem:[#allocation36_spill] sm:$0xff]  ;;  %v17961_v6 = vld [vmem:[#allocation58_spill] sm:$0xff] }
 0x453   :  { %12770 = vmatprep.subr.bf16.mxu1 %v13768_v44  ;;  %12741 = vmatpush3.bf16.msra.mxu0 %v13769_v3  ;;  %v5653_v3 = vpack.c.bf16 %v17958_v48, %v15822_v57  ;;  %v17963_v57 = vld [vmem:[#allocation103_spill] sm:$0xff] }
 0x454   :  { %12742 = vmatprep.subr.bf16.mxu0 %v13771_v62 }
 0x456   :  { %12771 = vmatpush3.bf16.msra.mxu1 %v13768_v44  ;;  %v17960_v44 = vld [vmem:[#allocation97_spill] sm:$0xff] }
 0x457   :  { %12772 = vmatprep.subr.bf16.mxu1 %v13770_v61  ;;  %12743 = vmatpush3.bf16.msra.mxu0 %v13771_v62  ;;  %v5855_v54 = vpack.c.bf16 %v17961_v6, %v17960_v44  ;;  %v5856_v62 = vpack.c.bf16 %v17962_v34, %v15829_v35  ;;  %v5657_v35 = vpack.c.bf16 %v17958_v48, %v15930_v18  ;;  %v17969_v18 = vld [vmem:[#allocation40_spill] sm:$0xff] }
 0x458   :  { %12792 = vmatprep.subr.bf16.mxu0 %v13773_v19 }
 0x459   :  { %12725 = vmatmul.mubr.bf16.gmra.mxu1 %v5051_v24 }
 0x45a   :  { %12773 = vmatpush3.bf16.msra.mxu1 %v13770_v61  ;;  %12776 = vmatprep.mubr.bf16.mxu1 %v5448_v37  ;;  %v13795_v61 = vld [vmem:[#allocation12 + $0x448] sm:$0xff]   ;;  %v17965_v37 = vld [vmem:[#allocation102_spill] sm:$0xff] }
 0x45b   :  { %12774 = vmatprep.subr.bf16.mxu1 %v13772_v41  ;;  %12745 = vmatmul.mubr.bf16.vlgmr.msra.gmra.mxu0 %v17953_v5  ;;  %v6057_v5 = vpack.c.bf16 %v17969_v18, %v15824_v43  ;;  %v13799_v43 = vld [vmem:[#allocation9 + $0xa8] sm:$0xff]  }
 0x45c   :  { %12748 = vmatprep.mubr.bf16.mxu0 %v5248_v27  ;;  %12793 = vmatpush3.bf16.msra.mxu0 %v13773_v19  ;;  %v17964_v19 = vld [vmem:[#allocation100_spill] sm:$0xff] }
 0x45d   :  { %12794 = vmatprep.subr.bf16.mxu0 %v13775_v42  ;;  %v5857_v24 = vpack.c.bf16 %v15862_v33, %v17964_v19 }
 0x45e   :  { %12775 = vmatpush3.bf16.msra.mxu1 %v13772_v41  ;;  %v13796_v41 = vld [vmem:[#allocation12 + $0x440] sm:$0xff]  }
 0x45f   :  { %12824 = vmatprep.subr.bf16.mxu1 %v13774_v63 }
 0x460   :  { %12795 = vmatpush3.bf16.msra.mxu0 %v13775_v42  ;;  %v17966_v42 = vld [vmem:[#allocation104_spill] sm:$0xff] }
 0x461   :  { %12777 = vmatmul.mubr.bf16.vlgmr.msra.gmra.mxu1 %v5449_v21  ;;  %12796 = vmatprep.subr.bf16.mxu0 %v13777_v49  ;;  %v13798_v21 = vld [vmem:[#allocation9 + $0xb0] sm:$0xff]  }
 0x462   :  { %12780 = vmatprep.mubr.bf16.mxu1 %v5450_v23  ;;  %12825 = vmatpush3.bf16.msra.mxu1 %v13774_v63  ;;  %v17970_v63 = vld [vmem:[#allocation54_spill] sm:$0xff] }
 0x463   :  { %12826 = vmatprep.subr.bf16.mxu1 %v13776_v9  ;;  %12749 = vmatmul.mubr.bf16.gmra.mxu0 %v15765_v55  ;;  %v5252_v55 = vpack.c.bf16 %v15889_v28, %v15862_v33  ;;  %v13787_v28 = vld [vmem:[#allocation12 + $0x3c0] sm:$0xff]   ;;  %v17968_v33 = vld [vmem:[#allocation105_spill] sm:$0xff] }
 0x464   :  { %12752 = vmatprep.mubr.bf16.mxu0 %v5250_v36  ;;  %12797 = vmatpush3.bf16.msra.mxu0 %v13777_v49  ;;  %v6061_v49 = vpack.c.bf16 %v17970_v63, %v15932_v7 }
 0x465   :  { %12798 = vmatprep.subr.bf16.mxu0 %v13779_v39 }
 0x466   :  { %12827 = vmatpush3.bf16.msra.mxu1 %v13776_v9  ;;  %v16065_v9 = vpop.f32.mrf.mxu0 }
 0x467   :  { %12828 = vmatprep.subr.bf16.mxu1 %v13778_v16  ;;  %17971 = vst [vmem:[#allocation98_spill] sm:$0xff] %v16065_v9 }
 0x468   :  { %12799 = vmatpush3.bf16.msra.mxu0 %v13779_v39 }
 0x469   :  { %12781 = vmatmul.mubr.bf16.gmra.mxu1 %v5451_v53  ;;  %12800 = vmatprep.subr.bf16.mxu0 %v13781_v15 }
 0x46a   :  { %12784 = vmatprep.mubr.bf16.mxu1 %v5452_v14  ;;  %12829 = vmatpush3.bf16.msra.mxu1 %v13778_v16  ;;  %v13801_v16 = vld [vmem:[#allocation9 + $0x98] sm:$0xff]  }
 0x46b   :  { %12830 = vmatprep.subr.bf16.mxu1 %v13780_v29  ;;  %12753 = vmatmul.mubr.bf16.gmra.mxu0 %v17954_v0  ;;  %v13802_v0 = vld [vmem:[#allocation9 + $0x90] sm:$0xff]  }
 0x46c   :  { %12756 = vmatprep.mubr.bf16.mxu0 %v5252_v55  ;;  %12801 = vmatpush3.bf16.msra.mxu0 %v13781_v15 }
 0x46d   :  { %12802 = vmatprep.subr.bf16.mxu0 %v13783_v1 }
 0x46e   :  { %12831 = vmatpush3.bf16.msra.mxu1 %v13780_v29 }
 0x46f   :  { %12832 = vmatprep.subr.bf16.mxu1 %v13782_v50 }
 0x470   :  { %12803 = vmatpush3.bf16.msra.mxu0 %v13783_v1 }
 0x471   :  { %12785 = vmatmul.mubr.bf16.gmra.mxu1 %v5453_v52  ;;  %12804 = vmatprep.subr.bf16.mxu0 %v13785_v56 }
 0x472   :  { %12788 = vmatprep.mubr.bf16.mxu1 %v5454_v59  ;;  %12833 = vmatpush3.bf16.msra.mxu1 %v13782_v50 }
 0x473   :  { %12834 = vmatprep.subr.bf16.mxu1 %v13784_v46  ;;  %12757 = vmatmul.mubr.bf16.gmra.mxu0 %v17955_v25 }
 0x474   :  { %12805 = vmatpush3.bf16.msra.mxu0 %v13785_v56  ;;  %12808 = vmatprep.mubr.bf16.mxu0 %v15775_v20  ;;  %v13791_v20 = vld [vmem:[#allocation12 + $0x468] sm:$0xff]  }
 0x475   :  { %12806 = vmatprep.subr.bf16.mxu0 %v13787_v28 }
 0x476   :  { %12835 = vmatpush3.bf16.msra.mxu1 %v13784_v46 }
 0x477   :  { %12836 = vmatprep.subr.bf16.mxu1 %v13786_v26 }
 0x478   :  { %12807 = vmatpush3.bf16.msra.mxu0 %v13787_v28  ;;  %v13803_v28 = vld [vmem:[#allocation9 + $0x88] sm:$0xff]  }
 0x479   :  { %12789 = vmatmul.mubr.bf16.gmra.mxu1 %v5455_v11  ;;  %12856 = vmatprep.subr.bf16.mxu0 %v13789_v12 }
 0x47a   :  { %12837 = vmatpush3.bf16.msra.mxu1 %v13786_v26  ;;  %12840 = vmatprep.mubr.bf16.mxu1 %v5852_v58 }
 0x47b   :  { %12838 = vmatprep.subr.bf16.mxu1 %v13788_v8  ;;  %12809 = vmatmul.mubr.bf16.vlgmr.msra.gmra.mxu0 %v15813_v30  ;;  %v13793_v30 = vld [vmem:[#allocation12 + $0x458] sm:$0xff]  }
 0x47c   :  { %12812 = vmatprep.mubr.bf16.mxu0 %v15849_v10  ;;  %12857 = vmatpush3.bf16.msra.mxu0 %v13789_v12  ;;  %v17959_v10 = vld [vmem:[#allocation101_spill] sm:$0xff] }
 0x47d   :  { %12858 = vmatprep.subr.bf16.mxu0 %v13790_v38 }
 0x47e   :  { %12839 = vmatpush3.bf16.msra.mxu1 %v13788_v8 }
 0x480   :  { %12859 = vmatpush3.bf16.msra.mxu0 %v13790_v38  ;;  %v13804_v38 = vld [vmem:[#allocation9 + $0x80] sm:$0xff]  }
 0x481   :  { %12841 = vmatmul.mubr.bf16.vlgmr.msra.gmra.mxu1 %v5853_v4  ;;  %12860 = vmatprep.subr.bf16.mxu0 %v13791_v20 }
 0x482   :  { %12844 = vmatprep.mubr.bf16.mxu1 %v5854_v17 }
 0x483   :  { %12813 = vmatmul.mubr.bf16.gmra.mxu0 %v5653_v3 }
 0x484   :  { %12816 = vmatprep.mubr.bf16.mxu0 %v17959_v10  ;;  %12861 = vmatpush3.bf16.msra.mxu0 %v13791_v20 }
 0x485   :  { %12862 = vmatprep.subr.bf16.mxu0 %v13792_v60 }
 0x488   :  { %12863 = vmatpush3.bf16.msra.mxu0 %v13792_v60 }
 0x489   :  { %12845 = vmatmul.mubr.bf16.gmra.mxu1 %v5855_v54  ;;  %12864 = vmatprep.subr.bf16.mxu0 %v13793_v30 }
 0x48a   :  { %12848 = vmatprep.mubr.bf16.mxu1 %v5856_v62 }
 0x48b   :  { %12817 = vmatmul.mubr.bf16.gmra.mxu0 %v17963_v57 }
 0x48c   :  { %12820 = vmatprep.mubr.bf16.mxu0 %v15943_v13  ;;  %12865 = vmatpush3.bf16.msra.mxu0 %v13793_v30  ;;  %v17967_v13 = vld [vmem:[#allocation41_spill] sm:$0xff] }
 0x48d   :  { %12866 = vmatprep.subr.bf16.mxu0 %v13794_v45  ;;  %v5859_v27 = vpack.c.bf16 %v17967_v13, %v15873_v22  ;;  %v13797_v22 = vld [vmem:[#allocation9 + $0xb8] sm:$0xff]  }
 0x48e   :  { %12888 = vmatprep.subr.bf16.mxu1 %v13797_v22 }
 0x48f   :  { %12889 = vmatpush3.bf16.msra.mxu1 %v13797_v22 }
 0x490   :  { %12867 = vmatpush3.bf16.msra.mxu0 %v13794_v45  ;;  %12890 = vmatprep.subr.bf16.mxu1 %v13798_v21 }
 0x491   :  { %12849 = vmatmul.mubr.bf16.gmra.mxu1 %v5857_v24  ;;  %12868 = vmatprep.subr.bf16.mxu0 %v13795_v61 }
 0x492   :  { %12852 = vmatprep.mubr.bf16.mxu1 %v17965_v37 }
 0x493   :  { %12821 = vmatmul.mubr.bf16.gmra.mxu0 %v5657_v35  ;;  %12891 = vmatpush3.bf16.msra.mxu1 %v13798_v21 }
 0x494   :  { %12869 = vmatpush3.bf16.msra.mxu0 %v13795_v61  ;;  %12872 = vmatprep.mubr.bf16.mxu0 %v17966_v42 }
 0x495   :  { %12870 = vmatprep.subr.bf16.mxu0 %v13796_v41  ;;  %12892 = vmatprep.subr.bf16.mxu1 %v13799_v43 }
 0x497   :  { %12893 = vmatpush3.bf16.msra.mxu1 %v13799_v43 }
 0x498   :  { %12871 = vmatpush3.bf16.msra.mxu0 %v13796_v41 }
 0x499   :  { %12853 = vmatmul.mubr.bf16.gmra.mxu1 %v5859_v27 }
 0x49b   :  { %12873 = vmatmul.mubr.bf16.vlgmr.msra.gmra.mxu0 %v17968_v33 }
 0x49c   :  { %12876 = vmatprep.mubr.bf16.mxu0 %v15966_v31 }
 0x4a3   :  { %12877 = vmatmul.mubr.bf16.gmra.mxu0 %v6057_v5 }
 0x4a4   :  { %12880 = vmatprep.mubr.bf16.mxu0 %v15977_v32 }
 0x4ab   :  { %12881 = vmatmul.mubr.bf16.gmra.mxu0 %v15981_v40  ;;  %v13800_v40 = vld [vmem:[#allocation9 + $0xa0] sm:$0xff]  }
 0x4ac   :  { %12884 = vmatprep.mubr.bf16.mxu0 %v15991_v2  ;;  %12894 = vmatprep.subr.bf16.mxu1 %v13800_v40 }
 0x4ad   :  { %12895 = vmatpush3.bf16.msra.mxu1 %v13800_v40 }
 0x4ae   :  { %12896 = vmatprep.subr.bf16.mxu1 %v13801_v16 }
 0x4b1   :  { %12897 = vmatpush3.bf16.msra.mxu1 %v13801_v16 }
 0x4b2   :  { %12898 = vmatprep.subr.bf16.mxu1 %v13802_v0 }
 0x4b3   :  { %12885 = vmatmul.mubr.bf16.gmra.mxu0 %v6061_v49 }
 0x4b5   :  { %12899 = vmatpush3.bf16.msra.mxu1 %v13802_v0 }
 0x4b6   :  { %12900 = vmatprep.subr.bf16.mxu1 %v13803_v28 }
 0x4b9   :  { %12901 = vmatpush3.bf16.msra.mxu1 %v13803_v28 }
 0x4ba   :  { %12902 = vmatprep.subr.bf16.mxu1 %v13804_v38 }
 0x4bd   :  { %12903 = vmatpush3.bf16.msra.mxu1 %v13804_v38 }
 0x4d5   :  { %v12618_v31 = vpop.f32.mrf.mxu0 }
 0x4d7   :  { %v4618_v23 = vpop.f32.mrf.mxu0 }
 0x4d9   :  { %v12619_v32 = vpop.f32.mrf.mxu0 }
 0x4db   :  { %v16067_v2 = vpop.f32.mrf.mxu0 }
 0x4de   :  { %v12622_v36 = vpop.f32.mrf.mxu0 }
 0x4df   :  { %v12650_v7 = vpop.f32.mrf.mxu1 }
 0x4e0   :  { %v4772_v39 = vadd.f32 %v12650_v7, %v12618_v31  ;;  %v4634_v29 = vpop.f32.mrf.mxu0 }
 0x4e1   :  { %v4763_v15 = vpop.f32.mrf.mxu1 }
 0x4e2   :  { %v4764_v53 = vadd.f32 %v4763_v15, %v4618_v23  ;;  %v12623_v55 = vpop.f32.mrf.mxu0  ;;  %v13805_v15 = vld [vmem:[#allocation12 + $0x4f8] sm:$0xff]  }
 0x4e3   :  { %v12651_v14 = vpop.f32.mrf.mxu1  ;;  %12920 = vmatprep.subr.bf16.mxu0 %v13805_v15 }
 0x4e4   :  { %v4775_v1 = vadd.f32 %v12651_v14, %v12619_v32  ;;  %v16071_v56 = vpop.f32.mrf.mxu0  ;;  %12921 = vmatpush3.bf16.msra.mxu0 %v13805_v15 }
 0x4e5   :  { %v16069_v50 = vpop.f32.mrf.mxu1 }
 0x4e6   :  { %v12626_v59 = vpop.f32.mrf.mxu0 }
 0x4e8   :  { %v12654_v52 = vpop.f32.mrf.mxu1  ;;  %v4650_v12 = vpop.f32.mrf.mxu0 }
 0x4e9   :  { %v4788_v46 = vadd.f32 %v12654_v52, %v12622_v36 }
 0x4ea   :  { %v4779_v25 = vpop.f32.mrf.mxu1  ;;  %v12627_v58 = vpop.f32.mrf.mxu0 }
 0x4eb   :  { %v4780_v26 = vadd.f32 %v4779_v25, %v4634_v29  ;;  %v13807_v29 = vld [vmem:[#allocation12 + $0x4f0] sm:$0xff]  }
 0x4ec   :  { %v12655_v11 = vpop.f32.mrf.mxu1  ;;  %v16075_v4 = vpop.f32.mrf.mxu0  ;;  %12922 = vmatprep.subr.bf16.mxu0 %v13807_v29 }
 0x4ed   :  { %v4791_v8 = vadd.f32 %v12655_v11, %v12623_v55  ;;  %12923 = vmatpush3.bf16.msra.mxu0 %v13807_v29 }
 0x4ee   :  { %v16073_v20 = vpop.f32.mrf.mxu1  ;;  %v12630_v17 = vpop.f32.mrf.mxu0 }
 0x4f0   :  { %v4666_v10 = vpop.f32.mrf.mxu0 }
 0x4f1   :  { %v12658_v51 = vpop.f32.mrf.mxu1 }
 0x4f2   :  { %v4804_v47 = vadd.f32 %v12658_v51, %v12626_v59  ;;  %v12631_v6 = vpop.f32.mrf.mxu0  ;;  %v13809_v59 = vld [vmem:[#allocation12 + $0x4e8] sm:$0xff]  }
 0x4f3   :  { %v4795_v3 = vpop.f32.mrf.mxu1  ;;  %12924 = vmatprep.subr.bf16.mxu0 %v13809_v59 }
 0x4f4   :  { %v4796_v60 = vadd.f32 %v4795_v3, %v4650_v12  ;;  %v16079_v34 = vpop.f32.mrf.mxu0  ;;  %12925 = vmatpush3.bf16.msra.mxu0 %v13809_v59 }
 0x4f5   :  { %v12659_v30 = vpop.f32.mrf.mxu1 }
 0x4f6   :  { %v4807_v44 = vadd.f32 %v12659_v30, %v12627_v58 }
 0x4f7   :  { %v16077_v54 = vpop.f32.mrf.mxu1 }
 0x4f8   :  { %v12682_v61 = vpop.f32.mrf.mxu0 }
 0x4f9   :  { %v12662_v62 = vpop.f32.mrf.mxu1  ;;  %v5014_v24 = vadd.f32 %v12682_v61, %v4772_v39 }
 0x4fa   :  { %v4820_v45 = vadd.f32 %v12662_v62, %v12630_v17  ;;  %v4949_v41 = vpop.f32.mrf.mxu0 }
 0x4fb   :  { %v4811_v57 = vpop.f32.mrf.mxu1  ;;  %v16081_v42 = vadd.f32 %v4949_v41, %v4764_v53  ;;  %v16101_v53 = vld [vmem:[#allocation12 + $0x4b8] sm:$0xff]  }
 0x4fc   :  { %v4812_v19 = vadd.f32 %v4811_v57, %v4666_v10  ;;  %v12683_v27 = vpop.f32.mrf.mxu0  ;;  %17972 = vst [vmem:[#allocation94_spill] sm:$0xff] %v16101_v53  ;;  %12952 = vmatprep.subr.bf16.mxu1 %v16101_v53 }
 0x4fd   :  { %v12663_v35 = vpop.f32.mrf.mxu1  ;;  %v16085_v33 = vadd.f32 %v12683_v27, %v4775_v1 }
 0x4fe   :  { %v4823_v37 = vadd.f32 %v12663_v35, %v12631_v6  ;;  %v16087_v5 = vpop.f32.mrf.mxu0 }
 0x4ff   :  { %v16083_v13 = vpop.f32.mrf.mxu1 }
 0x500   :  { %v12686_v22 = vpop.f32.mrf.mxu0 }
 0x501   :  { %v12714_v18 = vpop.f32.mrf.mxu1  ;;  %v5018_v21 = vadd.f32 %v12686_v22, %v4788_v46 }
 0x502   :  { %v5216_v63 = vadd.f32 %v12714_v18, %v5014_v24  ;;  %v4965_v43 = vpop.f32.mrf.mxu0 }
 0x503   :  { %v16089_v49 = vpop.f32.mrf.mxu1  ;;  %v16093_v23 = vadd.f32 %v4965_v43, %v4780_v26 }
 0x504   :  { %v12687_v40 = vpop.f32.mrf.mxu0 }
 0x505   :  { %v16091_v31 = vpop.f32.mrf.mxu1  ;;  %v16097_v7 = vadd.f32 %v12687_v40, %v4791_v8 }
 0x506   :  { %v16099_v36 = vpop.f32.mrf.mxu0 }
 0x507   :  { %v16095_v32 = vpop.f32.mrf.mxu1 }
 0x508   :  { %v12690_v1 = vpop.f32.mrf.mxu0 }
 0x509   :  { %v12718_v39 = vpop.f32.mrf.mxu1  ;;  %v5022_v55 = vadd.f32 %v12690_v1, %v4804_v47 }
 0x50a   :  { %v5220_v16 = vadd.f32 %v12718_v39, %v5018_v21  ;;  %v4981_v52 = vpop.f32.mrf.mxu0 }
 0x50b   :  { %v16103_v14 = vpop.f32.mrf.mxu1  ;;  %v16108_v46 = vadd.f32 %v4981_v52, %v4796_v60 }
 0x50c   :  { %v12691_v25 = vpop.f32.mrf.mxu0 }
 0x50d   :  { %v16106_v0 = vpop.f32.mrf.mxu1  ;;  %v16112_v26 = vadd.f32 %v12691_v25, %v4807_v44 }
 0x50e   :  { %v16114_v11 = vpop.f32.mrf.mxu0 }
 0x50f   :  { %v16110_v28 = vpop.f32.mrf.mxu1 }
 0x510   :  { %v12694_v38 = vpop.f32.mrf.mxu0 }
 0x511   :  { %v12722_v12 = vpop.f32.mrf.mxu1  ;;  %v5026_v51 = vadd.f32 %v12694_v38, %v4820_v45 }
 0x512   :  { %v5224_v8 = vadd.f32 %v12722_v12, %v5022_v55  ;;  %v4997_v17 = vpop.f32.mrf.mxu0 }
 0x513   :  { %v16116_v58 = vpop.f32.mrf.mxu1  ;;  %v16120_v3 = vadd.f32 %v4997_v17, %v4812_v19 }
 0x514   :  { %v12695_v10 = vpop.f32.mrf.mxu0 }
 0x515   :  { %v16118_v47 = vpop.f32.mrf.mxu1  ;;  %v16124_v30 = vadd.f32 %v12695_v10, %v4823_v37 }
 0x516   :  { %v16126_v6 = vpop.f32.mrf.mxu0 }
 0x517   :  { %v16122_v60 = vpop.f32.mrf.mxu1 }
 0x519   :  { %v12726_v44 = vpop.f32.mrf.mxu1 }
 0x51a   :  { %v5228_v62 = vadd.f32 %v12726_v44, %v5026_v51 }
 0x51b   :  { %v16128_v57 = vpop.f32.mrf.mxu1  ;;  %v12746_v61 = vpop.f32.mrf.mxu0 }
 0x51c   :  { %v16130_v24 = vadd.f32 %v12746_v61, %v5216_v63 }
 0x51d   :  { %v16132_v45 = vpop.f32.mrf.mxu1  ;;  %v16134_v35 = vpop.f32.mrf.mxu0 }
 0x51f   :  { %v16136_v19 = vpop.f32.mrf.mxu1  ;;  %v16138_v41 = vpop.f32.mrf.mxu0 }
 0x521   :  { %v16140_v27 = vpop.f32.mrf.mxu1  ;;  %v16142_v37 = vpop.f32.mrf.mxu0 }
 0x523   :  { %v16144_v18 = vpop.f32.mrf.mxu1  ;;  %v12750_v22 = vpop.f32.mrf.mxu0 }
 0x524   :  { %v16146_v21 = vadd.f32 %v12750_v22, %v5220_v16 }
 0x525   :  { %v16148_v43 = vpop.f32.mrf.mxu1  ;;  %v16150_v63 = vpop.f32.mrf.mxu0 }
 0x526   :  { %17973 = vst [vmem:[#allocation101_spill] sm:$0xff] %v16146_v21  ;;  %17974 = vst [vmem:[#allocation97_spill] sm:$0xff] %v16150_v63 }
 0x527   :  { %v16152_v40 = vpop.f32.mrf.mxu1  ;;  %v16154_v39 = vpop.f32.mrf.mxu0 }
 0x528   :  { %17975 = vst [vmem:[#allocation58_spill] sm:$0xff] %v16154_v39 }
 0x529   :  { %v16156_v15 = vpop.f32.mrf.mxu1  ;;  %v16158_v29 = vpop.f32.mrf.mxu0 }
 0x52a   :  { %17976 = vst [vmem:[#allocation99_spill] sm:$0xff] %v16156_v15  ;;  %17977 = vst [vmem:[#allocation103_spill] sm:$0xff] %v16158_v29 }
 0x52b   :  { %v16160_v1 = vpop.f32.mrf.mxu1  ;;  %v12754_v55 = vpop.f32.mrf.mxu0 }
 0x52c   :  { %17978 = vst [vmem:[#allocation100_spill] sm:$0xff] %v16160_v1  ;;  %v16162_v52 = vadd.f32 %v12754_v55, %v5224_v8 }
 0x52d   :  { %v16164_v59 = vpop.f32.mrf.mxu1  ;;  %v16166_v16 = vpop.f32.mrf.mxu0 }
 0x52e   :  { %17979 = vst [vmem:[#allocation102_spill] sm:$0xff] %v16162_v52  ;;  %17980 = vst [vmem:[#allocation104_spill] sm:$0xff] %v16164_v59  ;;  %v18006_v52 = vld [vmem:[#allocation43_spill] sm:$0xff] }
 0x52f   :  { %17981 = vst [vmem:[#allocation41_spill] sm:$0xff] %v16166_v16  ;;  %v16168_v25 = vpop.f32.mrf.mxu1  ;;  %v16170_v12 = vpop.f32.mrf.mxu0  ;;  %v18011_v59 = vld [vmem:[#allocation59_spill] sm:$0xff] }
 0x530   :  { %17982 = vst [vmem:[#allocation105_spill] sm:$0xff] %v16168_v25  ;;  %17983 = vst [vmem:[#allocation40_spill] sm:$0xff] %v16170_v12  ;;  %v18007_v25 = vld [vmem:[#allocation38_spill] sm:$0xff]  ;;  %v18008_v12 = vld [vmem:[#allocation39_spill] sm:$0xff] }
 0x531   :  { %v16172_v38 = vpop.f32.mrf.mxu1  ;;  %v16174_v51 = vpop.f32.mrf.mxu0  ;;  %v2683_v16 = vadd.f32 %v18008_v12, %v18007_v25  ;;  %v18019_v25 = vld [vmem:[#allocation60_spill] sm:$0xff] }
 0x532   :  { %17984 = vst [vmem:[#allocation54_spill] sm:$0xff] %v16172_v38  ;;  %17985 = vst [vmem:[#allocation106_spill] sm:$0xff] %v16174_v51  ;;  %v18005_v38 = vld [vmem:[#allocation42_spill] sm:$0xff] }
 0x533   :  { %v16176_v17 = vpop.f32.mrf.mxu1  ;;  %v12758_v10 = vpop.f32.mrf.mxu0 }
 0x534   :  { %17986 = vst [vmem:[#allocation107_spill] sm:$0xff] %v16176_v17  ;;  %v16178_v44 = vadd.f32 %v12758_v10, %v5228_v62 }
 0x535   :  { %v16180_v61 = vpop.f32.mrf.mxu1  ;;  %v16182_v8 = vpop.f32.mrf.mxu0 }
 0x536   :  { %17987 = vst [vmem:[#allocation108_spill] sm:$0xff] %v16178_v44  ;;  %17988 = vst [vmem:[#allocation109_spill] sm:$0xff] %v16180_v61 }
 0x537   :  { %17989 = vst [vmem:[#allocation110_spill] sm:$0xff] %v16182_v8  ;;  %v16184_v22 = vpop.f32.mrf.mxu1  ;;  %v16186_v55 = vpop.f32.mrf.mxu0 }
 0x538   :  { %17990 = vst [vmem:[#allocation111_spill] sm:$0xff] %v16184_v22  ;;  %17991 = vst [vmem:[#allocation112_spill] sm:$0xff] %v16186_v55 }
 0x539   :  { %v16188_v48 = vpop.f32.mrf.mxu1  ;;  %v16190_v9 = vpop.f32.mrf.mxu0 }
 0x53a   :  { %17992 = vst [vmem:[#allocation113_spill] sm:$0xff] %v16188_v48  ;;  %17993 = vst [vmem:[#allocation114_spill] sm:$0xff] %v16190_v9  ;;  %v18003_v9 = vld [vmem:[#allocation45_spill] sm:$0xff] }
 0x53b   :  { %v16192_v53 = vpop.f32.mrf.mxu1  ;;  %v16194_v51 = vpop.f32.mrf.mxu0 }
 0x53c   :  { %17994 = vst [vmem:[#allocation115_spill] sm:$0xff] %v16192_v53  ;;  %v18004_v53 = vld [vmem:[#allocation55_spill] sm:$0xff] }
 0x53d   :  { %v16196_v17 = vpop.f32.mrf.mxu1  ;;  %v16198_v62 = vpop.f32.mrf.mxu0  ;;  %v2651_v61 = vadd.f32 %v18004_v53, %v18003_v9  ;;  %v18016_v9 = vld [vmem:[#allocation46_spill] sm:$0xff]  ;;  %v18017_v53 = vld [vmem:[#allocation44_spill] sm:$0xff] }
 0x53e   :  { %17995 = vst [vmem:[#allocation116_spill] sm:$0xff] %v16196_v17  ;;  %17996 = vst [vmem:[#allocation117_spill] sm:$0xff] %v16198_v62  ;;  %v2667_v17 = vadd.f32 %v18006_v52, %v18005_v38  ;;  %v2699_v52 = vadd.f32 %v18017_v53, %v18016_v9  ;;  %v18018_v38 = vld [vmem:[#allocation29_spill] sm:$0xff]  ;;  %v18028_v9 = vld [vmem:[#allocation64_spill] sm:$0xff] }
 0x53f   :  { %v16200_v10 = vpop.f32.mrf.mxu1  ;;  %v16202_v44 = vpop.f32.mrf.mxu0  ;;  %v2897_v1 = vadd.f32 %v18011_v59, %v2651_v61  ;;  %v18029_v53 = vld [vmem:[#allocation66_spill] sm:$0xff] }
 0x540   :  { %17997 = vst [vmem:[#allocation118_spill] sm:$0xff] %v16200_v10  ;;  %17998 = vst [vmem:[#allocation119_spill] sm:$0xff] %v16202_v44 }
 0x541   :  { %v16204_v8 = vpop.f32.mrf.mxu1  ;;  %v16206_v22 = vpop.f32.mrf.mxu0  ;;  %v3099_v15 = vadd.f32 %v18018_v38, %v2897_v1  ;;  %v18030_v38 = vld [vmem:[#allocation68_spill] sm:$0xff] }
 0x542   :  { %17999 = vst [vmem:[#allocation120_spill] sm:$0xff] %v16204_v8  ;;  %18000 = vst [vmem:[#allocation121_spill] sm:$0xff] %v16206_v22  ;;  %v18012_v22 = vld [vmem:[#allocation52_spill] sm:$0xff] }
 0x543   :  { %v16208_v55 = vpop.f32.mrf.mxu1  ;;  %v16210_v48 = vpop.f32.mrf.mxu0  ;;  %v2901_v62 = vadd.f32 %v18012_v22, %v2667_v17  ;;  %v18023_v17 = vld [vmem:[#allocation63_spill] sm:$0xff] }
 0x544   :  { %18001 = vst [vmem:[#allocation122_spill] sm:$0xff] %v16208_v55  ;;  %18002 = vst [vmem:[#allocation123_spill] sm:$0xff] %v16210_v48  ;;  %v18013_v55 = vld [vmem:[#allocation61_spill] sm:$0xff]  ;;  %v2909_v61 = vadd.f32 %v18023_v17, %v2699_v52  ;;  %v18032_v52 = vld [vmem:[#allocation71_spill] sm:$0xff] }
 0x545   :  { %v16218_v10 = vpop.f32.mrf.mxu1  ;;  %v16220_v44 = vpop.f32.mrf.mxu0  ;;  %v2905_v8 = vadd.f32 %v18013_v55, %v2683_v16  ;;  %v3103_v12 = vadd.f32 %v18019_v25, %v2901_v62  ;;  %v18024_v16 = vld [vmem:[#allocation65_spill] sm:$0xff]  ;;  %v18025_v55 = vld [vmem:[#allocation67_spill] sm:$0xff]  ;;  %v18031_v25 = vld [vmem:[#allocation70_spill] sm:$0xff] }
 0x546   :  { %18009 = vst [vmem:[#allocation45_spill] sm:$0xff] %v16218_v10  ;;  %18010 = vst [vmem:[#allocation55_spill] sm:$0xff] %v16220_v44  ;;  %v18020_v10 = vld [vmem:[#allocation62_spill] sm:$0xff]  ;;  %v3301_v22 = vadd.f32 %v18024_v16, %v3099_v15  ;;  %v3111_v1 = vadd.f32 %v18028_v9, %v2909_v61  ;;  %v18033_v17 = vld [vmem:[#allocation73_spill] sm:$0xff] }
 0x547   :  { %v16225_v48 = vpop.f32.mrf.mxu1  ;;  %v16227_v29 = vpop.f32.mrf.mxu0  ;;  %v3107_v21 = vadd.f32 %v18020_v10, %v2905_v8  ;;  %v18034_v16 = vld [vmem:[#allocation75_spill] sm:$0xff]  ;;  %v18036_v61 = vld [vmem:[#allocation72_spill] sm:$0xff]  ;;  %v18037_v9 = vld [vmem:[#allocation74_spill] sm:$0xff] }
 0x548   :  { %18014 = vst [vmem:[#allocation42_spill] sm:$0xff] %v16225_v48  ;;  %18015 = vst [vmem:[#allocation43_spill] sm:$0xff] %v16227_v29  ;;  %v3305_v48 = vadd.f32 %v18025_v55, %v3103_v12  ;;  %v18026_v29 = vld [vmem:[#allocation69_spill] sm:$0xff]  ;;  %v3503_v62 = vadd.f32 %v18029_v53, %v3301_v22  ;;  %v3313_v15 = vadd.f32 %v18032_v52, %v3111_v1  ;;  %v18038_v53 = vld [vmem:[#allocation76_spill] sm:$0xff] }
 0x549   :  { %v16234_v44 = vpop.f32.mrf.mxu1  ;;  %v16236_v59 = vpop.f32.mrf.mxu0  ;;  %v3309_v39 = vadd.f32 %v18026_v29, %v3107_v21  ;;  %v18035_v29 = vld [vmem:[#allocation77_spill] sm:$0xff]  ;;  %v18039_v1 = vld [vmem:[#allocation78_spill] sm:$0xff] }
 0x54a   :  { %18021 = vst [vmem:[#allocation38_spill] sm:$0xff] %v16234_v44  ;;  %18022 = vst [vmem:[#allocation39_spill] sm:$0xff] %v16236_v59  ;;  %v3507_v8 = vadd.f32 %v18030_v38, %v3305_v48  ;;  %v3705_v12 = vadd.f32 %v18033_v17, %v3503_v62  ;;  %v3515_v22 = vadd.f32 %v18036_v61, %v3313_v15  ;;  %v18041_v15 = vld [vmem:[#allocation84_spill] sm:$0xff] }
 0x54b   :  { %v16242_v63 = vpop.f32.mrf.mxu0  ;;  %v16247_v10 = vpop.f32.mrf.mxu1  ;;  %v3511_v59 = vadd.f32 %v18031_v25, %v3309_v39  ;;  %v4767_v39 = vadd.f32 %v16069_v50, %v16067_v2  ;;  %v4783_v62 = vadd.f32 %v16073_v20, %v16071_v56  ;;  %v18043_v50 = vld [vmem:[#allocation92_spill] sm:$0xff]  ;;  %v4815_v56 = vadd.f32 %v16083_v13, %v16079_v34 }
 0x54c   :  { %18027 = vst [vmem:[#allocation59_spill] sm:$0xff] %v16242_v63  ;;  %v3709_v21 = vadd.f32 %v18034_v16, %v3507_v8  ;;  %v3907_v48 = vadd.f32 %v18037_v9, %v3705_v12  ;;  %v18042_v12 = vld [vmem:[#allocation88_spill] sm:$0xff]  ;;  %v5217_v9 = vadd.f32 %v16091_v31, %v16085_v33  ;;  %v5222_v34 = vadd.f32 %v16116_v58, %v16108_v46 }
 0x54d   :  { %v16250_v44 = vpop.f32.mrf.mxu0  ;;  %v3713_v55 = vadd.f32 %v18035_v29, %v3511_v59  ;;  %v16263_v25 = vpop.f32.mrf.mxu1  ;;  %v18040_v59 = vld [vmem:[#allocation79_spill] sm:$0xff]  ;;  %v5013_v2 = vadd.f32 %v16087_v5, %v4767_v39  ;;  %v5017_v20 = vadd.f32 %v16099_v36, %v4783_v62  ;;  %v5225_v33 = vadd.f32 %v16118_v47, %v16112_v26  ;;  %v18051_v39 = vld [vmem:[#allocation100_spill] sm:$0xff] }
 0x54e   :  { %v3911_v38 = vadd.f32 %v18038_v53, %v3709_v21  ;;  %v16271_v17 = vadd.f32 %v18040_v59, %v3515_v22  ;;  %v16274_v16 = vadd.f32 %v18041_v15, %v3907_v48  ;;  %v5214_v22 = vadd.f32 %v16089_v49, %v16081_v42  ;;  %v18054_v59 = vld [vmem:[#allocation40_spill] sm:$0xff] }
 0x54f   :  { %v16256_v63 = vpop.f32.mrf.mxu0  ;;  %v3915_v52 = vadd.f32 %v18039_v1, %v3713_v55  ;;  %v4799_v55 = vadd.f32 %v16077_v54, %v16075_v4  ;;  %v5215_v5 = vadd.f32 %v16095_v32, %v5013_v2  ;;  %v5218_v48 = vadd.f32 %v16103_v14, %v16093_v23  ;;  %v16297_v53 = vpop.f32.mrf.mxu1  ;;  %v18055_v2 = vld [vmem:[#allocation105_spill] sm:$0xff] }
 0x550   :  { %v16277_v21 = vadd.f32 %v18042_v12, %v3911_v38  ;;  %v5221_v4 = vadd.f32 %v16106_v0, %v16097_v7  ;;  %v5219_v54 = vadd.f32 %v16110_v28, %v5017_v20  ;;  %v5025_v49 = vadd.f32 %v16126_v6, %v4815_v56  ;;  %v18057_v20 = vld [vmem:[#allocation119_spill] sm:$0xff] }
 0x551   :  { %v16268_v8 = vpop.f32.mrf.mxu0  ;;  %v16281_v29 = vadd.f32 %v18043_v50, %v3915_v52  ;;  %v5021_v42 = vadd.f32 %v16114_v11, %v4799_v55  ;;  %v5620_v31 = vadd.f32 %v16140_v27, %v16130_v24  ;;  %v5416_v23 = vadd.f32 %v16134_v35, %v5214_v22  ;;  %v16325_v58 = vpop.f32.mrf.mxu1  ;;  %v18056_v55 = vld [vmem:[#allocation122_spill] sm:$0xff] }
 0x552   :  { %v5226_v7 = vadd.f32 %v16128_v57, %v16120_v3  ;;  %v5419_v36 = vadd.f32 %v16138_v41, %v5217_v9  ;;  %v5417_v14 = vadd.f32 %v16142_v37, %v5215_v5  ;;  %v5229_v46 = vadd.f32 %v16132_v45, %v16124_v30  ;;  %v18045_v57 = vld [vmem:[#allocation58_spill] sm:$0xff]  ;;  %v18046_v41 = vld [vmem:[#allocation101_spill] sm:$0xff]  ;;  %v18047_v30 = vld [vmem:[#allocation99_spill] sm:$0xff] }
 0x553   :  { %v16288_v61 = vpop.f32.mrf.mxu0  ;;  %v5223_v32 = vadd.f32 %v16122_v60, %v5021_v42  ;;  %v5227_v28 = vadd.f32 %v16136_v19, %v5025_v49  ;;  %v5618_v26 = vadd.f32 %v16144_v18, %v5416_v23  ;;  %v5822_v11 = vadd.f32 %v16194_v51, %v5620_v31  ;;  %v18044_v60 = vld [vmem:[#allocation97_spill] sm:$0xff]  ;;  %v18048_v19 = vld [vmem:[#allocation103_spill] sm:$0xff]  ;;  %v18049_v37 = vld [vmem:[#allocation120_spill] sm:$0xff]  ;;  %v16345_v9 = vpop.f32.mrf.mxu1 }
 0x554   :  { %v5621_v47 = vadd.f32 %v16148_v43, %v5419_v36  ;;  %v5619_v3 = vadd.f32 %v16152_v40, %v5417_v14  ;;  %v5420_v6 = vadd.f32 %v18044_v60, %v5218_v48  ;;  %v5423_v24 = vadd.f32 %v18045_v57, %v5221_v4  ;;  %v18050_v51 = vld [vmem:[#allocation117_spill] sm:$0xff]  ;;  %v18052_v43 = vld [vmem:[#allocation104_spill] sm:$0xff]  ;;  %v18058_v48 = vld [vmem:[#allocation102_spill] sm:$0xff] }
 0x555   :  { %v16305_v13 = vpop.f32.mrf.mxu0  ;;  %v5624_v45 = vadd.f32 %v18047_v30, %v18046_v41  ;;  %v5421_v27 = vadd.f32 %v18048_v19, %v5219_v54  ;;  %v6024_v18 = vadd.f32 %v18049_v37, %v5822_v11  ;;  %v5820_v38 = vadd.f32 %v18050_v51, %v5618_v26  ;;  %v18053_v40 = vld [vmem:[#allocation41_spill] sm:$0xff]  ;;  %v18059_v4 = vld [vmem:[#allocation54_spill] sm:$0xff]  ;;  %v18060_v42 = vld [vmem:[#allocation107_spill] sm:$0xff] }
 0x556   :  { %v5622_v1 = vadd.f32 %v18051_v39, %v5420_v6  ;;  %v5625_v52 = vadd.f32 %v18052_v43, %v5423_v24  ;;  %v5424_v62 = vadd.f32 %v18053_v40, %v5222_v34  ;;  %v5427_v15 = vadd.f32 %v18054_v59, %v5225_v33  ;;  %v18061_v31 = vld [vmem:[#allocation109_spill] sm:$0xff]  ;;  %v18062_v34 = vld [vmem:[#allocation106_spill] sm:$0xff]  ;;  %v18065_v6 = vld [vmem:[#allocation80_spill] sm:$0xff]  ;;  %v12851_v40 = vpop.f32.mrf.mxu1 }
 0x557   :  { %v16318_v0 = vpop.f32.mrf.mxu0  ;;  %v5623_v50 = vadd.f32 %v18055_v2, %v5421_v27  ;;  %v6022_v56 = vadd.f32 %v18056_v55, %v5820_v38  ;;  %v5823_v22 = vadd.f32 %v18057_v20, %v5621_v47  ;;  %v5628_v54 = vadd.f32 %v18059_v4, %v18058_v48  ;;  %v18063_v14 = vld [vmem:[#allocation110_spill] sm:$0xff]  ;;  %v18064_v11 = vld [vmem:[#allocation45_spill] sm:$0xff]  ;;  %v18066_v24 = vld [vmem:[#allocation111_spill] sm:$0xff] }
 0x558   :  { %v5626_v49 = vadd.f32 %v18060_v42, %v5424_v62  ;;  %v5629_v23 = vadd.f32 %v18061_v31, %v5427_v15  ;;  %v5425_v36 = vadd.f32 %v18062_v34, %v5223_v32  ;;  %v5428_v26 = vadd.f32 %v18063_v14, %v5226_v7  ;;  %v18067_v30 = vld [vmem:[#allocation108_spill] sm:$0xff]  ;;  %v18068_v19 = vld [vmem:[#allocation113_spill] sm:$0xff]  ;;  %v18071_v43 = vld [vmem:[#allocation123_spill] sm:$0xff] }
 0x559   :  { %v16331_v35 = vpop.f32.mrf.mxu0  ;;  %v6025_v60 = vadd.f32 %v18064_v11, %v5823_v22  ;;  %v5632_v27 = vadd.f32 %v18068_v19, %v18067_v30  ;;  %v18069_v37 = vld [vmem:[#allocation112_spill] sm:$0xff]  ;;  %v18070_v51 = vld [vmem:[#allocation121_spill] sm:$0xff]  ;;  %v5826_v32 = vadd.f32 %v18071_v43, %v5624_v45  ;;  %v18075_v2 = vld [vmem:[#allocation115_spill] sm:$0xff] }
 0x55a   :  { %v5627_v41 = vadd.f32 %v18066_v24, %v5425_v36  ;;  %v5821_v38 = vadd.f32 %v18070_v51, %v5619_v3  ;;  %v18072_v62 = vld [vmem:[#allocation56_spill] sm:$0xff]  ;;  %v18074_v59 = vld [vmem:[#allocation81_spill] sm:$0xff]  ;;  %v16366_v55 = vadd.f32 %v18075_v2, %v5428_v26  ;;  %v18077_v22 = vld [vmem:[#allocation114_spill] sm:$0xff] }
 0x55b   :  { %v12874_v12 = vpop.f32.mrf.mxu0  ;;  %v16373_v48 = vld [vmem:[#allocation6 + $0x2] ss:$0 sm:$0xff]  ;;  %v18079_v4 = vld [vmem:[#allocation38_spill] sm:$0xff]  ;;  %v18080_v31 = vld [vmem:[#allocation55_spill] sm:$0xff] }
 0x55c   :  { %v6226_v5 = vadd.f32 %v12874_v12, %v6024_v18  ;;  %v5431_v18 = vadd.f32 %v18069_v37, %v5229_v46  ;;  %v5429_v46 = vadd.f32 %v18077_v22, %v5227_v28  ;;  %v6028_v42 = vadd.f32 %v18079_v4, %v5826_v32  ;;  %v18081_v36 = vld [vmem:[#allocation57_spill] sm:$0xff]  ;;  %v18083_v14 = vld [vmem:[#allocation83_spill] sm:$0xff]  ;;  %v18084_v11 = vld [vmem:[#allocation118_spill] sm:$0xff]  ;;  %v5994_v37 = vpop.f32.mrf.mxu1 }
 0x55d   :  { %v6161_v33 = vpop.f32.mrf.mxu0  ;;  %v5824_v34 = vadd.f32 %v18080_v31, %v5622_v1  ;;  %v18086_v28 = vld [vmem:[#allocation39_spill] sm:$0xff]  ;;  %v18092_v22 = vld [vmem:[#allocation85_spill] sm:$0xff] }
 0x55e   :  { %v6242_v57 = vadd.f32 %v6226_v5, %v18065_v6  ;;  %v6224_v47 = vadd.f32 %v6161_v33, %v6022_v56  ;;  %v18076_v56 = vld [vmem:[#allocation116_spill] sm:$0xff]  ;;  %v18078_v5 = vld [vmem:[#allocation42_spill] sm:$0xff]  ;;  %v18085_v6 = vld [vmem:[#allocation43_spill] sm:$0xff] }
 0x55f   :  { %v12875_v39 = vpop.f32.mrf.mxu0  ;;  %v16369_v20 = vadd.f32 %v18076_v56, %v5431_v18  ;;  %v6023_v3 = vadd.f32 %v18078_v5, %v5821_v38  ;;  %v6026_v19 = vadd.f32 %v16247_v10, %v5824_v34  ;;  %v18087_v18 = vld [vmem:[#allocation47_spill] sm:$0xff] }
 0x560   :  { %v16362_v7 = vadd.f32 %v6242_v57, %v18072_v62  ;;  %v6240_v15 = vadd.f32 %v6224_v47, %v18074_v59  ;;  %v6227_v12 = vadd.f32 %v12875_v39, %v6025_v60  ;;  %v16382_v60 = vadd.f32 %v18084_v11, %v5429_v46  ;;  %v18089_v43 = vld [vmem:[#allocation59_spill] sm:$0xff]  ;;  %v16394_v62 = vld [vmem:[#allocation8 + $0x2] ss:$0 sm:$0xff] }
 0x561   :  { %v6164_v45 = vpop.f32.mrf.mxu0  ;;  %v5827_v57 = vadd.f32 %v18085_v6, %v5625_v52  ;;  %v5825_v47 = vadd.f32 %v18086_v28, %v5623_v50  ;;  %v5830_v32 = vadd.f32 %v18089_v43, %v5628_v54  ;;  %v18090_v54 = vld [vmem:[#allocation48_spill] sm:$0xff] }
 0x562   :  { %18073 = vst [vmem:[#allocation52_spill] sm:$0xff] %v16362_v7  ;;  %v16378_v33 = vadd.f32 %v6240_v15, %v18081_v36  ;;  %v6243_v26 = vadd.f32 %v6227_v12, %v18083_v14  ;;  %v6225_v24 = vadd.f32 %v6164_v45, %v6023_v3  ;;  %v6282_v1 = vmul.f32 %v16373_v48, %v16362_v7  ;;  %v12854_v3 = vpop.f32.mrf.mxu1 }
 0x563   :  { %v12878_v30 = vpop.f32.mrf.mxu0  ;;  %v6029_v39 = vadd.f32 %v16263_v25, %v5827_v57  ;;  %v6027_v59 = vadd.f32 %v16297_v53, %v5825_v47  ;;  %v5828_v15 = vadd.f32 %v16250_v44, %v5626_v49  ;;  %v5831_v12 = vadd.f32 %v16256_v63, %v5629_v23  ;;  %v18093_v23 = vld [vmem:[#allocation33_spill] sm:$0xff] }
 0x564   :  { %18082 = vst [vmem:[#allocation61_spill] sm:$0xff] %v16378_v33  ;;  %v16390_v51 = vadd.f32 %v6243_v26, %v18087_v18  ;;  %v6230_v38 = vadd.f32 %v12878_v30, %v6028_v42  ;;  %v6241_v52 = vadd.f32 %v6225_v24, %v16274_v16  ;;  %v6280_v10 = vmul.f32 %v16373_v48, %v16378_v33  ;;  %v18096_v26 = vld [vmem:[#allocation87_spill] sm:$0xff]  ;;  %v18097_v47 = vld [vmem:[#allocation49_spill] sm:$0xff]  ;;  %v6007_v30 = vpop.f32.mrf.mxu1 }
 0x565   :  { %v6177_v50 = vpop.f32.mrf.mxu0  ;;  %v6032_v25 = vadd.f32 %v16325_v58, %v5830_v32  ;;  %v6306_v45 = vadd.f32 %v16394_v62, %v6282_v1  ;;  %v5829_v49 = vadd.f32 %v16268_v8, %v5627_v41  ;;  %v18095_v58 = vld [vmem:[#allocation86_spill] sm:$0xff]  ;;  %v6030_v36 = vadd.f32 %v16345_v9, %v5828_v15  ;;  %v18099_v1 = vld [vmem:[#allocation28_spill] sm:$0xff] }
 0x566   :  { %18088 = vst [vmem:[#allocation46_spill] sm:$0xff] %v16390_v51  ;;  %v6283_v2 = vmul.f32 %v16373_v48, %v16390_v51  ;;  %v16406_v56 = vadd.f32 %v6241_v52, %v18090_v54  ;;  %v6246_v16 = vadd.f32 %v6230_v38, %v18092_v22  ;;  %v6228_v46 = vadd.f32 %v6177_v50, %v6026_v19  ;;  %v18101_v50 = vld [vmem:[#allocation30_spill] sm:$0xff]  ;;  %v12855_v22 = vpop.f32.mrf.mxu1 }
 0x567   :  { %v12879_v5 = vpop.f32.mrf.mxu0  ;;  %v6304_v63 = vadd.f32 %v16394_v62, %v6280_v10  ;;  %v5834_v14 = vadd.f32 %v16288_v61, %v5632_v27  ;;  %v6033_v57 = vadd.f32 %v12851_v40, %v5831_v12  ;;  %v6322_v19 = vmax.f32 %v6306_v45, 0.0  ;;  %v18103_v12 = vld [vmem:[#allocation89_spill] sm:$0xff] }
 0x568   :  { %18091 = vst [vmem:[#allocation44_spill] sm:$0xff] %v16406_v56  ;;  %v6307_v53 = vadd.f32 %v16394_v62, %v6283_v2  ;;  %v6231_v44 = vadd.f32 %v12879_v5, %v6029_v39  ;;  %v16414_v4 = vadd.f32 %v6246_v16, %v18093_v23  ;;  %v6244_v42 = vadd.f32 %v6228_v46, %v18095_v58  ;;  %v18104_v16 = vld [vmem:[#allocation90_spill] sm:$0xff]  ;;  %v13808_v45 = vld [vmem:[#allocation12 + $0x4b0] sm:$0xff]   ;;  %v18107_v58 = vld [vmem:[#allocation32_spill] sm:$0xff] }
 0x569   :  { %v6180_v31 = vpop.f32.mrf.mxu0  ;;  %v6281_v34 = vmul.f32 %v16373_v48, %v16406_v56  ;;  %v6320_v38 = vmax.f32 %v6304_v63, 0.0  ;;  %v5832_v32 = vadd.f32 %v16305_v13, %v16366_v55 }
 0x56a   :  { %18094 = vst [vmem:[#allocation29_spill] sm:$0xff] %v16414_v4  ;;  %v6247_v11 = vadd.f32 %v6231_v44, %v18096_v26  ;;  %v6229_v6 = vadd.f32 %v6180_v31, %v6027_v59  ;;  %v6323_v28 = vmax.f32 %v6307_v53, 0.0  ;;  %v16423_v8 = vadd.f32 %v6244_v42, %v18097_v47  ;;  %v18105_v44 = vld [vmem:[#allocation31_spill] sm:$0xff]  ;;  %v6010_v47 = vpop.f32.mrf.mxu1 }
 0x56b   :  { %v12882_v41 = vpop.f32.mrf.mxu0  ;;  %v6305_v24 = vadd.f32 %v16394_v62, %v6281_v34  ;;  %v6286_v61 = vmul.f32 %v16373_v48, %v16414_v4  ;;  %v6031_v59 = vadd.f32 %v5994_v37, %v5829_v49  ;;  %v6036_v53 = vadd.f32 %v12854_v3, %v5834_v14  ;;  %v18109_v31 = vld [vmem:[#allocation91_spill] sm:$0xff] }
 0x56c   :  { %18098 = vst [vmem:[#allocation60_spill] sm:$0xff] %v16423_v8  ;;  %v16427_v18 = vadd.f32 %v6247_v11, %v18099_v1  ;;  %v6245_v9 = vadd.f32 %v6229_v6, %v16277_v21  ;;  %v6234_v27 = vadd.f32 %v12882_v41, %v6032_v25  ;;  %v6284_v43 = vmul.f32 %v16373_v48, %v16423_v8  ;;  %v18111_v41 = vld [vmem:[#allocation35_spill] sm:$0xff] }
 0x56d   :  { %v6193_v40 = vpop.f32.mrf.mxu0  ;;  %v6321_v39 = vmax.f32 %v6305_v24, 0.0  ;;  %v6337_v15 = vpack.c.bf16 %v6323_v28, %v6322_v19  ;;  %v6310_v23 = vadd.f32 %v16394_v62, %v6286_v61  ;;  %v6034_v11 = vadd.f32 %v6007_v30, %v5832_v32  ;;  %v18110_v28 = vld [vmem:[#allocation94_spill] sm:$0xff]  ;;  %v13810_v30 = vld [vmem:[#allocation12 + $0x4a8] sm:$0xff]  }
 0x56e   :  { %18100 = vst [vmem:[#allocation62_spill] sm:$0xff] %v16427_v18  ;;  %v6287_v52 = vmul.f32 %v16373_v48, %v16427_v18  ;;  %v16439_v10 = vadd.f32 %v6245_v9, %v18101_v50  ;;  %v6232_v21 = vadd.f32 %v6193_v40, %v6030_v36  ;;  %v6250_v2 = vadd.f32 %v6234_v27, %v18103_v12  ;;  %v18113_v40 = vld [vmem:[#allocation37_spill] sm:$0xff]  ;;  %v18116_v32 = vld [vmem:[#allocation82_spill] sm:$0xff] }
 0x56f   :  { %v12883_v25 = vpop.f32.mrf.mxu0  ;;  %v6336_v54 = vpack.c.bf16 %v6321_v39, %v6320_v38  ;;  %v6308_v49 = vadd.f32 %v16394_v62, %v6284_v43  ;;  %v5835_v3 = vadd.f32 %v16318_v0, %v16369_v20  ;;  %v5833_v14 = vadd.f32 %v16331_v35, %v16382_v60 }
 0x570   :  { %18102 = vst [vmem:[#allocation63_spill] sm:$0xff] %v16439_v10  ;;  %v6248_v46 = vadd.f32 %v6232_v21, %v18104_v16  ;;  %v6235_v5 = vadd.f32 %v12883_v25, %v6033_v57  ;;  %v6285_v13 = vmul.f32 %v16373_v48, %v16439_v10  ;;  %v6311_v55 = vadd.f32 %v16394_v62, %v6287_v52 }
 0x571   :  { %v16447_v63 = vadd.f32 %v6250_v2, %v18105_v44  ;;  %12904 = vmatprep.mubr.bf16.mxu1 %v6336_v54  ;;  %v6196_v37 = vpop.f32.mrf.mxu0  ;;  %v6037_v38 = vadd.f32 %v12855_v22, %v5835_v3  ;;  %v6324_v0 = vmax.f32 %v6308_v49, 0.0  ;;  %v6326_v20 = vmax.f32 %v6310_v23, 0.0  ;;  %v18117_v22 = vld [vmem:[#allocation98_spill] sm:$0xff]  ;;  %v18122_v23 = vld [vmem:[#allocation53_spill] sm:$0xff] }
 0x572   :  { %v16452_v42 = vadd.f32 %v6248_v46, %v18107_v58  ;;  %v6251_v34 = vadd.f32 %v6235_v5, %v18109_v31  ;;  %v6233_v36 = vadd.f32 %v6196_v37, %v6031_v59  ;;  %12905 = vmatmul.mubr.bf16.vlgmr.msra.gmra.mxu1 %v6337_v15  ;;  %v6309_v26 = vadd.f32 %v16394_v62, %v6285_v13  ;;  %v18118_v46 = vld [vmem:[#allocation95_spill] sm:$0xff] }
 0x573   :  { %18106 = vst [vmem:[#allocation65_spill] sm:$0xff] %v16447_v63  ;;  %v12886_v6 = vpop.f32.mrf.mxu0  ;;  %v6327_v57 = vmax.f32 %v6311_v55, 0.0  ;;  %12953 = vmatpush3.bf16.msra.mxu1 %v18110_v28  ;;  %v6290_v60 = vmul.f32 %v16373_v48, %v16447_v63  ;;  %v3919_v52 = vadd.f32 %v18116_v32, %v16271_v17  ;;  %v6035_v50 = vadd.f32 %v6010_v47, %v5833_v14  ;;  %v18119_v55 = vld [vmem:[#allocation50_spill] sm:$0xff]  ;;  %v13811_v32 = vld [vmem:[#allocation12 + $0x4e0] sm:$0xff]  }
 0x574   :  { %18108 = vst [vmem:[#allocation67_spill] sm:$0xff] %v16452_v42  ;;  %v16462_v24 = vadd.f32 %v6251_v34, %v18111_v41  ;;  %v6249_v19 = vadd.f32 %v6233_v36, %v16281_v29  ;;  %v6238_v1 = vadd.f32 %v12886_v6, %v6036_v53  ;;  %v6325_v9 = vmax.f32 %v6309_v26, 0.0  ;;  %12954 = vmatprep.subr.bf16.mxu1 %v13808_v45  ;;  %v18115_v29 = vld [vmem:[#allocation93_spill] sm:$0xff]  ;;  %v18124_v34 = vld [vmem:[#allocation51_spill] sm:$0xff]  ;;  %v18126_v47 = vld [vmem:[#allocation34_spill] sm:$0xff] }
 0x575   :  { %v6209_v61 = vpop.f32.mrf.mxu0  ;;  %v6288_v35 = vmul.f32 %v16373_v48, %v16452_v42  ;;  %v6339_v2 = vpack.c.bf16 %v6327_v57, %v6326_v20  ;;  %v4121_v16 = vadd.f32 %v18117_v22, %v3919_v52  ;;  %v6314_v49 = vadd.f32 %v16394_v62, %v6290_v60  ;;  %12926 = vmatprep.subr.bf16.mxu0 %v13811_v32  ;;  %v13812_v52 = vld [vmem:[#allocation12 + $0x4a0] sm:$0xff]  }
 0x576   :  { %18112 = vst [vmem:[#allocation69_spill] sm:$0xff] %v16462_v24  ;;  %v6291_v27 = vmul.f32 %v16373_v48, %v16462_v24  ;;  %v16472_v39 = vadd.f32 %v6249_v19, %v18113_v40  ;;  %v6254_v43 = vadd.f32 %v6238_v1, %v18115_v29  ;;  %v6236_v21 = vadd.f32 %v6209_v61, %v6034_v11  ;;  %v13820_v22 = vld [vmem:[#allocation12 + $0x480] sm:$0xff]   ;;  %v13831_v24 = vld [vmem:[#allocation12 + $0x510] sm:$0xff]  }
 0x577   :  { %v12887_v59 = vpop.f32.mrf.mxu0  ;;  %v6338_v15 = vpack.c.bf16 %v6325_v9, %v6324_v0  ;;  %12955 = vmatpush3.bf16.msra.mxu1 %v13808_v45  ;;  %v6312_v17 = vadd.f32 %v16394_v62, %v6288_v35  ;;  %v18121_v45 = vld [vmem:[#allocation96_spill] sm:$0xff]  ;;  %v6330_v19 = vmax.f32 %v6314_v49, 0.0  ;;  %12927 = vmatpush3.bf16.msra.mxu0 %v13811_v32 }
 0x578   :  { %18114 = vst [vmem:[#allocation64_spill] sm:$0xff] %v16472_v39  ;;  %v6239_v12 = vadd.f32 %v12887_v59, %v6037_v38  ;;  %v6289_v25 = vmul.f32 %v16373_v48, %v16472_v39  ;;  %v6315_v54 = vadd.f32 %v16394_v62, %v6291_v27  ;;  %12956 = vmatprep.subr.bf16.mxu1 %v13810_v30  ;;  %v13816_v59 = vld [vmem:[#allocation12 + $0x490] sm:$0xff]  }
 0x579   :  { %v6252_v5 = vadd.f32 %v6236_v21, %v18118_v46  ;;  %12908 = vmatprep.mubr.bf16.mxu1 %v6338_v15  ;;  %v6212_v13 = vpop.f32.mrf.mxu0  ;;  %v16484_v53 = vadd.f32 %v6254_v43, %v18119_v55  ;;  %v6328_v3 = vmax.f32 %v6312_v17, 0.0  ;;  %v13817_v21 = vld [vmem:[#allocation12 + $0x4c8] sm:$0xff]   ;;  %v13819_v15 = vld [vmem:[#allocation12 + $0x4c0] sm:$0xff]   ;;  %v16517_v46 = vld [vmem:[#allocation12 + $0x578] sm:$0xff]  }
 0x57a   :  { %v6255_v44 = vadd.f32 %v6239_v12, %v18121_v45  ;;  %v6237_v37 = vadd.f32 %v6212_v13, %v6035_v50  ;;  %12909 = vmatmul.mubr.bf16.gmra.mxu1 %v6339_v2  ;;  %v6313_v31 = vadd.f32 %v16394_v62, %v6289_v25  ;;  %v6331_v11 = vmax.f32 %v6315_v54, 0.0  ;;  %v13815_v50 = vld [vmem:[#allocation12 + $0x4d0] sm:$0xff]   ;;  %v13818_v12 = vld [vmem:[#allocation12 + $0x488] sm:$0xff]   ;;  %v16510_v2 = vld [vmem:[#allocation12 + $0x538] sm:$0xff]  }
 0x57b   :  { %18120 = vst [vmem:[#allocation66_spill] sm:$0xff] %v16484_v53  ;;  %v16489_v58 = vadd.f32 %v6252_v5, %v18122_v23  ;;  %12957 = vmatpush3.bf16.msra.mxu1 %v13810_v30  ;;  %v6294_v57 = vmul.f32 %v16373_v48, %v16484_v53  ;;  %v6627_v25 = vld [vmem:[#allocation2 + $0x1] sm:$0xff]  ;;  %v16526_v17 = vld [vmem:[#allocation2 + $0x91] sm:$0xff] }
 0x57c   :  { %v16493_v36 = vadd.f32 %v6255_v44, %v18124_v34  ;;  %v6253_v26 = vadd.f32 %v6237_v37, %v4121_v16  ;;  %v6329_v14 = vmax.f32 %v6313_v31, 0.0  ;;  %v6341_v9 = vpack.c.bf16 %v6331_v11, %v6330_v19  ;;  %12958 = vmatprep.subr.bf16.mxu1 %v13812_v52  ;;  %v16513_v54 = vld [vmem:[#allocation2 + $0x2] sm:$0xff]  ;;  %v18128_v16 = vld [vmem:[#allocation36_spill] sm:$0xff]  ;;  %18129 = vst [vmem:[#allocation73_spill] sm:$0xff] %v16526_v17  ;;  %v16538_v37 = vld [vmem:[#allocation11 + $0x2] ss:$0 sm:$0xff] }
 0x57d   :  { %18123 = vst [vmem:[#allocation68_spill] sm:$0xff] %v16489_v58  ;;  %v6292_v6 = vmul.f32 %v16373_v48, %v16489_v58  ;;  %v6318_v20 = vadd.f32 %v16394_v62, %v6294_v57  ;;  %8647 = vst [vmem:[#allocation2 + $0x8] sm:$0x3] %v18128_v16  ;;  %v16520_v5 = vld [vmem:[#allocation2 + $0xa1] sm:$0xff]  ;;  %v16528_v55 = vld [vmem:[#allocation2 + $0x92] sm:$0xff] }
 0x57e   :  { %18125 = vst [vmem:[#allocation70_spill] sm:$0xff] %v16493_v36  ;;  %v6295_v28 = vmul.f32 %v16373_v48, %v16493_v36  ;;  %v16502_v41 = vadd.f32 %v6253_v26, %v18126_v47  ;;  %v6340_v1 = vpack.c.bf16 %v6329_v14, %v6328_v3  ;;  %8646 = vst [vmem:[#allocation2] sm:$0xff] %v18128_v16  ;;  %v16522_v13 = vld [vmem:[#allocation2 + $0xa2] sm:$0xff]  ;;  %v16532_v45 = vld [vmem:[#allocation2 + $0x131] sm:$0xff] }
 0x57f   :  { %v6316_v38 = vadd.f32 %v16394_v62, %v6292_v6  ;;  %v6334_v29 = vmax.f32 %v6318_v20, 0.0  ;;  %12959 = vmatpush3.bf16.msra.mxu1 %v13812_v52  ;;  %8667 = vst [vmem:[#allocation2 + $0xa8] sm:$0x3] %v18128_v16  ;;  %8666 = vst [vmem:[#allocation2 + $0xa0] sm:$0xff] %v18128_v16  ;;  %v16534_v44 = vld [vmem:[#allocation2 + $0x132] sm:$0xff] }
 0x580   :  { %18127 = vst [vmem:[#allocation71_spill] sm:$0xff] %v16502_v41  ;;  %v6293_v30 = vmul.f32 %v16373_v48, %v16502_v41  ;;  %v6319_v61 = vadd.f32 %v16394_v62, %v6295_v28  ;;  %12912 = vmatprep.mubr.bf16.mxu1 %v6340_v1  ;;  %v13813_v48 = vld [vmem:[#allocation12 + $0x4d8] sm:$0xff]   ;;  %18130 = vst [vmem:[#allocation75_spill] sm:$0xff] %v16528_v55 }
 0x581   :  { %v6332_v35 = vmax.f32 %v6316_v38, 0.0  ;;  %12928 = vmatprep.subr.bf16.mxu0 %v13813_v48  ;;  %8665 = vst [vmem:[#allocation2 + $0x98] sm:$0x3] %v18128_v16  ;;  %8664 = vst [vmem:[#allocation2 + $0x90] sm:$0xff] %v18128_v16 }
 0x582   :  { %12913 = vmatmul.mubr.bf16.gmra.mxu1 %v6341_v9  ;;  %v6317_v0 = vadd.f32 %v16394_v62, %v6293_v30  ;;  %v6335_v27 = vmax.f32 %v6319_v61, 0.0  ;;  %12929 = vmatpush3.bf16.msra.mxu0 %v13813_v48  ;;  %v13814_v62 = vld [vmem:[#allocation12 + $0x498] sm:$0xff]   ;;  %18131 = vst [vmem:[#allocation77_spill] sm:$0xff] %v16532_v45  ;;  %18132 = vst [vmem:[#allocation72_spill] sm:$0xff] %v16534_v44 }
 0x583   :  { %12930 = vmatprep.subr.bf16.mxu0 %v13815_v50  ;;  %12960 = vmatprep.subr.bf16.mxu1 %v13814_v62  ;;  %8685 = vst [vmem:[#allocation2 + $0x138] sm:$0x3] %v18128_v16  ;;  %8684 = vst [vmem:[#allocation2 + $0x130] sm:$0xff] %v18128_v16 }
 0x584   :  { %v6333_v60 = vmax.f32 %v6317_v0, 0.0  ;;  %v6343_v43 = vpack.c.bf16 %v6335_v27, %v6334_v29  ;;  %12961 = vmatpush3.bf16.msra.mxu1 %v13814_v62 }
 0x585   :  { %12962 = vmatprep.subr.bf16.mxu1 %v13816_v59 }
 0x586   :  { %v6342_v40 = vpack.c.bf16 %v6333_v60, %v6332_v35  ;;  %12931 = vmatpush3.bf16.msra.mxu0 %v13815_v50  ;;  %v13823_v35 = vld [vmem:[#allocation12 + $0x530] sm:$0xff]  }
 0x587   :  { %12932 = vmatprep.subr.bf16.mxu0 %v13817_v21 }
 0x588   :  { %12916 = vmatprep.mubr.bf16.mxu1 %v6342_v40  ;;  %12963 = vmatpush3.bf16.msra.mxu1 %v13816_v59 }
 0x589   :  { %12964 = vmatprep.subr.bf16.mxu1 %v13818_v12 }
 0x58a   :  { %12917 = vmatmul.mubr.bf16.gmra.mxu1 %v6343_v43  ;;  %12933 = vmatpush3.bf16.msra.mxu0 %v13817_v21 }
 0x58b   :  { %12934 = vmatprep.subr.bf16.mxu0 %v13819_v15 }
 0x58c   :  { %12965 = vmatpush3.bf16.msra.mxu1 %v13818_v12  ;;  %v13825_v12 = vld [vmem:[#allocation12 + $0x528] sm:$0xff]  }
 0x58d   :  { %12966 = vmatprep.subr.bf16.mxu1 %v13820_v22 }
 0x58e   :  { %12935 = vmatpush3.bf16.msra.mxu0 %v13819_v15 }
 0x58f   :  { %12984 = vmatprep.subr.bf16.mxu0 %v16510_v2 }
 0x590   :  { %12967 = vmatpush3.bf16.msra.mxu1 %v13820_v22 }
 0x591   :  { %13016 = vmatprep.subr.bf16.mxu1 %v16517_v46 }
 0x632   :  { %v12906_v49 = vpop.f32.mrf.mxu1 }
 0x633   :  { %v6460_v23 = vadd.f32 %v12906_v49, %v16538_v37 }
 0x634   :  { %v6451_v31 = vpop.f32.mrf.mxu1 }
 0x635   :  { %v16541_v34 = vmax.f32 %v6460_v23, 0.0  ;;  %v6452_v26 = vadd.f32 %v16538_v37, %v6451_v31 }
 0x636   :  { %v12907_v11 = vpop.f32.mrf.mxu1 }
 0x637   :  { %6572 = vst [vmem:[#allocation2 + $0x31] sm:$0xff] %v16541_v34  ;;  %v16545_v3 = vmax.f32 %v6452_v26, 0.0  ;;  %v6463_v14 = vadd.f32 %v12907_v11, %v16538_v37 }
 0x638   :  { %v6454_v6 = vpop.f32.mrf.mxu1 }
 0x639   :  { %6570 = vst [vmem:[#allocation2 + $0x11] sm:$0xff] %v16545_v3  ;;  %v16549_v57 = vmax.f32 %v6463_v14, 0.0  ;;  %v6455_v28 = vadd.f32 %v16538_v37, %v6454_v6  ;;  %v6643_v47 = vpack.c.bf16 %v16545_v3, %v6627_v25 }
 0x63a   :  { %v12910_v19 = vpop.f32.mrf.mxu1 }
 0x63b   :  { %6573 = vst [vmem:[#allocation2 + $0x41] sm:$0xff] %v16549_v57  ;;  %v16554_v1 = vmax.f32 %v6455_v28, 0.0  ;;  %v6476_v9 = vadd.f32 %v12910_v19, %v16538_v37  ;;  %12936 = vmatprep.mubr.bf16.mxu0 %v6643_v47 }
 0x63c   :  { %v6467_v38 = vpop.f32.mrf.mxu1 }
 0x63d   :  { %6571 = vst [vmem:[#allocation2 + $0x21] sm:$0xff] %v16554_v1  ;;  %v6520_v61 = vmax.f32 %v6476_v9, 0.0  ;;  %v6468_v0 = vadd.f32 %v16538_v37, %v6467_v38  ;;  %v6644_v20 = vpack.c.bf16 %v16541_v34, %v16554_v1  ;;  %v13824_v38 = vld [vmem:[#allocation12 + $0x570] sm:$0xff]  }
 0x63e   :  { %v12911_v60 = vpop.f32.mrf.mxu1  ;;  %v16563_v27 = vld [vmem:[#allocation2 + $0x30] sm:$0xff] }
 0x63f   :  { %v16565_v40 = vld [vmem:[#allocation2 + $0x32] sm:$0xff]  ;;  %6576 = vst [vmem:[#allocation2 + $0x71] sm:$0xff] %v6520_v61  ;;  %v16569_v43 = vmax.f32 %v6468_v0, 0.0  ;;  %v6479_v32 = vadd.f32 %v12911_v60, %v16538_v37  ;;  %12937 = vmatmul.mubr.bf16.vlgmr.msra.gmra.mxu0 %v6644_v20 }
 0x640   :  { %v16567_v29 = vld [vmem:[#allocation2 + $0x31] sm:$0xff]  ;;  %v6470_v48 = vpop.f32.mrf.mxu1  ;;  %12985 = vmatpush3.bf16.msra.mxu0 %v16510_v2 }
 0x641   :  { %8652 = vst [vmem:[#allocation2 + $0x30] sm:$0xff] %v18128_v16  ;;  %8653 = vst [vmem:[#allocation2 + $0x38] sm:$0x3] %v18128_v16  ;;  %v16574_v52 = vld [vmem:[#allocation2 + $0x10] sm:$0xff]  ;;  %v6521_v62 = vmax.f32 %v6479_v32, 0.0  ;;  %v6471_v21 = vadd.f32 %v16538_v37, %v6470_v48  ;;  %v6645_v15 = vpack.c.bf16 %v16569_v43, %v16549_v57  ;;  %12986 = vmatprep.subr.bf16.mxu0 %v13823_v35 }
 0x642   :  { %v16577_v50 = vld [vmem:[#allocation2 + $0x12] sm:$0xff]  ;;  %6574 = vst [vmem:[#allocation2 + $0x51] sm:$0xff] %v16569_v43  ;;  %v6602_v59 = vpack.c.bf16 %v16574_v52, %v18128_v16  ;;  %v12914_v2 = vpop.f32.mrf.mxu1  ;;  %v16587_v25 = vld [vmem:[#allocation2 + $0x40] sm:$0xff] }
 0x643   :  { %8648 = vst [vmem:[#allocation2 + $0x10] sm:$0xff] %v18128_v16  ;;  %8649 = vst [vmem:[#allocation2 + $0x18] sm:$0x3] %v18128_v16  ;;  %v16589_v22 = vld [vmem:[#allocation2 + $0x42] sm:$0xff]  ;;  %v16593_v23 = vmax.f32 %v6471_v21, 0.0  ;;  %v6492_v31 = vadd.f32 %v12914_v2, %v16538_v37  ;;  %12940 = vmatprep.mubr.bf16.mxu0 %v6645_v15  ;;  %v16602_v6 = vpack.c.bf16 %v6521_v62, %v6520_v61  ;;  %v13827_v20 = vld [vmem:[#allocation12 + $0x520] sm:$0xff]  }
 0x644   :  { %v16591_v49 = vld [vmem:[#allocation2 + $0x41] sm:$0xff]  ;;  %6577 = vst [vmem:[#allocation2 + $0x81] sm:$0xff] %v6521_v62  ;;  %12968 = vmatprep.mubr.bf16.mxu1 %v6602_v59  ;;  %v6483_v26 = vpop.f32.mrf.mxu1  ;;  %12987 = vmatpush3.bf16.msra.mxu0 %v13823_v35  ;;  %v6974_v56 = vpack.c.bf16 %v16577_v50, %v16513_v54 }
 0x645   :  { %8655 = vst [vmem:[#allocation2 + $0x48] sm:$0x3] %v18128_v16  ;;  %8654 = vst [vmem:[#allocation2 + $0x40] sm:$0xff] %v18128_v16  ;;  %v16598_v11 = vld [vmem:[#allocation2 + $0x20] sm:$0xff]  ;;  %v16607_v47 = vmax.f32 %v6492_v31, 0.0  ;;  %v6484_v19 = vadd.f32 %v16538_v37, %v6483_v26  ;;  %v6646_v0 = vpack.c.bf16 %v6520_v61, %v16593_v23  ;;  %12988 = vmatprep.subr.bf16.mxu0 %v13825_v12 }
 0x646   :  { %v16600_v14 = vld [vmem:[#allocation2 + $0x22] sm:$0xff]  ;;  %6575 = vst [vmem:[#allocation2 + $0x61] sm:$0xff] %v16593_v23  ;;  %v16612_v9 = vpack.c.bf16 %v16563_v27, %v16598_v11  ;;  %v12915_v35 = vpop.f32.mrf.mxu1  ;;  %v16617_v60 = vld [vmem:[#allocation2 + $0x70] sm:$0xff] }
 0x647   :  { %v16604_v28 = vld [vmem:[#allocation2 + $0x21] sm:$0xff]  ;;  %v16619_v32 = vld [vmem:[#allocation2 + $0x72] sm:$0xff]  ;;  %6580 = vst [vmem:[#allocation2 + $0xd1] sm:$0xff] %v16607_v47  ;;  %v16624_v62 = vmax.f32 %v6484_v19, 0.0  ;;  %v6495_v21 = vadd.f32 %v12915_v35, %v16538_v37  ;;  %12941 = vmatmul.mubr.bf16.gmra.mxu0 %v6646_v0 }
 0x648   :  { %8650 = vst [vmem:[#allocation2 + $0x20] sm:$0xff] %v18128_v16  ;;  %8651 = vst [vmem:[#allocation2 + $0x28] sm:$0x3] %v18128_v16  ;;  %v16621_v48 = vld [vmem:[#allocation2 + $0x71] sm:$0xff]  ;;  %12969 = vmatmul.mubr.bf16.vlgmr.msra.gmra.mxu1 %v16612_v9  ;;  %v6486_v61 = vpop.f32.mrf.mxu1  ;;  %12989 = vmatpush3.bf16.msra.mxu0 %v13825_v12  ;;  %v13829_v12 = vld [vmem:[#allocation12 + $0x518] sm:$0xff]  }
 0x649   :  { %18133 = vst [vmem:[#allocation74_spill] sm:$0xff] %v16621_v48  ;;  %8660 = vst [vmem:[#allocation2 + $0x70] sm:$0xff] %v18128_v16  ;;  %13017 = vmatpush3.bf16.msra.mxu1 %v16517_v46  ;;  %v16631_v59 = vld [vmem:[#allocation2 + $0x50] sm:$0xff]  ;;  %v16638_v31 = vmax.f32 %v6495_v21, 0.0  ;;  %v6487_v26 = vadd.f32 %v16538_v37, %v6486_v61  ;;  %v6647_v46 = vpack.c.bf16 %v16624_v62, %v16520_v5  ;;  %12990 = vmatprep.subr.bf16.mxu0 %v13827_v20 }
 0x64a   :  { %8661 = vst [vmem:[#allocation2 + $0x78] sm:$0x3] %v18128_v16  ;;  %v16633_v15 = vld [vmem:[#allocation2 + $0x52] sm:$0xff]  ;;  %6578 = vst [vmem:[#allocation2 + $0xb1] sm:$0xff] %v16624_v62  ;;  %v16643_v19 = vpack.c.bf16 %v16631_v59, %v16587_v25  ;;  %13018 = vmatprep.subr.bf16.mxu1 %v13824_v38  ;;  %v12918_v35 = vpop.f32.mrf.mxu1 }
 0x64b   :  { %v16635_v2 = vld [vmem:[#allocation2 + $0x51] sm:$0xff]  ;;  %v16649_v21 = vld [vmem:[#allocation2 + $0x80] sm:$0xff]  ;;  %6581 = vst [vmem:[#allocation2 + $0xe1] sm:$0xff] %v16638_v31  ;;  %v16656_v44 = vmax.f32 %v6487_v26, 0.0  ;;  %v6508_v53 = vadd.f32 %v12918_v35, %v16538_v37  ;;  %12944 = vmatprep.mubr.bf16.mxu0 %v6647_v46 }
 0x64c   :  { %v13826_v0 = vld [vmem:[#allocation12 + $0x568] sm:$0xff]   ;;  %8657 = vst [vmem:[#allocation2 + $0x58] sm:$0x3] %v18128_v16  ;;  %8656 = vst [vmem:[#allocation2 + $0x50] sm:$0xff] %v18128_v16  ;;  %v16651_v30 = vld [vmem:[#allocation2 + $0x82] sm:$0xff]  ;;  %12972 = vmatprep.mubr.bf16.mxu1 %v16643_v19  ;;  %v6499_v5 = vpop.f32.mrf.mxu1  ;;  %12991 = vmatpush3.bf16.msra.mxu0 %v13827_v20 }
 0x64d   :  { %v16653_v61 = vld [vmem:[#allocation2 + $0x81] sm:$0xff]  ;;  %13019 = vmatpush3.bf16.msra.mxu1 %v13824_v38  ;;  %6579 = vst [vmem:[#allocation2 + $0xc1] sm:$0xff] %v16656_v44  ;;  %v16671_v35 = vmax.f32 %v6508_v53, 0.0  ;;  %v6500_v46 = vadd.f32 %v16538_v37, %v6499_v5  ;;  %v13828_v38 = vld [vmem:[#allocation12 + $0x560] sm:$0xff]   ;;  %v6648_v20 = vpack.c.bf16 %v16607_v47, %v16656_v44  ;;  %12992 = vmatprep.subr.bf16.mxu0 %v13829_v12 }
 0x64e   :  { %18134 = vst [vmem:[#allocation76_spill] sm:$0xff] %v16653_v61  ;;  %8663 = vst [vmem:[#allocation2 + $0x88] sm:$0x3] %v18128_v16  ;;  %v16662_v36 = vld [vmem:[#allocation2 + $0x60] sm:$0xff]  ;;  %13020 = vmatprep.subr.bf16.mxu1 %v13826_v0  ;;  %v12919_v26 = vpop.f32.mrf.mxu1  ;;  %v16682_v53 = vld [vmem:[#allocation2 + $0xd0] sm:$0xff] }
 0x64f   :  { %8662 = vst [vmem:[#allocation2 + $0x80] sm:$0xff] %v18128_v16  ;;  %v16664_v58 = vld [vmem:[#allocation2 + $0x62] sm:$0xff]  ;;  %v16676_v41 = vpack.c.bf16 %v16617_v60, %v16662_v36  ;;  %v16684_v55 = vld [vmem:[#allocation2 + $0xd2] sm:$0xff]  ;;  %6584 = vst [vmem:[#allocation2 + $0x111] sm:$0xff] %v16671_v35  ;;  %v16689_v42 = vmax.f32 %v6500_v46, 0.0  ;;  %v6511_v4 = vadd.f32 %v12919_v26, %v16538_v37  ;;  %12945 = vmatmul.mubr.bf16.gmra.mxu0 %v6648_v20 }
 0x650   :  { %v16668_v63 = vld [vmem:[#allocation2 + $0x61] sm:$0xff]  ;;  %v16686_v5 = vld [vmem:[#allocation2 + $0xd1] sm:$0xff]  ;;  %v6502_v39 = vpop.f32.mrf.mxu1  ;;  %12993 = vmatpush3.bf16.msra.mxu0 %v13829_v12 }
 0x651   :  { %18135 = vst [vmem:[#allocation78_spill] sm:$0xff] %v16668_v63  ;;  %8658 = vst [vmem:[#allocation2 + $0x60] sm:$0xff] %v18128_v16  ;;  %12973 = vmatmul.mubr.bf16.gmra.mxu1 %v16676_v41  ;;  %v16695_v18 = vld [vmem:[#allocation2 + $0xb0] sm:$0xff]  ;;  %v6529_v46 = vmax.f32 %v6511_v4, 0.0  ;;  %v6503_v8 = vadd.f32 %v16538_v37, %v6502_v39  ;;  %v13830_v20 = vld [vmem:[#allocation12 + $0x558] sm:$0xff]   ;;  %v6649_v7 = vpack.c.bf16 %v16689_v42, %v16638_v31  ;;  %12994 = vmatprep.subr.bf16.mxu0 %v13831_v24 }
 0x652   :  { %8659 = vst [vmem:[#allocation2 + $0x68] sm:$0x3] %v18128_v16  ;;  %18136 = vst [vmem:[#allocation79_spill] sm:$0xff] %v16686_v5  ;;  %13021 = vmatpush3.bf16.msra.mxu1 %v13826_v0  ;;  %v16697_v45 = vld [vmem:[#allocation2 + $0xb2] sm:$0xff]  ;;  %v6606_v26 = vpack.c.bf16 %v16695_v18, %v18128_v16  ;;  %v16707_v12 = vld [vmem:[#allocation2 + $0xe0] sm:$0xff] }
 0x653   :  { %8672 = vst [vmem:[#allocation2 + $0xd0] sm:$0xff] %v18128_v16  ;;  %8673 = vst [vmem:[#allocation2 + $0xd8] sm:$0x3] %v18128_v16  ;;  %13022 = vmatprep.subr.bf16.mxu1 %v13828_v38  ;;  %v13833_v0 = vld [vmem:[#allocation12 + $0x508] sm:$0xff]   ;;  %v16709_v10 = vld [vmem:[#allocation2 + $0xe2] sm:$0xff]  ;;  %v16713_v39 = vmax.f32 %v6503_v8, 0.0  ;;  %12948 = vmatprep.mubr.bf16.mxu0 %v6649_v7  ;;  %v16716_v37 = vpack.c.bf16 %v6529_v46, %v16671_v35 }
 0x654   :  { %6582 = vst [vmem:[#allocation2 + $0xf1] sm:$0xff] %v16689_v42  ;;  %8668 = vst [vmem:[#allocation2 + $0xb0] sm:$0xff] %v18128_v16  ;;  %v16711_v4 = vld [vmem:[#allocation2 + $0xe1] sm:$0xff]  ;;  %12976 = vmatprep.mubr.bf16.mxu1 %v6606_v26  ;;  %12995 = vmatpush3.bf16.msra.mxu0 %v13831_v24  ;;  %v13835_v26 = vld [vmem:[#allocation12 + $0x500] sm:$0xff]  }
 0x655   :  { %8669 = vst [vmem:[#allocation2 + $0xb8] sm:$0x3] %v18128_v16  ;;  %18137 = vst [vmem:[#allocation84_spill] sm:$0xff] %v16711_v4  ;;  %v16720_v51 = vld [vmem:[#allocation2 + $0xc0] sm:$0xff]  ;;  %12996 = vmatprep.subr.bf16.mxu0 %v13833_v0  ;;  %v13836_v48 = vld [vmem:[#allocation12 + $0x540] sm:$0xff]  }
 0x656   :  { %6585 = vst [vmem:[#allocation2 + $0x121] sm:$0xff] %v6529_v46  ;;  %8675 = vst [vmem:[#allocation2 + $0xe8] sm:$0x3] %v18128_v16  ;;  %13023 = vmatpush3.bf16.msra.mxu1 %v13828_v38  ;;  %v16722_v33 = vld [vmem:[#allocation2 + $0xc2] sm:$0xff]  ;;  %v16727_v8 = vpack.c.bf16 %v16682_v53, %v16720_v51  ;;  %v6650_v46 = vpack.c.bf16 %v16671_v35, %v16713_v39  ;;  %v16733_v24 = vld [vmem:[#allocation2 + $0x110] sm:$0xff] }
 0x657   :  { %8674 = vst [vmem:[#allocation2 + $0xe0] sm:$0xff] %v18128_v16  ;;  %6583 = vst [vmem:[#allocation2 + $0x101] sm:$0xff] %v16713_v39  ;;  %13024 = vmatprep.subr.bf16.mxu1 %v13830_v20  ;;  %v13832_v7 = vld [vmem:[#allocation12 + $0x550] sm:$0xff]   ;;  %v16735_v38 = vld [vmem:[#allocation2 + $0x112] sm:$0xff] }
 0x658   :  { %18138 = vst [vmem:[#allocation88_spill] sm:$0xff] %v16727_v8  ;;  %8670 = vst [vmem:[#allocation2 + $0xc0] sm:$0xff] %v18128_v16  ;;  %v16737_v4 = vld [vmem:[#allocation2 + $0x111] sm:$0xff]  ;;  %12949 = vmatmul.mubr.bf16.gmra.mxu0 %v6650_v46  ;;  %v13837_v46 = vld [vmem:[#allocation12 + $0x5b8] sm:$0xff]  }
 0x659   :  { %8671 = vst [vmem:[#allocation2 + $0xc8] sm:$0x3] %v18128_v16  ;;  %18139 = vst [vmem:[#allocation92_spill] sm:$0xff] %v16737_v4  ;;  %12977 = vmatmul.mubr.bf16.gmra.mxu1 %v16727_v8  ;;  %12997 = vmatpush3.bf16.msra.mxu0 %v13833_v0  ;;  %v13834_v4 = vld [vmem:[#allocation12 + $0x548] sm:$0xff]   ;;  %v13838_v63 = vld [vmem:[#allocation12 + $0x5f8] sm:$0xff]  }
 0x65a   :  { %8680 = vst [vmem:[#allocation2 + $0x110] sm:$0xff] %v18128_v16  ;;  %8681 = vst [vmem:[#allocation2 + $0x118] sm:$0x3] %v18128_v16  ;;  %13025 = vmatpush3.bf16.msra.mxu1 %v13830_v20  ;;  %13000 = vmatprep.mubr.bf16.mxu0 %v6974_v56 }
 0x65b   :  { %v16744_v35 = vld [vmem:[#allocation2 + $0xf0] sm:$0xff]  ;;  %13026 = vmatprep.subr.bf16.mxu1 %v13832_v7  ;;  %12998 = vmatprep.subr.bf16.mxu0 %v13835_v26 }
 0x65c   :  { %v16746_v5 = vld [vmem:[#allocation2 + $0xf2] sm:$0xff]  ;;  %v16750_v17 = vpack.c.bf16 %v16744_v35, %v16707_v12 }
 0x65d   :  { %8677 = vst [vmem:[#allocation2 + $0xf8] sm:$0x3] %v18128_v16  ;;  %8676 = vst [vmem:[#allocation2 + $0xf0] sm:$0xff] %v18128_v16  ;;  %v16754_v54 = vld [vmem:[#allocation2 + $0x120] sm:$0xff]  ;;  %12999 = vmatpush3.bf16.msra.mxu0 %v13835_v26  ;;  %v16783_v26 = vpack.c.bf16 %v16633_v15, %v16589_v22 }
 0x65e   :  { %18140 = vst [vmem:[#allocation97_spill] sm:$0xff] %v16750_v17  ;;  %v16756_v20 = vld [vmem:[#allocation2 + $0x122] sm:$0xff]  ;;  %12980 = vmatprep.mubr.bf16.mxu1 %v16750_v17  ;;  %13027 = vmatpush3.bf16.msra.mxu1 %v13832_v7  ;;  %v7176_v7 = vpack.c.bf16 %v16598_v11, %v16574_v52  ;;  %v7177_v52 = vpack.c.bf16 %v16587_v25, %v16563_v27  ;;  %v13842_v25 = vld [vmem:[#allocation12 + $0x5e8] sm:$0xff]  }
 0x65f   :  { %v16758_v0 = vld [vmem:[#allocation2 + $0x121] sm:$0xff]  ;;  %13028 = vmatprep.subr.bf16.mxu1 %v13834_v4  ;;  %13048 = vmatprep.subr.bf16.mxu0 %v13837_v46  ;;  %v6978_v27 = vpack.c.bf16 %v16697_v45, %v16522_v13  ;;  %v7180_v13 = vpack.c.bf16 %v16720_v51, %v16695_v18  ;;  %v7181_v51 = vpack.c.bf16 %v16707_v12, %v16682_v53  ;;  %v13850_v12 = vld [vmem:[#allocation12 + $0x5c8] sm:$0xff]  }
 0x660   :  { %18141 = vst [vmem:[#allocation58_spill] sm:$0xff] %v16758_v0  ;;  %8683 = vst [vmem:[#allocation2 + $0x128] sm:$0x3] %v18128_v16  ;;  %v16763_v56 = vld [vmem:[#allocation2 + $0x100] sm:$0xff]  ;;  %v16773_v0 = vpack.c.bf16 %v16565_v40, %v16600_v14  ;;  %v7378_v53 = vpack.c.bf16 %v16554_v1, %v16545_v3  ;;  %v7380_v1 = vpack.c.bf16 %v16593_v23, %v16569_v43  ;;  %v13859_v43 = vld [vmem:[#allocation12 + $0x620] sm:$0xff]  }
 0x661   :  { %8682 = vst [vmem:[#allocation2 + $0x120] sm:$0xff] %v18128_v16  ;;  %v16765_v61 = vld [vmem:[#allocation2 + $0x102] sm:$0xff]  ;;  %v16769_v8 = vpack.c.bf16 %v16733_v24, %v16763_v56  ;;  %v7584_v23 = vpack.c.bf16 %v16722_v33, %v16697_v45 }
 0x662   :  { %18143 = vst [vmem:[#allocation99_spill] sm:$0xff] %v16773_v0  ;;  %8678 = vst [vmem:[#allocation2 + $0x100] sm:$0xff] %v18128_v16  ;;  %13001 = vmatmul.mubr.bf16.vlgmr.msra.gmra.mxu0 %v16773_v0  ;;  %v13839_v17 = vld [vmem:[#allocation12 + $0x5b0] sm:$0xff]   ;;  %13029 = vmatpush3.bf16.msra.mxu1 %v13834_v4  ;;  %v16790_v0 = vpack.c.bf16 %v16619_v32, %v16664_v58  ;;  %v7178_v4 = vpack.c.bf16 %v16662_v36, %v16631_v59 }
 0x663   :  { %18142 = vst [vmem:[#allocation101_spill] sm:$0xff] %v16769_v8  ;;  %8679 = vst [vmem:[#allocation2 + $0x108] sm:$0x3] %v18128_v16  ;;  %12981 = vmatmul.mubr.bf16.gmra.mxu1 %v16769_v8  ;;  %13030 = vmatprep.subr.bf16.mxu1 %v13836_v48  ;;  %v13840_v11 = vld [vmem:[#allocation12 + $0x5f0] sm:$0xff]   ;;  %v13841_v8 = vld [vmem:[#allocation12 + $0x5a8] sm:$0xff]   ;;  %v7179_v36 = vpack.c.bf16 %v16649_v21, %v16617_v60  ;;  %v16808_v60 = vpack.c.bf16 %v16746_v5, %v16709_v10 }
 0x664   :  { %13032 = vmatprep.mubr.bf16.mxu1 %v7176_v7  ;;  %13004 = vmatprep.mubr.bf16.mxu0 %v16783_v26  ;;  %v13847_v59 = vld [vmem:[#allocation12 + $0x590] sm:$0xff]   ;;  %v16815_v7 = vpack.c.bf16 %v16735_v38, %v16765_v61 }
 0x665   :  { %13049 = vmatpush3.bf16.msra.mxu0 %v13837_v46  ;;  %v13843_v46 = vld [vmem:[#allocation12 + $0x5a0] sm:$0xff]   ;;  %v13848_v18 = vld [vmem:[#allocation12 + $0x5d0] sm:$0xff]  }
 0x666   :  { %13050 = vmatprep.subr.bf16.mxu0 %v13839_v17  ;;  %13031 = vmatpush3.bf16.msra.mxu1 %v13836_v48  ;;  %v16801_v48 = vpack.c.bf16 %v16684_v55, %v16722_v33  ;;  %v13855_v3 = vld [vmem:[#allocation12 + $0x630] sm:$0xff]   ;;  %v7585_v33 = vpack.c.bf16 %v16709_v10, %v16684_v55  ;;  %v13869_v10 = vld [vmem:[#allocation12 + $0x6b8] sm:$0xff]   ;;  %v7587_v55 = vpack.c.bf16 %v16756_v20, %v16735_v38 }
 0x667   :  { %13080 = vmatprep.subr.bf16.mxu1 %v13838_v63  ;;  %v13864_v45 = vld [vmem:[#allocation12 + $0x650] sm:$0xff]   ;;  %v7985_v38 = vpack.c.bf16 %v16635_v2, %v16591_v49  ;;  %v13877_v49 = vld [vmem:[#allocation12 + $0x698] sm:$0xff]   ;;  %v18149_v2 = vld [vmem:[#allocation76_spill] sm:$0xff] }
 0x669   :  { %13051 = vmatpush3.bf16.msra.mxu0 %v13839_v17  ;;  %v13844_v17 = vld [vmem:[#allocation12 + $0x5e0] sm:$0xff]  }
 0x66a   :  { %13005 = vmatmul.mubr.bf16.gmra.mxu0 %v16790_v0  ;;  %13052 = vmatprep.subr.bf16.mxu0 %v13841_v8 }
 0x66b   :  { %13033 = vmatmul.mubr.bf16.vlgmr.msra.gmra.mxu1 %v7177_v52  ;;  %13008 = vmatprep.mubr.bf16.mxu0 %v6978_v27  ;;  %v13849_v52 = vld [vmem:[#allocation12 + $0x588] sm:$0xff]   ;;  %v7580_v27 = vpack.c.bf16 %v16600_v14, %v16577_v50  ;;  %v7581_v50 = vpack.c.bf16 %v16589_v22, %v16565_v40  ;;  %v13856_v14 = vld [vmem:[#allocation12 + $0x670] sm:$0xff]   ;;  %v13861_v40 = vld [vmem:[#allocation12 + $0x618] sm:$0xff]  }
 0x66c   :  { %13036 = vmatprep.mubr.bf16.mxu1 %v7178_v4  ;;  %13081 = vmatpush3.bf16.msra.mxu1 %v13838_v63  ;;  %v13845_v63 = vld [vmem:[#allocation12 + $0x598] sm:$0xff]   ;;  %v13851_v4 = vld [vmem:[#allocation12 + $0x580] sm:$0xff]  }
 0x66d   :  { %13082 = vmatprep.subr.bf16.mxu1 %v13840_v11  ;;  %13053 = vmatpush3.bf16.msra.mxu0 %v13841_v8  ;;  %v13846_v8 = vld [vmem:[#allocation12 + $0x5d8] sm:$0xff]   ;;  %v13860_v22 = vld [vmem:[#allocation12 + $0x660] sm:$0xff]  }
 0x66e   :  { %13054 = vmatprep.subr.bf16.mxu0 %v13843_v46 }
 0x670   :  { %13083 = vmatpush3.bf16.msra.mxu1 %v13840_v11  ;;  %v7182_v11 = vpack.c.bf16 %v16763_v56, %v16744_v35  ;;  %v7183_v35 = vpack.c.bf16 %v16754_v54, %v16733_v24  ;;  %v13852_v56 = vld [vmem:[#allocation12 + $0x5c0] sm:$0xff]   ;;  %v13854_v24 = vld [vmem:[#allocation12 + $0x678] sm:$0xff]  }
 0x671   :  { %13084 = vmatprep.subr.bf16.mxu1 %v13842_v25  ;;  %13055 = vmatpush3.bf16.msra.mxu0 %v13843_v46  ;;  %v13853_v46 = vld [vmem:[#allocation12 + $0x638] sm:$0xff]  }
 0x672   :  { %13009 = vmatmul.mubr.bf16.gmra.mxu0 %v16801_v48  ;;  %13056 = vmatprep.subr.bf16.mxu0 %v13845_v63 }
 0x673   :  { %13037 = vmatmul.mubr.bf16.gmra.mxu1 %v7179_v36  ;;  %13012 = vmatprep.mubr.bf16.mxu0 %v16808_v60  ;;  %v13857_v36 = vld [vmem:[#allocation12 + $0x628] sm:$0xff]  }
 0x674   :  { %13040 = vmatprep.mubr.bf16.mxu1 %v7180_v13  ;;  %13085 = vmatpush3.bf16.msra.mxu1 %v13842_v25  ;;  %v18144_v25 = vpack.c.bf16 %v16549_v57, %v16541_v34  ;;  %v7382_v34 = vpack.c.bf16 %v16656_v44, %v16624_v62  ;;  %v13858_v57 = vld [vmem:[#allocation12 + $0x668] sm:$0xff]   ;;  %v13863_v62 = vld [vmem:[#allocation12 + $0x610] sm:$0xff]   ;;  %v7586_v13 = vpack.c.bf16 %v16765_v61, %v16746_v5 }
 0x675   :  { %13086 = vmatprep.subr.bf16.mxu1 %v13844_v17  ;;  %13057 = vmatpush3.bf16.msra.mxu0 %v13845_v63  ;;  %v13865_v63 = vld [vmem:[#allocation12 + $0x608] sm:$0xff]   ;;  %v7984_v61 = vpack.c.bf16 %v16567_v29, %v16604_v28  ;;  %v13871_v5 = vld [vmem:[#allocation12 + $0x6b0] sm:$0xff]   ;;  %v18146_v28 = vld [vmem:[#allocation78_spill] sm:$0xff] }
 0x676   :  { %13058 = vmatprep.subr.bf16.mxu0 %v13847_v59  ;;  %v13872_v29 = vld [vmem:[#allocation9 + $0xf0] sm:$0xff]  }
 0x678   :  { %13087 = vmatpush3.bf16.msra.mxu1 %v13844_v17  ;;  %v7582_v17 = vpack.c.bf16 %v16664_v58, %v16633_v15  ;;  %v7583_v58 = vpack.c.bf16 %v16651_v30, %v16619_v32  ;;  %v18145_v15 = vpack.c.bf16 %v16638_v31, %v16607_v47  ;;  %v13862_v32 = vld [vmem:[#allocation12 + $0x658] sm:$0xff]   ;;  %v13866_v47 = vld [vmem:[#allocation12 + $0x648] sm:$0xff]   ;;  %v13868_v31 = vld [vmem:[#allocation12 + $0x640] sm:$0xff]  }
 0x679   :  { %13088 = vmatprep.subr.bf16.mxu1 %v13846_v8  ;;  %13059 = vmatpush3.bf16.msra.mxu0 %v13847_v59  ;;  %v13867_v59 = vld [vmem:[#allocation12 + $0x600] sm:$0xff]  }
 0x67a   :  { %13013 = vmatmul.mubr.bf16.gmra.mxu0 %v16815_v7  ;;  %13060 = vmatprep.subr.bf16.mxu0 %v13849_v52 }
 0x67b   :  { %13041 = vmatmul.mubr.bf16.gmra.mxu1 %v7181_v51  ;;  %13064 = vmatprep.mubr.bf16.mxu0 %v7378_v53  ;;  %v13876_v53 = vld [vmem:[#allocation9 + $0xe0] sm:$0xff]  }
 0x67c   :  { %13044 = vmatprep.mubr.bf16.mxu1 %v7182_v11  ;;  %13089 = vmatpush3.bf16.msra.mxu1 %v13846_v8  ;;  %v18147_v8 = vld [vmem:[#allocation74_spill] sm:$0xff]  ;;  %v18150_v11 = vld [vmem:[#allocation73_spill] sm:$0xff] }
 0x67d   :  { %13090 = vmatprep.subr.bf16.mxu1 %v13848_v18  ;;  %13061 = vmatpush3.bf16.msra.mxu0 %v13849_v52  ;;  %v7986_v51 = vpack.c.bf16 %v18147_v8, %v18146_v28  ;;  %v18148_v52 = vld [vmem:[#allocation88_spill] sm:$0xff]  ;;  %v18165_v28 = vld [vmem:[#allocation62_spill] sm:$0xff] }
 0x67e   :  { %13062 = vmatprep.subr.bf16.mxu0 %v13851_v4 }
 0x680   :  { %13091 = vmatpush3.bf16.msra.mxu1 %v13848_v18  ;;  %v13875_v18 = vld [vmem:[#allocation12 + $0x6a0] sm:$0xff]  }
 0x681   :  { %13092 = vmatprep.subr.bf16.mxu1 %v13850_v12  ;;  %13063 = vmatpush3.bf16.msra.mxu0 %v13851_v4  ;;  %v7987_v4 = vpack.c.bf16 %v18150_v11, %v18149_v2  ;;  %v18168_v11 = vld [vmem:[#allocation67_spill] sm:$0xff] }
 0x682   :  { %13112 = vmatprep.subr.bf16.mxu0 %v13853_v46 }
 0x683   :  { %13045 = vmatmul.mubr.bf16.gmra.mxu1 %v7183_v35  ;;  %v16870_v35 = vld [vmem:[#allocation6 + $0x3] ss:$0 sm:$0xff] }
 0x684   :  { %13093 = vmatpush3.bf16.msra.mxu1 %v13850_v12  ;;  %13096 = vmatprep.mubr.bf16.mxu1 %v7580_v27  ;;  %v13878_v27 = vld [vmem:[#allocation9 + $0xd8] sm:$0xff]   ;;  %v8403_v8 = vmul.f32 %v16870_v35, %v18165_v28 }
 0x685   :  { %13094 = vmatprep.subr.bf16.mxu1 %v13852_v56  ;;  %13065 = vmatmul.mubr.bf16.vlgmr.msra.gmra.mxu0 %v18144_v25  ;;  %v9082_v28 = vld [vmem:[#allocation2 + $0xa2] sm:$0xff] }
 0x686   :  { %13068 = vmatprep.mubr.bf16.mxu0 %v7380_v1  ;;  %13113 = vmatpush3.bf16.msra.mxu0 %v13853_v46  ;;  %v13879_v46 = vld [vmem:[#allocation12 + $0x690] sm:$0xff]   ;;  %v18154_v1 = vld [vmem:[#allocation44_spill] sm:$0xff] }
 0x687   :  { %13114 = vmatprep.subr.bf16.mxu0 %v13855_v3  ;;  %v8397_v25 = vmul.f32 %v16870_v35, %v18154_v1 }
 0x688   :  { %13095 = vmatpush3.bf16.msra.mxu1 %v13852_v56  ;;  %v18152_v56 = vld [vmem:[#allocation97_spill] sm:$0xff] }
 0x689   :  { %13144 = vmatprep.subr.bf16.mxu1 %v13854_v24 }
 0x68a   :  { %13115 = vmatpush3.bf16.msra.mxu0 %v13855_v3  ;;  %v18153_v3 = vld [vmem:[#allocation101_spill] sm:$0xff] }
 0x68b   :  { %13097 = vmatmul.mubr.bf16.vlgmr.msra.gmra.mxu1 %v7581_v50  ;;  %13116 = vmatprep.subr.bf16.mxu0 %v13857_v36  ;;  %v16878_v50 = vld [vmem:[#allocation8 + $0x3] ss:$0 sm:$0xff] }
 0x68c   :  { %13100 = vmatprep.mubr.bf16.mxu1 %v7582_v17  ;;  %13145 = vmatpush3.bf16.msra.mxu1 %v13854_v24  ;;  %v18155_v24 = vld [vmem:[#allocation61_spill] sm:$0xff] }
 0x68d   :  { %13146 = vmatprep.subr.bf16.mxu1 %v13856_v14  ;;  %13069 = vmatmul.mubr.bf16.gmra.mxu0 %v16602_v6  ;;  %v7384_v6 = vpack.c.bf16 %v16713_v39, %v16689_v42 }
 0x68e   :  { %13072 = vmatprep.mubr.bf16.mxu0 %v7382_v34  ;;  %13117 = vmatpush3.bf16.msra.mxu0 %v13857_v36  ;;  %v8396_v36 = vmul.f32 %v16870_v35, %v18155_v24  ;;  %v18157_v34 = vld [vmem:[#allocation92_spill] sm:$0xff] }
 0x68f   :  { %13118 = vmatprep.subr.bf16.mxu0 %v13859_v43 }
 0x690   :  { %13147 = vmatpush3.bf16.msra.mxu1 %v13856_v14  ;;  %v18156_v14 = vld [vmem:[#allocation84_spill] sm:$0xff] }
 0x691   :  { %13148 = vmatprep.subr.bf16.mxu1 %v13858_v57  ;;  %v7989_v17 = vpack.c.bf16 %v16689_v42, %v18156_v14  ;;  %v18171_v14 = vld [vmem:[#allocation71_spill] sm:$0xff] }
 0x692   :  { %13119 = vmatpush3.bf16.msra.mxu0 %v13859_v43  ;;  %v13880_v43 = vld [vmem:[#allocation9 + $0xd0] sm:$0xff]  }
 0x693   :  { %13101 = vmatmul.mubr.bf16.gmra.mxu1 %v7583_v58  ;;  %13120 = vmatprep.subr.bf16.mxu0 %v13861_v40  ;;  %v7789_v58 = vpack.c.bf16 %v18128_v16, %v16754_v54  ;;  %v18161_v54 = vld [vmem:[#allocation52_spill] sm:$0xff] }
 0x694   :  { %13104 = vmatprep.mubr.bf16.mxu1 %v7584_v23  ;;  %13149 = vmatpush3.bf16.msra.mxu1 %v13858_v57  ;;  %v7990_v57 = vpack.c.bf16 %v18157_v34, %v16713_v39  ;;  %v8420_v23 = vadd.f32 %v16878_v50, %v8396_v36  ;;  %v18159_v39 = vld [vmem:[#allocation99_spill] sm:$0xff] }
 0x695   :  { %13150 = vmatprep.subr.bf16.mxu1 %v13860_v22  ;;  %13073 = vmatmul.mubr.bf16.gmra.mxu0 %v18145_v15 }
 0x696   :  { %13076 = vmatprep.mubr.bf16.mxu0 %v7384_v6  ;;  %13121 = vmatpush3.bf16.msra.mxu0 %v13861_v40  ;;  %v8421_v40 = vadd.f32 %v16878_v50, %v8397_v25  ;;  %v13882_v6 = vld [vmem:[#allocation9 + $0xc8] sm:$0xff]  }
 0x697   :  { %13122 = vmatprep.subr.bf16.mxu0 %v13863_v62 }
 0x698   :  { %13151 = vmatpush3.bf16.msra.mxu1 %v13860_v22  ;;  %v13883_v22 = vld [vmem:[#allocation12 + $0x680] sm:$0xff]   ;;  %v8437_v15 = vmax.f32 %v8421_v40, 0.0  ;;  %v18173_v40 = vld [vmem:[#allocation68_spill] sm:$0xff] }
 0x699   :  { %13152 = vmatprep.subr.bf16.mxu1 %v13862_v32 }
 0x69a   :  { %13123 = vmatpush3.bf16.msra.mxu0 %v13863_v62  ;;  %v18158_v62 = vld [vmem:[#allocation46_spill] sm:$0xff] }
 0x69b   :  { %13105 = vmatmul.mubr.bf16.gmra.mxu1 %v7585_v33  ;;  %13124 = vmatprep.subr.bf16.mxu0 %v13865_v63  ;;  %v8399_v42 = vmul.f32 %v16870_v35, %v18158_v62  ;;  %v8398_v33 = vmul.f32 %v16870_v35, %v18161_v54 }
 0x69c   :  { %13108 = vmatprep.mubr.bf16.mxu1 %v7586_v13  ;;  %13153 = vmatpush3.bf16.msra.mxu1 %v13862_v32  ;;  %v18160_v32 = vld [vmem:[#allocation63_spill] sm:$0xff]  ;;  %v18162_v13 = vld [vmem:[#allocation60_spill] sm:$0xff] }
 0x69d   :  { %13154 = vmatprep.subr.bf16.mxu1 %v13864_v45  ;;  %13077 = vmatmul.mubr.bf16.gmra.mxu0 %v16716_v37  ;;  %v13873_v37 = vld [vmem:[#allocation12 + $0x6a8] sm:$0xff]  }
 0x69e   :  { %13125 = vmatpush3.bf16.msra.mxu0 %v13865_v63  ;;  %13128 = vmatprep.mubr.bf16.mxu0 %v16612_v9  ;;  %v13870_v9 = vld [vmem:[#allocation9 + $0xf8] sm:$0xff]   ;;  %v8401_v63 = vmul.f32 %v16870_v35, %v18160_v32 }
 0x69f   :  { %13126 = vmatprep.subr.bf16.mxu0 %v13867_v59  ;;  %v13919_v32 = vld [vmem:[#allocation12 + $0x7f0] sm:$0xff]  }
 0x6a0   :  { %13155 = vmatpush3.bf16.msra.mxu1 %v13864_v45  ;;  %v8436_v45 = vmax.f32 %v8420_v23, 0.0 }
 0x6a1   :  { %13156 = vmatprep.subr.bf16.mxu1 %v13866_v47 }
 0x6a2   :  { %13127 = vmatpush3.bf16.msra.mxu0 %v13867_v59  ;;  %v8400_v59 = vmul.f32 %v16870_v35, %v18162_v13 }
 0x6a3   :  { %13109 = vmatmul.mubr.bf16.gmra.mxu1 %v7587_v55  ;;  %13176 = vmatprep.subr.bf16.mxu0 %v13869_v10  ;;  %v18164_v55 = vld [vmem:[#allocation77_spill] sm:$0xff] }
 0x6a4   :  { %13157 = vmatpush3.bf16.msra.mxu1 %v13866_v47  ;;  %13160 = vmatprep.mubr.bf16.mxu1 %v7984_v61  ;;  %v8423_v47 = vadd.f32 %v16878_v50, %v8399_v42  ;;  %v13884_v61 = vld [vmem:[#allocation9 + $0xc0] sm:$0xff]  }
 0x6a5   :  { %13158 = vmatprep.subr.bf16.mxu1 %v13868_v31  ;;  %13129 = vmatmul.mubr.bf16.vlgmr.msra.gmra.mxu0 %v16643_v19  ;;  %v7785_v19 = vpack.c.bf16 %v18128_v16, %v16649_v21  ;;  %v18151_v21 = vld [vmem:[#allocation79_spill] sm:$0xff] }
 0x6a6   :  { %13132 = vmatprep.mubr.bf16.mxu0 %v16676_v41  ;;  %13177 = vmatpush3.bf16.msra.mxu0 %v13869_v10  ;;  %v13874_v41 = vld [vmem:[#allocation9 + $0xe8] sm:$0xff]   ;;  %v7988_v12 = vpack.c.bf16 %v18151_v21, %v16656_v44  ;;  %v18163_v10 = vld [vmem:[#allocation58_spill] sm:$0xff]  ;;  %v8427_v21 = vadd.f32 %v16878_v50, %v8403_v8 }
 0x6a7   :  { %13178 = vmatprep.subr.bf16.mxu0 %v13871_v5  ;;  %v13881_v44 = vld [vmem:[#allocation12 + $0x688] sm:$0xff]   ;;  %v13885_v8 = vld [vmem:[#allocation12 + $0x738] sm:$0xff]  }
 0x6a8   :  { %13159 = vmatpush3.bf16.msra.mxu1 %v13868_v31  ;;  %v7991_v31 = vpack.c.bf16 %v18164_v55, %v18163_v10 }
 0x6a9   :  { %13208 = vmatprep.subr.bf16.mxu1 %v13870_v9 }
 0x6aa   :  { %13179 = vmatpush3.bf16.msra.mxu0 %v13871_v5  ;;  %v8452_v5 = vpack.c.bf16 %v8437_v15, %v8436_v45  ;;  %v18174_v15 = vld [vmem:[#allocation70_spill] sm:$0xff] }
 0x6ab   :  { %13161 = vmatmul.mubr.bf16.vlgmr.msra.gmra.mxu1 %v7985_v38  ;;  %13180 = vmatprep.subr.bf16.mxu0 %v13873_v37  ;;  %v8424_v38 = vadd.f32 %v16878_v50, %v8400_v59  ;;  %v18175_v59 = vld [vmem:[#allocation66_spill] sm:$0xff] }
 0x6ac   :  { %13164 = vmatprep.mubr.bf16.mxu1 %v7986_v51  ;;  %13209 = vmatpush3.bf16.msra.mxu1 %v13870_v9  ;;  %v8425_v9 = vadd.f32 %v16878_v50, %v8401_v63  ;;  %v8411_v63 = vmul.f32 %v16870_v35, %v18174_v15 }
 0x6ad   :  { %13210 = vmatprep.subr.bf16.mxu1 %v13872_v29  ;;  %13133 = vmatmul.mubr.bf16.gmra.mxu0 %v7785_v19  ;;  %v18166_v19 = vld [vmem:[#allocation64_spill] sm:$0xff]  ;;  %v8440_v2 = vmax.f32 %v8424_v38, 0.0 }
 0x6ae   :  { %13136 = vmatprep.mubr.bf16.mxu0 %v18148_v52  ;;  %13181 = vmatpush3.bf16.msra.mxu0 %v13873_v37  ;;  %v8422_v37 = vadd.f32 %v16878_v50, %v8398_v33  ;;  %v8441_v51 = vmax.f32 %v8425_v9, 0.0  ;;  %v18167_v52 = vld [vmem:[#allocation29_spill] sm:$0xff]  ;;  %v18176_v9 = vld [vmem:[#allocation72_spill] sm:$0xff] }
 0x6af   :  { %13182 = vmatprep.subr.bf16.mxu0 %v13875_v18 }
 0x6b0   :  { %13211 = vmatpush3.bf16.msra.mxu1 %v13872_v29  ;;  %v8439_v29 = vmax.f32 %v8423_v47, 0.0  ;;  %v8410_v47 = vmul.f32 %v16870_v35, %v18175_v59 }
 0x6b1   :  { %13212 = vmatprep.subr.bf16.mxu1 %v13874_v41 }
 0x6b2   :  { %13183 = vmatpush3.bf16.msra.mxu0 %v13875_v18  ;;  %v8405_v18 = vmul.f32 %v16870_v35, %v18166_v19  ;;  %v8434_v38 = vadd.f32 %v16878_v50, %v8410_v47  ;;  %v13896_v47 = vld [vmem:[#allocation12 + $0x6d0] sm:$0xff]  }
 0x6b3   :  { %13165 = vmatmul.mubr.bf16.gmra.mxu1 %v7987_v4  ;;  %13184 = vmatprep.subr.bf16.mxu0 %v13877_v49  ;;  %v8404_v4 = vmul.f32 %v16870_v35, %v18168_v11 }
 0x6b4   :  { %13168 = vmatprep.mubr.bf16.mxu1 %v7988_v12  ;;  %13213 = vmatpush3.bf16.msra.mxu1 %v13874_v41  ;;  %v8438_v41 = vmax.f32 %v8422_v37, 0.0  ;;  %v8454_v12 = vpack.c.bf16 %v8441_v51, %v8440_v2  ;;  %v8193_v37 = vpack.c.bf16 %v18176_v9, %v16756_v20  ;;  %v13890_v2 = vld [vmem:[#allocation12 + $0x6e8] sm:$0xff]  }
 0x6b5   :  { %13214 = vmatprep.subr.bf16.mxu1 %v13876_v53  ;;  %13137 = vmatmul.mubr.bf16.gmra.mxu0 %v18152_v56  ;;  %v13897_v9 = vld [vmem:[#allocation12 + $0x708] sm:$0xff]  }
 0x6b6   :  { %13140 = vmatprep.mubr.bf16.mxu0 %v18153_v3  ;;  %13185 = vmatpush3.bf16.msra.mxu0 %v13877_v49  ;;  %v8402_v49 = vmul.f32 %v16870_v35, %v18167_v52  ;;  %v18170_v3 = vld [vmem:[#allocation69_spill] sm:$0xff] }
 0x6b7   :  { %13186 = vmatprep.subr.bf16.mxu0 %v13879_v46  ;;  %v8407_v25 = vmul.f32 %v16870_v35, %v18170_v3 }
 0x6b8   :  { %13215 = vmatpush3.bf16.msra.mxu1 %v13876_v53  ;;  %v8453_v53 = vpack.c.bf16 %v8439_v29, %v8438_v41  ;;  %v8426_v56 = vadd.f32 %v16878_v50, %v8402_v49  ;;  %v13888_v41 = vld [vmem:[#allocation12 + $0x6f0] sm:$0xff]  }
 0x6b9   :  { %13216 = vmatprep.subr.bf16.mxu1 %v13878_v27  ;;  %v8431_v23 = vadd.f32 %v16878_v50, %v8407_v25 }
 0x6ba   :  { %13187 = vmatpush3.bf16.msra.mxu0 %v13879_v46 }
 0x6bb   :  { %13169 = vmatmul.mubr.bf16.gmra.mxu1 %v7989_v17  ;;  %13188 = vmatprep.subr.bf16.mxu0 %v13881_v44  ;;  %v8409_v17 = vmul.f32 %v16870_v35, %v18171_v14  ;;  %v8447_v33 = vmax.f32 %v8431_v23, 0.0  ;;  %v13894_v23 = vld [vmem:[#allocation12 + $0x6d8] sm:$0xff]  }
 0x6bc   :  { %13172 = vmatprep.mubr.bf16.mxu1 %v7990_v57  ;;  %13217 = vmatpush3.bf16.msra.mxu1 %v13878_v27  ;;  %v8428_v27 = vadd.f32 %v16878_v50, %v8404_v4 }
 0x6bd   :  { %13218 = vmatprep.subr.bf16.mxu1 %v13880_v43  ;;  %13141 = vmatmul.mubr.bf16.gmra.mxu0 %v7789_v58  ;;  %v8408_v58 = vmul.f32 %v16870_v35, %v18173_v40 }
 0x6be   :  { %13189 = vmatpush3.bf16.msra.mxu0 %v13881_v44  ;;  %13192 = vmatprep.mubr.bf16.mxu0 %v18159_v39  ;;  %v8443_v44 = vmax.f32 %v8427_v21, 0.0  ;;  %v8444_v57 = vmax.f32 %v8428_v27, 0.0 }
 0x6bf   :  { %13190 = vmatprep.subr.bf16.mxu0 %v13883_v22  ;;  %v8432_v39 = vadd.f32 %v16878_v50, %v8408_v58 }
 0x6c0   :  { %13219 = vmatpush3.bf16.msra.mxu1 %v13880_v43  ;;  %v18172_v43 = vld [vmem:[#allocation65_spill] sm:$0xff] }
 0x6c1   :  { %13220 = vmatprep.subr.bf16.mxu1 %v13882_v6  ;;  %v8406_v34 = vmul.f32 %v16870_v35, %v18172_v43  ;;  %v8448_v55 = vmax.f32 %v8432_v39, 0.0  ;;  %v13886_v35 = vld [vmem:[#allocation12 + $0x6f8] sm:$0xff]   ;;  %v13916_v43 = vld [vmem:[#allocation12 + $0x780] sm:$0xff]  }
 0x6c2   :  { %13191 = vmatpush3.bf16.msra.mxu0 %v13883_v22 }
 0x6c3   :  { %13173 = vmatmul.mubr.bf16.gmra.mxu1 %v7991_v31  ;;  %13240 = vmatprep.subr.bf16.mxu0 %v13885_v8 }
 0x6c4   :  { %13221 = vmatpush3.bf16.msra.mxu1 %v13882_v6  ;;  %13224 = vmatprep.mubr.bf16.mxu1 %v8452_v5  ;;  %v8433_v6 = vadd.f32 %v16878_v50, %v8409_v17 }
 0x6c5   :  { %13222 = vmatprep.subr.bf16.mxu1 %v13884_v61  ;;  %13193 = vmatmul.mubr.bf16.vlgmr.msra.gmra.mxu0 %v16783_v26  ;;  %v8429_v26 = vadd.f32 %v16878_v50, %v8405_v18  ;;  %v13887_v18 = vld [vmem:[#allocation12 + $0x730] sm:$0xff]  }
 0x6c6   :  { %13196 = vmatprep.mubr.bf16.mxu0 %v16790_v0  ;;  %v18169_v0 = vld [vmem:[#allocation75_spill] sm:$0xff]  ;;  %v8449_v45 = vmax.f32 %v8433_v6, 0.0  ;;  %13241 = vmatpush3.bf16.msra.mxu0 %v13885_v8 }
 0x6c7   :  { %v8189_v46 = vpack.c.bf16 %v18169_v0, %v16651_v30  ;;  %v8445_v36 = vmax.f32 %v8429_v26, 0.0  ;;  %v8442_v30 = vmax.f32 %v8426_v56, 0.0  ;;  %13242 = vmatprep.subr.bf16.mxu0 %v13887_v18 }
 0x6c8   :  { %13223 = vmatpush3.bf16.msra.mxu1 %v13884_v61  ;;  %v8435_v61 = vadd.f32 %v16878_v50, %v8411_v63  ;;  %v8458_v5 = vpack.c.bf16 %v8449_v45, %v8448_v55  ;;  %v13895_v45 = vld [vmem:[#allocation12 + $0x710] sm:$0xff]  }
 0x6c9   :  { %v8455_v22 = vpack.c.bf16 %v8443_v44, %v8442_v30  ;;  %v8456_v42 = vpack.c.bf16 %v8445_v36, %v8444_v57  ;;  %13272 = vmatprep.subr.bf16.mxu1 %v13886_v35  ;;  %v13891_v44 = vld [vmem:[#allocation12 + $0x720] sm:$0xff]  }
 0x6ca   :  { %13243 = vmatpush3.bf16.msra.mxu0 %v13887_v18  ;;  %v13892_v36 = vld [vmem:[#allocation12 + $0x6e0] sm:$0xff]  }
 0x6cb   :  { %13225 = vmatmul.mubr.bf16.vlgmr.msra.gmra.mxu1 %v8453_v53  ;;  %v13900_v18 = vld [vmem:[#allocation12 + $0x6c0] sm:$0xff]  }
 0x6cc   :  { %13228 = vmatprep.mubr.bf16.mxu1 %v8454_v12  ;;  %13273 = vmatpush3.bf16.msra.mxu1 %v13886_v35 }
 0x6cd   :  { %13197 = vmatmul.mubr.bf16.gmra.mxu0 %v8189_v46  ;;  %13274 = vmatprep.subr.bf16.mxu1 %v13888_v41 }
 0x6ce   :  { %13200 = vmatprep.mubr.bf16.mxu0 %v16801_v48  ;;  %v8430_v48 = vadd.f32 %v16878_v50, %v8406_v34  ;;  %v13889_v50 = vld [vmem:[#allocation12 + $0x728] sm:$0xff]  }
 0x6cf   :  { %13244 = vmatprep.subr.bf16.mxu0 %v13889_v50 }
 0x6d0   :  { %v8446_v10 = vmax.f32 %v8430_v48, 0.0  ;;  %13275 = vmatpush3.bf16.msra.mxu1 %v13888_v41  ;;  %13245 = vmatpush3.bf16.msra.mxu0 %v13889_v50 }
 0x6d1   :  { %13276 = vmatprep.subr.bf16.mxu1 %v13890_v2  ;;  %13246 = vmatprep.subr.bf16.mxu0 %v13891_v44 }
 0x6d2   :  { %v8457_v31 = vpack.c.bf16 %v8447_v33, %v8446_v10 }
 0x6d3   :  { %13229 = vmatmul.mubr.bf16.gmra.mxu1 %v8455_v22  ;;  %v13893_v22 = vld [vmem:[#allocation12 + $0x718] sm:$0xff]  }
 0x6d4   :  { %13232 = vmatprep.mubr.bf16.mxu1 %v8456_v42  ;;  %13277 = vmatpush3.bf16.msra.mxu1 %v13890_v2 }
 0x6d5   :  { %13201 = vmatmul.mubr.bf16.gmra.mxu0 %v16808_v60  ;;  %v8451_v60 = vmax.f32 %v8435_v61, 0.0  ;;  %13278 = vmatprep.subr.bf16.mxu1 %v13892_v36 }
 0x6d6   :  { %13204 = vmatprep.mubr.bf16.mxu0 %v16815_v7  ;;  %v8450_v7 = vmax.f32 %v8434_v38, 0.0  ;;  %13247 = vmatpush3.bf16.msra.mxu0 %v13891_v44 }
 0x6d7   :  { %13248 = vmatprep.subr.bf16.mxu0 %v13893_v22 }
 0x6d8   :  { %v8459_v29 = vpack.c.bf16 %v8451_v60, %v8450_v7  ;;  %13279 = vmatpush3.bf16.msra.mxu1 %v13892_v36 }
 0x6d9   :  { %13280 = vmatprep.subr.bf16.mxu1 %v13894_v23 }
 0x6da   :  { %13249 = vmatpush3.bf16.msra.mxu0 %v13893_v22 }
 0x6db   :  { %13233 = vmatmul.mubr.bf16.gmra.mxu1 %v8457_v31  ;;  %13250 = vmatprep.subr.bf16.mxu0 %v13895_v45 }
 0x6dc   :  { %13236 = vmatprep.mubr.bf16.mxu1 %v8458_v5  ;;  %13281 = vmatpush3.bf16.msra.mxu1 %v13894_v23 }
 0x6dd   :  { %13205 = vmatmul.mubr.bf16.gmra.mxu0 %v8193_v37  ;;  %13282 = vmatprep.subr.bf16.mxu1 %v13896_v47  ;;  %v13898_v37 = vld [vmem:[#allocation12 + $0x6c8] sm:$0xff]  }
 0x6de   :  { %13251 = vmatpush3.bf16.msra.mxu0 %v13895_v45 }
 0x6df   :  { %13252 = vmatprep.subr.bf16.mxu0 %v13897_v9 }
 0x6e0   :  { %13283 = vmatpush3.bf16.msra.mxu1 %v13896_v47 }
 0x6e1   :  { %13284 = vmatprep.subr.bf16.mxu1 %v13898_v37 }
 0x6e2   :  { %13253 = vmatpush3.bf16.msra.mxu0 %v13897_v9 }
 0x6e3   :  { %13237 = vmatmul.mubr.bf16.gmra.mxu1 %v8459_v29 }
 0x6e4   :  { %13285 = vmatpush3.bf16.msra.mxu1 %v13898_v37 }
 0x6e5   :  { %13286 = vmatprep.subr.bf16.mxu1 %v13900_v18 }
 0x6e8   :  { %13287 = vmatpush3.bf16.msra.mxu1 %v13900_v18 }
 0x6ff   :  { %v12938_v51 = vpop.f32.mrf.mxu0 }
 0x701   :  { %v6750_v49 = vpop.f32.mrf.mxu0 }
 0x703   :  { %v12939_v20 = vpop.f32.mrf.mxu0 }
 0x705   :  { %v16942_v4 = vpop.f32.mrf.mxu0 }
 0x707   :  { %v12942_v21 = vpop.f32.mrf.mxu0 }
 0x708   :  { %v12970_v53 = vpop.f32.mrf.mxu1 }
 0x709   :  { %v16944_v12 = vadd.f32 %v12970_v53, %v12938_v51  ;;  %v6766_v0 = vpop.f32.mrf.mxu0  ;;  %v13899_v51 = vld [vmem:[#allocation12 + $0x700] sm:$0xff]  }
 0x70a   :  { %v6895_v26 = vpop.f32.mrf.mxu1  ;;  %13254 = vmatprep.subr.bf16.mxu0 %v13899_v51 }
 0x70b   :  { %v16946_v46 = vadd.f32 %v6895_v26, %v6750_v49  ;;  %v12943_v27 = vpop.f32.mrf.mxu0  ;;  %13255 = vmatpush3.bf16.msra.mxu0 %v13899_v51  ;;  %v16969_v26 = vld [vmem:[#allocation12 + $0x7b8] sm:$0xff]  }
 0x70c   :  { %v12971_v56 = vpop.f32.mrf.mxu1  ;;  %13336 = vmatprep.subr.bf16.mxu1 %v16969_v26 }
 0x70d   :  { %v16948_v25 = vadd.f32 %v12971_v56, %v12939_v20  ;;  %v16952_v34 = vpop.f32.mrf.mxu0 }
 0x70e   :  { %v16950_v17 = vpop.f32.mrf.mxu1 }
 0x70f   :  { %v12946_v57 = vpop.f32.mrf.mxu0 }
 0x711   :  { %v12974_v30 = vpop.f32.mrf.mxu1  ;;  %v6782_v6 = vpop.f32.mrf.mxu0 }
 0x712   :  { %v16954_v58 = vadd.f32 %v12974_v30, %v12942_v21  ;;  %v16967_v21 = vld [vmem:[#allocation12 + $0x778] sm:$0xff]  }
 0x713   :  { %v6911_v42 = vpop.f32.mrf.mxu1  ;;  %v12947_v63 = vpop.f32.mrf.mxu0  ;;  %13304 = vmatprep.subr.bf16.mxu0 %v16967_v21 }
 0x714   :  { %v16956_v48 = vadd.f32 %v6911_v42, %v6766_v0 }
 0x715   :  { %v12975_v39 = vpop.f32.mrf.mxu1  ;;  %v16960_v55 = vpop.f32.mrf.mxu0 }
 0x716   :  { %v6923_v33 = vadd.f32 %v12975_v39, %v12943_v27 }
 0x717   :  { %v16958_v10 = vpop.f32.mrf.mxu1 }
 0x718   :  { %v12950_v61 = vpop.f32.mrf.mxu0 }
 0x719   :  { %v12978_v31 = vpop.f32.mrf.mxu1 }
 0x71a   :  { %v6936_v5 = vadd.f32 %v12978_v31, %v12946_v57  ;;  %v6798_v60 = vpop.f32.mrf.mxu0 }
 0x71b   :  { %v6927_v38 = vpop.f32.mrf.mxu1 }
 0x71c   :  { %v6928_v7 = vadd.f32 %v6927_v38, %v6782_v6  ;;  %v12951_v8 = vpop.f32.mrf.mxu0 }
 0x71d   :  { %v12979_v29 = vpop.f32.mrf.mxu1 }
 0x71e   :  { %v6939_v35 = vadd.f32 %v12979_v29, %v12947_v63  ;;  %v16964_v49 = vpop.f32.mrf.mxu0 }
 0x71f   :  { %v16962_v41 = vpop.f32.mrf.mxu1 }
 0x722   :  { %v13002_v50 = vpop.f32.mrf.mxu0 }
 0x723   :  { %v12982_v20 = vpop.f32.mrf.mxu1  ;;  %v7146_v53 = vadd.f32 %v13002_v50, %v16944_v12 }
 0x724   :  { %v6952_v2 = vadd.f32 %v12982_v20, %v12950_v61  ;;  %v7081_v56 = vpop.f32.mrf.mxu0 }
 0x725   :  { %v6943_v0 = vpop.f32.mrf.mxu1  ;;  %v7144_v44 = vadd.f32 %v7081_v56, %v16946_v46 }
 0x726   :  { %v6944_v27 = vadd.f32 %v6943_v0, %v6798_v60  ;;  %v13003_v30 = vpop.f32.mrf.mxu0 }
 0x727   :  { %v12983_v36 = vpop.f32.mrf.mxu1  ;;  %v7147_v22 = vadd.f32 %v13003_v30, %v16948_v25 }
 0x728   :  { %v6955_v57 = vadd.f32 %v12983_v36, %v12951_v8  ;;  %v16977_v12 = vpop.f32.mrf.mxu0 }
 0x729   :  { %v16975_v23 = vpop.f32.mrf.mxu1 }
 0x72a   :  { %v13006_v6 = vpop.f32.mrf.mxu0 }
 0x72b   :  { %v13034_v42 = vpop.f32.mrf.mxu1  ;;  %v7150_v63 = vadd.f32 %v13006_v6, %v16954_v58 }
 0x72c   :  { %v7348_v39 = vadd.f32 %v13034_v42, %v7146_v53  ;;  %v7097_v46 = vpop.f32.mrf.mxu0 }
 0x72d   :  { %v7283_v45 = vpop.f32.mrf.mxu1  ;;  %v7148_v31 = vadd.f32 %v7097_v46, %v16956_v48 }
 0x72e   :  { %v7346_v47 = vadd.f32 %v7283_v45, %v7144_v44  ;;  %v13007_v9 = vpop.f32.mrf.mxu0 }
 0x72f   :  { %v13035_v61 = vpop.f32.mrf.mxu1  ;;  %v7151_v38 = vadd.f32 %v13007_v9, %v6923_v33 }
 0x730   :  { %v7349_v37 = vadd.f32 %v13035_v61, %v7147_v22  ;;  %v16983_v25 = vpop.f32.mrf.mxu0 }
 0x731   :  { %v16981_v60 = vpop.f32.mrf.mxu1 }
 0x732   :  { %v13010_v8 = vpop.f32.mrf.mxu0 }
 0x733   :  { %v13038_v29 = vpop.f32.mrf.mxu1  ;;  %v7154_v18 = vadd.f32 %v13010_v8, %v6936_v5 }
 0x734   :  { %v7352_v51 = vadd.f32 %v13038_v29, %v7150_v63  ;;  %v7113_v50 = vpop.f32.mrf.mxu0 }
 0x735   :  { %v7299_v20 = vpop.f32.mrf.mxu1  ;;  %v7152_v53 = vadd.f32 %v7113_v50, %v6928_v7 }
 0x736   :  { %v7350_v58 = vadd.f32 %v7299_v20, %v7148_v31  ;;  %v13011_v56 = vpop.f32.mrf.mxu0 }
 0x737   :  { %v13039_v0 = vpop.f32.mrf.mxu1  ;;  %v7155_v48 = vadd.f32 %v13011_v56, %v6939_v35 }
 0x738   :  { %v7353_v44 = vadd.f32 %v13039_v0, %v7151_v38  ;;  %v16987_v30 = vpop.f32.mrf.mxu0 }
 0x739   :  { %v16985_v36 = vpop.f32.mrf.mxu1 }
 0x73a   :  { %v13014_v22 = vpop.f32.mrf.mxu0 }
 0x73b   :  { %v13042_v33 = vpop.f32.mrf.mxu1  ;;  %v7158_v6 = vadd.f32 %v13014_v22, %v6952_v2 }
 0x73c   :  { %v7356_v42 = vadd.f32 %v13042_v33, %v7154_v18  ;;  %v7129_v46 = vpop.f32.mrf.mxu0 }
 0x73d   :  { %v7315_v45 = vpop.f32.mrf.mxu1  ;;  %v7156_v5 = vadd.f32 %v7129_v46, %v6944_v27 }
 0x73e   :  { %v7354_v63 = vadd.f32 %v7315_v45, %v7152_v53  ;;  %v13015_v9 = vpop.f32.mrf.mxu0 }
 0x73f   :  { %v13043_v61 = vpop.f32.mrf.mxu1  ;;  %v7159_v7 = vadd.f32 %v13015_v9, %v6955_v57 }
 0x740   :  { %v7357_v31 = vadd.f32 %v13043_v61, %v7155_v48  ;;  %v16991_v38 = vpop.f32.mrf.mxu0 }
 0x741   :  { %v16989_v29 = vpop.f32.mrf.mxu1 }
 0x743   :  { %v13046_v35 = vpop.f32.mrf.mxu1 }
 0x744   :  { %v7360_v8 = vadd.f32 %v13046_v35, %v7158_v6 }
 0x745   :  { %v7331_v20 = vpop.f32.mrf.mxu1  ;;  %v13066_v50 = vpop.f32.mrf.mxu0 }
 0x746   :  { %v7358_v0 = vadd.f32 %v7331_v20, %v7156_v5  ;;  %v7550_v56 = vadd.f32 %v13066_v50, %v7348_v39 }
 0x747   :  { %v13047_v18 = vpop.f32.mrf.mxu1  ;;  %v7485_v2 = vpop.f32.mrf.mxu0 }
 0x748   :  { %v7361_v33 = vadd.f32 %v13047_v18, %v7159_v7  ;;  %v7548_v22 = vadd.f32 %v7485_v2, %v7346_v47 }
 0x749   :  { %v16993_v53 = vpop.f32.mrf.mxu1  ;;  %v13067_v27 = vpop.f32.mrf.mxu0 }
 0x74a   :  { %v7551_v45 = vadd.f32 %v13067_v27, %v7349_v37 }
 0x74b   :  { %v13098_v48 = vpop.f32.mrf.mxu1  ;;  %v7488_v57 = vpop.f32.mrf.mxu0 }
 0x74c   :  { %v7752_v46 = vadd.f32 %v13098_v48, %v7550_v56 }
 0x74d   :  { %v7687_v61 = vpop.f32.mrf.mxu1  ;;  %v13070_v9 = vpop.f32.mrf.mxu0 }
 0x74e   :  { %v7750_v14 = vadd.f32 %v7687_v61, %v7548_v22  ;;  %v7554_v15 = vadd.f32 %v13070_v9, %v7352_v51 }
 0x74f   :  { %v13099_v6 = vpop.f32.mrf.mxu1  ;;  %v7501_v35 = vpop.f32.mrf.mxu0 }
 0x750   :  { %v7753_v59 = vadd.f32 %v13099_v6, %v7551_v45  ;;  %v7552_v5 = vadd.f32 %v7501_v35, %v7350_v58 }
 0x751   :  { %v7690_v39 = vpop.f32.mrf.mxu1  ;;  %v13071_v20 = vpop.f32.mrf.mxu0 }
 0x752   :  { %v7555_v50 = vadd.f32 %v13071_v20, %v7353_v44 }
 0x753   :  { %v13102_v7 = vpop.f32.mrf.mxu1  ;;  %v7504_v47 = vpop.f32.mrf.mxu0 }
 0x754   :  { %v7756_v18 = vadd.f32 %v13102_v7, %v7554_v15 }
 0x755   :  { %v7703_v2 = vpop.f32.mrf.mxu1  ;;  %v13074_v40 = vpop.f32.mrf.mxu0 }
 0x756   :  { %v7754_v37 = vadd.f32 %v7703_v2, %v7552_v5  ;;  %v7558_v27 = vadd.f32 %v13074_v40, %v7356_v42 }
 0x757   :  { %v13103_v19 = vpop.f32.mrf.mxu1  ;;  %v7517_v56 = vpop.f32.mrf.mxu0 }
 0x758   :  { %v7757_v48 = vadd.f32 %v13103_v19, %v7555_v50  ;;  %v7556_v3 = vadd.f32 %v7517_v56, %v7354_v63 }
 0x759   :  { %v7706_v22 = vpop.f32.mrf.mxu1  ;;  %v13075_v51 = vpop.f32.mrf.mxu0 }
 0x75a   :  { %v7559_v61 = vadd.f32 %v13075_v51, %v7357_v31 }
 0x75b   :  { %v13106_v9 = vpop.f32.mrf.mxu1  ;;  %v16995_v45 = vpop.f32.mrf.mxu0 }
 0x75c   :  { %v7760_v58 = vadd.f32 %v13106_v9, %v7558_v27 }
 0x75d   :  { %v7719_v6 = vpop.f32.mrf.mxu1  ;;  %v13078_v44 = vpop.f32.mrf.mxu0 }
 0x75e   :  { %v16997_v35 = vadd.f32 %v7719_v6, %v7556_v3  ;;  %v7562_v15 = vadd.f32 %v13078_v44, %v7360_v8  ;;  %v6899_v3 = vadd.f32 %v16950_v17, %v16942_v4 }
 0x75f   :  { %v13107_v20 = vpop.f32.mrf.mxu1  ;;  %v7533_v7 = vpop.f32.mrf.mxu0 }
 0x760   :  { %v16999_v5 = vadd.f32 %v13107_v20, %v7559_v61  ;;  %v7560_v40 = vadd.f32 %v7533_v7, %v7358_v0  ;;  %v7145_v0 = vadd.f32 %v16977_v12, %v6899_v3 }
 0x761   :  { %v7722_v42 = vpop.f32.mrf.mxu1  ;;  %v13079_v19 = vpop.f32.mrf.mxu0 }
 0x762   :  { %v7563_v63 = vadd.f32 %v13079_v19, %v7361_v33  ;;  %v7347_v7 = vadd.f32 %v16981_v60, %v7145_v0 }
 0x763   :  { %v13110_v50 = vpop.f32.mrf.mxu1  ;;  %v17001_v2 = vpop.f32.mrf.mxu0 }
 0x764   :  { %v17003_v31 = vadd.f32 %v13110_v50, %v7562_v15  ;;  %v6915_v15 = vadd.f32 %v16958_v10, %v16952_v34 }
 0x765   :  { %v7735_v56 = vpop.f32.mrf.mxu1  ;;  %v13130_v27 = vpop.f32.mrf.mxu0 }
 0x766   :  { %v17007_v51 = vadd.f32 %v7735_v56, %v7560_v40  ;;  %v7954_v8 = vadd.f32 %v13130_v27, %v7752_v46  ;;  %v7149_v46 = vadd.f32 %v16983_v25, %v6915_v15  ;;  %v7549_v40 = vadd.f32 %v7488_v57, %v7347_v7 }
 0x767   :  { %v13111_v9 = vpop.f32.mrf.mxu1  ;;  %v7889_v61 = vpop.f32.mrf.mxu0  ;;  %v6931_v57 = vadd.f32 %v16962_v41, %v16960_v55 }
 0x768   :  { %v17010_v6 = vadd.f32 %v13111_v9, %v7563_v63  ;;  %v7952_v33 = vadd.f32 %v7889_v61, %v7750_v14  ;;  %v7351_v14 = vadd.f32 %v16985_v36, %v7149_v46  ;;  %v7751_v56 = vadd.f32 %v7690_v39, %v7549_v40 }
 0x769   :  { %v17012_v44 = vpop.f32.mrf.mxu1  ;;  %v13131_v20 = vpop.f32.mrf.mxu0 }
 0x76a   :  { %v7955_v19 = vadd.f32 %v13131_v20, %v7753_v59  ;;  %v7553_v10 = vadd.f32 %v7504_v47, %v7351_v14 }
 0x76b   :  { %v13162_v4 = vpop.f32.mrf.mxu1  ;;  %v7892_v17 = vpop.f32.mrf.mxu0 }
 0x76c   :  { %v17018_v50 = vadd.f32 %v13162_v4, %v7954_v8  ;;  %v7953_v59 = vadd.f32 %v7892_v17, %v7751_v56  ;;  %v7755_v8 = vadd.f32 %v7706_v22, %v7553_v10 }
 0x76d   :  { %v8091_v12 = vpop.f32.mrf.mxu1  ;;  %v13134_v63 = vpop.f32.mrf.mxu0 }
 0x76e   :  { %v17021_v27 = vadd.f32 %v8091_v12, %v7952_v33  ;;  %v7958_v3 = vadd.f32 %v13134_v63, %v7756_v18  ;;  %v7153_v18 = vadd.f32 %v16987_v30, %v6931_v57  ;;  %v6947_v12 = vadd.f32 %v16975_v23, %v16964_v49 }
 0x76f   :  { %v13163_v9 = vpop.f32.mrf.mxu1  ;;  %v7905_v34 = vpop.f32.mrf.mxu0 }
 0x770   :  { %v17023_v60 = vadd.f32 %v13163_v9, %v7955_v19  ;;  %v7956_v61 = vadd.f32 %v7905_v34, %v7754_v37  ;;  %v7355_v37 = vadd.f32 %v16989_v29, %v7153_v18 }
 0x771   :  { %v8094_v0 = vpop.f32.mrf.mxu1  ;;  %v13135_v25 = vpop.f32.mrf.mxu0 }
 0x772   :  { %v17027_v20 = vadd.f32 %v8094_v0, %v7953_v59  ;;  %v7959_v36 = vadd.f32 %v13135_v25, %v7757_v48  ;;  %v7557_v41 = vadd.f32 %v16995_v45, %v7355_v37 }
 0x773   :  { %v13166_v39 = vpop.f32.mrf.mxu1  ;;  %v7908_v33 = vpop.f32.mrf.mxu0 }
 0x774   :  { %v17030_v15 = vadd.f32 %v13166_v39, %v7958_v3  ;;  %v7957_v47 = vadd.f32 %v7908_v33, %v7755_v8  ;;  %v7759_v63 = vadd.f32 %v7722_v42, %v7557_v41  ;;  %v7157_v3 = vadd.f32 %v16991_v38, %v6947_v12 }
 0x775   :  { %v8107_v7 = vpop.f32.mrf.mxu1  ;;  %v13138_v19 = vpop.f32.mrf.mxu0 }
 0x776   :  { %v17033_v4 = vadd.f32 %v8107_v7, %v7956_v61  ;;  %v7962_v17 = vadd.f32 %v13138_v19, %v7760_v58 }
 0x777   :  { %v13167_v46 = vpop.f32.mrf.mxu1  ;;  %v7921_v55 = vpop.f32.mrf.mxu0 }
 0x778   :  { %v17036_v22 = vadd.f32 %v13167_v46, %v7959_v36  ;;  %v7960_v48 = vadd.f32 %v7921_v55, %v16997_v35  ;;  %v7359_v35 = vadd.f32 %v16993_v53, %v7157_v3 }
 0x779   :  { %v8110_v40 = vpop.f32.mrf.mxu1  ;;  %v13139_v30 = vpop.f32.mrf.mxu0 }
 0x77a   :  { %v17041_v14 = vadd.f32 %v8110_v40, %v7957_v47  ;;  %v7963_v29 = vadd.f32 %v13139_v30, %v16999_v5  ;;  %v7561_v61 = vadd.f32 %v17001_v2, %v7359_v35 }
 0x77b   :  { %v13170_v56 = vpop.f32.mrf.mxu1  ;;  %v7924_v58 = vpop.f32.mrf.mxu0 }
 0x77c   :  { %v17045_v9 = vadd.f32 %v13170_v56, %v7962_v17  ;;  %v7961_v45 = vadd.f32 %v7924_v58, %v7759_v63  ;;  %v7763_v57 = vadd.f32 %v17012_v44, %v7561_v61  ;;  %v17071_v17 = vld [vmem:[#allocation11 + $0x3] ss:$0 sm:$0xff] }
 0x77d   :  { %v8123_v34 = vpop.f32.mrf.mxu1  ;;  %v13142_v10 = vpop.f32.mrf.mxu0 }
 0x77e   :  { %v17048_v59 = vadd.f32 %v8123_v34, %v7960_v48  ;;  %v7966_v49 = vadd.f32 %v13142_v10, %v17003_v31 }
 0x77f   :  { %v13171_v23 = vpop.f32.mrf.mxu1  ;;  %v7937_v42 = vpop.f32.mrf.mxu0 }
 0x780   :  { %v17052_v5 = vadd.f32 %v13171_v23, %v7963_v29  ;;  %v7964_v0 = vadd.f32 %v7937_v42, %v17007_v51 }
 0x781   :  { %v8126_v38 = vpop.f32.mrf.mxu1  ;;  %v13143_v25 = vpop.f32.mrf.mxu0 }
 0x782   :  { %v17056_v8 = vadd.f32 %v8126_v38, %v7961_v45  ;;  %v7967_v53 = vadd.f32 %v13143_v25, %v17010_v6 }
 0x783   :  { %v13174_v36 = vpop.f32.mrf.mxu1  ;;  %v7940_v39 = vpop.f32.mrf.mxu0 }
 0x784   :  { %v17059_v33 = vadd.f32 %v13174_v36, %v7966_v49  ;;  %v7965_v31 = vadd.f32 %v7940_v39, %v7763_v57 }
 0x785   :  { %v8139_v18 = vpop.f32.mrf.mxu1  ;;  %v13194_v47 = vpop.f32.mrf.mxu0 }
 0x786   :  { %v17061_v2 = vadd.f32 %v8139_v18, %v7964_v0  ;;  %v17064_v7 = vadd.f32 %v13194_v47, %v17018_v50  ;;  %v13903_v47 = vld [vmem:[#allocation12 + $0x770] sm:$0xff]  }
 0x787   :  { %v13175_v51 = vpop.f32.mrf.mxu1  ;;  %v8293_v19 = vpop.f32.mrf.mxu0 }
 0x788   :  { %v17066_v37 = vadd.f32 %v13175_v51, %v7967_v53  ;;  %v17069_v44 = vadd.f32 %v8293_v19, %v17021_v27 }
 0x789   :  { %v8142_v6 = vpop.f32.mrf.mxu1  ;;  %v13195_v46 = vpop.f32.mrf.mxu0 }
 0x78a   :  { %v17073_v55 = vadd.f32 %v8142_v6, %v7965_v31  ;;  %v17076_v41 = vadd.f32 %v13195_v46, %v17023_v60  ;;  %v8743_v60 = vld [vmem:[#allocation2 + $0x1] sm:$0xff] }
 0x78b   :  { %v13226_v48 = vpop.f32.mrf.mxu1  ;;  %v8296_v40 = vpop.f32.mrf.mxu0 }
 0x78c   :  { %18177 = vst [vmem:[#allocation103_spill] sm:$0xff] %v17073_v55  ;;  %18178 = vst [vmem:[#allocation120_spill] sm:$0xff] %v17076_v41  ;;  %v8576_v50 = vadd.f32 %v13226_v48, %v17071_v17  ;;  %v17080_v30 = vadd.f32 %v8296_v40, %v17027_v20  ;;  %v13912_v55 = vld [vmem:[#allocation12 + $0x790] sm:$0xff]  }
 0x78d   :  { %v8567_v12 = vpop.f32.mrf.mxu1  ;;  %v13198_v63 = vpop.f32.mrf.mxu0 }
 0x78e   :  { %18179 = vst [vmem:[#allocation117_spill] sm:$0xff] %v17080_v30  ;;  %v17082_v27 = vmax.f32 %v8576_v50, 0.0  ;;  %v8568_v29 = vadd.f32 %v17071_v17, %v8567_v12  ;;  %v17086_v56 = vadd.f32 %v13198_v63, %v17030_v15 }
 0x78f   :  { %v13227_v58 = vpop.f32.mrf.mxu1  ;;  %v8309_v3 = vpop.f32.mrf.mxu0 }
 0x790   :  { %18180 = vst [vmem:[#allocation100_spill] sm:$0xff] %v17086_v56  ;;  %8688 = vst [vmem:[#allocation2 + $0x31] sm:$0xff] %v17082_v27  ;;  %v17089_v45 = vmax.f32 %v8568_v29, 0.0  ;;  %v8579_v34 = vadd.f32 %v13227_v58, %v17071_v17  ;;  %v17093_v20 = vadd.f32 %v8309_v3, %v17033_v4 }
 0x791   :  { %v8570_v10 = vpop.f32.mrf.mxu1  ;;  %v13199_v35 = vpop.f32.mrf.mxu0 }
 0x792   :  { %18181 = vst [vmem:[#allocation104_spill] sm:$0xff] %v17093_v20  ;;  %8686 = vst [vmem:[#allocation2 + $0x11] sm:$0xff] %v17089_v45  ;;  %v17096_v49 = vmax.f32 %v8579_v34, 0.0  ;;  %v8571_v15 = vadd.f32 %v17071_v17, %v8570_v10  ;;  %v17100_v23 = vadd.f32 %v13199_v35, %v17036_v22  ;;  %v8759_v42 = vpack.c.bf16 %v17089_v45, %v8743_v60 }
 0x793   :  { %v13230_v61 = vpop.f32.mrf.mxu1  ;;  %v8312_v0 = vpop.f32.mrf.mxu0 }
 0x794   :  { %18182 = vst [vmem:[#allocation41_spill] sm:$0xff] %v17100_v23  ;;  %8689 = vst [vmem:[#allocation2 + $0x41] sm:$0xff] %v17096_v49  ;;  %v17104_v38 = vmax.f32 %v8571_v15, 0.0  ;;  %v8592_v4 = vadd.f32 %v13230_v61, %v17071_v17  ;;  %v17108_v25 = vadd.f32 %v8312_v0, %v17041_v14  ;;  %13256 = vmatprep.mubr.bf16.mxu0 %v8759_v42 }
 0x795   :  { %v8583_v53 = vpop.f32.mrf.mxu1  ;;  %v13202_v22 = vpop.f32.mrf.mxu0 }
 0x796   :  { %18183 = vst [vmem:[#allocation40_spill] sm:$0xff] %v17108_v25  ;;  %8687 = vst [vmem:[#allocation2 + $0x21] sm:$0xff] %v17104_v38  ;;  %v8636_v36 = vmax.f32 %v8592_v4, 0.0  ;;  %v8584_v39 = vadd.f32 %v17071_v17, %v8583_v53  ;;  %v17115_v31 = vadd.f32 %v13202_v22, %v17045_v9  ;;  %v8760_v18 = vpack.c.bf16 %v17082_v27, %v17104_v38  ;;  %v13904_v22 = vld [vmem:[#allocation12 + $0x7b0] sm:$0xff]  }
 0x797   :  { %v13231_v14 = vpop.f32.mrf.mxu1  ;;  %v8325_v51 = vpop.f32.mrf.mxu0 }
 0x798   :  { %18184 = vst [vmem:[#allocation105_spill] sm:$0xff] %v17115_v31  ;;  %8692 = vst [vmem:[#allocation2 + $0x71] sm:$0xff] %v8636_v36  ;;  %v17119_v19 = vmax.f32 %v8584_v39, 0.0  ;;  %v8595_v6 = vadd.f32 %v13231_v14, %v17071_v17  ;;  %v17123_v46 = vadd.f32 %v8325_v51, %v17048_v59  ;;  %13257 = vmatmul.mubr.bf16.vlgmr.msra.gmra.mxu0 %v8760_v18  ;;  %v13905_v59 = vld [vmem:[#allocation12 + $0x768] sm:$0xff]   ;;  %v13907_v14 = vld [vmem:[#allocation12 + $0x760] sm:$0xff]  }
 0x799   :  { %v8586_v48 = vpop.f32.mrf.mxu1  ;;  %v17125_v40 = vld [vmem:[#allocation2 + $0x10] sm:$0xff]  ;;  %v13203_v9 = vpop.f32.mrf.mxu0  ;;  %13305 = vmatpush3.bf16.msra.mxu0 %v16967_v21 }
 0x79a   :  { %18185 = vst [vmem:[#allocation122_spill] sm:$0xff] %v17123_v46  ;;  %8690 = vst [vmem:[#allocation2 + $0x51] sm:$0xff] %v17119_v19  ;;  %v8637_v50 = vmax.f32 %v8595_v6, 0.0  ;;  %v8587_v12 = vadd.f32 %v17071_v17, %v8586_v48  ;;  %v8718_v63 = vpack.c.bf16 %v17125_v40, %v18128_v16  ;;  %v17133_v29 = vadd.f32 %v13203_v9, %v17052_v5  ;;  %v17145_v5 = vld [vmem:[#allocation2 + $0x30] sm:$0xff] }
 0x79b   :  { %13306 = vmatprep.subr.bf16.mxu0 %v13903_v47  ;;  %v13234_v58 = vpop.f32.mrf.mxu1  ;;  %v8328_v3 = vpop.f32.mrf.mxu0  ;;  %v8761_v60 = vpack.c.bf16 %v17119_v19, %v17096_v49  ;;  %v17268_v46 = vld [vmem:[#allocation2 + $0x32] sm:$0xff]  ;;  %v17275_v31 = vld [vmem:[#allocation2 + $0x42] sm:$0xff] }
 0x79c   :  { %18186 = vst [vmem:[#allocation119_spill] sm:$0xff] %v17133_v29  ;;  %8693 = vst [vmem:[#allocation2 + $0x81] sm:$0xff] %v8637_v50  ;;  %v17137_v21 = vmax.f32 %v8587_v12, 0.0  ;;  %v8608_v34 = vadd.f32 %v13234_v58, %v17071_v17  ;;  %13288 = vmatprep.mubr.bf16.mxu1 %v8718_v63  ;;  %v17141_v10 = vadd.f32 %v8328_v3, %v17056_v8 }
 0x79d   :  { %v8599_v35 = vpop.f32.mrf.mxu1  ;;  %v17143_v15 = vld [vmem:[#allocation2 + $0x20] sm:$0xff]  ;;  %v13206_v42 = vpop.f32.mrf.mxu0  ;;  %13260 = vmatprep.mubr.bf16.mxu0 %v8761_v60  ;;  %13307 = vmatpush3.bf16.msra.mxu0 %v13903_v47  ;;  %v17147_v61 = vpack.c.bf16 %v8637_v50, %v8636_v36 }
 0x79e   :  { %18187 = vst [vmem:[#allocation102_spill] sm:$0xff] %v17141_v10  ;;  %8691 = vst [vmem:[#allocation2 + $0x61] sm:$0xff] %v17137_v21  ;;  %v17150_v0 = vmax.f32 %v8608_v34, 0.0  ;;  %v8600_v4 = vadd.f32 %v17071_v17, %v8599_v35  ;;  %v17155_v8 = vpack.c.bf16 %v17145_v5, %v17143_v15  ;;  %v17158_v53 = vadd.f32 %v13206_v42, %v17059_v33  ;;  %v8751_v33 = vld [vmem:[#allocation2 + $0xa1] sm:$0xff] }
 0x79f   :  { %13308 = vmatprep.subr.bf16.mxu0 %v13905_v59  ;;  %v13235_v39 = vpop.f32.mrf.mxu1  ;;  %v8341_v18 = vpop.f32.mrf.mxu0  ;;  %v8762_v47 = vpack.c.bf16 %v8636_v36, %v17137_v21  ;;  %v17170_v50 = vld [vmem:[#allocation2 + $0x40] sm:$0xff]  ;;  %v17291_v20 = vld [vmem:[#allocation2 + $0x72] sm:$0xff] }
 0x7a0   :  { %18188 = vst [vmem:[#allocation54_spill] sm:$0xff] %v17158_v53  ;;  %8696 = vst [vmem:[#allocation2 + $0xd1] sm:$0xff] %v17150_v0  ;;  %v17162_v51 = vmax.f32 %v8600_v4, 0.0  ;;  %v8611_v6 = vadd.f32 %v13235_v39, %v17071_v17  ;;  %13289 = vmatmul.mubr.bf16.vlgmr.msra.gmra.mxu1 %v17155_v8  ;;  %v17167_v48 = vadd.f32 %v8341_v18, %v17061_v2  ;;  %v13909_v35 = vld [vmem:[#allocation12 + $0x758] sm:$0xff]   ;;  %v13914_v53 = vld [vmem:[#allocation12 + $0x788] sm:$0xff]  }
 0x7a1   :  { %v8602_v9 = vpop.f32.mrf.mxu1  ;;  %13337 = vmatpush3.bf16.msra.mxu1 %v16969_v26  ;;  %v17172_v12 = vld [vmem:[#allocation2 + $0x50] sm:$0xff]  ;;  %v13207_v36 = vpop.f32.mrf.mxu0  ;;  %13261 = vmatmul.mubr.bf16.gmra.mxu0 %v8762_v47  ;;  %v13917_v10 = vld [vmem:[#allocation12 + $0x7f8] sm:$0xff]  }
 0x7a2   :  { %18189 = vst [vmem:[#allocation107_spill] sm:$0xff] %v17167_v48  ;;  %8694 = vst [vmem:[#allocation2 + $0xb1] sm:$0xff] %v17162_v51  ;;  %v17175_v63 = vmax.f32 %v8611_v6, 0.0  ;;  %v8603_v58 = vadd.f32 %v17071_v17, %v8602_v9  ;;  %v17180_v2 = vpack.c.bf16 %v17172_v12, %v17170_v50  ;;  %13338 = vmatprep.subr.bf16.mxu1 %v13904_v22  ;;  %v13906_v26 = vld [vmem:[#allocation12 + $0x7a8] sm:$0xff]   ;;  %13309 = vmatpush3.bf16.msra.mxu0 %v13905_v59  ;;  %v17258_v11 = vld [vmem:[#allocation2 + $0x22] sm:$0xff] }
 0x7a3   :  { %v17183_v3 = vadd.f32 %v13207_v36, %v17066_v37  ;;  %v13238_v60 = vpop.f32.mrf.mxu1  ;;  %v8763_v34 = vpack.c.bf16 %v17162_v51, %v8751_v33  ;;  %13310 = vmatprep.subr.bf16.mxu0 %v13907_v14  ;;  %v17193_v37 = vld [vmem:[#allocation2 + $0x70] sm:$0xff]  ;;  %v17299_v52 = vld [vmem:[#allocation2 + $0x80] sm:$0xff] }
 0x7a4   :  { %8697 = vst [vmem:[#allocation2 + $0xe1] sm:$0xff] %v17175_v63  ;;  %v17187_v42 = vmax.f32 %v8603_v58, 0.0  ;;  %v8624_v4 = vadd.f32 %v13238_v60, %v17071_v17  ;;  %13292 = vmatprep.mubr.bf16.mxu1 %v17180_v2  ;;  %v13911_v58 = vld [vmem:[#allocation12 + $0x750] sm:$0xff]  }
 0x7a5   :  { %18190 = vst [vmem:[#allocation109_spill] sm:$0xff] %v17183_v3  ;;  %v8615_v39 = vpop.f32.mrf.mxu1  ;;  %13339 = vmatpush3.bf16.msra.mxu1 %v13904_v22  ;;  %v17191_v18 = vld [vmem:[#allocation2 + $0x60] sm:$0xff]  ;;  %13264 = vmatprep.mubr.bf16.mxu0 %v8763_v34  ;;  %v13908_v22 = vld [vmem:[#allocation12 + $0x7a0] sm:$0xff]  }
 0x7a6   :  { %8695 = vst [vmem:[#allocation2 + $0xc1] sm:$0xff] %v17187_v42  ;;  %v17198_v47 = vmax.f32 %v8624_v4, 0.0  ;;  %v8616_v6 = vadd.f32 %v17071_v17, %v8615_v39  ;;  %v17203_v33 = vpack.c.bf16 %v17193_v37, %v17191_v18  ;;  %13340 = vmatprep.subr.bf16.mxu1 %v13906_v26  ;;  %13311 = vmatpush3.bf16.msra.mxu0 %v13907_v14  ;;  %v17283_v25 = vld [vmem:[#allocation2 + $0x62] sm:$0xff] }
 0x7a7   :  { %v8764_v9 = vpack.c.bf16 %v17150_v0, %v17187_v42  ;;  %v13239_v36 = vpop.f32.mrf.mxu1  ;;  %13312 = vmatprep.subr.bf16.mxu0 %v13909_v35  ;;  %v9294_v23 = vpack.c.bf16 %v17191_v18, %v17172_v12  ;;  %v9295_v18 = vpack.c.bf16 %v17299_v52, %v17193_v37 }
 0x7a8   :  { %8700 = vst [vmem:[#allocation2 + $0x111] sm:$0xff] %v17198_v47  ;;  %v17208_v60 = vmax.f32 %v8616_v6, 0.0  ;;  %v8627_v34 = vadd.f32 %v13239_v36, %v17071_v17  ;;  %13293 = vmatmul.mubr.bf16.gmra.mxu1 %v17203_v33  ;;  %v13910_v6 = vld [vmem:[#allocation12 + $0x798] sm:$0xff]  }
 0x7a9   :  { %v8618_v4 = vpop.f32.mrf.mxu1  ;;  %13341 = vmatpush3.bf16.msra.mxu1 %v13906_v26  ;;  %v17212_v39 = vld [vmem:[#allocation2 + $0xb0] sm:$0xff]  ;;  %13265 = vmatmul.mubr.bf16.gmra.mxu0 %v8764_v9 }
 0x7aa   :  { %8698 = vst [vmem:[#allocation2 + $0xf1] sm:$0xff] %v17208_v60  ;;  %v17215_v14 = vmax.f32 %v8627_v34, 0.0  ;;  %v8619_v59 = vadd.f32 %v17071_v17, %v8618_v4  ;;  %v8722_v57 = vpack.c.bf16 %v17212_v39, %v18128_v16  ;;  %13342 = vmatprep.subr.bf16.mxu1 %v13908_v22  ;;  %13313 = vmatpush3.bf16.msra.mxu0 %v13909_v35  ;;  %v13913_v26 = vld [vmem:[#allocation12 + $0x748] sm:$0xff]  }
 0x7ab   :  { %v8765_v36 = vpack.c.bf16 %v17208_v60, %v17175_v63  ;;  %13314 = vmatprep.subr.bf16.mxu0 %v13911_v58  ;;  %v17229_v4 = vld [vmem:[#allocation2 + $0xd0] sm:$0xff]  ;;  %v17243_v17 = vld [vmem:[#allocation2 + $0xe0] sm:$0xff] }
 0x7ac   :  { %8701 = vst [vmem:[#allocation2 + $0x121] sm:$0xff] %v17215_v14  ;;  %v17223_v9 = vmax.f32 %v8619_v59, 0.0  ;;  %13296 = vmatprep.mubr.bf16.mxu1 %v8722_v57  ;;  %v9074_v59 = vld [vmem:[#allocation2 + $0x2] sm:$0xff]  ;;  %v17287_v13 = vld [vmem:[#allocation2 + $0xb2] sm:$0xff] }
 0x7ad   :  { %13268 = vmatprep.mubr.bf16.mxu0 %v8765_v36  ;;  %13343 = vmatpush3.bf16.msra.mxu1 %v13908_v22  ;;  %v17227_v34 = vld [vmem:[#allocation2 + $0xc0] sm:$0xff]  ;;  %v17240_v36 = vld [vmem:[#allocation2 + $0x12] sm:$0xff] }
 0x7ae   :  { %8699 = vst [vmem:[#allocation2 + $0x101] sm:$0xff] %v17223_v9  ;;  %v17234_v35 = vpack.c.bf16 %v17229_v4, %v17227_v34  ;;  %13344 = vmatprep.subr.bf16.mxu1 %v13910_v6  ;;  %13315 = vmatpush3.bf16.msra.mxu0 %v13911_v58  ;;  %v17238_v57 = vpack.c.bf16 %v17198_v47, %v17223_v9  ;;  %v13915_v22 = vld [vmem:[#allocation12 + $0x740] sm:$0xff]   ;;  %v17301_v12 = vld [vmem:[#allocation2 + $0xc2] sm:$0xff] }
 0x7af   :  { %13316 = vmatprep.subr.bf16.mxu0 %v13913_v26  ;;  %v9090_v58 = vpack.c.bf16 %v17240_v36, %v9074_v59  ;;  %v17256_v29 = vld [vmem:[#allocation2 + $0x110] sm:$0xff] }
 0x7b0   :  { %13297 = vmatmul.mubr.bf16.gmra.mxu1 %v17234_v35  ;;  %v17329_v56 = vld [vmem:[#allocation2 + $0x112] sm:$0xff] }
 0x7b1   :  { %13345 = vmatpush3.bf16.msra.mxu1 %v13910_v6  ;;  %v17245_v3 = vld [vmem:[#allocation2 + $0xf0] sm:$0xff]  ;;  %13269 = vmatmul.mubr.bf16.gmra.mxu0 %v17238_v57 }
 0x7b2   :  { %v17251_v48 = vpack.c.bf16 %v17245_v3, %v17243_v17  ;;  %13346 = vmatprep.subr.bf16.mxu1 %v13912_v55  ;;  %13317 = vmatpush3.bf16.msra.mxu0 %v13913_v26  ;;  %v17264_v26 = vld [vmem:[#allocation2 + $0x52] sm:$0xff] }
 0x7b3   :  { %13320 = vmatprep.mubr.bf16.mxu0 %v9090_v58  ;;  %13318 = vmatprep.subr.bf16.mxu0 %v13915_v22  ;;  %v9292_v58 = vpack.c.bf16 %v17143_v15, %v17125_v40  ;;  %v13918_v40 = vld [vmem:[#allocation12 + $0x838] sm:$0xff]   ;;  %v13921_v15 = vld [vmem:[#allocation12 + $0x7e8] sm:$0xff]  }
 0x7b4   :  { %13300 = vmatprep.mubr.bf16.mxu1 %v17251_v48 }
 0x7b5   :  { %13347 = vmatpush3.bf16.msra.mxu1 %v13912_v55  ;;  %v17254_v6 = vld [vmem:[#allocation2 + $0x100] sm:$0xff]  ;;  %v17273_v55 = vpack.c.bf16 %v17268_v46, %v17258_v11 }
 0x7b6   :  { %v17262_v59 = vpack.c.bf16 %v17256_v29, %v17254_v6  ;;  %13348 = vmatprep.subr.bf16.mxu1 %v13914_v53  ;;  %13319 = vmatpush3.bf16.msra.mxu0 %v13915_v22  ;;  %v17279_v22 = vpack.c.bf16 %v17264_v26, %v17275_v31 }
 0x7b7   :  { %13368 = vmatprep.subr.bf16.mxu0 %v13917_v10 }
 0x7b8   :  { %13301 = vmatmul.mubr.bf16.gmra.mxu1 %v17262_v59 }
 0x7b9   :  { %13349 = vmatpush3.bf16.msra.mxu1 %v13914_v53  ;;  %13352 = vmatprep.mubr.bf16.mxu1 %v9292_v58  ;;  %v9293_v53 = vpack.c.bf16 %v17170_v50, %v17145_v5  ;;  %v13920_v58 = vld [vmem:[#allocation12 + $0x830] sm:$0xff]   ;;  %v9094_v5 = vpack.c.bf16 %v17287_v13, %v9082_v28  ;;  %v13922_v50 = vld [vmem:[#allocation12 + $0x828] sm:$0xff]   ;;  %v9296_v28 = vpack.c.bf16 %v17227_v34, %v17212_v39  ;;  %v13926_v39 = vld [vmem:[#allocation12 + $0x818] sm:$0xff]  }
 0x7ba   :  { %13350 = vmatprep.subr.bf16.mxu1 %v13916_v43  ;;  %13321 = vmatmul.mubr.bf16.vlgmr.msra.gmra.mxu0 %v17273_v55  ;;  %v13929_v34 = vld [vmem:[#allocation12 + $0x7c8] sm:$0xff]  }
 0x7bb   :  { %13324 = vmatprep.mubr.bf16.mxu0 %v17279_v22  ;;  %13369 = vmatpush3.bf16.msra.mxu0 %v13917_v10  ;;  %v13923_v10 = vld [vmem:[#allocation12 + $0x7e0] sm:$0xff]  }
 0x7bc   :  { %13370 = vmatprep.subr.bf16.mxu0 %v13919_v32 }
 0x7bd   :  { %13351 = vmatpush3.bf16.msra.mxu1 %v13916_v43  ;;  %v17295_v43 = vpack.c.bf16 %v17291_v20, %v17283_v25 }
 0x7be   :  { %13400 = vmatprep.subr.bf16.mxu1 %v13918_v40 }
 0x7bf   :  { %13371 = vmatpush3.bf16.msra.mxu0 %v13919_v32  ;;  %v13925_v32 = vld [vmem:[#allocation12 + $0x7d8] sm:$0xff]  }
 0x7c0   :  { %13353 = vmatmul.mubr.bf16.vlgmr.msra.gmra.mxu1 %v9293_v53  ;;  %13372 = vmatprep.subr.bf16.mxu0 %v13921_v15  ;;  %v17309_v53 = vld [vmem:[#allocation2 + $0xd2] sm:$0xff] }
 0x7c1   :  { %13356 = vmatprep.mubr.bf16.mxu1 %v9294_v23  ;;  %13401 = vmatpush3.bf16.msra.mxu1 %v13918_v40  ;;  %v13924_v23 = vld [vmem:[#allocation12 + $0x820] sm:$0xff]  }
 0x7c2   :  { %13402 = vmatprep.subr.bf16.mxu1 %v13920_v58  ;;  %13325 = vmatmul.mubr.bf16.gmra.mxu0 %v17295_v43  ;;  %v17305_v40 = vld [vmem:[#allocation2 + $0xf2] sm:$0xff] }
 0x7c3   :  { %13328 = vmatprep.mubr.bf16.mxu0 %v9094_v5  ;;  %13373 = vmatpush3.bf16.msra.mxu0 %v13921_v15  ;;  %v17313_v15 = vpack.c.bf16 %v17309_v53, %v17301_v12  ;;  %v13927_v5 = vld [vmem:[#allocation12 + $0x7d0] sm:$0xff]  }
 0x7c4   :  { %13374 = vmatprep.subr.bf16.mxu0 %v13923_v10 }
 0x7c5   :  { %13403 = vmatpush3.bf16.msra.mxu1 %v13920_v58  ;;  %v17315_v58 = vld [vmem:[#allocation2 + $0xe2] sm:$0xff] }
 0x7c6   :  { %13404 = vmatprep.subr.bf16.mxu1 %v13922_v50  ;;  %v17319_v37 = vpack.c.bf16 %v17305_v40, %v17315_v58 }
 0x7c7   :  { %13375 = vmatpush3.bf16.msra.mxu0 %v13923_v10  ;;  %v17323_v10 = vld [vmem:[#allocation2 + $0x102] sm:$0xff] }
 0x7c8   :  { %13357 = vmatmul.mubr.bf16.gmra.mxu1 %v9295_v18  ;;  %13376 = vmatprep.subr.bf16.mxu0 %v13925_v32  ;;  %v9297_v18 = vpack.c.bf16 %v17243_v17, %v17229_v4  ;;  %v9494_v17 = vpack.c.bf16 %v17104_v38, %v17089_v45  ;;  %v13930_v4 = vld [vmem:[#allocation12 + $0x808] sm:$0xff]   ;;  %v13935_v45 = vld [vmem:[#allocation12 + $0x870] sm:$0xff]   ;;  %v9496_v38 = vpack.c.bf16 %v17137_v21, %v17119_v19  ;;  %v13939_v19 = vld [vmem:[#allocation12 + $0x860] sm:$0xff]  }
 0x7c9   :  { %13360 = vmatprep.mubr.bf16.mxu1 %v9296_v28  ;;  %13405 = vmatpush3.bf16.msra.mxu1 %v13922_v50  ;;  %v13928_v50 = vld [vmem:[#allocation12 + $0x810] sm:$0xff]   ;;  %v9298_v28 = vpack.c.bf16 %v17254_v6, %v17245_v3  ;;  %v13933_v6 = vld [vmem:[#allocation12 + $0x878] sm:$0xff]  }
 0x7ca   :  { %13406 = vmatprep.subr.bf16.mxu1 %v13924_v23  ;;  %13329 = vmatmul.mubr.bf16.gmra.mxu0 %v17313_v15  ;;  %v17338_v3 = vld [vmem:[#allocation2 + $0x120] sm:$0xff] }
 0x7cb   :  { %13332 = vmatprep.mubr.bf16.mxu0 %v17319_v37  ;;  %13377 = vmatpush3.bf16.msra.mxu0 %v13925_v32  ;;  %v17333_v32 = vpack.c.bf16 %v17329_v56, %v17323_v10  ;;  %v17356_v21 = vld [vmem:[#allocation2 + $0x82] sm:$0xff] }
 0x7cc   :  { %13378 = vmatprep.subr.bf16.mxu0 %v13927_v5 }
 0x7cd   :  { %13407 = vmatpush3.bf16.msra.mxu1 %v13924_v23  ;;  %v13931_v23 = vld [vmem:[#allocation12 + $0x7c0] sm:$0xff]  }
 0x7ce   :  { %13408 = vmatprep.subr.bf16.mxu1 %v13926_v39 }
 0x7cf   :  { %13379 = vmatpush3.bf16.msra.mxu0 %v13927_v5  ;;  %v9299_v5 = vpack.c.bf16 %v17338_v3, %v17256_v29  ;;  %v13934_v29 = vld [vmem:[#allocation12 + $0x8b8] sm:$0xff]  }
 0x7d0   :  { %13361 = vmatmul.mubr.bf16.gmra.mxu1 %v9297_v18  ;;  %13380 = vmatprep.subr.bf16.mxu0 %v13929_v34  ;;  %v13932_v18 = vld [vmem:[#allocation12 + $0x800] sm:$0xff]  }
 0x7d1   :  { %13364 = vmatprep.mubr.bf16.mxu1 %v9298_v28  ;;  %13409 = vmatpush3.bf16.msra.mxu1 %v13926_v39  ;;  %v9696_v39 = vpack.c.bf16 %v17258_v11, %v17240_v36  ;;  %v9697_v11 = vpack.c.bf16 %v17275_v31, %v17268_v46  ;;  %v13936_v36 = vld [vmem:[#allocation12 + $0x8b0] sm:$0xff]   ;;  %v9698_v28 = vpack.c.bf16 %v17283_v25, %v17264_v26  ;;  %v13941_v31 = vld [vmem:[#allocation12 + $0x858] sm:$0xff]   ;;  %v13940_v46 = vld [vmem:[#allocation12 + $0x8a0] sm:$0xff]  }
 0x7d2   :  { %13410 = vmatprep.subr.bf16.mxu1 %v13928_v50  ;;  %13333 = vmatmul.mubr.bf16.gmra.mxu0 %v17333_v32  ;;  %v9699_v25 = vpack.c.bf16 %v17356_v21, %v17291_v20  ;;  %v9700_v26 = vpack.c.bf16 %v17301_v12, %v17287_v13  ;;  %v13942_v20 = vld [vmem:[#allocation12 + $0x898] sm:$0xff]   ;;  %v9701_v13 = vpack.c.bf16 %v17315_v58, %v17309_v53  ;;  %v13944_v12 = vld [vmem:[#allocation12 + $0x890] sm:$0xff]  }
 0x7d3   :  { %13381 = vmatpush3.bf16.msra.mxu0 %v13929_v34  ;;  %13384 = vmatprep.mubr.bf16.mxu0 %v9494_v17  ;;  %v18191_v34 = vpack.c.bf16 %v17096_v49, %v17082_v27  ;;  %v9498_v27 = vpack.c.bf16 %v17187_v42, %v17162_v51  ;;  %v13938_v49 = vld [vmem:[#allocation12 + $0x8a8] sm:$0xff]   ;;  %v9500_v51 = vpack.c.bf16 %v17223_v9, %v17208_v60  ;;  %v13947_v9 = vld [vmem:[#allocation12 + $0x840] sm:$0xff]   ;;  %v10084_v53 = vld [vmem:[#allocation2 + $0x21] sm:$0xff] }
 0x7d4   :  { %13382 = vmatprep.subr.bf16.mxu0 %v13931_v23  ;;  %v13945_v17 = vld [vmem:[#allocation12 + $0x848] sm:$0xff]  }
 0x7d5   :  { %13411 = vmatpush3.bf16.msra.mxu1 %v13928_v50  ;;  %v13937_v50 = vld [vmem:[#allocation12 + $0x868] sm:$0xff]  }
 0x7d6   :  { %13412 = vmatprep.subr.bf16.mxu1 %v13930_v4 }
 0x7d7   :  { %13383 = vmatpush3.bf16.msra.mxu0 %v13931_v23  ;;  %v18192_v23 = vpack.c.bf16 %v17175_v63, %v17150_v0  ;;  %v18193_v0 = vpack.c.bf16 %v17215_v14, %v17198_v47  ;;  %v13946_v63 = vld [vmem:[#allocation12 + $0x888] sm:$0xff]   ;;  %v13950_v47 = vld [vmem:[#allocation12 + $0x8f0] sm:$0xff]  }
 0x7d8   :  { %13365 = vmatmul.mubr.bf16.gmra.mxu1 %v9299_v5  ;;  %13432 = vmatprep.subr.bf16.mxu0 %v13933_v6  ;;  %v13948_v5 = vld [vmem:[#allocation12 + $0x880] sm:$0xff]  }
 0x7d9   :  { %13413 = vmatpush3.bf16.msra.mxu1 %v13930_v4  ;;  %13416 = vmatprep.mubr.bf16.mxu1 %v9696_v39  ;;  %v9702_v4 = vpack.c.bf16 %v17323_v10, %v17305_v40  ;;  %v13949_v40 = vld [vmem:[#allocation12 + $0x8f8] sm:$0xff]   ;;  %v10085_v10 = vld [vmem:[#allocation2 + $0x31] sm:$0xff] }
 0x7da   :  { %13414 = vmatprep.subr.bf16.mxu1 %v13932_v18  ;;  %13385 = vmatmul.mubr.bf16.vlgmr.msra.gmra.mxu0 %v18191_v34  ;;  %v10088_v39 = vld [vmem:[#allocation2 + $0x61] sm:$0xff]  ;;  %v10089_v34 = vld [vmem:[#allocation2 + $0x71] sm:$0xff] }
 0x7db   :  { %13388 = vmatprep.mubr.bf16.mxu0 %v9496_v38  ;;  %13433 = vmatpush3.bf16.msra.mxu0 %v13933_v6  ;;  %v17374_v6 = vld [vmem:[#allocation2 + $0x122] sm:$0xff] }
 0x7dc   :  { %13434 = vmatprep.subr.bf16.mxu0 %v13935_v45  ;;  %v9703_v58 = vpack.c.bf16 %v17374_v6, %v17329_v56  ;;  %v13951_v56 = vld [vmem:[#allocation12 + $0x8e8] sm:$0xff]  }
 0x7dd   :  { %13415 = vmatpush3.bf16.msra.mxu1 %v13932_v18  ;;  %v10100_v18 = vpack.c.bf16 %v10085_v10, %v10084_v53 }
 0x7de   :  { %13464 = vmatprep.subr.bf16.mxu1 %v13934_v29 }
 0x7df   :  { %13435 = vmatpush3.bf16.msra.mxu0 %v13935_v45  ;;  %v10086_v45 = vld [vmem:[#allocation2 + $0x41] sm:$0xff] }
 0x7e0   :  { %13417 = vmatmul.mubr.bf16.vlgmr.msra.gmra.mxu1 %v9697_v11  ;;  %13436 = vmatprep.subr.bf16.mxu0 %v13937_v50  ;;  %v10091_v11 = vld [vmem:[#allocation2 + $0x91] sm:$0xff] }
 0x7e1   :  { %13420 = vmatprep.mubr.bf16.mxu1 %v9698_v28  ;;  %13465 = vmatpush3.bf16.msra.mxu1 %v13934_v29  ;;  %v10102_v29 = vpack.c.bf16 %v10089_v34, %v10088_v39  ;;  %v13953_v28 = vld [vmem:[#allocation12 + $0x8d8] sm:$0xff]  }
 0x7e2   :  { %13466 = vmatprep.subr.bf16.mxu1 %v13936_v36  ;;  %13389 = vmatmul.mubr.bf16.gmra.mxu0 %v17147_v61  ;;  %v13943_v61 = vld [vmem:[#allocation12 + $0x850] sm:$0xff]  }
 0x7e3   :  { %13392 = vmatprep.mubr.bf16.mxu0 %v9498_v27  ;;  %13437 = vmatpush3.bf16.msra.mxu0 %v13937_v50  ;;  %v9901_v50 = vpack.c.bf16 %v18128_v16, %v17299_v52  ;;  %v10094_v52 = vld [vmem:[#allocation2 + $0xe1] sm:$0xff] }
 0x7e4   :  { %13438 = vmatprep.subr.bf16.mxu0 %v13939_v19 }
 0x7e5   :  { %13467 = vmatpush3.bf16.msra.mxu1 %v13936_v36  ;;  %v10093_v36 = vld [vmem:[#allocation2 + $0xd1] sm:$0xff] }
 0x7e6   :  { %13468 = vmatprep.subr.bf16.mxu1 %v13938_v49  ;;  %v10104_v27 = vpack.c.bf16 %v10093_v36, %v17187_v42  ;;  %v9905_v42 = vpack.c.bf16 %v18128_v16, %v17338_v3 }
 0x7e7   :  { %13439 = vmatpush3.bf16.msra.mxu0 %v13939_v19 }
 0x7e8   :  { %13421 = vmatmul.mubr.bf16.gmra.mxu1 %v9699_v25  ;;  %13440 = vmatprep.subr.bf16.mxu0 %v13941_v31  ;;  %v13956_v25 = vld [vmem:[#allocation12 + $0x8c0] sm:$0xff]  }
 0x7e9   :  { %13424 = vmatprep.mubr.bf16.mxu1 %v9700_v26  ;;  %13469 = vmatpush3.bf16.msra.mxu1 %v13938_v49  ;;  %v13954_v49 = vld [vmem:[#allocation12 + $0x8d0] sm:$0xff]  }
 0x7ea   :  { %13470 = vmatprep.subr.bf16.mxu1 %v13940_v46  ;;  %13393 = vmatmul.mubr.bf16.gmra.mxu0 %v18192_v23 }
 0x7eb   :  { %13396 = vmatprep.mubr.bf16.mxu0 %v9500_v51  ;;  %13441 = vmatpush3.bf16.msra.mxu0 %v13941_v31  ;;  %v10105_v31 = vpack.c.bf16 %v17208_v60, %v10094_v52  ;;  %v10293_v60 = vld [vmem:[#allocation2 + $0x92] sm:$0xff] }
 0x7ec   :  { %13442 = vmatprep.subr.bf16.mxu0 %v13943_v61 }
 0x7ed   :  { %13471 = vmatpush3.bf16.msra.mxu1 %v13940_v46  ;;  %v10099_v46 = vld [vmem:[#allocation2 + $0x131] sm:$0xff] }
 0x7ee   :  { %13472 = vmatprep.subr.bf16.mxu1 %v13942_v20 }
 0x7ef   :  { %13443 = vmatpush3.bf16.msra.mxu0 %v13943_v61 }
 0x7f0   :  { %13425 = vmatmul.mubr.bf16.gmra.mxu1 %v9701_v13  ;;  %13444 = vmatprep.subr.bf16.mxu0 %v13945_v17 }
 0x7f1   :  { %13428 = vmatprep.mubr.bf16.mxu1 %v9702_v4  ;;  %13473 = vmatpush3.bf16.msra.mxu1 %v13942_v20 }
 0x7f2   :  { %13474 = vmatprep.subr.bf16.mxu1 %v13944_v12  ;;  %13397 = vmatmul.mubr.bf16.gmra.mxu0 %v18193_v0 }
 0x7f3   :  { %13445 = vmatpush3.bf16.msra.mxu0 %v13945_v17  ;;  %13448 = vmatprep.mubr.bf16.mxu0 %v17155_v8  ;;  %v10087_v8 = vld [vmem:[#allocation2 + $0x51] sm:$0xff] }
 0x7f4   :  { %13446 = vmatprep.subr.bf16.mxu0 %v13947_v9  ;;  %v10101_v38 = vpack.c.bf16 %v10087_v8, %v10086_v45 }
 0x7f5   :  { %13475 = vmatpush3.bf16.msra.mxu1 %v13944_v12 }
 0x7f6   :  { %13476 = vmatprep.subr.bf16.mxu1 %v13946_v63 }
 0x7f7   :  { %13447 = vmatpush3.bf16.msra.mxu0 %v13947_v9 }
 0x7f8   :  { %13429 = vmatmul.mubr.bf16.gmra.mxu1 %v9703_v58  ;;  %13496 = vmatprep.subr.bf16.mxu0 %v13949_v40 }
 0x7f9   :  { %13477 = vmatpush3.bf16.msra.mxu1 %v13946_v63  ;;  %13480 = vmatprep.mubr.bf16.mxu1 %v10100_v18 }
 0x7fa   :  { %13478 = vmatprep.subr.bf16.mxu1 %v13948_v5  ;;  %13449 = vmatmul.mubr.bf16.vlgmr.msra.gmra.mxu0 %v17180_v2  ;;  %v13952_v2 = vld [vmem:[#allocation12 + $0x8e0] sm:$0xff]  }
 0x7fb   :  { %13452 = vmatprep.mubr.bf16.mxu0 %v17203_v33  ;;  %13497 = vmatpush3.bf16.msra.mxu0 %v13949_v40  ;;  %v10090_v33 = vld [vmem:[#allocation2 + $0x81] sm:$0xff] }
 0x7fc   :  { %13498 = vmatprep.subr.bf16.mxu0 %v13950_v47  ;;  %v10103_v19 = vpack.c.bf16 %v10091_v11, %v10090_v33 }
 0x7fd   :  { %13479 = vmatpush3.bf16.msra.mxu1 %v13948_v5 }
 0x7fe   :  { %13528 = vmatprep.subr.bf16.mxu1 %v18128_v16 }
 0x7ff   :  { %13499 = vmatpush3.bf16.msra.mxu0 %v13950_v47 }
 0x800   :  { %13481 = vmatmul.mubr.bf16.vlgmr.msra.gmra.mxu1 %v10101_v38  ;;  %13500 = vmatprep.subr.bf16.mxu0 %v13951_v56 }
 0x801   :  { %13484 = vmatprep.mubr.bf16.mxu1 %v10102_v29 }
 0x802   :  { %13453 = vmatmul.mubr.bf16.gmra.mxu0 %v9901_v50 }
 0x803   :  { %13456 = vmatprep.mubr.bf16.mxu0 %v17234_v35  ;;  %13501 = vmatpush3.bf16.msra.mxu0 %v13951_v56  ;;  %v13955_v35 = vld [vmem:[#allocation12 + $0x8c8] sm:$0xff]  }
 0x804   :  { %13502 = vmatprep.subr.bf16.mxu0 %v13952_v2 }
 0x807   :  { %13503 = vmatpush3.bf16.msra.mxu0 %v13952_v2 }
 0x808   :  { %13485 = vmatmul.mubr.bf16.gmra.mxu1 %v10103_v19  ;;  %13504 = vmatprep.subr.bf16.mxu0 %v13953_v28 }
 0x809   :  { %13488 = vmatprep.mubr.bf16.mxu1 %v10104_v27 }
 0x80a   :  { %13457 = vmatmul.mubr.bf16.gmra.mxu0 %v17251_v48  ;;  %v10107_v48 = vpack.c.bf16 %v10099_v46, %v17215_v14  ;;  %v17401_v14 = vpop.f32.mrf.mxu0 }
 0x80b   :  { %13460 = vmatprep.mubr.bf16.mxu0 %v17262_v59  ;;  %13505 = vmatpush3.bf16.msra.mxu0 %v13953_v28  ;;  %v10305_v59 = vpack.c.bf16 %v10293_v60, %v17356_v21  ;;  %18194 = vst [vmem:[#allocation106_spill] sm:$0xff] %v17401_v14 }
 0x80c   :  { %13506 = vmatprep.subr.bf16.mxu0 %v13954_v49 }
 0x80f   :  { %13507 = vmatpush3.bf16.msra.mxu0 %v13954_v49 }
 0x810   :  { %13489 = vmatmul.mubr.bf16.gmra.mxu1 %v10105_v31  ;;  %13508 = vmatprep.subr.bf16.mxu0 %v13955_v35 }
 0x811   :  { %13492 = vmatprep.mubr.bf16.mxu1 %v17238_v57  ;;  %v10301_v57 = vld [vmem:[#allocation2 + $0x132] sm:$0xff] }
 0x812   :  { %13461 = vmatmul.mubr.bf16.gmra.mxu0 %v9905_v42 }
 0x813   :  { %13509 = vmatpush3.bf16.msra.mxu0 %v13955_v35  ;;  %13512 = vmatprep.mubr.bf16.mxu0 %v17273_v55  ;;  %v10309_v55 = vpack.c.bf16 %v10301_v57, %v17374_v6 }
 0x814   :  { %13510 = vmatprep.subr.bf16.mxu0 %v13956_v25 }
 0x817   :  { %13511 = vmatpush3.bf16.msra.mxu0 %v13956_v25 }
 0x818   :  { %13493 = vmatmul.mubr.bf16.gmra.mxu1 %v10107_v48 }
 0x819   :  { %13544 = vmatprep.mubr.msk.bf16.mxu1 %vm14221_vm0, %v18128_v16 }
 0x81a   :  { %13513 = vmatmul.mubr.bf16.vlgmr.msra.gmra.mxu0 %v17279_v22 }
 0x81b   :  { %13516 = vmatprep.mubr.bf16.mxu0 %v17295_v43 }
 0x822   :  { %13517 = vmatmul.mubr.bf16.gmra.mxu0 %v10305_v59 }
 0x823   :  { %13520 = vmatprep.mubr.bf16.mxu0 %v17313_v15 }
 0x82a   :  { %13521 = vmatmul.mubr.bf16.gmra.mxu0 %v17319_v37 }
 0x82b   :  { %13524 = vmatprep.mubr.bf16.mxu0 %v17333_v32 }
 0x832   :  { %13525 = vmatmul.mubr.bf16.gmra.mxu0 %v10309_v55 }
 0x858   :  { %v13258_v3 = vpop.f32.mrf.mxu0 }
 0x85a   :  { %v8866_v22 = vpop.f32.mrf.mxu0 }
 0x85c   :  { %v13259_v26 = vpop.f32.mrf.mxu0 }
 0x85e   :  { %v8869_v43 = vpop.f32.mrf.mxu0 }
 0x860   :  { %v13290_v61 = vpop.f32.mrf.mxu1 }
 0x861   :  { %v9020_v51 = vadd.f32 %v13290_v61, %v13258_v3  ;;  %v13262_v21 = vpop.f32.mrf.mxu0 }
 0x862   :  { %v9011_v23 = vpop.f32.mrf.mxu1 }
 0x863   :  { %v9012_v20 = vadd.f32 %v9011_v23, %v8866_v22  ;;  %v8882_v15 = vpop.f32.mrf.mxu0 }
 0x864   :  { %v13291_v17 = vpop.f32.mrf.mxu1 }
 0x865   :  { %v9023_v37 = vadd.f32 %v13291_v17, %v13259_v26  ;;  %v13263_v13 = vpop.f32.mrf.mxu0 }
 0x866   :  { %v9014_v32 = vpop.f32.mrf.mxu1 }
 0x867   :  { %v9015_v12 = vadd.f32 %v9014_v32, %v8869_v43  ;;  %v8885_v4 = vpop.f32.mrf.mxu0 }
 0x868   :  { %v13294_v9 = vpop.f32.mrf.mxu1 }
 0x869   :  { %v9036_v0 = vadd.f32 %v13294_v9, %v13262_v21  ;;  %v13266_v63 = vpop.f32.mrf.mxu0 }
 0x86a   :  { %v9027_v6 = vpop.f32.mrf.mxu1 }
 0x86b   :  { %v9028_v53 = vadd.f32 %v9027_v6, %v8882_v15  ;;  %v8898_v40 = vpop.f32.mrf.mxu0 }
 0x86c   :  { %v13295_v58 = vpop.f32.mrf.mxu1 }
 0x86d   :  { %v9039_v10 = vadd.f32 %v13295_v58, %v13263_v13  ;;  %v13267_v5 = vpop.f32.mrf.mxu0 }
 0x86e   :  { %v9030_v18 = vpop.f32.mrf.mxu1 }
 0x86f   :  { %v9031_v47 = vadd.f32 %v9030_v18, %v8885_v4  ;;  %v8901_v8 = vpop.f32.mrf.mxu0 }
 0x870   :  { %v13298_v39 = vpop.f32.mrf.mxu1 }
 0x871   :  { %v9052_v56 = vadd.f32 %v13298_v39, %v13266_v63  ;;  %v13270_v45 = vpop.f32.mrf.mxu0 }
 0x872   :  { %v9043_v38 = vpop.f32.mrf.mxu1 }
 0x873   :  { %v9044_v34 = vadd.f32 %v9043_v38, %v8898_v40  ;;  %v8914_v29 = vpop.f32.mrf.mxu0 }
 0x874   :  { %v13299_v50 = vpop.f32.mrf.mxu1 }
 0x875   :  { %v9055_v2 = vadd.f32 %v13299_v50, %v13267_v5  ;;  %v13271_v33 = vpop.f32.mrf.mxu0 }
 0x876   :  { %v9046_v11 = vpop.f32.mrf.mxu1 }
 0x877   :  { %v9047_v36 = vadd.f32 %v9046_v11, %v8901_v8  ;;  %v8917_v28 = vpop.f32.mrf.mxu0 }
 0x878   :  { %v13302_v19 = vpop.f32.mrf.mxu1 }
 0x879   :  { %v9068_v27 = vadd.f32 %v13302_v19, %v13270_v45 }
 0x87a   :  { %v9059_v49 = vpop.f32.mrf.mxu1  ;;  %v13322_v52 = vpop.f32.mrf.mxu0 }
 0x87b   :  { %v9060_v35 = vadd.f32 %v9059_v49, %v8914_v29  ;;  %v9262_v31 = vadd.f32 %v13322_v52, %v9020_v51 }
 0x87c   :  { %v13303_v42 = vpop.f32.mrf.mxu1  ;;  %v9197_v25 = vpop.f32.mrf.mxu0 }
 0x87d   :  { %v9071_v46 = vadd.f32 %v13303_v42, %v13271_v33  ;;  %v9260_v48 = vadd.f32 %v9197_v25, %v9012_v20  ;;  %v13958_v42 = vld [vmem:[#allocation17 + $0x30] sm:$0xff]  }
 0x87e   :  { %v9062_v60 = vpop.f32.mrf.mxu1  ;;  %v13323_v59 = vpop.f32.mrf.mxu0 }
 0x87f   :  { %v9063_v57 = vadd.f32 %v9062_v60, %v8917_v28  ;;  %v9263_v55 = vadd.f32 %v13323_v59, %v9023_v37  ;;  %v13957_v28 = vld [vmem:[#allocation17 + $0x38] sm:$0xff]  }
 0x880   :  { %v13354_v3 = vpop.f32.mrf.mxu1  ;;  %v9200_v22 = vpop.f32.mrf.mxu0  ;;  %13529 = vmatpush3.bf16.msra.mxu1 %v13957_v28 }
 0x881   :  { %v9464_v26 = vadd.f32 %v13354_v3, %v9262_v31  ;;  %v9261_v43 = vadd.f32 %v9200_v22, %v9015_v12  ;;  %13530 = vmatprep.subr.bf16.mxu1 %v18128_v16 }
 0x882   :  { %v9399_v61 = vpop.f32.mrf.mxu1  ;;  %v13326_v21 = vpop.f32.mrf.mxu0 }
 0x883   :  { %v9462_v23 = vadd.f32 %v9399_v61, %v9260_v48  ;;  %v9266_v15 = vadd.f32 %v13326_v21, %v9036_v0 }
 0x884   :  { %v13355_v17 = vpop.f32.mrf.mxu1  ;;  %v9213_v13 = vpop.f32.mrf.mxu0  ;;  %13531 = vmatpush3.bf16.msra.mxu1 %v13958_v42 }
 0x885   :  { %v9465_v32 = vadd.f32 %v13355_v17, %v9263_v55  ;;  %v9264_v51 = vadd.f32 %v9213_v13, %v9028_v53  ;;  %13532 = vmatprep.subr.bf16.mxu1 %v18128_v16  ;;  %v13959_v55 = vld [vmem:[#allocation17 + $0x28] sm:$0xff]   ;;  %v13961_v13 = vld [vmem:[#allocation17 + $0x18] sm:$0xff]  }
 0x886   :  { %v9402_v4 = vpop.f32.mrf.mxu1  ;;  %v13327_v9 = vpop.f32.mrf.mxu0 }
 0x887   :  { %v9463_v63 = vadd.f32 %v9402_v4, %v9261_v43  ;;  %v9267_v20 = vadd.f32 %v13327_v9, %v9039_v10 }
 0x888   :  { %v13358_v6 = vpop.f32.mrf.mxu1  ;;  %v9216_v40 = vpop.f32.mrf.mxu0  ;;  %13533 = vmatpush3.bf16.msra.mxu1 %v13959_v55 }
 0x889   :  { %v9468_v58 = vadd.f32 %v13358_v6, %v9266_v15  ;;  %v9265_v37 = vadd.f32 %v9216_v40, %v9031_v47  ;;  %13534 = vmatprep.subr.bf16.mxu1 %v18128_v16 }
 0x88a   :  { %v9415_v5 = vpop.f32.mrf.mxu1  ;;  %v13330_v18 = vpop.f32.mrf.mxu0 }
 0x88b   :  { %v9466_v8 = vadd.f32 %v9415_v5, %v9264_v51  ;;  %v9270_v12 = vadd.f32 %v13330_v18, %v9052_v56 }
 0x88c   :  { %v13359_v39 = vpop.f32.mrf.mxu1  ;;  %v9229_v45 = vpop.f32.mrf.mxu0 }
 0x88d   :  { %v17403_v38 = vadd.f32 %v13359_v39, %v9267_v20  ;;  %v17405_v0 = vadd.f32 %v9229_v45, %v9044_v34 }
 0x88e   :  { %v9418_v29 = vpop.f32.mrf.mxu1  ;;  %v13331_v53 = vpop.f32.mrf.mxu0 }
 0x88f   :  { %v17407_v50 = vadd.f32 %v9418_v29, %v9265_v37  ;;  %v17409_v33 = vadd.f32 %v13331_v53, %v9055_v2 }
 0x890   :  { %v13362_v10 = vpop.f32.mrf.mxu1  ;;  %v9232_v11 = vpop.f32.mrf.mxu0 }
 0x891   :  { %v17411_v47 = vadd.f32 %v13362_v10, %v9270_v12  ;;  %v17413_v19 = vadd.f32 %v9232_v11, %v9047_v36  ;;  %v13964_v10 = vld [vmem:[#allocation17] sm:$0xff]  }
 0x892   :  { %v17415_v56 = vpop.f32.mrf.mxu1  ;;  %v13334_v49 = vpop.f32.mrf.mxu0 }
 0x893   :  { %v9274_v52 = vadd.f32 %v13334_v49, %v9068_v27 }
 0x894   :  { %v17418_v34 = vpop.f32.mrf.mxu1  ;;  %v9245_v31 = vpop.f32.mrf.mxu0 }
 0x895   :  { %v17420_v2 = vadd.f32 %v9245_v31, %v9060_v35  ;;  %v13960_v35 = vld [vmem:[#allocation17 + $0x20] sm:$0xff]  }
 0x896   :  { %v17422_v25 = vpop.f32.mrf.mxu1  ;;  %v13335_v48 = vpop.f32.mrf.mxu0  ;;  %13535 = vmatpush3.bf16.msra.mxu1 %v13960_v35 }
 0x897   :  { %v17424_v60 = vadd.f32 %v13335_v48, %v9071_v46  ;;  %13536 = vmatprep.subr.bf16.mxu1 %v18128_v16 }
 0x898   :  { %v13366_v36 = vpop.f32.mrf.mxu1  ;;  %v9248_v59 = vpop.f32.mrf.mxu0 }
 0x899   :  { %v9476_v27 = vadd.f32 %v13366_v36, %v9274_v52  ;;  %v17427_v3 = vadd.f32 %v9248_v59, %v9063_v57 }
 0x89a   :  { %v17429_v22 = vpop.f32.mrf.mxu1  ;;  %v13386_v43 = vpop.f32.mrf.mxu0  ;;  %13537 = vmatpush3.bf16.msra.mxu1 %v13961_v13 }
 0x89b   :  { %v17431_v61 = vadd.f32 %v13386_v43, %v9464_v26  ;;  %13538 = vmatprep.subr.bf16.mxu1 %v18128_v16 }
 0x89c   :  { %v17435_v46 = vpop.f32.mrf.mxu1  ;;  %v9601_v21 = vpop.f32.mrf.mxu0 }
 0x89d   :  { %v17437_v15 = vadd.f32 %v9601_v21, %v9462_v23  ;;  %v13962_v23 = vld [vmem:[#allocation17 + $0x10] sm:$0xff]  }
 0x89e   :  { %v17439_v17 = vpop.f32.mrf.mxu1  ;;  %v13387_v57 = vpop.f32.mrf.mxu0  ;;  %13539 = vmatpush3.bf16.msra.mxu1 %v13962_v23 }
 0x89f   :  { %v17441_v51 = vadd.f32 %v13387_v57, %v9465_v32  ;;  %13540 = vmatprep.subr.bf16.mxu1 %v18128_v16 }
 0x8a0   :  { %v17444_v26 = vpop.f32.mrf.mxu1  ;;  %v9604_v4 = vpop.f32.mrf.mxu0 }
 0x8a1   :  { %v17446_v9 = vadd.f32 %v9604_v4, %v9463_v63  ;;  %v13963_v63 = vld [vmem:[#allocation17 + $0x8] sm:$0xff]  }
 0x8a2   :  { %v17448_v20 = vpop.f32.mrf.mxu1  ;;  %v13390_v6 = vpop.f32.mrf.mxu0  ;;  %13541 = vmatpush3.bf16.msra.mxu1 %v13963_v63 }
 0x8a3   :  { %v17450_v40 = vadd.f32 %v13390_v6, %v9468_v58  ;;  %13542 = vmatprep.subr.bf16.mxu1 %v18128_v16 }
 0x8a4   :  { %v17453_v37 = vpop.f32.mrf.mxu1  ;;  %v9617_v32 = vpop.f32.mrf.mxu0 }
 0x8a5   :  { %v17455_v5 = vadd.f32 %v9617_v32, %v9466_v8 }
 0x8a6   :  { %v17457_v18 = vpop.f32.mrf.mxu1  ;;  %v13391_v12 = vpop.f32.mrf.mxu0  ;;  %13543 = vmatpush3.bf16.msra.mxu1 %v13964_v10 }
 0x8a7   :  { %v17460_v39 = vadd.f32 %v13391_v12, %v17403_v38 }
 0x8a8   :  { %v17463_v45 = vpop.f32.mrf.mxu1  ;;  %v9620_v58 = vpop.f32.mrf.mxu0 }
 0x8a9   :  { %v17466_v29 = vadd.f32 %v9620_v58, %v17407_v50 }
 0x8aa   :  { %v17468_v53 = vpop.f32.mrf.mxu1  ;;  %v13394_v8 = vpop.f32.mrf.mxu0 }
 0x8ab   :  { %v17471_v11 = vadd.f32 %v13394_v8, %v17411_v47 }
 0x8ac   :  { %v13423_v38 = vpop.f32.mrf.mxu1  ;;  %v9633_v28 = vpop.f32.mrf.mxu0 }
 0x8ae   :  { %v9822_v49 = vpop.f32.mrf.mxu1  ;;  %v13395_v52 = vpop.f32.mrf.mxu0 }
 0x8b0   :  { %v13426_v31 = vpop.f32.mrf.mxu1  ;;  %v17474_v42 = vpop.f32.mrf.mxu0 }
 0x8b2   :  { %v9835_v50 = vpop.f32.mrf.mxu1  ;;  %v13398_v48 = vpop.f32.mrf.mxu0 }
 0x8b3   :  { %v17476_v36 = vadd.f32 %v13398_v48, %v9476_v27 }
 0x8b4   :  { %v13427_v59 = vpop.f32.mrf.mxu1  ;;  %v17478_v55 = vpop.f32.mrf.mxu0 }
 0x8b6   :  { %v17480_v43 = vpop.f32.mrf.mxu1  ;;  %v17482_v47 = vpop.f32.mrf.mxu0 }
 0x8b8   :  { %v17484_v16 = vpop.f32.mrf.mxu1  ;;  %v17486_v35 = vpop.f32.mrf.mxu0 }
 0x8ba   :  { %v17488_v21 = vpop.f32.mrf.mxu1  ;;  %v13450_v57 = vpop.f32.mrf.mxu0 }
 0x8bc   :  { %v17490_v13 = vpop.f32.mrf.mxu1  ;;  %v10005_v4 = vpop.f32.mrf.mxu0 }
 0x8bd   :  { %18195 = vst [vmem:[#allocation110_spill] sm:$0xff] %v17490_v13 }
 0x8be   :  { %v17492_v6 = vpop.f32.mrf.mxu1  ;;  %v13451_v27 = vpop.f32.mrf.mxu0 }
 0x8bf   :  { %18196 = vst [vmem:[#allocation45_spill] sm:$0xff] %v17492_v6 }
 0x8c0   :  { %v13482_v23 = vpop.f32.mrf.mxu1  ;;  %v10008_v32 = vpop.f32.mrf.mxu0 }
 0x8c2   :  { %v10207_v12 = vpop.f32.mrf.mxu1  ;;  %v17494_v63 = vpop.f32.mrf.mxu0 }
 0x8c3   :  { %18197 = vst [vmem:[#allocation80_spill] sm:$0xff] %v17494_v63 }
 0x8c4   :  { %v13483_v58 = vpop.f32.mrf.mxu1  ;;  %v10021_v8 = vpop.f32.mrf.mxu0 }
 0x8c6   :  { %v10210_v10 = vpop.f32.mrf.mxu1  ;;  %v17496_v48 = vpop.f32.mrf.mxu0 }
 0x8c7   :  { %18198 = vst [vmem:[#allocation111_spill] sm:$0xff] %v17496_v48 }
 0x8c8   :  { %v17498_v14 = vpop.f32.mrf.mxu1  ;;  %v17500_v1 = vpop.f32.mrf.mxu0 }
 0x8c9   :  { %18199 = vst [vmem:[#allocation108_spill] sm:$0xff] %v17500_v1  ;;  %v9868_v1 = vadd.f32 %v17444_v26, %v17431_v61  ;;  %v9477_v61 = vadd.f32 %v17435_v46, %v17424_v60  ;;  %v9870_v60 = vadd.f32 %v17468_v53, %v17455_v5 }
 0x8ca   :  { %v17502_v30 = vpop.f32.mrf.mxu0  ;;  %v17504_v62 = vpop.f32.mrf.mxu1 }
 0x8cb   :  { %18200 = vst [vmem:[#allocation113_spill] sm:$0xff] %v17502_v30  ;;  %18201 = vst [vmem:[#allocation112_spill] sm:$0xff] %v17504_v62  ;;  %v9470_v30 = vadd.f32 %v17415_v56, %v17405_v0  ;;  %v9475_v0 = vadd.f32 %v17439_v17, %v17427_v3  ;;  %v9869_v56 = vadd.f32 %v17453_v37, %v17441_v51 }
 0x8cc   :  { %v17506_v6 = vpop.f32.mrf.mxu0  ;;  %v17510_v24 = vpop.f32.mrf.mxu1  ;;  %v9873_v3 = vadd.f32 %v13423_v38, %v17460_v39  ;;  %v9871_v17 = vadd.f32 %v9822_v49, %v17466_v29  ;;  %v9880_v29 = vadd.f32 %v17484_v16, %v17476_v36 }
 0x8cd   :  { %v10071_v26 = vadd.f32 %v13451_v27, %v9869_v56 }
 0x8ce   :  { %v17508_v41 = vpop.f32.mrf.mxu0  ;;  %v17516_v13 = vpop.f32.mrf.mxu1 }
 0x8cf   :  { %18202 = vst [vmem:[#allocation121_spill] sm:$0xff] %v17508_v41  ;;  %18205 = vst [vmem:[#allocation81_spill] sm:$0xff] %v17516_v13  ;;  %v9473_v41 = vadd.f32 %v17418_v34, %v17409_v33  ;;  %v10070_v13 = vadd.f32 %v13450_v57, %v9868_v1  ;;  %v9872_v1 = vadd.f32 %v17463_v45, %v17450_v40 }
 0x8d0   :  { %v17512_v54 = vpop.f32.mrf.mxu0  ;;  %v17540_v33 = vpop.f32.mrf.mxu1 }
 0x8d1   :  { %18203 = vst [vmem:[#allocation123_spill] sm:$0xff] %v17512_v54  ;;  %v9471_v54 = vadd.f32 %v17422_v25, %v17413_v19  ;;  %v9867_v19 = vadd.f32 %v17457_v18, %v17446_v9  ;;  %v9675_v46 = vadd.f32 %v13395_v52, %v9473_v41  ;;  %v9876_v9 = vadd.f32 %v13426_v31, %v17471_v11 }
 0x8d2   :  { %v17514_v63 = vpop.f32.mrf.mxu0  ;;  %v10239_v45 = vpop.f32.mrf.mxu1  ;;  %v9679_v11 = vadd.f32 %v17482_v47, %v9477_v61  ;;  %v18210_v47 = vld [vmem:[#allocation61_spill] sm:$0xff]  ;;  %v17576_v61 = vld [vmem:[#allocation14] ss:$0 sm:$0xff] }
 0x8d3   :  { %18204 = vst [vmem:[#allocation56_spill] sm:$0xff] %v17514_v63  ;;  %v9866_v63 = vadd.f32 %v17448_v20, %v17437_v15  ;;  %v9877_v18 = vadd.f32 %v13427_v59, %v9675_v46  ;;  %v9673_v40 = vadd.f32 %v17474_v42, %v9471_v54  ;;  %v10069_v5 = vadd.f32 %v10008_v32, %v9867_v19  ;;  %v18218_v46 = vld [vmem:[#allocation113_spill] sm:$0xff] }
 0x8d4   :  { %v17518_v48 = vpop.f32.mrf.mxu0  ;;  %v13491_v36 = vpop.f32.mrf.mxu1 }
 0x8d5   :  { %18206 = vst [vmem:[#allocation115_spill] sm:$0xff] %v17518_v48  ;;  %v9474_v48 = vadd.f32 %v17429_v22, %v17420_v2  ;;  %v10272_v2 = vadd.f32 %v13482_v23, %v10070_v13  ;;  %v10068_v25 = vadd.f32 %v10005_v4, %v9866_v63  ;;  %v9672_v22 = vadd.f32 %v9633_v28, %v9470_v30  ;;  %v18211_v23 = vld [vmem:[#allocation120_spill] sm:$0xff]  ;;  %v18213_v63 = vld [vmem:[#allocation111_spill] sm:$0xff] }
 0x8d6   :  { %v17524_v62 = vpop.f32.mrf.mxu0  ;;  %v10273_v13 = vadd.f32 %v13483_v58, %v10071_v26  ;;  %v9875_v41 = vadd.f32 %v17480_v43, %v9673_v40  ;;  %v9677_v28 = vadd.f32 %v17486_v35, %v9475_v0  ;;  %v10271_v54 = vadd.f32 %v10210_v10, %v10069_v5  ;;  %v18214_v10 = vld [vmem:[#allocation108_spill] sm:$0xff]  ;;  %v18219_v26 = vld [vmem:[#allocation81_spill] sm:$0xff]  ;;  %v17588_v5 = vld [vmem:[#allocation15] ss:$0 sm:$0xff] }
 0x8d7   :  { %v10270_v51 = vadd.f32 %v10207_v12, %v10068_v25  ;;  %v9874_v37 = vadd.f32 %v9835_v50, %v9672_v22  ;;  %v9676_v53 = vadd.f32 %v17478_v55, %v9474_v48  ;;  %v18208_v50 = vld [vmem:[#allocation80_spill] sm:$0xff]  ;;  %v10072_v43 = vadd.f32 %v10021_v8, %v9870_v60  ;;  %v18212_v12 = vld [vmem:[#allocation45_spill] sm:$0xff] }
 0x8d8   :  { %v17542_v34 = vpop.f32.mrf.mxu0  ;;  %v10074_v59 = vadd.f32 %v18208_v50, %v9872_v1  ;;  %v18209_v55 = vld [vmem:[#allocation52_spill] sm:$0xff]  ;;  %v10075_v58 = vadd.f32 %v18213_v63, %v9873_v3  ;;  %v10073_v48 = vadd.f32 %v18214_v10, %v9871_v17  ;;  %v18216_v1 = vld [vmem:[#allocation46_spill] sm:$0xff]  ;;  %v18217_v25 = vld [vmem:[#allocation117_spill] sm:$0xff]  ;;  %v10242_v3 = vpop.f32.mrf.mxu1 }
 0x8d9   :  { %v9878_v31 = vadd.f32 %v17488_v21, %v9676_v53  ;;  %v18215_v0 = vld [vmem:[#allocation112_spill] sm:$0xff]  ;;  %v18220_v40 = vld [vmem:[#allocation121_spill] sm:$0xff]  ;;  %v18229_v10 = vld [vmem:[#allocation62_spill] sm:$0xff] }
 0x8da   :  { %v13514_v15 = vpop.f32.mrf.mxu0  ;;  %v10276_v21 = vadd.f32 %v17498_v14, %v10074_v59  ;;  %v10274_v56 = vadd.f32 %v18215_v0, %v10072_v43  ;;  %v10277_v22 = vadd.f32 %v17510_v24, %v10075_v58  ;;  %v10076_v14 = vadd.f32 %v17506_v6, %v9874_v37  ;;  %v13494_v59 = vpop.f32.mrf.mxu1  ;;  %v18225_v43 = vld [vmem:[#allocation29_spill] sm:$0xff] }
 0x8db   :  { %v10474_v20 = vadd.f32 %v13514_v15, %v10272_v2  ;;  %v10078_v15 = vadd.f32 %v18218_v46, %v9876_v9  ;;  %v18222_v9 = vld [vmem:[#allocation100_spill] sm:$0xff] }
 0x8dc   :  { %v10409_v57 = vpop.f32.mrf.mxu0 }
 0x8dd   :  { %v10490_v39 = vadd.f32 %v10474_v20, %v17064_v7  ;;  %v10472_v30 = vadd.f32 %v10409_v57, %v10270_v51  ;;  %v18207_v7 = vld [vmem:[#allocation110_spill] sm:$0xff]  ;;  %v10275_v20 = vadd.f32 %v18219_v26, %v10073_v48  ;;  %v10079_v57 = vadd.f32 %v18220_v40, %v9877_v18 }
 0x8de   :  { %v13515_v38 = vpop.f32.mrf.mxu0  ;;  %v17564_v42 = vadd.f32 %v18207_v7, %v9679_v11  ;;  %v18224_v7 = vld [vmem:[#allocation56_spill] sm:$0xff] }
 0x8df   :  { %v10488_v49 = vadd.f32 %v10472_v30, %v17069_v44  ;;  %v10475_v52 = vadd.f32 %v13515_v38, %v10273_v13  ;;  %v10506_v4 = vadd.f32 %v10490_v39, %v18209_v55  ;;  %v17571_v44 = vadd.f32 %v18212_v12, %v9677_v28  ;;  %v18221_v39 = vld [vmem:[#allocation44_spill] sm:$0xff]  ;;  %v18223_v28 = vld [vmem:[#allocation123_spill] sm:$0xff] }
 0x8e0   :  { %v10412_v16 = vpop.f32.mrf.mxu0  ;;  %v10280_v38 = vadd.f32 %v17540_v33, %v10078_v15  ;;  %v10082_v50 = vadd.f32 %v18224_v7, %v9880_v29  ;;  %v18226_v55 = vld [vmem:[#allocation104_spill] sm:$0xff]  ;;  %v18236_v7 = vld [vmem:[#allocation67_spill] sm:$0xff] }
 0x8e1   :  { %v10504_v27 = vadd.f32 %v10488_v49, %v18210_v47  ;;  %v10491_v35 = vadd.f32 %v10475_v52, %v18211_v23  ;;  %v10473_v32 = vadd.f32 %v10412_v16, %v10271_v54  ;;  %v10529_v13 = vmul.f32 %v17576_v61, %v10506_v4 }
 0x8e2   :  { %v13518_v8 = vpop.f32.mrf.mxu0  ;;  %v10077_v54 = vadd.f32 %v18223_v28, %v9875_v41  ;;  %v10278_v52 = vadd.f32 %v10239_v45, %v10076_v14  ;;  %v10281_v41 = vadd.f32 %v13491_v36, %v10079_v57  ;;  %v18228_v45 = vld [vmem:[#allocation60_spill] sm:$0xff]  ;;  %v18232_v14 = vld [vmem:[#allocation63_spill] sm:$0xff] }
 0x8e3   :  { %v10527_v19 = vmul.f32 %v17576_v61, %v10504_v27  ;;  %v10507_v2 = vadd.f32 %v10491_v35, %v18216_v1  ;;  %v10489_v60 = vadd.f32 %v10473_v32, %v18217_v25  ;;  %v10478_v51 = vadd.f32 %v13518_v8, %v10276_v21  ;;  %v18227_v35 = vld [vmem:[#allocation41_spill] sm:$0xff]  ;;  %v18230_v8 = vld [vmem:[#allocation40_spill] sm:$0xff]  ;;  %v18231_v1 = vld [vmem:[#allocation115_spill] sm:$0xff]  ;;  %v10255_v25 = vpop.f32.mrf.mxu1 }
 0x8e4   :  { %v10425_v17 = vpop.f32.mrf.mxu0  ;;  %v10552_v27 = vadd.f32 %v17588_v5, %v10529_v13  ;;  %v10284_v13 = vadd.f32 %v13494_v59, %v10082_v50  ;;  %v18237_v59 = vld [vmem:[#allocation119_spill] sm:$0xff] }
 0x8e5   :  { %v10505_v30 = vadd.f32 %v10489_v60, %v18221_v39  ;;  %v10550_v53 = vadd.f32 %v17588_v5, %v10527_v19  ;;  %v10530_v24 = vmul.f32 %v17576_v61, %v10507_v2  ;;  %v10494_v11 = vadd.f32 %v10478_v51, %v18222_v9  ;;  %v13495_v9 = vpop.f32.mrf.mxu1 }
 0x8e6   :  { %v10476_v6 = vadd.f32 %v10425_v17, %v10274_v56  ;;  %v13519_v37 = vpop.f32.mrf.mxu0  ;;  %v10279_v19 = vadd.f32 %v10242_v3, %v10077_v54  ;;  %v10080_v2 = vadd.f32 %v18231_v1, %v9878_v31  ;;  %v10568_v46 = vmax.f32 %v10552_v27, 0.0  ;;  %v18233_v17 = vld [vmem:[#allocation105_spill] sm:$0xff]  ;;  %v18241_v1 = vld [vmem:[#allocation64_spill] sm:$0xff] }
 0x8e7   :  { %v10528_v18 = vmul.f32 %v17576_v61, %v10505_v30  ;;  %v10479_v49 = vadd.f32 %v13519_v37, %v10277_v22  ;;  %v10510_v16 = vadd.f32 %v10494_v11, %v18225_v43  ;;  %v10566_v12 = vmax.f32 %v10550_v53, 0.0 }
 0x8e8   :  { %v10492_v4 = vadd.f32 %v10476_v6, %v18226_v55  ;;  %v10428_v47 = vpop.f32.mrf.mxu0  ;;  %v10553_v21 = vadd.f32 %v17588_v5, %v10530_v24  ;;  %v10282_v24 = vadd.f32 %v10255_v25, %v10080_v2  ;;  %v18234_v6 = vld [vmem:[#allocation122_spill] sm:$0xff] }
 0x8e9   :  { %v10551_v23 = vadd.f32 %v17588_v5, %v10528_v18  ;;  %v10495_v33 = vadd.f32 %v10479_v49, %v18227_v35  ;;  %v10477_v32 = vadd.f32 %v10428_v47, %v10275_v20  ;;  %v10533_v60 = vmul.f32 %v17576_v61, %v10510_v16  ;;  %v18235_v18 = vld [vmem:[#allocation65_spill] sm:$0xff] }
 0x8ea   :  { %v10508_v63 = vadd.f32 %v10492_v4, %v18228_v45  ;;  %v13522_v29 = vpop.f32.mrf.mxu0  ;;  %v10083_v20 = vadd.f32 %v17524_v62, %v17564_v42  ;;  %v10569_v39 = vmax.f32 %v10553_v21, 0.0 }
 0x8eb   :  { %v10567_v58 = vmax.f32 %v10551_v23, 0.0  ;;  %v10511_v48 = vadd.f32 %v10495_v33, %v18229_v10  ;;  %v10493_v0 = vadd.f32 %v10477_v32, %v18230_v8  ;;  %v10482_v56 = vadd.f32 %v13522_v29, %v10280_v38  ;;  %v18238_v32 = vld [vmem:[#allocation69_spill] sm:$0xff]  ;;  %v18240_v10 = vld [vmem:[#allocation54_spill] sm:$0xff] }
 0x8ec   :  { %v10531_v36 = vmul.f32 %v17576_v61, %v10508_v63  ;;  %v10441_v22 = vpop.f32.mrf.mxu0  ;;  %v10556_v11 = vadd.f32 %v17588_v5, %v10533_v60  ;;  %v10285_v4 = vadd.f32 %v13495_v9, %v10083_v20  ;;  %v10258_v63 = vpop.f32.mrf.mxu1 }
 0x8ed   :  { %v10582_v15 = vadd.f32 %v10567_v58, %v10566_v12  ;;  %v10509_v51 = vadd.f32 %v10493_v0, %v18232_v14  ;;  %v10498_v26 = vadd.f32 %v10482_v56, %v18233_v17  ;;  %v10534_v3 = vmul.f32 %v17576_v61, %v10511_v48  ;;  %v18239_v12 = vld [vmem:[#allocation102_spill] sm:$0xff] }
 0x8ee   :  { %v10554_v40 = vadd.f32 %v17588_v5, %v10531_v36  ;;  %v10480_v31 = vadd.f32 %v10441_v22, %v10278_v52  ;;  %v13523_v57 = vpop.f32.mrf.mxu0  ;;  %v10572_v35 = vmax.f32 %v10556_v11, 0.0  ;;  %v10081_v0 = vadd.f32 %v17542_v34, %v17571_v44  ;;  %v18242_v22 = vld [vmem:[#allocation107_spill] sm:$0xff]  ;;  %v18243_v34 = vld [vmem:[#allocation68_spill] sm:$0xff] }
 0x8ef   :  { %v10583_v30 = vadd.f32 %v10582_v15, %v10568_v46  ;;  %v10532_v53 = vmul.f32 %v17576_v61, %v10509_v51  ;;  %v10483_v38 = vadd.f32 %v13523_v57, %v10281_v41  ;;  %v10514_v49 = vadd.f32 %v10498_v26, %v18235_v18  ;;  %v18246_v57 = vld [vmem:[#allocation106_spill] sm:$0xff] }
 0x8f0   :  { %v10496_v37 = vadd.f32 %v10480_v31, %v18234_v6  ;;  %v10444_v28 = vpop.f32.mrf.mxu0  ;;  %v10570_v62 = vmax.f32 %v10554_v40, 0.0  ;;  %v10557_v52 = vadd.f32 %v17588_v5, %v10534_v3  ;;  %v10283_v14 = vadd.f32 %v10258_v63, %v10081_v0  ;;  %v18244_v40 = vld [vmem:[#allocation109_spill] sm:$0xff]  ;;  %v18245_v31 = vld [vmem:[#allocation103_spill] sm:$0xff] }
 0x8f1   :  { %v10584_v42 = vadd.f32 %v10583_v30, %v10569_v39  ;;  %v10555_v54 = vadd.f32 %v17588_v5, %v10532_v53  ;;  %v10499_v43 = vadd.f32 %v10483_v38, %v18237_v59  ;;  %v10481_v16 = vadd.f32 %v10444_v28, %v10279_v19  ;;  %v18247_v30 = vld [vmem:[#allocation66_spill] sm:$0xff] }
 0x8f2   :  { %v10512_v50 = vadd.f32 %v10496_v37, %v18236_v7  ;;  %v13526_v55 = vpop.f32.mrf.mxu0  ;;  %v10537_v58 = vmul.f32 %v17576_v61, %v10514_v49  ;;  %v10573_v56 = vmax.f32 %v10557_v52, 0.0  ;;  %v18248_v28 = vld [vmem:[#allocation70_spill] sm:$0xff]  ;;  %v18249_v7 = vld [vmem:[#allocation71_spill] sm:$0xff] }
 0x8f3   :  { %v10585_v47 = vadd.f32 %v10584_v42, %v10570_v62  ;;  %v10571_v27 = vmax.f32 %v10555_v54, 0.0  ;;  %v10486_v23 = vadd.f32 %v13526_v55, %v10284_v13  ;;  %v10515_v41 = vadd.f32 %v10499_v43, %v18238_v32 }
 0x8f4   :  { %v10535_v33 = vmul.f32 %v17576_v61, %v10512_v50  ;;  %v10497_v21 = vadd.f32 %v10481_v16, %v18239_v12  ;;  %v10457_v45 = vpop.f32.mrf.mxu0  ;;  %v10560_v20 = vadd.f32 %v17588_v5, %v10537_v58  ;;  %v8369_v13 = vadd.f32 %v18246_v57, %v18245_v31 }
 0x8f5   :  { %v10586_v29 = vadd.f32 %v10585_v47, %v10571_v27  ;;  %v10502_v48 = vadd.f32 %v10486_v23, %v18240_v10  ;;  %v10484_v8 = vadd.f32 %v10457_v45, %v10282_v24  ;;  %v10538_v36 = vmul.f32 %v17576_v61, %v10515_v41 }
 0x8f6   :  { %v10558_v19 = vadd.f32 %v17588_v5, %v10535_v33  ;;  %v10513_v2 = vadd.f32 %v10497_v21, %v18241_v1  ;;  %v13527_v25 = vpop.f32.mrf.mxu0  ;;  %v10576_v54 = vmax.f32 %v10560_v20, 0.0 }
 0x8f7   :  { %v10587_v60 = vadd.f32 %v10586_v29, %v10572_v35  ;;  %v10500_v46 = vadd.f32 %v10484_v8, %v18242_v22  ;;  %v10487_v15 = vadd.f32 %v13527_v25, %v10285_v4  ;;  %v10518_v53 = vadd.f32 %v10502_v48, %v18247_v30 }
 0x8f8   :  { %v10536_v51 = vmul.f32 %v17576_v61, %v10513_v2  ;;  %v10460_v17 = vpop.f32.mrf.mxu0  ;;  %v10574_v9 = vmax.f32 %v10558_v19, 0.0  ;;  %v10561_v11 = vadd.f32 %v17588_v5, %v10538_v36 }
 0x8f9   :  { %v10588_v26 = vadd.f32 %v10587_v60, %v10573_v56  ;;  %v10516_v44 = vadd.f32 %v10500_v46, %v18243_v34  ;;  %v10503_v3 = vadd.f32 %v10487_v15, %v18244_v40  ;;  %v10485_v24 = vadd.f32 %v10460_v17, %v10283_v14 }
 0x8fa   :  { %v10559_v39 = vadd.f32 %v17588_v5, %v10536_v51  ;;  %v10541_v49 = vmul.f32 %v17576_v61, %v10518_v53  ;;  %v10577_v59 = vmax.f32 %v10561_v11, 0.0  ;;  %v11158_v51 = vld [vmem:[#allocation18] ss:$0 sm:$0xff] }
 0x8fb   :  { %v10539_v6 = vmul.f32 %v17576_v61, %v10516_v44  ;;  %v10589_v37 = vrot.slane %v10588_v26, 4  ;;  %v10519_v62 = vadd.f32 %v10503_v3, %v18248_v28  ;;  %v10501_v42 = vadd.f32 %v10485_v24, %v8369_v13 }
 0x8fc   :  { %v10575_v38 = vmax.f32 %v10559_v39, 0.0  ;;  %v10564_v47 = vadd.f32 %v17588_v5, %v10541_v49 }
 0x8fd   :  { %v10562_v52 = vadd.f32 %v17588_v5, %v10539_v6  ;;  %v10517_v50 = vadd.f32 %v10501_v42, %v18249_v7  ;;  %v10590_v43 = vadd.f32 %v10589_v37, %v10588_v26  ;;  %v10542_v55 = vmul.f32 %v17576_v61, %v10519_v62 }
 0x8fe   :  { %v10595_v18 = vadd.f32 %v10575_v38, %v10574_v9  ;;  %v10580_v21 = vmax.f32 %v10564_v47, 0.0 }
 0x8ff   :  { %v10540_v4 = vmul.f32 %v17576_v61, %v10517_v50  ;;  %v10578_v27 = vmax.f32 %v10562_v52, 0.0  ;;  %v10591_v33 = vrot.slane %v10590_v43, 2  ;;  %v10565_v41 = vadd.f32 %v17588_v5, %v10542_v55 }
 0x900   :  { %v10596_v16 = vadd.f32 %v10595_v18, %v10576_v54 }
 0x901   :  { %v10563_v35 = vadd.f32 %v17588_v5, %v10540_v4  ;;  %v10592_v63 = vadd.f32 %v10591_v33, %v10590_v43  ;;  %v10581_v29 = vmax.f32 %v10565_v41, 0.0 }
 0x902   :  { %v10597_v23 = vadd.f32 %v10596_v16, %v10577_v59 }
 0x903   :  { %v10579_v12 = vmax.f32 %v10563_v35, 0.0  ;;  %v10593_v48 = vrot.slane %v10592_v63, 1 }
 0x904   :  { %v10598_v32 = vadd.f32 %v10597_v23, %v10578_v27 }
 0x905   :  { %v10594_v0 = vadd.f32 %v10593_v48, %v10592_v63 }
 0x906   :  { %v10599_v45 = vadd.f32 %v10598_v32, %v10579_v12 }
 0x907   :  { %v10608_v1 = vmul.f32 0.015625, %v10594_v0 }
 0x908   :  { %v10600_v58 = vadd.f32 %v10599_v45, %v10580_v21 }
 0x909   :  { %v10610_v60 = vpack.c.bf16 %v10608_v1, %v10608_v1 }
 0x90a   :  { %v10601_v10 = vadd.f32 %v10600_v58, %v10581_v29 }
 0x90b   :  { %v10637_v5 = vunpack.c.l.b16 %v10610_v60 }
 0x90c   :  { %v10602_v8 = vrot.slane %v10601_v10, 4 }
 0x90e   :  { %v10603_v61 = vadd.f32 %v10602_v8, %v10601_v10 }
 0x910   :  { %v10604_v56 = vrot.slane %v10603_v61, 2 }
 0x912   :  { %v10605_v19 = vadd.f32 %v10604_v56, %v10603_v61 }
 0x914   :  { %v10606_v2 = vrot.slane %v10605_v19, 1 }
 0x916   :  { %v10607_v25 = vadd.f32 %v10606_v2, %v10605_v19 }
 0x918   :  { %v10609_v36 = vmul.f32 0.015625, %v10607_v25 }
 0x91a   :  { %v10611_v22 = vpack.c.bf16 %v10609_v36, %v10609_v36 }
 0x91c   :  { %v10638_v46 = vunpack.c.l.b16 %v10611_v22 }
 0x91e   :  { %v10640_v15 = vsel %vm10639_vm1, %v10638_v46, %v10637_v5 }
 0x91f   :  { %v10641_v14 = vpack.c.b16 %v10640_v15, %v10640_v15 }
 0x921   :  { %13545 = vmatmul.mubr.bf16.vlgmr.msra.gmra.mxu1 %v10641_v14 }
 0x9e1   :  { %v10725_v17 = vpop.f32.mrf.mxu1 }
 0x9e2   :  { %v10726_v26 = vadd.f32 %v11158_v51, %v10725_v17 }
 0x9e3   :  { %v13546_v20 = vpop.f32.mrf.mxu1 }
 0x9e4   :  { %10731 = vst [vmem:[#allocation20] sm:$0x3] %v10726_v26 }
 0x9e5   :  { %v10728_v34 = vpop.f32.mrf.mxu1 }
 0x9e6   :  { %14183 = shalt.err (!%p14180_p12)
}
 0x9e7   :  { %10741 = dma.vmem_to_hbm [thread:$0]  %s10739_s30, 32, %s17668_s11, [#allocation5]   ;;  %v13547_v44 = vpop.f32.mrf.mxu1 }
 0x9e8   :  { %14204 = dma.done.wait [#allocation5], 32  }
 0x9e9   :  { %14205 = vsyncadd [#allocation5], 4294967264 }
 0x9ea   :  { %10745 = vsyncpa [#allocation4], 1 }
 0x9eb   :  { %10746 = vsyncpa [#allocation7], 1 }
 0x9ec   :  { %10747 = vsyncpa [#allocation10], 1 }
 0x9ed   :  { %10748 = vsyncpa [#allocation13], 1 }
 0x9ee   :  { %10749 = vsyncpa [#allocation16], 1 }
 0x9ef   :  { %10750 = vsyncpa [#allocation19], 1 }
 0x9f0   :  { %10751 = vsyncpa [#allocation5], 1 }

</bundles_post_ra>
